<compile_context>
chip_gen: v6e
topology: v6e:2x2x1
jax: 0.10.0
libtpu: 0.0.40
codegen_flags: <defaults>
</compile_context>

<pallas_src>
import math
import functools

import jax
import jax.numpy as jnp
from jax import lax
from jax.experimental import pallas as pl
from jax.experimental.pallas import tpu as pltpu

# ---------------------------------------------------------------------------
# Model hyper-parameters (from Classifier.__init__)
# ---------------------------------------------------------------------------
D_IN = 40            # mel feature dim
D_MODEL = 80         # d_model
N_HEADS = 2          # nhead
HEAD_DIM = D_MODEL // N_HEADS   # 40
HD_PAD = 128         # per-head q/k/v column group padded to one full vreg
QKV_W = 3 * N_HEADS * HD_PAD    # 768 lanes in the fused in-proj
WO_ROWS = N_HEADS * HD_PAD      # 256 padded rows in the out-proj
D_FF = 256           # dim_feedforward
N_SPKS = 600         # number of speakers
N_SPKS_PAD = 640     # 5 * 128 lanes; sliced back to 600 in the wrapper
LN_EPS = 1e-5
ATTN_SCALE = 1.0 / math.sqrt(HEAD_DIM)

TARGET_ROWS = 2048   # target slab rows (bb * L) per grid step


def _ceil_div(a, b):
    return -(-a // b)


def _round_up(a, b):
    return _ceil_div(a, b) * b


def _layer_norm(x, gamma, beta):
    mu = jnp.mean(x, axis=-1, keepdims=True)
    xc = x - mu
    var = jnp.mean(xc * xc, axis=-1, keepdims=True)
    return xc * lax.rsqrt(var + LN_EPS) * gamma + beta


# ---------------------------------------------------------------------------
# VMEM budgeting (generation-aware: v7x has 64 MiB, v5e/v6e have 128 MiB)
# ---------------------------------------------------------------------------
@functools.lru_cache(maxsize=1)
def _vmem_capacity_bytes():
    try:
        return int(pltpu.get_tpu_info().vmem_capacity_bytes)
    except Exception:
        return 64 << 20   # conservative fallback == v7x physical VMEM per TC


def _vmem_budget_bytes():
    cap = _vmem_capacity_bytes()
    # leave headroom for compiler temps / pipeline slack
    return min(max((cap * 5) // 8, 24 << 20), 80 << 20)


def _vmem_limit_bytes():
    return min(_vmem_capacity_bytes(), 96 << 20)


def _vmem_estimate_bytes(bb, seq_pad):
    """Generous per-grid-step VMEM footprint estimate for block batch bb."""
    rows = bb * seq_pad
    f32 = 4
    # pipeline buffers: (rows, 40->128 lanes) input + (bb, 640) output, double-buffered
    pipeline = 2 * rows * 128 * f32 + 2 * bb * N_SPKS_PAD * f32
    # resident weights (~1 MiB) + block-diagonal pooling matrix (bb, rows)
    resident = (1 << 20) + bb * rows * f32
    # live intermediates: qkv(768) + ~5 d_model-wide slabs + FFN hidden(256)
    # + per-head q/k/v copies (3*128) + two (bb, L, L) score tensors
    inter = rows * f32 * (QKV_W + 5 * 128 + D_FF + 3 * HD_PAD)
    inter += 2 * bb * seq_pad * seq_pad * f32
    return pipeline + resident + inter


def _choose_block_batch(B, seq_pad):
    """Batch elements per grid step (multiple of 8, VMEM-aware, even-step friendly)."""
    B8 = _round_up(B, 8)
    # target ~TARGET_ROWS slab rows per step (amortize ~0.35us/step overhead)
    bb = _round_up(_ceil_div(TARGET_ROWS, seq_pad), 8)
    bb = max(8, min(bb, B8))
    budget = _vmem_budget_bytes()
    while bb > 8 and _vmem_estimate_bytes(bb, seq_pad) > budget:
        bb -= 8
    # prefer an even number of grid steps when the batch needs >1 step
    # (v7x dual TensorCore + dimension_semantics=("parallel",)), as long as
    # each step keeps at least ~512 slab rows.
    n = _ceil_div(B8, bb)
    if n > 1 and n % 2 == 1:
        bb_even = _round_up(_ceil_div(B8, n + 1), 8)
        if bb_even >= 8 and bb_even * seq_pad >= 512:
            bb = bb_even
    return bb


# ---------------------------------------------------------------------------
# Pallas kernel: bb batch elements per grid step, token ops on a (bb*Lp, D) slab
# ---------------------------------------------------------------------------
def classifier_kernel(
    x_ref,                                     # (bb*Lp, 40)
    pool_ref,                                  # (bb, bb*Lp) block-diag mean pool
    w_pre_ref, b_pre_ref,                      # prenet
    w_qkv_ref, b_qkv_ref,                      # fused, lane-aligned attn in-proj
    w_o_ref, b_o_ref,                          # attn out-proj (rows padded to 256)
    g1_ref, be1_ref,                           # norm1
    w_f1_ref, b_f1_ref, w_f2_ref, b_f2_ref,    # feed-forward
    g2_ref, be2_ref,                           # norm2
    w_p1_ref, b_p1_ref, w_p2_ref, b_p2_ref,    # pred_layer (w_p2 padded to 640)
    out_ref,                                   # (bb, 640)
    *, bb, seq_len, seq_pad,
):
    rows = bb * seq_pad
    x = x_ref[...]                                                   # (rows, 40)

    # ---- prenet: Linear(40 -> 80) on the whole slab ----
    h = jnp.dot(x, w_pre_ref[...], preferred_element_type=jnp.float32) + b_pre_ref[...]

    # ---- fused in-proj: Linear(80 -> 768); per-head groups lane-aligned to 128,
    #      q columns pre-scaled by 1/sqrt(head_dim), padded columns are zero ----
    qkv = jnp.dot(h, w_qkv_ref[...], preferred_element_type=jnp.float32) + b_qkv_ref[...]

    # key mask for padded sequence positions (static: only emitted when Lp > L)
    if seq_pad > seq_len:
        key_valid = lax.broadcasted_iota(jnp.int32, (1, 1, seq_pad), 2) < seq_len
        key_bias = jnp.where(key_valid, 0.0, -1e30).astype(jnp.float32)
    else:
        key_bias = None

    # ---- multi-head self-attention (per-element (L, L) scores, batched) ----
    attn = jnp.zeros((rows, D_MODEL), jnp.float32)
    for hh in range(N_HEADS):                                        # static 2-way unroll
        q_off = hh * HD_PAD
        k_off = (N_HEADS + hh) * HD_PAD
        v_off = (2 * N_HEADS + hh) * HD_PAD
        # 128-lane-aligned slices -> no lane rotates; reshape is sublane-aligned
        qh = qkv[:, q_off:q_off + HD_PAD].reshape(bb, seq_pad, HD_PAD)
        kh = qkv[:, k_off:k_off + HD_PAD].reshape(bb, seq_pad, HD_PAD)
        vh = qkv[:, v_off:v_off + HD_PAD].reshape(bb, seq_pad, HD_PAD)

        # scores: contract (padded) head dim, batch over bb; zero padding adds 0
        s = lax.dot_general(qh, kh, (((2,), (2,)), ((0,), (0,))),
                            preferred_element_type=jnp.float32)      # (bb, Lp, Lp)
        if key_bias is not None:
            s = s + key_bias
        s = s - jnp.max(s, axis=-1, keepdims=True)
        p = jnp.exp(s)
        inv = pl.reciprocal(jnp.sum(p, axis=-1, keepdims=True), approx=True)
        p = p * inv

        o = lax.dot_general(p, vh, (((2,), (1,)), ((0,), (0,))),
                            preferred_element_type=jnp.float32)      # (bb, Lp, 128)
        # accumulate head contribution through its (padded) slice of the out-proj
        attn = attn + jnp.dot(o.reshape(rows, HD_PAD),
                              w_o_ref[hh * HD_PAD:(hh + 1) * HD_PAD, :],
                              preferred_element_type=jnp.float32)
    attn = attn + b_o_ref[...]

    # ---- residual + LayerNorm 1 ----
    y = _layer_norm(h + attn, g1_ref[...], be1_ref[...])

    # ---- feed-forward: Linear(80->256) -> relu -> Linear(256->80) ----
    f = jnp.dot(y, w_f1_ref[...], preferred_element_type=jnp.float32) + b_f1_ref[...]
    f = jnp.maximum(f, 0.0)
    f = jnp.dot(f, w_f2_ref[...], preferred_element_type=jnp.float32) + b_f2_ref[...]

    # ---- residual + LayerNorm 2 ----
    z = _layer_norm(y + f, g2_ref[...], be2_ref[...])                # (rows, 80)

    # ---- mean pooling per element as an MXU matmul; pool matrix is a
    #      precomputed, resident input (padded tokens have zero weight) ----
    stats = jnp.dot(pool_ref[...], z, preferred_element_type=jnp.float32)  # (bb, 80)

    # ---- pred_layer on the whole (bb, 80) block ----
    p1 = jnp.dot(stats, w_p1_ref[...], preferred_element_type=jnp.float32) + b_p1_ref[...]
    p1 = jnp.maximum(p1, 0.0)
    logits = jnp.dot(p1, w_p2_ref[...], preferred_element_type=jnp.float32) + b_p2_ref[...]

    out_ref[...] = logits.astype(out_ref.dtype)                      # (bb, 640)


# ---------------------------------------------------------------------------
# Wrapper
# ---------------------------------------------------------------------------
_KERNEL_PARAM_ORDER = [
    "w_pre", "b_pre",
    "w_qkv", "b_qkv",
    "w_o", "b_o",
    "g1", "be1",
    "w_f1", "b_f1", "w_f2", "b_f2",
    "g2", "be2",
    "w_p1", "b_p1", "w_p2", "b_p2",
]


def _prepare_kernel_params(params):
    """Fuse+lane-align QKV, fold attn scale into q, pad out-proj rows and logits."""
    w_qkv = jnp.zeros((D_MODEL, QKV_W), jnp.float32)
    b_qkv = jnp.zeros((1, QKV_W), jnp.float32)
    triples = [
        (params["w_q"], params["b_q"], ATTN_SCALE),
        (params["w_k"], params["b_k"], 1.0),
        (params["w_v"], params["b_v"], 1.0),
    ]
    for which, (wm, bm, sc) in enumerate(triples):
        for hh in range(N_HEADS):
            col = (which * N_HEADS + hh) * HD_PAD
            src = slice(hh * HEAD_DIM, (hh + 1) * HEAD_DIM)
            w_qkv = w_qkv.at[:, col:col + HEAD_DIM].set(wm[:, src] * sc)
            b_qkv = b_qkv.at[:, col:col + HEAD_DIM].set(bm[:, src] * sc)

    w_o_pad = jnp.zeros((WO_ROWS, D_MODEL), jnp.float32)
    for hh in range(N_HEADS):
        w_o_pad = w_o_pad.at[hh * HD_PAD:hh * HD_PAD + HEAD_DIM, :].set(
            params["w_o"][hh * HEAD_DIM:(hh + 1) * HEAD_DIM, :])

    kp = {
        "w_pre": params["w_pre"], "b_pre": params["b_pre"],
        "w_qkv": w_qkv, "b_qkv": b_qkv,
        "w_o": w_o_pad, "b_o": params["b_o"],
        "g1": params["g1"], "be1": params["be1"],
        "w_f1": params["w_f1"], "b_f1": params["b_f1"],
        "w_f2": params["w_f2"], "b_f2": params["b_f2"],
        "g2": params["g2"], "be2": params["be2"],
        "w_p1": params["w_p1"], "b_p1": params["b_p1"],
        "w_p2": jnp.pad(params["w_p2"], ((0, 0), (0, N_SPKS_PAD - N_SPKS))),
        "b_p2": jnp.pad(params["b_p2"], ((0, 0), (0, N_SPKS_PAD - N_SPKS))),
    }
    return [kp[name] for name in _KERNEL_PARAM_ORDER]


def _make_pool_matrix(bb, seq_len, seq_pad):
    """Block-diagonal mean-pool matrix (bb, bb*seq_pad); padded tokens weight 0."""
    r = jnp.arange(bb, dtype=jnp.int32)[:, None]
    c = jnp.arange(bb * seq_pad, dtype=jnp.int32)[None, :]
    tok = c - r * seq_pad
    return jnp.where((tok >= 0) & (tok < seq_len),
                     jnp.float32(1.0 / seq_len), jnp.float32(0.0))


@jax.jit
def classifier_forward(mels, params):
    B, L, d_in = mels.shape
    assert d_in == D_IN
    seq_pad = _round_up(L, 8)                     # sublane-aligned sequence length
    bb = _choose_block_batch(B, seq_pad)
    n_steps = _ceil_div(B, bb)
    Bp = n_steps * bb

    mels_p = mels.astype(jnp.float32)
    if Bp != B or seq_pad != L:
        mels_p = jnp.pad(mels_p, ((0, Bp - B), (0, seq_pad - L), (0, 0)))
    x_flat = mels_p.reshape(Bp * seq_pad, D_IN)   # token slab, feature dim -> lanes

    pool = _make_pool_matrix(bb, L, seq_pad)      # resident across all grid steps
    weights = _prepare_kernel_params(params)

    in_specs = [
        pl.BlockSpec((bb * seq_pad, D_IN), lambda i: (i, 0)),
        pl.BlockSpec(pool.shape, lambda i: (0, 0)),
    ]
    for w in weights:
        # every parameter is 2D and replicated across the batch grid
        in_specs.append(pl.BlockSpec(w.shape, lambda i: (0, 0)))

    out_padded = pl.pallas_call(
        functools.partial(classifier_kernel, bb=bb, seq_len=L, seq_pad=seq_pad),
        out_shape=jax.ShapeDtypeStruct((Bp, N_SPKS_PAD), jnp.float32),
        grid_spec=pltpu.PrefetchScalarGridSpec(
            num_scalar_prefetch=0,
            grid=(n_steps,),
            in_specs=in_specs,
            out_specs=pl.BlockSpec((bb, N_SPKS_PAD), lambda i: (i, 0)),
        ),
        compiler_params=pltpu.CompilerParams(
            dimension_semantics=("parallel",),
            vmem_limit_bytes=_vmem_limit_bytes(),
        ),
    )(x_flat, pool, *weights)

    # drop padded batch rows and padded logit columns
    return out_padded[:B, :N_SPKS]


# ---------------------------------------------------------------------------
# Pure-JAX reference (same math, exact softmax) for a correctness check
# ---------------------------------------------------------------------------
def reference_forward(mels, p):
    def ln(x, g, b):
        mu = jnp.mean(x, axis=-1, keepdims=True)
        var = jnp.mean((x - mu) ** 2, axis=-1, keepdims=True)
        return (x - mu) / jnp.sqrt(var + LN_EPS) * g + b

    h = mels @ p["w_pre"] + p["b_pre"]                            # (B, L, 80)
    q = h @ p["w_q"] + p["b_q"]
    k = h @ p["w_k"] + p["b_k"]
    v = h @ p["w_v"] + p["b_v"]
    B, L, _ = h.shape
    qh = q.reshape(B, L, N_HEADS, HEAD_DIM)
    kh = k.reshape(B, L, N_HEADS, HEAD_DIM)
    vh = v.reshape(B, L, N_HEADS, HEAD_DIM)
    s = jnp.einsum("blhd,bmhd->bhlm", qh, kh) * ATTN_SCALE
    a = jax.nn.softmax(s, axis=-1)
    o = jnp.einsum("bhlm,bmhd->blhd", a, vh).reshape(B, L, D_MODEL)
    attn = o @ p["w_o"] + p["b_o"]
    y = ln(h + attn, p["g1"], p["be1"])
    f = jnp.maximum(y @ p["w_f1"] + p["b_f1"], 0.0) @ p["w_f2"] + p["b_f2"]
    z = ln(y + f, p["g2"], p["be2"])
    stats = jnp.mean(z, axis=1)
    p1 = jnp.maximum(stats @ p["w_p1"] + p["b_p1"], 0.0)
    return p1 @ p["w_p2"] + p["b_p2"]


# ---------------------------------------------------------------------------
# Deterministic parameter initialization (synthetic, shapes from __init__)
# ---------------------------------------------------------------------------
def init_params(key):
    shapes = {
        "w_pre": (D_IN, D_MODEL),  "b_pre": (1, D_MODEL),
        "w_q":   (D_MODEL, D_MODEL), "b_q": (1, D_MODEL),
        "w_k":   (D_MODEL, D_MODEL), "b_k": (1, D_MODEL),
        "w_v":   (D_MODEL, D_MODEL), "b_v": (1, D_MODEL),
        "w_o":   (D_MODEL, D_MODEL), "b_o": (1, D_MODEL),
        "w_f1":  (D_MODEL, D_FF),    "b_f1": (1, D_FF),
        "w_f2":  (D_FF, D_MODEL),    "b_f2": (1, D_MODEL),
        "w_p1":  (D_MODEL, D_MODEL), "b_p1": (1, D_MODEL),
        "w_p2":  (D_MODEL, N_SPKS),  "b_p2": (1, N_SPKS),
    }
    params = {}
    keys = jax.random.split(key, len(shapes))
    for (name, shape), k in zip(shapes.items(), keys):
        scale = 0.05 if name.startswith("w_") else 0.01
        params[name] = (scale * jax.random.normal(k, shape)).astype(jnp.float32)
    # LayerNorm affine params
    params["g1"] = jnp.ones((1, D_MODEL), jnp.float32)
    params["be1"] = jnp.zeros((1, D_MODEL), jnp.float32)
    params["g2"] = jnp.ones((1, D_MODEL), jnp.float32)
    params["be2"] = jnp.zeros((1, D_MODEL), jnp.float32)
    return params


if __name__ == "__main__":
    # small shapes: 12 utterances of 16 frames x 40 mels
    B, L = 12, 16
    key = jax.random.PRNGKey(0)
    mels = jax.random.normal(key, (B, L, D_IN), dtype=jnp.float32)

    params = init_params(jax.random.PRNGKey(1234))

    out = jax.block_until_ready(classifier_forward(mels, params))
    assert out.shape == (B, N_SPKS), out.shape

    ref = jax.block_until_ready(reference_forward(mels, params))
    # tolerance accounts for the EUP approx-reciprocal in the softmax denom
    err = float(jnp.max(jnp.abs(out - ref)))
    assert jnp.allclose(out, ref, rtol=1e-3, atol=1e-3), err

    print("KERNEL_OK")
</pallas_src>

<mosaic_0001>
module attributes {stable_mosaic.version = 11 : i64} {
  func.func @classifier_kernel(%arg0: i32, %arg1: memref<256x40xf32, #tpu.memory_space<vmem>>, %arg2: memref<16x256xf32, #tpu.memory_space<vmem>>, %arg3: memref<40x80xf32, #tpu.memory_space<vmem>>, %arg4: memref<1x80xf32, #tpu.memory_space<vmem>>, %arg5: memref<80x768xf32, #tpu.memory_space<vmem>>, %arg6: memref<1x768xf32, #tpu.memory_space<vmem>>, %arg7: memref<256x80xf32, #tpu.memory_space<vmem>>, %arg8: memref<1x80xf32, #tpu.memory_space<vmem>>, %arg9: memref<1x80xf32, #tpu.memory_space<vmem>>, %arg10: memref<1x80xf32, #tpu.memory_space<vmem>>, %arg11: memref<80x256xf32, #tpu.memory_space<vmem>>, %arg12: memref<1x256xf32, #tpu.memory_space<vmem>>, %arg13: memref<256x80xf32, #tpu.memory_space<vmem>>, %arg14: memref<1x80xf32, #tpu.memory_space<vmem>>, %arg15: memref<1x80xf32, #tpu.memory_space<vmem>>, %arg16: memref<1x80xf32, #tpu.memory_space<vmem>>, %arg17: memref<80x80xf32, #tpu.memory_space<vmem>>, %arg18: memref<1x80xf32, #tpu.memory_space<vmem>>, %arg19: memref<80x640xf32, #tpu.memory_space<vmem>>, %arg20: memref<1x640xf32, #tpu.memory_space<vmem>>, %arg21: memref<16x640xf32, #tpu.memory_space<vmem>>) attributes {dimension_semantics = [#tpu.dimension_semantics<parallel>], iteration_bounds = array<i64: 1>, scalar_prefetch = 0 : i64, scratch_operands = 0 : i64, tpu.core_type = #tpu.core_type<tc>, window_params = [{transform_indices = @transform_0, window_bounds = array<i64: 256, 40>}, {pipeline_mode = #tpu.pipeline_mode<synchronous>, transform_indices = @transform_1, window_bounds = array<i64: 16, 256>}, {pipeline_mode = #tpu.pipeline_mode<synchronous>, transform_indices = @transform_2, window_bounds = array<i64: 40, 80>}, {pipeline_mode = #tpu.pipeline_mode<synchronous>, transform_indices = @transform_3, window_bounds = array<i64: 1, 80>}, {pipeline_mode = #tpu.pipeline_mode<synchronous>, transform_indices = @transform_4, window_bounds = array<i64: 80, 768>}, {pipeline_mode = #tpu.pipeline_mode<synchronous>, transform_indices = @transform_5, window_bounds = array<i64: 1, 768>}, {pipeline_mode = #tpu.pipeline_mode<synchronous>, transform_indices = @transform_6, window_bounds = array<i64: 256, 80>}, {pipeline_mode = #tpu.pipeline_mode<synchronous>, transform_indices = @transform_7, window_bounds = array<i64: 1, 80>}, {pipeline_mode = #tpu.pipeline_mode<synchronous>, transform_indices = @transform_8, window_bounds = array<i64: 1, 80>}, {pipeline_mode = #tpu.pipeline_mode<synchronous>, transform_indices = @transform_9, window_bounds = array<i64: 1, 80>}, {pipeline_mode = #tpu.pipeline_mode<synchronous>, transform_indices = @transform_10, window_bounds = array<i64: 80, 256>}, {pipeline_mode = #tpu.pipeline_mode<synchronous>, transform_indices = @transform_11, window_bounds = array<i64: 1, 256>}, {pipeline_mode = #tpu.pipeline_mode<synchronous>, transform_indices = @transform_12, window_bounds = array<i64: 256, 80>}, {pipeline_mode = #tpu.pipeline_mode<synchronous>, transform_indices = @transform_13, window_bounds = array<i64: 1, 80>}, {pipeline_mode = #tpu.pipeline_mode<synchronous>, transform_indices = @transform_14, window_bounds = array<i64: 1, 80>}, {pipeline_mode = #tpu.pipeline_mode<synchronous>, transform_indices = @transform_15, window_bounds = array<i64: 1, 80>}, {pipeline_mode = #tpu.pipeline_mode<synchronous>, transform_indices = @transform_16, window_bounds = array<i64: 80, 80>}, {pipeline_mode = #tpu.pipeline_mode<synchronous>, transform_indices = @transform_17, window_bounds = array<i64: 1, 80>}, {pipeline_mode = #tpu.pipeline_mode<synchronous>, transform_indices = @transform_18, window_bounds = array<i64: 80, 640>}, {pipeline_mode = #tpu.pipeline_mode<synchronous>, transform_indices = @transform_19, window_bounds = array<i64: 1, 640>}, {transform_indices = @transform_20, window_bounds = array<i64: 16, 640>}]} {
    %c0 = arith.constant 0 : index
    %c0_0 = arith.constant 0 : index
    %0 = vector.load %arg1[%c0, %c0_0] : memref<256x40xf32, #tpu.memory_space<vmem>>, vector<256x40xf32>
    %c0_1 = arith.constant 0 : index
    %c0_2 = arith.constant 0 : index
    %1 = vector.load %arg3[%c0_1, %c0_2] : memref<40x80xf32, #tpu.memory_space<vmem>>, vector<40x80xf32>
    %cst = arith.constant dense<0.000000e+00> : vector<256x80xf32>
    %2 = tpu.matmul %0, %1, %cst {dimension_numbers = #tpu.dot_dimension_numbers<[1], [0], [0], [1], [0, 0, 1, 1], [], []>} : vector<256x40xf32>, vector<40x80xf32>, vector<256x80xf32> -> vector<256x80xf32>
    %c0_3 = arith.constant 0 : index
    %c0_4 = arith.constant 0 : index
    %3 = vector.load %arg4[%c0_3, %c0_4] : memref<1x80xf32, #tpu.memory_space<vmem>>, vector<1x80xf32>
    %4 = vector.broadcast %3 : vector<1x80xf32> to vector<256x80xf32>
    %5 = arith.addf %2, %4 : vector<256x80xf32>
    %c0_5 = arith.constant 0 : index
    %c0_6 = arith.constant 0 : index
    %6 = vector.load %arg5[%c0_5, %c0_6] : memref<80x768xf32, #tpu.memory_space<vmem>>, vector<80x768xf32>
    %cst_7 = arith.constant dense<0.000000e+00> : vector<256x768xf32>
    %7 = tpu.matmul %5, %6, %cst_7 {dimension_numbers = #tpu.dot_dimension_numbers<[1], [0], [0], [1], [0, 0, 1, 1], [], []>} : vector<256x80xf32>, vector<80x768xf32>, vector<256x768xf32> -> vector<256x768xf32>
    %c0_8 = arith.constant 0 : index
    %c0_9 = arith.constant 0 : index
    %8 = vector.load %arg6[%c0_8, %c0_9] : memref<1x768xf32, #tpu.memory_space<vmem>>, vector<1x768xf32>
    %9 = vector.broadcast %8 : vector<1x768xf32> to vector<256x768xf32>
    %10 = arith.addf %7, %9 : vector<256x768xf32>
    %cst_10 = arith.constant 0.000000e+00 : f32
    %11 = vector.broadcast %cst_10 : f32 to vector<256x80xf32>
    %12 = vector.extract_strided_slice %10 {offsets = [0, 0], sizes = [256, 128], strides = [1, 1]} : vector<256x768xf32> to vector<256x128xf32>
    %13 = vector.shape_cast %12 : vector<256x128xf32> to vector<16x16x128xf32>
    %14 = vector.extract_strided_slice %10 {offsets = [0, 256], sizes = [256, 128], strides = [1, 1]} : vector<256x768xf32> to vector<256x128xf32>
    %15 = vector.shape_cast %14 : vector<256x128xf32> to vector<16x16x128xf32>
    %16 = vector.extract_strided_slice %10 {offsets = [0, 512], sizes = [256, 128], strides = [1, 1]} : vector<256x768xf32> to vector<256x128xf32>
    %17 = vector.shape_cast %16 : vector<256x128xf32> to vector<16x16x128xf32>
    %cst_11 = arith.constant dense<0.000000e+00> : vector<16x16x16xf32>
    %18 = tpu.matmul %13, %15, %cst_11 {dimension_numbers = #tpu.dot_dimension_numbers<[2], [2], [1], [1], [0, 0, 0, 1, 1, 1], [0], [0]>} : vector<16x16x128xf32>, vector<16x16x128xf32>, vector<16x16x16xf32> -> vector<16x16x16xf32>
    %cst_12 = arith.constant dense<0xFF800000> : vector<16x16xf32>
    %19 = vector.multi_reduction <maximumf>, %18, %cst_12 [2] : vector<16x16x16xf32> to vector<16x16xf32>
    %20 = vector.shape_cast %19 : vector<16x16xf32> to vector<16x16x1xf32>
    %21 = vector.broadcast %20 : vector<16x16x1xf32> to vector<16x16x16xf32>
    %22 = arith.subf %18, %21 : vector<16x16x16xf32>
    %23 = math.exp %22 : vector<16x16x16xf32>
    %cst_13 = arith.constant dense<0.000000e+00> : vector<16x16xf32>
    %24 = vector.multi_reduction <add>, %23, %cst_13 [2] : vector<16x16x16xf32> to vector<16x16xf32>
    %25 = vector.shape_cast %24 : vector<16x16xf32> to vector<16x16x1xf32>
    %26 = tpu.reciprocal %25 {approx = true} : vector<16x16x1xf32> -> vector<16x16x1xf32>
    %27 = vector.broadcast %26 : vector<16x16x1xf32> to vector<16x16x16xf32>
    %28 = arith.mulf %23, %27 : vector<16x16x16xf32>
    %cst_14 = arith.constant dense<0.000000e+00> : vector<16x16x128xf32>
    %29 = tpu.matmul %28, %17, %cst_14 {dimension_numbers = #tpu.dot_dimension_numbers<[2], [1], [1], [2], [0, 0, 0, 1, 1, 2], [0], [0]>} : vector<16x16x16xf32>, vector<16x16x128xf32>, vector<16x16x128xf32> -> vector<16x16x128xf32>
    %30 = vector.shape_cast %29 : vector<16x16x128xf32> to vector<256x128xf32>
    %c0_15 = arith.constant 0 : index
    %c0_16 = arith.constant 0 : index
    %31 = vector.load %arg7[%c0_15, %c0_16] : memref<256x80xf32, #tpu.memory_space<vmem>>, vector<128x80xf32>
    %cst_17 = arith.constant dense<0.000000e+00> : vector<256x80xf32>
    %32 = tpu.matmul %30, %31, %cst_17 {dimension_numbers = #tpu.dot_dimension_numbers<[1], [0], [0], [1], [0, 0, 1, 1], [], []>} : vector<256x128xf32>, vector<128x80xf32>, vector<256x80xf32> -> vector<256x80xf32>
    %33 = arith.addf %11, %32 : vector<256x80xf32>
    %34 = vector.extract_strided_slice %10 {offsets = [0, 128], sizes = [256, 128], strides = [1, 1]} : vector<256x768xf32> to vector<256x128xf32>
    %35 = vector.shape_cast %34 : vector<256x128xf32> to vector<16x16x128xf32>
    %36 = vector.extract_strided_slice %10 {offsets = [0, 384], sizes = [256, 128], strides = [1, 1]} : vector<256x768xf32> to vector<256x128xf32>
    %37 = vector.shape_cast %36 : vector<256x128xf32> to vector<16x16x128xf32>
    %38 = vector.extract_strided_slice %10 {offsets = [0, 640], sizes = [256, 128], strides = [1, 1]} : vector<256x768xf32> to vector<256x128xf32>
    %39 = vector.shape_cast %38 : vector<256x128xf32> to vector<16x16x128xf32>
    %cst_18 = arith.constant dense<0.000000e+00> : vector<16x16x16xf32>
    %40 = tpu.matmul %35, %37, %cst_18 {dimension_numbers = #tpu.dot_dimension_numbers<[2], [2], [1], [1], [0, 0, 0, 1, 1, 1], [0], [0]>} : vector<16x16x128xf32>, vector<16x16x128xf32>, vector<16x16x16xf32> -> vector<16x16x16xf32>
    %cst_19 = arith.constant dense<0xFF800000> : vector<16x16xf32>
    %41 = vector.multi_reduction <maximumf>, %40, %cst_19 [2] : vector<16x16x16xf32> to vector<16x16xf32>
    %42 = vector.shape_cast %41 : vector<16x16xf32> to vector<16x16x1xf32>
    %43 = vector.broadcast %42 : vector<16x16x1xf32> to vector<16x16x16xf32>
    %44 = arith.subf %40, %43 : vector<16x16x16xf32>
    %45 = math.exp %44 : vector<16x16x16xf32>
    %cst_20 = arith.constant dense<0.000000e+00> : vector<16x16xf32>
    %46 = vector.multi_reduction <add>, %45, %cst_20 [2] : vector<16x16x16xf32> to vector<16x16xf32>
    %47 = vector.shape_cast %46 : vector<16x16xf32> to vector<16x16x1xf32>
    %48 = tpu.reciprocal %47 {approx = true} : vector<16x16x1xf32> -> vector<16x16x1xf32>
    %49 = vector.broadcast %48 : vector<16x16x1xf32> to vector<16x16x16xf32>
    %50 = arith.mulf %45, %49 : vector<16x16x16xf32>
    %cst_21 = arith.constant dense<0.000000e+00> : vector<16x16x128xf32>
    %51 = tpu.matmul %50, %39, %cst_21 {dimension_numbers = #tpu.dot_dimension_numbers<[2], [1], [1], [2], [0, 0, 0, 1, 1, 2], [0], [0]>} : vector<16x16x16xf32>, vector<16x16x128xf32>, vector<16x16x128xf32> -> vector<16x16x128xf32>
    %52 = vector.shape_cast %51 : vector<16x16x128xf32> to vector<256x128xf32>
    %c128 = arith.constant 128 : index
    %c0_22 = arith.constant 0 : index
    %53 = vector.load %arg7[%c128, %c0_22] : memref<256x80xf32, #tpu.memory_space<vmem>>, vector<128x80xf32>
    %cst_23 = arith.constant dense<0.000000e+00> : vector<256x80xf32>
    %54 = tpu.matmul %52, %53, %cst_23 {dimension_numbers = #tpu.dot_dimension_numbers<[1], [0], [0], [1], [0, 0, 1, 1], [], []>} : vector<256x128xf32>, vector<128x80xf32>, vector<256x80xf32> -> vector<256x80xf32>
    %55 = arith.addf %33, %54 : vector<256x80xf32>
    %c0_24 = arith.constant 0 : index
    %c0_25 = arith.constant 0 : index
    %56 = vector.load %arg8[%c0_24, %c0_25] : memref<1x80xf32, #tpu.memory_space<vmem>>, vector<1x80xf32>
    %57 = vector.broadcast %56 : vector<1x80xf32> to vector<256x80xf32>
    %58 = arith.addf %55, %57 : vector<256x80xf32>
    %59 = arith.addf %5, %58 : vector<256x80xf32>
    %c0_26 = arith.constant 0 : index
    %c0_27 = arith.constant 0 : index
    %60 = vector.load %arg9[%c0_26, %c0_27] : memref<1x80xf32, #tpu.memory_space<vmem>>, vector<1x80xf32>
    %c0_28 = arith.constant 0 : index
    %c0_29 = arith.constant 0 : index
    %61 = vector.load %arg10[%c0_28, %c0_29] : memref<1x80xf32, #tpu.memory_space<vmem>>, vector<1x80xf32>
    %cst_30 = arith.constant dense<0.000000e+00> : vector<256xf32>
    %62 = vector.multi_reduction <add>, %59, %cst_30 [1] : vector<256x80xf32> to vector<256xf32>
    %63 = vector.shape_cast %62 : vector<256xf32> to vector<256x1xf32>
    %cst_31 = arith.constant 8.000000e+01 : f32
    %64 = vector.broadcast %cst_31 : f32 to vector<256x1xf32>
    %65 = arith.divf %63, %64 : vector<256x1xf32>
    %66 = vector.broadcast %65 : vector<256x1xf32> to vector<256x80xf32>
    %67 = arith.subf %59, %66 : vector<256x80xf32>
    %68 = arith.mulf %67, %67 : vector<256x80xf32>
    %cst_32 = arith.constant dense<0.000000e+00> : vector<256xf32>
    %69 = vector.multi_reduction <add>, %68, %cst_32 [1] : vector<256x80xf32> to vector<256xf32>
    %70 = vector.shape_cast %69 : vector<256xf32> to vector<256x1xf32>
    %cst_33 = arith.constant 8.000000e+01 : f32
    %71 = vector.broadcast %cst_33 : f32 to vector<256x1xf32>
    %72 = arith.divf %70, %71 : vector<256x1xf32>
    %cst_34 = arith.constant 9.99999974E-6 : f32
    %73 = vector.broadcast %cst_34 : f32 to vector<256x1xf32>
    %74 = arith.addf %72, %73 : vector<256x1xf32>
    %75 = math.rsqrt %74 : vector<256x1xf32>
    %76 = vector.broadcast %75 : vector<256x1xf32> to vector<256x80xf32>
    %77 = arith.mulf %67, %76 : vector<256x80xf32>
    %78 = vector.broadcast %60 : vector<1x80xf32> to vector<256x80xf32>
    %79 = arith.mulf %77, %78 : vector<256x80xf32>
    %80 = vector.broadcast %61 : vector<1x80xf32> to vector<256x80xf32>
    %81 = arith.addf %79, %80 : vector<256x80xf32>
    %c0_35 = arith.constant 0 : index
    %c0_36 = arith.constant 0 : index
    %82 = vector.load %arg11[%c0_35, %c0_36] : memref<80x256xf32, #tpu.memory_space<vmem>>, vector<80x256xf32>
    %cst_37 = arith.constant dense<0.000000e+00> : vector<256x256xf32>
    %83 = tpu.matmul %81, %82, %cst_37 {dimension_numbers = #tpu.dot_dimension_numbers<[1], [0], [0], [1], [0, 0, 1, 1], [], []>} : vector<256x80xf32>, vector<80x256xf32>, vector<256x256xf32> -> vector<256x256xf32>
    %c0_38 = arith.constant 0 : index
    %c0_39 = arith.constant 0 : index
    %84 = vector.load %arg12[%c0_38, %c0_39] : memref<1x256xf32, #tpu.memory_space<vmem>>, vector<1x256xf32>
    %85 = vector.broadcast %84 : vector<1x256xf32> to vector<256x256xf32>
    %86 = arith.addf %83, %85 : vector<256x256xf32>
    %cst_40 = arith.constant 0.000000e+00 : f32
    %87 = vector.broadcast %cst_40 : f32 to vector<256x256xf32>
    %88 = arith.maximumf %86, %87 : vector<256x256xf32>
    %c0_41 = arith.constant 0 : index
    %c0_42 = arith.constant 0 : index
    %89 = vector.load %arg13[%c0_41, %c0_42] : memref<256x80xf32, #tpu.memory_space<vmem>>, vector<256x80xf32>
    %cst_43 = arith.constant dense<0.000000e+00> : vector<256x80xf32>
    %90 = tpu.matmul %88, %89, %cst_43 {dimension_numbers = #tpu.dot_dimension_numbers<[1], [0], [0], [1], [0, 0, 1, 1], [], []>} : vector<256x256xf32>, vector<256x80xf32>, vector<256x80xf32> -> vector<256x80xf32>
    %c0_44 = arith.constant 0 : index
    %c0_45 = arith.constant 0 : index
    %91 = vector.load %arg14[%c0_44, %c0_45] : memref<1x80xf32, #tpu.memory_space<vmem>>, vector<1x80xf32>
    %92 = vector.broadcast %91 : vector<1x80xf32> to vector<256x80xf32>
    %93 = arith.addf %90, %92 : vector<256x80xf32>
    %94 = arith.addf %81, %93 : vector<256x80xf32>
    %c0_46 = arith.constant 0 : index
    %c0_47 = arith.constant 0 : index
    %95 = vector.load %arg15[%c0_46, %c0_47] : memref<1x80xf32, #tpu.memory_space<vmem>>, vector<1x80xf32>
    %c0_48 = arith.constant 0 : index
    %c0_49 = arith.constant 0 : index
    %96 = vector.load %arg16[%c0_48, %c0_49] : memref<1x80xf32, #tpu.memory_space<vmem>>, vector<1x80xf32>
    %cst_50 = arith.constant dense<0.000000e+00> : vector<256xf32>
    %97 = vector.multi_reduction <add>, %94, %cst_50 [1] : vector<256x80xf32> to vector<256xf32>
    %98 = vector.shape_cast %97 : vector<256xf32> to vector<256x1xf32>
    %cst_51 = arith.constant 8.000000e+01 : f32
    %99 = vector.broadcast %cst_51 : f32 to vector<256x1xf32>
    %100 = arith.divf %98, %99 : vector<256x1xf32>
    %101 = vector.broadcast %100 : vector<256x1xf32> to vector<256x80xf32>
    %102 = arith.subf %94, %101 : vector<256x80xf32>
    %103 = arith.mulf %102, %102 : vector<256x80xf32>
    %cst_52 = arith.constant dense<0.000000e+00> : vector<256xf32>
    %104 = vector.multi_reduction <add>, %103, %cst_52 [1] : vector<256x80xf32> to vector<256xf32>
    %105 = vector.shape_cast %104 : vector<256xf32> to vector<256x1xf32>
    %cst_53 = arith.constant 8.000000e+01 : f32
    %106 = vector.broadcast %cst_53 : f32 to vector<256x1xf32>
    %107 = arith.divf %105, %106 : vector<256x1xf32>
    %cst_54 = arith.constant 9.99999974E-6 : f32
    %108 = vector.broadcast %cst_54 : f32 to vector<256x1xf32>
    %109 = arith.addf %107, %108 : vector<256x1xf32>
    %110 = math.rsqrt %109 : vector<256x1xf32>
    %111 = vector.broadcast %110 : vector<256x1xf32> to vector<256x80xf32>
    %112 = arith.mulf %102, %111 : vector<256x80xf32>
    %113 = vector.broadcast %95 : vector<1x80xf32> to vector<256x80xf32>
    %114 = arith.mulf %112, %113 : vector<256x80xf32>
    %115 = vector.broadcast %96 : vector<1x80xf32> to vector<256x80xf32>
    %116 = arith.addf %114, %115 : vector<256x80xf32>
    %c0_55 = arith.constant 0 : index
    %c0_56 = arith.constant 0 : index
    %117 = vector.load %arg2[%c0_55, %c0_56] : memref<16x256xf32, #tpu.memory_space<vmem>>, vector<16x256xf32>
    %cst_57 = arith.constant dense<0.000000e+00> : vector<16x80xf32>
    %118 = tpu.matmul %117, %116, %cst_57 {dimension_numbers = #tpu.dot_dimension_numbers<[1], [0], [0], [1], [0, 0, 1, 1], [], []>} : vector<16x256xf32>, vector<256x80xf32>, vector<16x80xf32> -> vector<16x80xf32>
    %c0_58 = arith.constant 0 : index
    %c0_59 = arith.constant 0 : index
    %119 = vector.load %arg17[%c0_58, %c0_59] : memref<80x80xf32, #tpu.memory_space<vmem>>, vector<80x80xf32>
    %cst_60 = arith.constant dense<0.000000e+00> : vector<16x80xf32>
    %120 = tpu.matmul %118, %119, %cst_60 {dimension_numbers = #tpu.dot_dimension_numbers<[1], [0], [0], [1], [0, 0, 1, 1], [], []>} : vector<16x80xf32>, vector<80x80xf32>, vector<16x80xf32> -> vector<16x80xf32>
    %c0_61 = arith.constant 0 : index
    %c0_62 = arith.constant 0 : index
    %121 = vector.load %arg18[%c0_61, %c0_62] : memref<1x80xf32, #tpu.memory_space<vmem>>, vector<1x80xf32>
    %122 = vector.broadcast %121 : vector<1x80xf32> to vector<16x80xf32>
    %123 = arith.addf %120, %122 : vector<16x80xf32>
    %cst_63 = arith.constant 0.000000e+00 : f32
    %124 = vector.broadcast %cst_63 : f32 to vector<16x80xf32>
    %125 = arith.maximumf %123, %124 : vector<16x80xf32>
    %c0_64 = arith.constant 0 : index
    %c0_65 = arith.constant 0 : index
    %126 = vector.load %arg19[%c0_64, %c0_65] : memref<80x640xf32, #tpu.memory_space<vmem>>, vector<80x640xf32>
    %cst_66 = arith.constant dense<0.000000e+00> : vector<16x640xf32>
    %127 = tpu.matmul %125, %126, %cst_66 {dimension_numbers = #tpu.dot_dimension_numbers<[1], [0], [0], [1], [0, 0, 1, 1], [], []>} : vector<16x80xf32>, vector<80x640xf32>, vector<16x640xf32> -> vector<16x640xf32>
    %c0_67 = arith.constant 0 : index
    %c0_68 = arith.constant 0 : index
    %128 = vector.load %arg20[%c0_67, %c0_68] : memref<1x640xf32, #tpu.memory_space<vmem>>, vector<1x640xf32>
    %129 = vector.broadcast %128 : vector<1x640xf32> to vector<16x640xf32>
    %130 = arith.addf %127, %129 : vector<16x640xf32>
    %c0_69 = arith.constant 0 : index
    %c0_70 = arith.constant 0 : index
    %131 = vector.load %arg21[%c0_69, %c0_70] : memref<16x640xf32, #tpu.memory_space<vmem>>, vector<16x640xf32>
    tpu.vector_store %arg21[%c0_69, %c0_70], %130 {strides = array<i32>} : memref<16x640xf32, #tpu.memory_space<vmem>>, vector<16x640xf32>,
    return
  }
  func.func @transform_0(%arg0: i32) -> (i32, i32) {
    %c0_i32 = arith.constant 0 : i32
    %c0_i32_0 = arith.constant 0 : i32
    return %arg0, %c0_i32 : i32, i32
  }
  func.func @transform_1(%arg0: i32) -> (i32, i32) {
    %c0_i32 = arith.constant 0 : i32
    %c0_i32_0 = arith.constant 0 : i32
    %c0_i32_1 = arith.constant 0 : i32
    return %c0_i32, %c0_i32_0 : i32, i32
  }
  func.func @transform_2(%arg0: i32) -> (i32, i32) {
    %c0_i32 = arith.constant 0 : i32
    %c0_i32_0 = arith.constant 0 : i32
    %c0_i32_1 = arith.constant 0 : i32
    return %c0_i32, %c0_i32_0 : i32, i32
  }
  func.func @transform_3(%arg0: i32) -> (i32, i32) {
    %c0_i32 = arith.constant 0 : i32
    %c0_i32_0 = arith.constant 0 : i32
    %c0_i32_1 = arith.constant 0 : i32
    return %c0_i32, %c0_i32_0 : i32, i32
  }
  func.func @transform_4(%arg0: i32) -> (i32, i32) {
    %c0_i32 = arith.constant 0 : i32
    %c0_i32_0 = arith.constant 0 : i32
    %c0_i32_1 = arith.constant 0 : i32
    return %c0_i32, %c0_i32_0 : i32, i32
  }
  func.func @transform_5(%arg0: i32) -> (i32, i32) {
    %c0_i32 = arith.constant 0 : i32
    %c0_i32_0 = arith.constant 0 : i32
    %c0_i32_1 = arith.constant 0 : i32
    return %c0_i32, %c0_i32_0 : i32, i32
  }
  func.func @transform_6(%arg0: i32) -> (i32, i32) {
    %c0_i32 = arith.constant 0 : i32
    %c0_i32_0 = arith.constant 0 : i32
    %c0_i32_1 = arith.constant 0 : i32
    return %c0_i32, %c0_i32_0 : i32, i32
  }
  func.func @transform_7(%arg0: i32) -> (i32, i32) {
    %c0_i32 = arith.constant 0 : i32
    %c0_i32_0 = arith.constant 0 : i32
    %c0_i32_1 = arith.constant 0 : i32
    return %c0_i32, %c0_i32_0 : i32, i32
  }
  func.func @transform_8(%arg0: i32) -> (i32, i32) {
    %c0_i32 = arith.constant 0 : i32
    %c0_i32_0 = arith.constant 0 : i32
    %c0_i32_1 = arith.constant 0 : i32
    return %c0_i32, %c0_i32_0 : i32, i32
  }
  func.func @transform_9(%arg0: i32) -> (i32, i32) {
    %c0_i32 = arith.constant 0 : i32
    %c0_i32_0 = arith.constant 0 : i32
    %c0_i32_1 = arith.constant 0 : i32
    return %c0_i32, %c0_i32_0 : i32, i32
  }
  func.func @transform_10(%arg0: i32) -> (i32, i32) {
    %c0_i32 = arith.constant 0 : i32
    %c0_i32_0 = arith.constant 0 : i32
    %c0_i32_1 = arith.constant 0 : i32
    return %c0_i32, %c0_i32_0 : i32, i32
  }
  func.func @transform_11(%arg0: i32) -> (i32, i32) {
    %c0_i32 = arith.constant 0 : i32
    %c0_i32_0 = arith.constant 0 : i32
    %c0_i32_1 = arith.constant 0 : i32
    return %c0_i32, %c0_i32_0 : i32, i32
  }
  func.func @transform_12(%arg0: i32) -> (i32, i32) {
    %c0_i32 = arith.constant 0 : i32
    %c0_i32_0 = arith.constant 0 : i32
    %c0_i32_1 = arith.constant 0 : i32
    return %c0_i32, %c0_i32_0 : i32, i32
  }
  func.func @transform_13(%arg0: i32) -> (i32, i32) {
    %c0_i32 = arith.constant 0 : i32
    %c0_i32_0 = arith.constant 0 : i32
    %c0_i32_1 = arith.constant 0 : i32
    return %c0_i32, %c0_i32_0 : i32, i32
  }
  func.func @transform_14(%arg0: i32) -> (i32, i32) {
    %c0_i32 = arith.constant 0 : i32
    %c0_i32_0 = arith.constant 0 : i32
    %c0_i32_1 = arith.constant 0 : i32
    return %c0_i32, %c0_i32_0 : i32, i32
  }
  func.func @transform_15(%arg0: i32) -> (i32, i32) {
    %c0_i32 = arith.constant 0 : i32
    %c0_i32_0 = arith.constant 0 : i32
    %c0_i32_1 = arith.constant 0 : i32
    return %c0_i32, %c0_i32_0 : i32, i32
  }
  func.func @transform_16(%arg0: i32) -> (i32, i32) {
    %c0_i32 = arith.constant 0 : i32
    %c0_i32_0 = arith.constant 0 : i32
    %c0_i32_1 = arith.constant 0 : i32
    return %c0_i32, %c0_i32_0 : i32, i32
  }
  func.func @transform_17(%arg0: i32) -> (i32, i32) {
    %c0_i32 = arith.constant 0 : i32
    %c0_i32_0 = arith.constant 0 : i32
    %c0_i32_1 = arith.constant 0 : i32
    return %c0_i32, %c0_i32_0 : i32, i32
  }
  func.func @transform_18(%arg0: i32) -> (i32, i32) {
    %c0_i32 = arith.constant 0 : i32
    %c0_i32_0 = arith.constant 0 : i32
    %c0_i32_1 = arith.constant 0 : i32
    return %c0_i32, %c0_i32_0 : i32, i32
  }
  func.func @transform_19(%arg0: i32) -> (i32, i32) {
    %c0_i32 = arith.constant 0 : i32
    %c0_i32_0 = arith.constant 0 : i32
    %c0_i32_1 = arith.constant 0 : i32
    return %c0_i32, %c0_i32_0 : i32, i32
  }
  func.func @transform_20(%arg0: i32) -> (i32, i32) {
    %c0_i32 = arith.constant 0 : i32
    %c0_i32_0 = arith.constant 0 : i32
    return %arg0, %c0_i32 : i32, i32
  }
}

</mosaic_0001>

<bundles_post_ra>
// kernel: classifier_forward.1
= control target key start
LH: loop header
LB: loop body
LE: loop exit
PB: predicated region body
PF: predicated region fallthrough
CT: control target
= control target key end

     0   :  { %s15732_s0 = inlined_call_operand.vmem [shape: f32[256,40], index: 0, kind: input, shape index: {}]   ;;  %s15733_s1 = inlined_call_operand.vmem [shape: f32[16,256], index: 1, kind: input, shape index: {}]   ;;  %s15734_s2 = inlined_call_operand.vmem [shape: f32[40,80], index: 2, kind: input, shape index: {}]   ;;  %s15735_s3 = inlined_call_operand.vmem [shape: f32[1,80], index: 3, kind: input, shape index: {}]   ;;  %s15736_s4 = inlined_call_operand.vmem [shape: f32[80,768], index: 4, kind: input, shape index: {}]   ;;  %s15737_s5 = inlined_call_operand.vmem [shape: f32[1,768], index: 5, kind: input, shape index: {}]   ;;  %s15738_s6 = inlined_call_operand.vmem [shape: f32[256,80], index: 6, kind: input, shape index: {}]   ;;  %s15739_s7 = inlined_call_operand.vmem [shape: f32[1,80], index: 7, kind: input, shape index: {}]   ;;  %s15740_s8 = inlined_call_operand.vmem [shape: f32[1,80], index: 8, kind: input, shape index: {}]   ;;  %s15741_s9 = inlined_call_operand.vmem [shape: f32[1,80], index: 9, kind: input, shape index: {}]   ;;  %s15742_s10 = inlined_call_operand.vmem [shape: f32[80,256], index: 10, kind: input, shape index: {}]   ;;  %s15743_s11 = inlined_call_operand.vmem [shape: f32[1,256], index: 11, kind: input, shape index: {}]   ;;  %s15744_s12 = inlined_call_operand.vmem [shape: f32[256,80], index: 12, kind: input, shape index: {}]   ;;  %s15745_s13 = inlined_call_operand.vmem [shape: f32[1,80], index: 13, kind: input, shape index: {}]   ;;  %s15746_s14 = inlined_call_operand.vmem [shape: f32[1,80], index: 14, kind: input, shape index: {}]   ;;  %s15747_s15 = inlined_call_operand.vmem [shape: f32[1,80], index: 15, kind: input, shape index: {}]   ;;  %s15748_s16 = inlined_call_operand.vmem [shape: f32[80,80], index: 16, kind: input, shape index: {}]   ;;  %s15749_s17 = inlined_call_operand.vmem [shape: f32[1,80], index: 17, kind: input, shape index: {}]   ;;  %s15750_s18 = inlined_call_operand.vmem [shape: f32[80,640], index: 18, kind: input, shape index: {}]   ;;  %s15751_s19 = inlined_call_operand.vmem [shape: f32[1,640], index: 19, kind: input, shape index: {}]   ;;  %s15752_s20 = inlined_call_operand.hbm [shape: f32[16,640], index: 20, kind: output, shape index: {}]  }
   0x1   :  { %15802 = sst [smem:[#allocation145_spill]] %s15732_s0 }
   0x2   :  { %15803 = sst [smem:[#allocation146_spill]] %s15733_s1 }
   0x3   :  { %15804 = sst [smem:[#allocation147_spill]] %s15734_s2 }
   0x4   :  { %15805 = sst [smem:[#allocation148_spill]] %s15735_s3 }
   0x5   :  { %15806 = sst [smem:[#allocation149_spill]] %s15736_s4 }
   0x6   :  { %s15807_s23 = sld [smem:[#allocation147_spill]]  ;;  %vm110_vm0 = vcmask 326656  }
   0x7   :  { %s15808_s26 = sld [smem:[#allocation145_spill]] }
   0x8   :  { %s15809_s4 = sld [smem:[#allocation149_spill]] }
   0xc   :  { %v102_v0 = vld [vmem:[%s15807_s23 + $0x20] sm:$0xff]  ;;  %v101_v1 = vld [vmem:[%s15807_s23 + $0x18] sm:$0xff]  ;;  %v100_v3 = vld [vmem:[%s15807_s23 + $0x10] sm:$0xff] }
   0xd   :  { %10584 = vmatprep.subr.mxu0 %v102_v0  ;;  %v66_v2 = vld [vmem:[%s15808_s26] sm:$0xff]  ;;  %v99_v4 = vld [vmem:[%s15807_s23 + $0x8] sm:$0xff]  ;;  %v68_v7 = vld [vmem:[%s15808_s26 + $0x10] sm:$0xff] }
   0xe   :  { %10585 = vmatpush3.msra.mxu0 %v102_v0  ;;  %10594 = vmatprep.mubr.msk.f32.mxu0 %vm110_vm0, %v66_v2  ;;  %v98_v5 = vld [vmem:[%s15807_s23] sm:$0xff]  ;;  %v67_v6 = vld [vmem:[%s15808_s26 + $0x8] sm:$0xff]  ;;  %v69_v8 = vld [vmem:[%s15808_s26 + $0x18] sm:$0xff] }
   0xf   :  { %10586 = vmatprep.subr.mxu0 %v101_v1  ;;  %v70_v9 = vld [vmem:[%s15808_s26 + $0x20] sm:$0xff]  ;;  %v487_v10 = vld [vmem:[%s15809_s4 + $0x1b8] sm:$0xff]  ;;  %v489_v11 = vld [vmem:[%s15809_s4 + $0x1c8] sm:$0xff] }
  0x10   :  { %10587 = vmatpush3.msra.mxu0 %v101_v1  ;;  %633 = vmatprep.subr.mxu1 %v487_v10  ;;  %v486_v12 = vld [vmem:[%s15809_s4 + $0x1b0] sm:$0xff]  ;;  %v488_v13 = vld [vmem:[%s15809_s4 + $0x1c0] sm:$0xff]  ;;  %v481_v14 = vld [vmem:[%s15809_s4 + $0x188] sm:$0xff] }
  0x11   :  { %10588 = vmatprep.subr.mxu0 %v100_v3  ;;  %634 = vmatpush1.msra.mxu1 %v486_v12  ;;  %v483_v15 = vld [vmem:[%s15809_s4 + $0x198] sm:$0xff]  ;;  %v480_v16 = vld [vmem:[%s15809_s4 + $0x180] sm:$0xff]  ;;  %v482_v17 = vld [vmem:[%s15809_s4 + $0x190] sm:$0xff] }
  0x12   :  { %10589 = vmatpush3.msra.mxu0 %v100_v3  ;;  %635 = vmatprep.subr.mxu1 %v481_v14  ;;  %v475_v18 = vld [vmem:[%s15809_s4 + $0x158] sm:$0xff]  ;;  %v477_v19 = vld [vmem:[%s15809_s4 + $0x168] sm:$0xff]  ;;  %v474_v21 = vld [vmem:[%s15809_s4 + $0x150] sm:$0xff] }
  0x13   :  { %10590 = vmatprep.subr.mxu0 %v99_v4  ;;  %v71_v20 = vld [vmem:[%s15808_s26 + $0x28] sm:$0xff]  ;;  %v72_v22 = vld [vmem:[%s15808_s26 + $0x30] sm:$0xff]  ;;  %636 = vmatpush1.msra.mxu1 %v480_v16  ;;  %v476_v23 = vld [vmem:[%s15809_s4 + $0x160] sm:$0xff] }
  0x14   :  { %10591 = vmatpush3.msra.mxu0 %v99_v4  ;;  %637 = vmatprep.subr.mxu1 %v475_v18  ;;  %v469_v24 = vld [vmem:[%s15809_s4 + $0x128] sm:$0xff]  ;;  %v471_v25 = vld [vmem:[%s15809_s4 + $0x138] sm:$0xff]  ;;  %v468_v26 = vld [vmem:[%s15809_s4 + $0x120] sm:$0xff] }
  0x15   :  { %10592 = vmatprep.subr.mxu0 %v98_v5  ;;  %638 = vmatpush1.msra.mxu1 %v474_v21  ;;  %v470_v27 = vld [vmem:[%s15809_s4 + $0x130] sm:$0xff]  ;;  %v73_v28 = vld [vmem:[%s15808_s26 + $0x38] sm:$0xff]  ;;  %v74_v30 = vld [vmem:[%s15808_s26 + $0x40] sm:$0xff] }
  0x16   :  { %10593 = vmatpush3.msra.mxu0 %v98_v5  ;;  %v463_v29 = vld [vmem:[%s15809_s4 + $0xf8] sm:$0xff]  ;;  %639 = vmatprep.subr.mxu1 %v469_v24  ;;  %v465_v31 = vld [vmem:[%s15809_s4 + $0x108] sm:$0xff]  ;;  %v462_v32 = vld [vmem:[%s15809_s4 + $0xf0] sm:$0xff] }
  0x17   :  { %10595 = vmatmul.mubr.msk.f32.vlgmr.msra.gmra.mxu0 %vm110_vm0, %v67_v6  ;;  %890 = vmatprep.subr.mxu0 %v489_v11  ;;  %v464_v33 = vld [vmem:[%s15809_s4 + $0x100] sm:$0xff] }
  0x18   :  { %10597 = vmatprep.mubr.msk.f32.mxu0 %vm110_vm0, %v68_v7  ;;  %891 = vmatpush1.msra.mxu0 %v488_v13 }
  0x19   :  { %892 = vmatprep.subr.mxu0 %v483_v15  ;;  %640 = vmatpush1.msra.mxu1 %v468_v26 }
  0x1a   :  { %893 = vmatpush1.msra.mxu0 %v482_v17 }
  0x1b   :  { %10598 = vmatmul.mubr.msk.f32.gmra.mxu0 %vm110_vm0, %v69_v8  ;;  %894 = vmatprep.subr.mxu0 %v477_v19 }
  0x1c   :  { %10600 = vmatprep.mubr.msk.f32.mxu0 %vm110_vm0, %v70_v9  ;;  %895 = vmatpush1.msra.mxu0 %v476_v23 }
  0x1d   :  { %896 = vmatprep.subr.mxu0 %v471_v25 }
  0x1e   :  { %897 = vmatpush1.msra.mxu0 %v470_v27 }
  0x1f   :  { %10601 = vmatmul.mubr.msk.f32.gmra.mxu0 %vm110_vm0, %v71_v20 }
  0x20   :  { %10603 = vmatprep.mubr.msk.f32.mxu0 %vm110_vm0, %v72_v22 }
  0x21   :  { %25 = vsyncpa [#allocation3], 0  ;;  %641 = vmatprep.subr.mxu1 %v463_v29  ;;  %v457_v34 = vld [vmem:[%s15809_s4 + $0xc8] sm:$0xff]  ;;  %v459_v35 = vld [vmem:[%s15809_s4 + $0xd8] sm:$0xff]  ;;  %898 = vmatprep.subr.mxu0 %v465_v31  ;;  %v15776_v13 = vmov 0.0   ;;  %s15810_s1 = sld [smem:[#allocation148_spill]] }
  0x22   :  { %v75_v36 = vld [vmem:[%s15808_s26 + $0x48] sm:$0xff]  ;;  %v456_v37 = vld [vmem:[%s15809_s4 + $0xc0] sm:$0xff]  ;;  %v76_v38 = vld [vmem:[%s15808_s26 + $0x50] sm:$0xff]  ;;  %642 = vmatpush1.msra.mxu1 %v462_v32  ;;  %899 = vmatpush1.msra.mxu0 %v464_v33  ;;  %vm524_vm1 = vcmask 654336   ;;  %vm2592_vm2 = vcmask 130048   ;;  %s16128_s28 = sld [smem:[#allocation146_spill]] }
  0x23   :  { %10604 = vmatmul.mubr.msk.f32.gmra.mxu0 %vm110_vm0, %v73_v28  ;;  %v458_v39 = vld [vmem:[%s15809_s4 + $0xd0] sm:$0xff]  ;;  %643 = vmatprep.subr.mxu1 %v457_v34  ;;  %v451_v40 = vld [vmem:[%s15809_s4 + $0x98] sm:$0xff]  ;;  %v453_v41 = vld [vmem:[%s15809_s4 + $0xa8] sm:$0xff] }
  0x24   :  { %10606 = vmatprep.mubr.msk.f32.mxu0 %vm110_vm0, %v74_v30  ;;  %900 = vmatprep.subr.mxu0 %v459_v35  ;;  %v450_v42 = vld [vmem:[%s15809_s4 + $0x90] sm:$0xff]  ;;  %v452_v43 = vld [vmem:[%s15809_s4 + $0xa0] sm:$0xff]  ;;  %v77_v44 = vld [vmem:[%s15808_s26 + $0x58] sm:$0xff] }
  0x25   :  { %644 = vmatpush1.msra.mxu1 %v456_v37  ;;  %901 = vmatpush1.msra.mxu0 %v458_v39  ;;  %v445_v45 = vld [vmem:[%s15809_s4 + $0x68] sm:$0xff]  ;;  %v78_v46 = vld [vmem:[%s15808_s26 + $0x60] sm:$0xff]  ;;  %v447_v47 = vld [vmem:[%s15809_s4 + $0x78] sm:$0xff] }
  0x26   :  { %645 = vmatprep.subr.mxu1 %v451_v40  ;;  %902 = vmatprep.subr.mxu0 %v453_v41  ;;  %v79_v48 = vld [vmem:[%s15808_s26 + $0x68] sm:$0xff]  ;;  %v80_v49 = vld [vmem:[%s15808_s26 + $0x70] sm:$0xff]  ;;  %v81_v50 = vld [vmem:[%s15808_s26 + $0x78] sm:$0xff] }
  0x27   :  { %10607 = vmatmul.mubr.msk.f32.gmra.mxu0 %vm110_vm0, %v75_v36  ;;  %646 = vmatpush1.msra.mxu1 %v450_v42  ;;  %v82_v51 = vld [vmem:[%s15808_s26 + $0x80] sm:$0xff]  ;;  %v83_v52 = vld [vmem:[%s15808_s26 + $0x88] sm:$0xff]  ;;  %v84_v53 = vld [vmem:[%s15808_s26 + $0x90] sm:$0xff] }
  0x28   :  { %10609 = vmatprep.mubr.msk.f32.mxu0 %vm110_vm0, %v76_v38  ;;  %903 = vmatpush1.msra.mxu0 %v452_v43  ;;  %v85_v54 = vld [vmem:[%s15808_s26 + $0x98] sm:$0xff]  ;;  %v86_v55 = vld [vmem:[%s15808_s26 + $0xa0] sm:$0xff]  ;;  %v87_v56 = vld [vmem:[%s15808_s26 + $0xa8] sm:$0xff] }
  0x29   :  { %647 = vmatprep.subr.mxu1 %v445_v45  ;;  %904 = vmatprep.subr.mxu0 %v447_v47  ;;  %v88_v57 = vld [vmem:[%s15808_s26 + $0xb0] sm:$0xff]  ;;  %v89_v58 = vld [vmem:[%s15808_s26 + $0xb8] sm:$0xff]  ;;  %v90_v59 = vld [vmem:[%s15808_s26 + $0xc0] sm:$0xff] }
  0x2a   :  { %v91_v60 = vld [vmem:[%s15808_s26 + $0xc8] sm:$0xff]  ;;  %v92_v61 = vld [vmem:[%s15808_s26 + $0xd0] sm:$0xff]  ;;  %v93_v62 = vld [vmem:[%s15808_s26 + $0xd8] sm:$0xff]  ;;  %685 = vmatprep.mubr.f32.mxu1 %v15776_v13 }
  0x2b   :  { %10610 = vmatmul.mubr.msk.f32.gmra.mxu0 %vm110_vm0, %v77_v44  ;;  %v94_v63 = vld [vmem:[%s15808_s26 + $0xe0] sm:$0xff]  ;;  %v95_v0 = vld [vmem:[%s15808_s26 + $0xe8] sm:$0xff]  ;;  %v96_v1 = vld [vmem:[%s15808_s26 + $0xf0] sm:$0xff] }
  0x2c   :  { %10612 = vmatprep.mubr.msk.f32.mxu0 %vm110_vm0, %v78_v46  ;;  %v97_v2 = vld [vmem:[%s15808_s26 + $0xf8] sm:$0xff]  ;;  %v444_v3 = vld [vmem:[%s15809_s4 + $0x60] sm:$0xff]  ;;  %v446_v4 = vld [vmem:[%s15809_s4 + $0x70] sm:$0xff] }
  0x2d   :  { %648 = vmatpush1.msra.mxu1 %v444_v3  ;;  %905 = vmatpush1.msra.mxu0 %v446_v4  ;;  %v439_v5 = vld [vmem:[%s15809_s4 + $0x38] sm:$0xff]  ;;  %v441_v6 = vld [vmem:[%s15809_s4 + $0x48] sm:$0xff]  ;;  %v438_v7 = vld [vmem:[%s15809_s4 + $0x30] sm:$0xff] }
  0x2e   :  { %649 = vmatprep.subr.mxu1 %v439_v5  ;;  %906 = vmatprep.subr.mxu0 %v441_v6  ;;  %v440_v8 = vld [vmem:[%s15809_s4 + $0x40] sm:$0xff]  ;;  %v433_v9 = vld [vmem:[%s15809_s4 + $0x8] sm:$0xff]  ;;  %v435_v10 = vld [vmem:[%s15809_s4 + $0x18] sm:$0xff] }
  0x2f   :  { %10613 = vmatmul.mubr.msk.f32.gmra.mxu0 %vm110_vm0, %v79_v48  ;;  %650 = vmatpush1.msra.mxu1 %v438_v7  ;;  %v432_v11 = vld [vmem:[%s15809_s4] sm:$0xff]  ;;  %v434_v12 = vld [vmem:[%s15809_s4 + $0x10] sm:$0xff]  ;;  %v491_v14 = vld [vmem:[%s15809_s4 + $0x1d8] sm:$0xff] }
  0x30   :  { %10615 = vmatprep.mubr.msk.f32.mxu0 %vm110_vm0, %v80_v49  ;;  %907 = vmatpush1.msra.mxu0 %v440_v8  ;;  %v12087_v16 = vld [vmem:[%s15810_s1] ss:$0 sm:$0xff]  ;;  %v490_v20 = vld [vmem:[%s15809_s4 + $0x1d0] sm:$0xff]  ;;  %v485_v21 = vld [vmem:[%s15809_s4 + $0x1a8] sm:$0xff] }
  0x31   :  { %651 = vmatprep.subr.mxu1 %v433_v9  ;;  %908 = vmatprep.subr.mxu0 %v435_v10  ;;  %v484_v24 = vld [vmem:[%s15809_s4 + $0x1a0] sm:$0xff]  ;;  %v479_v25 = vld [vmem:[%s15809_s4 + $0x178] sm:$0xff]  ;;  %v478_v28 = vld [vmem:[%s15809_s4 + $0x170] sm:$0xff] }
  0x32   :  { %652 = vmatpush1.msra.mxu1 %v432_v11  ;;  %909 = vmatpush1.msra.mxu0 %v434_v12  ;;  %v473_v29 = vld [vmem:[%s15809_s4 + $0x148] sm:$0xff]  ;;  %v472_v32 = vld [vmem:[%s15809_s4 + $0x140] sm:$0xff]  ;;  %v467_v33 = vld [vmem:[%s15809_s4 + $0x118] sm:$0xff] }
  0x33   :  { %10616 = vmatmul.mubr.msk.f32.gmra.mxu0 %vm110_vm0, %v81_v50  ;;  %1147 = vmatprep.subr.mxu1 %v491_v14  ;;  %v466_v36 = vld [vmem:[%s15809_s4 + $0x110] sm:$0xff]  ;;  %v461_v37 = vld [vmem:[%s15809_s4 + $0xe8] sm:$0xff]  ;;  %v460_v40 = vld [vmem:[%s15809_s4 + $0xe0] sm:$0xff] }
  0x34   :  { %10618 = vmatprep.mubr.msk.f32.mxu0 %vm110_vm0, %v82_v51  ;;  %v455_v41 = vld [vmem:[%s15809_s4 + $0xb8] sm:$0xff]  ;;  %v454_v44 = vld [vmem:[%s15809_s4 + $0xb0] sm:$0xff]  ;;  %v449_v45 = vld [vmem:[%s15809_s4 + $0x88] sm:$0xff] }
  0x35   :  { %v448_v48 = vld [vmem:[%s15809_s4 + $0x80] sm:$0xff]  ;;  %v443_v49 = vld [vmem:[%s15809_s4 + $0x58] sm:$0xff] }
  0x37   :  { %10619 = vmatmul.mubr.msk.f32.gmra.mxu0 %vm110_vm0, %v83_v52  ;;  %v442_v52 = vld [vmem:[%s15809_s4 + $0x50] sm:$0xff] }
  0x38   :  { %10621 = vmatprep.mubr.msk.f32.mxu0 %vm110_vm0, %v84_v53  ;;  %v437_v53 = vld [vmem:[%s15809_s4 + $0x28] sm:$0xff] }
  0x3b   :  { %10622 = vmatmul.mubr.msk.f32.gmra.mxu0 %vm110_vm0, %v85_v54 }
  0x3c   :  { %10624 = vmatprep.mubr.msk.f32.mxu0 %vm110_vm0, %v86_v55 }
  0x3f   :  { %10625 = vmatmul.mubr.msk.f32.gmra.mxu0 %vm110_vm0, %v87_v56  ;;  %v436_v56 = vld [vmem:[%s15809_s4 + $0x20] sm:$0xff] }
  0x40   :  { %10627 = vmatprep.mubr.msk.f32.mxu0 %vm110_vm0, %v88_v57 }
  0x43   :  { %10628 = vmatmul.mubr.msk.f32.gmra.mxu0 %vm110_vm0, %v89_v58 }
  0x44   :  { %10630 = vmatprep.mubr.msk.f32.mxu0 %vm110_vm0, %v90_v59 }
  0x47   :  { %10631 = vmatmul.mubr.msk.f32.gmra.mxu0 %vm110_vm0, %v91_v60 }
  0x48   :  { %10633 = vmatprep.mubr.msk.f32.mxu0 %vm110_vm0, %v92_v61 }
  0x4b   :  { %10634 = vmatmul.mubr.msk.f32.gmra.mxu0 %vm110_vm0, %v93_v62 }
  0x4c   :  { %10636 = vmatprep.mubr.msk.f32.mxu0 %vm110_vm0, %v94_v63 }
  0x4f   :  { %10637 = vmatmul.mubr.msk.f32.gmra.mxu0 %vm110_vm0, %v95_v0 }
  0x50   :  { %10639 = vmatprep.mubr.msk.f32.mxu0 %vm110_vm0, %v96_v1 }
  0x53   :  { %10640 = vmatmul.mubr.msk.f32.gmra.mxu0 %vm110_vm0, %v97_v2 }
  0x54   :  { %942 = vmatprep.mubr.f32.mxu0 %v15776_v13 }
  0xd7   :  { %v10596_v15 = vpop.f32.mrf.mxu0 }
  0xd8   :  { %v12105_v22 = vadd.f32 %v10596_v15, %v12087_v16 }
  0xd9   :  { %v273_v17 = vpop.f32.mrf.mxu0 }
  0xda   :  { %v12090_v18 = vadd.f32 %v12087_v16, %v273_v17  ;;  %15812 = vst [vmem:[#allocation6_spill] sm:$0xff] %v12105_v22 }
  0xdb   :  { %v10599_v19 = vpop.f32.mrf.mxu0 }
  0xdc   :  { %15811 = vst [vmem:[#allocation5_spill] sm:$0xff] %v12090_v18  ;;  %9926 = vmatmul.mubr.msk.f32.vlgmr.msra.gmra.mxu1 %vm524_vm1, %v12090_v18  ;;  %9958 = vmatmul.mubr.msk.f32.vlgmr.msra.gmra.mxu0 %vm524_vm1, %v12090_v18  ;;  %v12135_v30 = vadd.f32 %v10599_v19, %v12087_v16 }
  0xdd   :  { %691 = vmatprep.mubr.f32.mxu1 %v15776_v13  ;;  %948 = vmatprep.mubr.f32.mxu0 %v15776_v13  ;;  %v283_v23 = vpop.f32.mrf.mxu0 }
  0xde   :  { %1148 = vmatpush1.msra.mxu1 %v490_v20  ;;  %v12120_v26 = vadd.f32 %v12087_v16, %v283_v23  ;;  %15814 = vst [vmem:[#allocation8_spill] sm:$0xff] %v12135_v30 }
  0xdf   :  { %1149 = vmatprep.subr.mxu1 %v485_v21  ;;  %v10602_v27 = vpop.f32.mrf.mxu0 }
  0xe0   :  { %9927 = vmatmul.mubr.msk.f32.gmra.mxu1 %vm524_vm1, %v12105_v22  ;;  %9959 = vmatmul.mubr.msk.f32.gmra.mxu0 %vm524_vm1, %v12105_v22  ;;  %15813 = vst [vmem:[#allocation7_spill] sm:$0xff] %v12120_v26  ;;  %v12165_v38 = vadd.f32 %v10602_v27, %v12087_v16 }
  0xe1   :  { %697 = vmatprep.mubr.f32.mxu1 %v15776_v13  ;;  %954 = vmatprep.mubr.f32.mxu0 %v15776_v13  ;;  %v293_v31 = vpop.f32.mrf.mxu0 }
  0xe2   :  { %1150 = vmatpush1.msra.mxu1 %v484_v24  ;;  %v12150_v34 = vadd.f32 %v12087_v16, %v293_v31  ;;  %15816 = vst [vmem:[#allocation10_spill] sm:$0xff] %v12165_v38 }
  0xe3   :  { %1151 = vmatprep.subr.mxu1 %v479_v25  ;;  %v10605_v35 = vpop.f32.mrf.mxu0 }
  0xe4   :  { %9928 = vmatmul.mubr.msk.f32.gmra.mxu1 %vm524_vm1, %v12120_v26  ;;  %9960 = vmatmul.mubr.msk.f32.gmra.mxu0 %vm524_vm1, %v12120_v26  ;;  %15815 = vst [vmem:[#allocation9_spill] sm:$0xff] %v12150_v34  ;;  %v12195_v46 = vadd.f32 %v10605_v35, %v12087_v16 }
  0xe5   :  { %703 = vmatprep.mubr.f32.mxu1 %v15776_v13  ;;  %960 = vmatprep.mubr.f32.mxu0 %v15776_v13  ;;  %v303_v39 = vpop.f32.mrf.mxu0 }
  0xe6   :  { %1152 = vmatpush1.msra.mxu1 %v478_v28  ;;  %v12180_v42 = vadd.f32 %v12087_v16, %v303_v39  ;;  %15818 = vst [vmem:[#allocation12_spill] sm:$0xff] %v12195_v46 }
  0xe7   :  { %1153 = vmatprep.subr.mxu1 %v473_v29  ;;  %v10608_v43 = vpop.f32.mrf.mxu0 }
  0xe8   :  { %9929 = vmatmul.mubr.msk.f32.gmra.mxu1 %vm524_vm1, %v12135_v30  ;;  %9961 = vmatmul.mubr.msk.f32.gmra.mxu0 %vm524_vm1, %v12135_v30  ;;  %15817 = vst [vmem:[#allocation11_spill] sm:$0xff] %v12180_v42  ;;  %v12225_v54 = vadd.f32 %v10608_v43, %v12087_v16 }
  0xe9   :  { %709 = vmatprep.mubr.f32.mxu1 %v15776_v13  ;;  %966 = vmatprep.mubr.f32.mxu0 %v15776_v13  ;;  %v313_v47 = vpop.f32.mrf.mxu0 }
  0xea   :  { %1154 = vmatpush1.msra.mxu1 %v472_v32  ;;  %v12210_v50 = vadd.f32 %v12087_v16, %v313_v47  ;;  %15820 = vst [vmem:[#allocation14_spill] sm:$0xff] %v12225_v54  ;;  %v12487_v47 = vld [vmem:[%s15737_s5] sm:$0x3f] }
  0xeb   :  { %1155 = vmatprep.subr.mxu1 %v467_v33  ;;  %v10611_v51 = vpop.f32.mrf.mxu0 }
  0xec   :  { %9930 = vmatmul.mubr.msk.f32.gmra.mxu1 %vm524_vm1, %v12150_v34  ;;  %9962 = vmatmul.mubr.msk.f32.gmra.mxu0 %vm524_vm1, %v12150_v34  ;;  %15819 = vst [vmem:[#allocation13_spill] sm:$0xff] %v12210_v50  ;;  %v12246_v59 = vadd.f32 %v10611_v51, %v12087_v16 }
  0xed   :  { %715 = vmatprep.mubr.f32.mxu1 %v15776_v13  ;;  %972 = vmatprep.mubr.f32.mxu0 %v15776_v13  ;;  %v323_v55 = vpop.f32.mrf.mxu0 }
  0xee   :  { %1156 = vmatpush1.msra.mxu1 %v466_v36  ;;  %v12237_v57 = vadd.f32 %v12087_v16, %v323_v55  ;;  %15822 = vst [vmem:[#allocation16_spill] sm:$0xff] %v12246_v59 }
  0xef   :  { %1157 = vmatprep.subr.mxu1 %v461_v37  ;;  %v10614_v58 = vpop.f32.mrf.mxu0 }
  0xf0   :  { %9931 = vmatmul.mubr.msk.f32.gmra.mxu1 %vm524_vm1, %v12165_v38  ;;  %9963 = vmatmul.mubr.msk.f32.gmra.mxu0 %vm524_vm1, %v12165_v38  ;;  %15821 = vst [vmem:[#allocation15_spill] sm:$0xff] %v12237_v57  ;;  %v12264_v63 = vadd.f32 %v10614_v58, %v12087_v16 }
  0xf1   :  { %721 = vmatprep.mubr.f32.mxu1 %v15776_v13  ;;  %978 = vmatprep.mubr.f32.mxu0 %v15776_v13  ;;  %v333_v60 = vpop.f32.mrf.mxu0 }
  0xf2   :  { %1158 = vmatpush1.msra.mxu1 %v460_v40  ;;  %v12255_v61 = vadd.f32 %v12087_v16, %v333_v60  ;;  %15824 = vst [vmem:[#allocation18_spill] sm:$0xff] %v12264_v63 }
  0xf3   :  { %1159 = vmatprep.subr.mxu1 %v455_v41  ;;  %v10617_v62 = vpop.f32.mrf.mxu0 }
  0xf4   :  { %9932 = vmatmul.mubr.msk.f32.gmra.mxu1 %vm524_vm1, %v12180_v42  ;;  %9964 = vmatmul.mubr.msk.f32.gmra.mxu0 %vm524_vm1, %v12180_v42  ;;  %15823 = vst [vmem:[#allocation17_spill] sm:$0xff] %v12255_v61  ;;  %v12282_v3 = vadd.f32 %v10617_v62, %v12087_v16 }
  0xf5   :  { %727 = vmatprep.mubr.f32.mxu1 %v15776_v13  ;;  %984 = vmatprep.mubr.f32.mxu0 %v15776_v13  ;;  %v343_v0 = vpop.f32.mrf.mxu0 }
  0xf6   :  { %1160 = vmatpush1.msra.mxu1 %v454_v44  ;;  %v12273_v1 = vadd.f32 %v12087_v16, %v343_v0  ;;  %15826 = vst [vmem:[#allocation20_spill] sm:$0xff] %v12282_v3 }
  0xf7   :  { %1161 = vmatprep.subr.mxu1 %v449_v45  ;;  %v10620_v2 = vpop.f32.mrf.mxu0 }
  0xf8   :  { %9933 = vmatmul.mubr.msk.f32.gmra.mxu1 %vm524_vm1, %v12195_v46  ;;  %9965 = vmatmul.mubr.msk.f32.gmra.mxu0 %vm524_vm1, %v12195_v46  ;;  %15825 = vst [vmem:[#allocation19_spill] sm:$0xff] %v12273_v1  ;;  %v12300_v7 = vadd.f32 %v10620_v2, %v12087_v16 }
  0xf9   :  { %733 = vmatprep.mubr.f32.mxu1 %v15776_v13  ;;  %990 = vmatprep.mubr.f32.mxu0 %v15776_v13  ;;  %v353_v4 = vpop.f32.mrf.mxu0 }
  0xfa   :  { %1162 = vmatpush1.msra.mxu1 %v448_v48  ;;  %v12291_v5 = vadd.f32 %v12087_v16, %v353_v4  ;;  %15828 = vst [vmem:[#allocation22_spill] sm:$0xff] %v12300_v7 }
  0xfb   :  { %1163 = vmatprep.subr.mxu1 %v443_v49  ;;  %v10623_v6 = vpop.f32.mrf.mxu0 }
  0xfc   :  { %9934 = vmatmul.mubr.msk.f32.gmra.mxu1 %vm524_vm1, %v12210_v50  ;;  %9966 = vmatmul.mubr.msk.f32.gmra.mxu0 %vm524_vm1, %v12210_v50  ;;  %15827 = vst [vmem:[#allocation21_spill] sm:$0xff] %v12291_v5  ;;  %v12318_v11 = vadd.f32 %v10623_v6, %v12087_v16 }
  0xfd   :  { %739 = vmatprep.mubr.f32.mxu1 %v15776_v13  ;;  %996 = vmatprep.mubr.f32.mxu0 %v15776_v13  ;;  %v363_v8 = vpop.f32.mrf.mxu0 }
  0xfe   :  { %1164 = vmatpush1.msra.mxu1 %v442_v52  ;;  %v12309_v9 = vadd.f32 %v12087_v16, %v363_v8  ;;  %15830 = vst [vmem:[#allocation24_spill] sm:$0xff] %v12318_v11 }
  0xff   :  { %1165 = vmatprep.subr.mxu1 %v437_v53  ;;  %v10626_v10 = vpop.f32.mrf.mxu0 }
 0x100   :  { %9935 = vmatmul.mubr.msk.f32.gmra.mxu1 %vm524_vm1, %v12225_v54  ;;  %9967 = vmatmul.mubr.msk.f32.gmra.mxu0 %vm524_vm1, %v12225_v54  ;;  %15829 = vst [vmem:[#allocation23_spill] sm:$0xff] %v12309_v9  ;;  %v12336_v17 = vadd.f32 %v10626_v10, %v12087_v16 }
 0x101   :  { %745 = vmatprep.mubr.f32.mxu1 %v15776_v13  ;;  %1002 = vmatprep.mubr.f32.mxu0 %v15776_v13  ;;  %v373_v12 = vpop.f32.mrf.mxu0 }
 0x102   :  { %1166 = vmatpush1.msra.mxu1 %v436_v56  ;;  %v12327_v14 = vadd.f32 %v12087_v16, %v373_v12  ;;  %15832 = vst [vmem:[#allocation26_spill] sm:$0xff] %v12336_v17 }
 0x103   :  { %v10629_v15 = vpop.f32.mrf.mxu0 }
 0x104   :  { %9936 = vmatmul.mubr.msk.f32.gmra.mxu1 %vm524_vm1, %v12237_v57  ;;  %9968 = vmatmul.mubr.msk.f32.gmra.mxu0 %vm524_vm1, %v12237_v57  ;;  %15831 = vst [vmem:[#allocation25_spill] sm:$0xff] %v12327_v14  ;;  %v12354_v23 = vadd.f32 %v10629_v15, %v12087_v16 }
 0x105   :  { %751 = vmatprep.mubr.f32.mxu1 %v15776_v13  ;;  %1008 = vmatprep.mubr.f32.mxu0 %v15776_v13  ;;  %v383_v19 = vpop.f32.mrf.mxu0 }
 0x106   :  { %v12345_v20 = vadd.f32 %v12087_v16, %v383_v19  ;;  %15834 = vst [vmem:[#allocation28_spill] sm:$0xff] %v12354_v23 }
 0x107   :  { %v10632_v21 = vpop.f32.mrf.mxu0 }
 0x108   :  { %9937 = vmatmul.mubr.msk.f32.gmra.mxu1 %vm524_vm1, %v12246_v59  ;;  %9969 = vmatmul.mubr.msk.f32.gmra.mxu0 %vm524_vm1, %v12246_v59  ;;  %15833 = vst [vmem:[#allocation27_spill] sm:$0xff] %v12345_v20  ;;  %v12372_v28 = vadd.f32 %v10632_v21, %v12087_v16 }
 0x109   :  { %757 = vmatprep.mubr.f32.mxu1 %v15776_v13  ;;  %1014 = vmatprep.mubr.f32.mxu0 %v15776_v13  ;;  %v393_v24 = vpop.f32.mrf.mxu0 }
 0x10a   :  { %v12363_v25 = vadd.f32 %v12087_v16, %v393_v24  ;;  %15836 = vst [vmem:[#allocation30_spill] sm:$0xff] %v12372_v28 }
 0x10b   :  { %v10635_v27 = vpop.f32.mrf.mxu0 }
 0x10c   :  { %9938 = vmatmul.mubr.msk.f32.gmra.mxu1 %vm524_vm1, %v12255_v61  ;;  %9970 = vmatmul.mubr.msk.f32.gmra.mxu0 %vm524_vm1, %v12255_v61  ;;  %15835 = vst [vmem:[#allocation29_spill] sm:$0xff] %v12363_v25  ;;  %v12390_v33 = vadd.f32 %v10635_v27, %v12087_v16 }
 0x10d   :  { %763 = vmatprep.mubr.f32.mxu1 %v15776_v13  ;;  %1020 = vmatprep.mubr.f32.mxu0 %v15776_v13  ;;  %v403_v29 = vpop.f32.mrf.mxu0 }
 0x10e   :  { %v12381_v31 = vadd.f32 %v12087_v16, %v403_v29  ;;  %15838 = vst [vmem:[#allocation32_spill] sm:$0xff] %v12390_v33 }
 0x10f   :  { %v10638_v32 = vpop.f32.mrf.mxu0 }
 0x110   :  { %9939 = vmatmul.mubr.msk.f32.gmra.mxu1 %vm524_vm1, %v12264_v63  ;;  %9971 = vmatmul.mubr.msk.f32.gmra.mxu0 %vm524_vm1, %v12264_v63  ;;  %15837 = vst [vmem:[#allocation31_spill] sm:$0xff] %v12381_v31  ;;  %v12408_v40 = vadd.f32 %v10638_v32, %v12087_v16 }
 0x111   :  { %769 = vmatprep.mubr.f32.mxu1 %v15776_v13  ;;  %1026 = vmatprep.mubr.f32.mxu0 %v15776_v13  ;;  %v413_v35 = vpop.f32.mrf.mxu0 }
 0x112   :  { %v12399_v37 = vadd.f32 %v12087_v16, %v413_v35  ;;  %15840 = vst [vmem:[#allocation34_spill] sm:$0xff] %v12408_v40 }
 0x113   :  { %v10641_v36 = vpop.f32.mrf.mxu0 }
 0x114   :  { %9940 = vmatmul.mubr.msk.f32.gmra.mxu1 %vm524_vm1, %v12273_v1  ;;  %9972 = vmatmul.mubr.msk.f32.gmra.mxu0 %vm524_vm1, %v12273_v1  ;;  %15839 = vst [vmem:[#allocation33_spill] sm:$0xff] %v12399_v37  ;;  %v12426_v43 = vadd.f32 %v10641_v36, %v12087_v16 }
 0x115   :  { %775 = vmatprep.mubr.f32.mxu1 %v15776_v13  ;;  %1032 = vmatprep.mubr.f32.mxu0 %v15776_v13  ;;  %v423_v39 = vpop.f32.mrf.mxu0 }
 0x116   :  { %v12415_v41 = vadd.f32 %v12087_v16, %v423_v39  ;;  %15842 = vst [vmem:[#allocation36_spill] sm:$0xff] %v12426_v43  ;;  %v494_v16 = vlaneseq }
 0x118   :  { %9941 = vmatmul.mubr.msk.f32.gmra.mxu1 %vm524_vm1, %v12282_v3  ;;  %9973 = vmatmul.mubr.msk.f32.gmra.mxu0 %vm524_vm1, %v12282_v3  ;;  %15841 = vst [vmem:[#allocation35_spill] sm:$0xff] %v12415_v41  ;;  %v12478_v44 = vshrl.u32 %v494_v16, 7 }
 0x119   :  { %781 = vmatprep.mubr.f32.mxu1 %v15776_v13  ;;  %1038 = vmatprep.mubr.f32.mxu0 %v15776_v13 }
 0x11a   :  { %15843 = vst [vmem:[#allocation37_spill] sm:$0xff] %v12478_v44  ;;  %v15757_v45 = vsub.s32 2, %v12478_v44  ;;  %v12499_v53 = vsub.s32 0, %v12478_v44 }
 0x11c   :  { %9942 = vmatmul.mubr.msk.f32.gmra.mxu1 %vm524_vm1, %v12291_v5  ;;  %9974 = vmatmul.mubr.msk.f32.gmra.mxu0 %vm524_vm1, %v12291_v5  ;;  %15846 = vst [vmem:[#allocation40_spill] sm:$0xff] %v12499_v53  ;;  %v12504_v55 = vrot.slane %v12487_v47, %v15757_v45  ;;  %v12518_v2 = vrot.slane %v12487_v47, %v12499_v53 }
 0x11d   :  { %787 = vmatprep.mubr.f32.mxu1 %v15776_v13  ;;  %1044 = vmatprep.mubr.f32.mxu0 %v15776_v13 }
 0x120   :  { %9943 = vmatmul.mubr.msk.f32.gmra.mxu1 %vm524_vm1, %v12300_v7  ;;  %9975 = vmatmul.mubr.msk.f32.gmra.mxu0 %vm524_vm1, %v12300_v7 }
 0x121   :  { %793 = vmatprep.mubr.f32.mxu1 %v15776_v13  ;;  %1050 = vmatprep.mubr.f32.mxu0 %v15776_v13 }
 0x124   :  { %9944 = vmatmul.mubr.msk.f32.gmra.mxu1 %vm524_vm1, %v12309_v9  ;;  %9976 = vmatmul.mubr.msk.f32.gmra.mxu0 %vm524_vm1, %v12309_v9 }
 0x125   :  { %799 = vmatprep.mubr.f32.mxu1 %v15776_v13  ;;  %1056 = vmatprep.mubr.f32.mxu0 %v15776_v13 }
 0x128   :  { %9945 = vmatmul.mubr.msk.f32.gmra.mxu1 %vm524_vm1, %v12318_v11  ;;  %9977 = vmatmul.mubr.msk.f32.gmra.mxu0 %vm524_vm1, %v12318_v11 }
 0x129   :  { %805 = vmatprep.mubr.f32.mxu1 %v15776_v13  ;;  %1062 = vmatprep.mubr.f32.mxu0 %v15776_v13 }
 0x12c   :  { %9946 = vmatmul.mubr.msk.f32.gmra.mxu1 %vm524_vm1, %v12327_v14  ;;  %9978 = vmatmul.mubr.msk.f32.gmra.mxu0 %vm524_vm1, %v12327_v14 }
 0x12d   :  { %811 = vmatprep.mubr.f32.mxu1 %v15776_v13  ;;  %1068 = vmatprep.mubr.f32.mxu0 %v15776_v13 }
 0x130   :  { %9947 = vmatmul.mubr.msk.f32.gmra.mxu1 %vm524_vm1, %v12336_v17  ;;  %9979 = vmatmul.mubr.msk.f32.gmra.mxu0 %vm524_vm1, %v12336_v17 }
 0x131   :  { %817 = vmatprep.mubr.f32.mxu1 %v15776_v13  ;;  %1074 = vmatprep.mubr.f32.mxu0 %v15776_v13 }
 0x134   :  { %9948 = vmatmul.mubr.msk.f32.gmra.mxu1 %vm524_vm1, %v12345_v20  ;;  %9980 = vmatmul.mubr.msk.f32.gmra.mxu0 %vm524_vm1, %v12345_v20 }
 0x135   :  { %823 = vmatprep.mubr.f32.mxu1 %v15776_v13  ;;  %1080 = vmatprep.mubr.f32.mxu0 %v15776_v13 }
 0x138   :  { %9949 = vmatmul.mubr.msk.f32.gmra.mxu1 %vm524_vm1, %v12354_v23  ;;  %9981 = vmatmul.mubr.msk.f32.gmra.mxu0 %vm524_vm1, %v12354_v23 }
 0x139   :  { %829 = vmatprep.mubr.f32.mxu1 %v15776_v13  ;;  %1086 = vmatprep.mubr.f32.mxu0 %v15776_v13 }
 0x13c   :  { %9950 = vmatmul.mubr.msk.f32.gmra.mxu1 %vm524_vm1, %v12363_v25  ;;  %9982 = vmatmul.mubr.msk.f32.gmra.mxu0 %vm524_vm1, %v12363_v25 }
 0x13d   :  { %835 = vmatprep.mubr.f32.mxu1 %v15776_v13  ;;  %1092 = vmatprep.mubr.f32.mxu0 %v15776_v13 }
 0x140   :  { %9951 = vmatmul.mubr.msk.f32.gmra.mxu1 %vm524_vm1, %v12372_v28  ;;  %9983 = vmatmul.mubr.msk.f32.gmra.mxu0 %vm524_vm1, %v12372_v28 }
 0x141   :  { %841 = vmatprep.mubr.f32.mxu1 %v15776_v13  ;;  %1098 = vmatprep.mubr.f32.mxu0 %v15776_v13 }
 0x144   :  { %9952 = vmatmul.mubr.msk.f32.gmra.mxu1 %vm524_vm1, %v12381_v31  ;;  %9984 = vmatmul.mubr.msk.f32.gmra.mxu0 %vm524_vm1, %v12381_v31 }
 0x145   :  { %847 = vmatprep.mubr.f32.mxu1 %v15776_v13  ;;  %1104 = vmatprep.mubr.f32.mxu0 %v15776_v13 }
 0x148   :  { %9953 = vmatmul.mubr.msk.f32.gmra.mxu1 %vm524_vm1, %v12390_v33  ;;  %9985 = vmatmul.mubr.msk.f32.gmra.mxu0 %vm524_vm1, %v12390_v33 }
 0x149   :  { %853 = vmatprep.mubr.f32.mxu1 %v15776_v13  ;;  %1110 = vmatprep.mubr.f32.mxu0 %v15776_v13 }
 0x14c   :  { %9954 = vmatmul.mubr.msk.f32.gmra.mxu1 %vm524_vm1, %v12399_v37  ;;  %9986 = vmatmul.mubr.msk.f32.gmra.mxu0 %vm524_vm1, %v12399_v37 }
 0x14d   :  { %859 = vmatprep.mubr.f32.mxu1 %v15776_v13  ;;  %1116 = vmatprep.mubr.f32.mxu0 %v15776_v13 }
 0x150   :  { %9955 = vmatmul.mubr.msk.f32.gmra.mxu1 %vm524_vm1, %v12408_v40  ;;  %9987 = vmatmul.mubr.msk.f32.gmra.mxu0 %vm524_vm1, %v12408_v40 }
 0x151   :  { %865 = vmatprep.mubr.f32.mxu1 %v15776_v13  ;;  %1122 = vmatprep.mubr.f32.mxu0 %v15776_v13 }
 0x154   :  { %9956 = vmatmul.mubr.msk.f32.gmra.mxu1 %vm524_vm1, %v12415_v41  ;;  %9988 = vmatmul.mubr.msk.f32.gmra.mxu0 %vm524_vm1, %v12415_v41 }
 0x155   :  { %871 = vmatprep.mubr.f32.mxu1 %v15776_v13  ;;  %1128 = vmatprep.mubr.f32.mxu0 %v15776_v13 }
 0x158   :  { %9957 = vmatmul.mubr.msk.f32.gmra.mxu1 %vm524_vm1, %v12426_v43  ;;  %9989 = vmatmul.mubr.msk.f32.gmra.mxu0 %vm524_vm1, %v12426_v43 }
 0x159   :  { %1199 = vmatprep.mubr.f32.mxu1 %v15776_v13 }
 0x15c   :  { %9990 = vmatmul.mubr.msk.f32.vlgmr.msra.gmra.mxu1 %vm524_vm1, %v12090_v18 }
 0x15d   :  { %1205 = vmatprep.mubr.f32.mxu1 %v15776_v13 }
 0x160   :  { %9991 = vmatmul.mubr.msk.f32.gmra.mxu1 %vm524_vm1, %v12105_v22 }
 0x161   :  { %1211 = vmatprep.mubr.f32.mxu1 %v15776_v13 }
 0x164   :  { %9992 = vmatmul.mubr.msk.f32.gmra.mxu1 %vm524_vm1, %v12120_v26 }
 0x165   :  { %1217 = vmatprep.mubr.f32.mxu1 %v15776_v13 }
 0x168   :  { %9993 = vmatmul.mubr.msk.f32.gmra.mxu1 %vm524_vm1, %v12135_v30 }
 0x169   :  { %1223 = vmatprep.mubr.f32.mxu1 %v15776_v13 }
 0x16c   :  { %9994 = vmatmul.mubr.msk.f32.gmra.mxu1 %vm524_vm1, %v12150_v34 }
 0x16d   :  { %1229 = vmatprep.mubr.f32.mxu1 %v15776_v13 }
 0x170   :  { %9995 = vmatmul.mubr.msk.f32.gmra.mxu1 %vm524_vm1, %v12165_v38 }
 0x171   :  { %1235 = vmatprep.mubr.f32.mxu1 %v15776_v13 }
 0x174   :  { %9996 = vmatmul.mubr.msk.f32.gmra.mxu1 %vm524_vm1, %v12180_v42 }
 0x175   :  { %1241 = vmatprep.mubr.f32.mxu1 %v15776_v13 }
 0x178   :  { %9997 = vmatmul.mubr.msk.f32.gmra.mxu1 %vm524_vm1, %v12195_v46 }
 0x179   :  { %1247 = vmatprep.mubr.f32.mxu1 %v15776_v13 }
 0x17c   :  { %9998 = vmatmul.mubr.msk.f32.gmra.mxu1 %vm524_vm1, %v12210_v50 }
 0x17d   :  { %1253 = vmatprep.mubr.f32.mxu1 %v15776_v13 }
 0x180   :  { %9999 = vmatmul.mubr.msk.f32.gmra.mxu1 %vm524_vm1, %v12225_v54 }
 0x181   :  { %1259 = vmatprep.mubr.f32.mxu1 %v15776_v13 }
 0x184   :  { %10000 = vmatmul.mubr.msk.f32.gmra.mxu1 %vm524_vm1, %v12237_v57 }
 0x185   :  { %1265 = vmatprep.mubr.f32.mxu1 %v15776_v13 }
 0x188   :  { %10001 = vmatmul.mubr.msk.f32.gmra.mxu1 %vm524_vm1, %v12246_v59 }
 0x189   :  { %1271 = vmatprep.mubr.f32.mxu1 %v15776_v13 }
 0x18c   :  { %10002 = vmatmul.mubr.msk.f32.gmra.mxu1 %vm524_vm1, %v12255_v61 }
 0x18d   :  { %1277 = vmatprep.mubr.f32.mxu1 %v15776_v13 }
 0x190   :  { %10003 = vmatmul.mubr.msk.f32.gmra.mxu1 %vm524_vm1, %v12264_v63 }
 0x191   :  { %1283 = vmatprep.mubr.f32.mxu1 %v15776_v13 }
 0x194   :  { %10004 = vmatmul.mubr.msk.f32.gmra.mxu1 %vm524_vm1, %v12273_v1 }
 0x195   :  { %1289 = vmatprep.mubr.f32.mxu1 %v15776_v13 }
 0x198   :  { %10005 = vmatmul.mubr.msk.f32.gmra.mxu1 %vm524_vm1, %v12282_v3 }
 0x199   :  { %1295 = vmatprep.mubr.f32.mxu1 %v15776_v13 }
 0x19c   :  { %v12489_v48 = vpop.f32.mrf.mxu1  ;;  %v944_v49 = vpop.f32.mrf.mxu0  ;;  %10006 = vmatmul.mubr.msk.f32.gmra.mxu1 %vm524_vm1, %v12291_v5 }
 0x19d   :  { %1301 = vmatprep.mubr.f32.mxu1 %v15776_v13  ;;  %v945_v4 = vadd.f32 %v944_v49, %v12504_v55 }
 0x19e   :  { %v12494_v51 = vpop.f32.mrf.mxu1  ;;  %v12496_v52 = vpop.f32.mrf.mxu0 }
 0x19f   :  { %15844 = vst [vmem:[#allocation38_spill] sm:$0xff] %v12494_v51  ;;  %15845 = vst [vmem:[#allocation39_spill] sm:$0xff] %v12496_v52 }
 0x1a0   :  { %v12506_v56 = vpop.f32.mrf.mxu1  ;;  %v950_v58 = vpop.f32.mrf.mxu0  ;;  %10007 = vmatmul.mubr.msk.f32.gmra.mxu1 %vm524_vm1, %v12300_v7 }
 0x1a1   :  { %v951_v60 = vadd.f32 %v950_v58, %v12504_v55  ;;  %1307 = vmatprep.mubr.f32.mxu1 %v15776_v13 }
 0x1a2   :  { %v12512_v62 = vpop.f32.mrf.mxu1  ;;  %v12514_v0 = vpop.f32.mrf.mxu0 }
 0x1a3   :  { %15847 = vst [vmem:[#allocation41_spill] sm:$0xff] %v12512_v62  ;;  %15848 = vst [vmem:[#allocation42_spill] sm:$0xff] %v12514_v0  ;;  %10642 = vmatprep.subr.mxu1 %v951_v60 }
 0x1a4   :  { %v699_v6 = vpop.f32.mrf.mxu1  ;;  %v956_v8 = vpop.f32.mrf.mxu0  ;;  %10008 = vmatmul.mubr.msk.f32.gmra.mxu1 %vm524_vm1, %v12309_v9 }
 0x1a5   :  { %v700_v10 = vadd.f32 %v699_v6, %v12518_v2  ;;  %10643 = vmatpush3.xpose.msra.mxu1 %v951_v60  ;;  %1313 = vmatprep.mubr.f32.mxu1 %v15776_v13  ;;  %v957_v32 = vadd.f32 %v956_v8, %v12504_v55 }
 0x1a6   :  { %10644 = vmatprep.subr.mxu1 %v945_v4  ;;  %v12525_v12 = vpop.f32.mrf.mxu1  ;;  %v12527_v15 = vpop.f32.mrf.mxu0 }
 0x1a7   :  { %15849 = vst [vmem:[#allocation43_spill] sm:$0xff] %v12525_v12  ;;  %15850 = vst [vmem:[#allocation44_spill] sm:$0xff] %v12527_v15  ;;  %10653 = vmatprep.mubr.f32.mxu0 %v700_v10 }
 0x1a8   :  { %v705_v19 = vpop.f32.mrf.mxu1  ;;  %v962_v21 = vpop.f32.mrf.mxu0  ;;  %10009 = vmatmul.mubr.msk.f32.gmra.mxu1 %vm524_vm1, %v12318_v11 }
 0x1a9   :  { %v963_v24 = vadd.f32 %v962_v21, %v12504_v55  ;;  %10645 = vmatpush3.xpose.msra.mxu1 %v945_v4  ;;  %1319 = vmatprep.mubr.f32.mxu1 %v15776_v13  ;;  %v706_v60 = vadd.f32 %v705_v19, %v12518_v2 }
 0x1aa   :  { %v12533_v27 = vpop.f32.mrf.mxu1  ;;  %v12535_v29 = vpop.f32.mrf.mxu0 }
 0x1ab   :  { %15851 = vst [vmem:[#allocation45_spill] sm:$0xff] %v12533_v27  ;;  %15852 = vst [vmem:[#allocation46_spill] sm:$0xff] %v12535_v29  ;;  %10649 = vmatprep.subr.mxu0 %v963_v24 }
 0x1ac   :  { %v711_v35 = vpop.f32.mrf.mxu1  ;;  %v968_v36 = vpop.f32.mrf.mxu0  ;;  %10010 = vmatmul.mubr.msk.f32.gmra.mxu1 %vm524_vm1, %v12327_v14  ;;  %10650 = vmatpush3.xpose.msra.mxu0 %v963_v24 }
 0x1ad   :  { %10651 = vmatprep.subr.mxu0 %v957_v32  ;;  %1325 = vmatprep.mubr.f32.mxu1 %v15776_v13  ;;  %v712_v10 = vadd.f32 %v711_v35, %v12518_v2  ;;  %v969_v21 = vadd.f32 %v968_v36, %v12504_v55 }
 0x1ae   :  { %v12541_v39 = vpop.f32.mrf.mxu1  ;;  %v12543_v16 = vpop.f32.mrf.mxu0 }
 0x1af   :  { %15853 = vst [vmem:[#allocation47_spill] sm:$0xff] %v12541_v39  ;;  %15854 = vst [vmem:[#allocation48_spill] sm:$0xff] %v12543_v16 }
 0x1b0   :  { %v717_v49 = vpop.f32.mrf.mxu1  ;;  %v974_v58 = vpop.f32.mrf.mxu0  ;;  %10011 = vmatmul.mubr.msk.f32.gmra.mxu1 %vm524_vm1, %v12336_v17  ;;  %10652 = vmatpush3.xpose.msra.mxu0 %v957_v32 }
 0x1b1   :  { %v975_v4 = vadd.f32 %v974_v58, %v12504_v55  ;;  %1331 = vmatprep.mubr.f32.mxu1 %v15776_v13  ;;  %v718_v36 = vadd.f32 %v717_v49, %v12518_v2 }
 0x1b2   :  { %v12550_v6 = vpop.f32.mrf.mxu1  ;;  %v12552_v8 = vpop.f32.mrf.mxu0 }
 0x1b3   :  { %15855 = vst [vmem:[#allocation49_spill] sm:$0xff] %v12550_v6  ;;  %15856 = vst [vmem:[#allocation50_spill] sm:$0xff] %v12552_v8  ;;  %10654 = vmatmul.mubr.f32.vlgmr.msra.gmra.mxu0 %v706_v60  ;;  %10656 = vmatprep.subr.mxu0 %v975_v4 }
 0x1b4   :  { %v723_v24 = vpop.f32.mrf.mxu1  ;;  %v980_v45 = vpop.f32.mrf.mxu0  ;;  %10012 = vmatmul.mubr.msk.f32.gmra.mxu1 %vm524_vm1, %v12345_v20  ;;  %10657 = vmatpush3.xpose.msra.mxu0 %v975_v4 }
 0x1b5   :  { %10660 = vmatprep.mubr.f32.mxu0 %v712_v10  ;;  %10658 = vmatprep.subr.mxu0 %v969_v21  ;;  %v724_v53 = vadd.f32 %v723_v24, %v12518_v2  ;;  %v981_v20 = vadd.f32 %v980_v45, %v12504_v55 }
 0x1b6   :  { %v12558_v19 = vpop.f32.mrf.mxu1  ;;  %v12560_v32 = vpop.f32.mrf.mxu0  ;;  %1337 = vmatprep.mubr.f32.mxu1 %v15776_v13 }
 0x1b7   :  { %15857 = vst [vmem:[#allocation51_spill] sm:$0xff] %v12558_v19  ;;  %15858 = vst [vmem:[#allocation52_spill] sm:$0xff] %v12560_v32 }
 0x1b8   :  { %v729_v58 = vpop.f32.mrf.mxu1  ;;  %v986_v35 = vpop.f32.mrf.mxu0  ;;  %10013 = vmatmul.mubr.msk.f32.gmra.mxu1 %vm524_vm1, %v12354_v23  ;;  %10659 = vmatpush3.xpose.msra.mxu0 %v969_v21 }
 0x1b9   :  { %v987_v60 = vadd.f32 %v986_v35, %v12504_v55  ;;  %1343 = vmatprep.mubr.f32.mxu1 %v15776_v13  ;;  %v730_v45 = vadd.f32 %v729_v58, %v12518_v2 }
 0x1ba   :  { %v12568_v4 = vpop.f32.mrf.mxu1  ;;  %v12570_v10 = vpop.f32.mrf.mxu0 }
 0x1bb   :  { %15859 = vst [vmem:[#allocation53_spill] sm:$0xff] %v12568_v4  ;;  %15860 = vst [vmem:[#allocation54_spill] sm:$0xff] %v12570_v10  ;;  %10661 = vmatmul.mubr.f32.vlgmr.msra.gmra.mxu0 %v718_v36  ;;  %10663 = vmatprep.subr.mxu0 %v987_v60 }
 0x1bc   :  { %v735_v17 = vpop.f32.mrf.mxu1  ;;  %v992_v14 = vpop.f32.mrf.mxu0  ;;  %10014 = vmatmul.mubr.msk.f32.gmra.mxu1 %vm524_vm1, %v12363_v25  ;;  %10664 = vmatpush3.xpose.msra.mxu0 %v987_v60 }
 0x1bd   :  { %10667 = vmatprep.mubr.f32.mxu0 %v724_v53  ;;  %10665 = vmatprep.subr.mxu0 %v981_v20  ;;  %v736_v25 = vadd.f32 %v735_v17, %v12518_v2  ;;  %v993_v23 = vadd.f32 %v992_v14, %v12504_v55 }
 0x1be   :  { %v12576_v49 = vpop.f32.mrf.mxu1  ;;  %v12578_v21 = vpop.f32.mrf.mxu0  ;;  %1349 = vmatprep.mubr.f32.mxu1 %v15776_v13 }
 0x1bf   :  { %15861 = vst [vmem:[#allocation55_spill] sm:$0xff] %v12576_v49  ;;  %15862 = vst [vmem:[#allocation56_spill] sm:$0xff] %v12578_v21 }
 0x1c0   :  { %v741_v35 = vpop.f32.mrf.mxu1  ;;  %v998_v24 = vpop.f32.mrf.mxu0  ;;  %10015 = vmatmul.mubr.msk.f32.gmra.mxu1 %vm524_vm1, %v12372_v28  ;;  %10666 = vmatpush3.xpose.msra.mxu0 %v981_v20 }
 0x1c1   :  { %v999_v36 = vadd.f32 %v998_v24, %v12504_v55  ;;  %1355 = vmatprep.mubr.f32.mxu1 %v15776_v13  ;;  %v742_v14 = vadd.f32 %v741_v35, %v12518_v2 }
 0x1c2   :  { %v12586_v53 = vpop.f32.mrf.mxu1  ;;  %v12588_v60 = vpop.f32.mrf.mxu0 }
 0x1c3   :  { %15863 = vst [vmem:[#allocation57_spill] sm:$0xff] %v12586_v53  ;;  %15864 = vst [vmem:[#allocation58_spill] sm:$0xff] %v12588_v60  ;;  %10668 = vmatmul.mubr.f32.vlgmr.msra.gmra.mxu0 %v730_v45  ;;  %10670 = vmatprep.subr.mxu0 %v999_v36 }
 0x1c4   :  { %v747_v9 = vpop.f32.mrf.mxu1  ;;  %v1004_v11 = vpop.f32.mrf.mxu0  ;;  %10016 = vmatmul.mubr.msk.f32.gmra.mxu1 %vm524_vm1, %v12381_v31  ;;  %10671 = vmatpush3.xpose.msra.mxu0 %v999_v36 }
 0x1c5   :  { %10674 = vmatprep.mubr.f32.mxu0 %v736_v25  ;;  %10672 = vmatprep.subr.mxu0 %v993_v23  ;;  %v748_v31 = vadd.f32 %v747_v9, %v12518_v2  ;;  %v1005_v28 = vadd.f32 %v1004_v11, %v12504_v55 }
 0x1c6   :  { %v12594_v20 = vpop.f32.mrf.mxu1  ;;  %v12596_v58 = vpop.f32.mrf.mxu0  ;;  %1361 = vmatprep.mubr.f32.mxu1 %v15776_v13 }
 0x1c7   :  { %15865 = vst [vmem:[#allocation59_spill] sm:$0xff] %v12594_v20  ;;  %15866 = vst [vmem:[#allocation60_spill] sm:$0xff] %v12596_v58 }
 0x1c8   :  { %v753_v24 = vpop.f32.mrf.mxu1  ;;  %v1010_v17 = vpop.f32.mrf.mxu0  ;;  %10017 = vmatmul.mubr.msk.f32.gmra.mxu1 %vm524_vm1, %v12390_v33  ;;  %10673 = vmatpush3.xpose.msra.mxu0 %v993_v23 }
 0x1c9   :  { %v1011_v45 = vadd.f32 %v1010_v17, %v12504_v55  ;;  %1367 = vmatprep.mubr.f32.mxu1 %v15776_v13  ;;  %v754_v11 = vadd.f32 %v753_v24, %v12518_v2 }
 0x1ca   :  { %v12604_v25 = vpop.f32.mrf.mxu1  ;;  %v12606_v36 = vpop.f32.mrf.mxu0 }
 0x1cb   :  { %15867 = vst [vmem:[#allocation61_spill] sm:$0xff] %v12604_v25  ;;  %15868 = vst [vmem:[#allocation62_spill] sm:$0xff] %v12606_v36  ;;  %10675 = vmatmul.mubr.f32.vlgmr.msra.gmra.mxu0 %v742_v14  ;;  %10677 = vmatprep.subr.mxu0 %v1011_v45 }
 0x1cc   :  { %v759_v5 = vpop.f32.mrf.mxu1  ;;  %v1016_v7 = vpop.f32.mrf.mxu0  ;;  %10018 = vmatmul.mubr.msk.f32.gmra.mxu1 %vm524_vm1, %v12399_v37  ;;  %10678 = vmatpush3.xpose.msra.mxu0 %v1011_v45 }
 0x1cd   :  { %10681 = vmatprep.mubr.f32.mxu0 %v748_v31  ;;  %10679 = vmatprep.subr.mxu0 %v1005_v28  ;;  %v760_v37 = vadd.f32 %v759_v5, %v12518_v2  ;;  %v1017_v33 = vadd.f32 %v1016_v7, %v12504_v55  ;;  %v688_v5 = vadd.f32 %v12489_v48, %v12518_v2 }
 0x1ce   :  { %v12612_v23 = vpop.f32.mrf.mxu1  ;;  %v12614_v35 = vpop.f32.mrf.mxu0  ;;  %1373 = vmatprep.mubr.f32.mxu1 %v15776_v13 }
 0x1cf   :  { %15869 = vst [vmem:[#allocation63_spill] sm:$0xff] %v12612_v23  ;;  %15870 = vst [vmem:[#allocation64_spill] sm:$0xff] %v12614_v35 }
 0x1d0   :  { %v765_v17 = vpop.f32.mrf.mxu1  ;;  %v1022_v9 = vpop.f32.mrf.mxu0  ;;  %10019 = vmatmul.mubr.msk.f32.gmra.mxu1 %vm524_vm1, %v12408_v40  ;;  %10680 = vmatpush3.xpose.msra.mxu0 %v1005_v28 }
 0x1d1   :  { %v1023_v14 = vadd.f32 %v1022_v9, %v12504_v55  ;;  %1379 = vmatprep.mubr.f32.mxu1 %v15776_v13 }
 0x1d2   :  { %v12622_v31 = vpop.f32.mrf.mxu1  ;;  %v12624_v45 = vpop.f32.mrf.mxu0 }
 0x1d3   :  { %15871 = vst [vmem:[#allocation65_spill] sm:$0xff] %v12622_v31  ;;  %15872 = vst [vmem:[#allocation66_spill] sm:$0xff] %v12624_v45  ;;  %10682 = vmatmul.mubr.f32.vlgmr.msra.gmra.mxu0 %v754_v11  ;;  %10684 = vmatprep.subr.mxu0 %v1023_v14  ;;  %v766_v11 = vadd.f32 %v765_v17, %v12518_v2 }
 0x1d4   :  { %v771_v1 = vpop.f32.mrf.mxu1  ;;  %v1028_v3 = vpop.f32.mrf.mxu0  ;;  %10020 = vmatmul.mubr.msk.f32.gmra.mxu1 %vm524_vm1, %v12415_v41  ;;  %10685 = vmatpush3.xpose.msra.mxu0 %v1023_v14  ;;  %v694_v14 = vadd.f32 %v12506_v56, %v12518_v2 }
 0x1d5   :  { %10688 = vmatprep.mubr.f32.mxu0 %v760_v37  ;;  %10686 = vmatprep.subr.mxu0 %v1017_v33  ;;  %v772_v48 = vadd.f32 %v771_v1, %v12518_v2  ;;  %v1029_v40 = vadd.f32 %v1028_v3, %v12504_v55 }
 0x1d6   :  { %v12630_v28 = vpop.f32.mrf.mxu1  ;;  %v12632_v24 = vpop.f32.mrf.mxu0  ;;  %1385 = vmatprep.mubr.f32.mxu1 %v15776_v13 }
 0x1d7   :  { %15873 = vst [vmem:[#allocation67_spill] sm:$0xff] %v12630_v28  ;;  %15874 = vst [vmem:[#allocation68_spill] sm:$0xff] %v12632_v24 }
 0x1d8   :  { %v777_v7 = vpop.f32.mrf.mxu1  ;;  %v1034_v9 = vpop.f32.mrf.mxu0  ;;  %10021 = vmatmul.mubr.msk.f32.gmra.mxu1 %vm524_vm1, %v12426_v43  ;;  %10687 = vmatpush3.xpose.msra.mxu0 %v1017_v33 }
 0x1d9   :  { %v1035_v37 = vadd.f32 %v1034_v9, %v12504_v55  ;;  %10646 = vmatprep.mubr.f32.mxu1 %v688_v5  ;;  %v778_v61 = vadd.f32 %v777_v7, %v12518_v2 }
 0x1da   :  { %v12643_v41 = vpop.f32.mrf.mxu1  ;;  %v12645_v13 = vpop.f32.mrf.mxu0 }
 0x1db   :  { %15875 = vst [vmem:[#allocation69_spill] sm:$0xff] %v12643_v41  ;;  %15876 = vst [vmem:[#allocation70_spill] sm:$0xff] %v12645_v13  ;;  %10689 = vmatmul.mubr.f32.vlgmr.msra.gmra.mxu0 %v766_v11  ;;  %10691 = vmatprep.subr.mxu0 %v1035_v37 }
 0x1dc   :  { %v783_v43 = vpop.f32.mrf.mxu1  ;;  %v1040_v33 = vpop.f32.mrf.mxu0  ;;  %10647 = vmatmul.mubr.f32.vlgmr.msra.gmra.mxu1 %v694_v14  ;;  %10692 = vmatpush3.xpose.msra.mxu0 %v1035_v37 }
 0x1dd   :  { %10695 = vmatprep.mubr.f32.mxu0 %v772_v48  ;;  %10693 = vmatprep.subr.mxu0 %v1029_v40  ;;  %v784_v3 = vadd.f32 %v783_v43, %v12518_v2  ;;  %v1041_v37 = vadd.f32 %v1040_v33, %v12504_v55 }
 0x1de   :  { %v12649_v17 = vpop.f32.mrf.mxu1  ;;  %v12651_v5 = vpop.f32.mrf.mxu0 }
 0x1df   :  { %15877 = vst [vmem:[#allocation71_spill] sm:$0xff] %v12649_v17  ;;  %15878 = vst [vmem:[#allocation72_spill] sm:$0xff] %v12651_v5 }
 0x1e0   :  { %v789_v56 = vpop.f32.mrf.mxu1  ;;  %v1046_v9 = vpop.f32.mrf.mxu0  ;;  %10694 = vmatpush3.xpose.msra.mxu0 %v1029_v40 }
 0x1e1   :  { %v1047_v1 = vadd.f32 %v1046_v9, %v12504_v55  ;;  %v790_v43 = vadd.f32 %v789_v56, %v12518_v2 }
 0x1e2   :  { %v12656_v11 = vpop.f32.mrf.mxu1  ;;  %v12658_v63 = vpop.f32.mrf.mxu0 }
 0x1e3   :  { %15879 = vst [vmem:[#allocation73_spill] sm:$0xff] %v12656_v11  ;;  %15880 = vst [vmem:[#allocation74_spill] sm:$0xff] %v12658_v63  ;;  %10696 = vmatmul.mubr.f32.vlgmr.msra.gmra.mxu0 %v778_v61  ;;  %10698 = vmatprep.subr.mxu0 %v1047_v1 }
 0x1e4   :  { %v795_v14 = vpop.f32.mrf.mxu1  ;;  %v1052_v48 = vpop.f32.mrf.mxu0  ;;  %10699 = vmatpush3.xpose.msra.mxu0 %v1047_v1  ;;  %10702 = vmatprep.mubr.f32.mxu0 %v784_v3 }
 0x1e5   :  { %10700 = vmatprep.subr.mxu0 %v1041_v37  ;;  %v796_v33 = vadd.f32 %v795_v14, %v12518_v2  ;;  %v1053_v1 = vadd.f32 %v1052_v48, %v12504_v55 }
 0x1e6   :  { %v12661_v40 = vpop.f32.mrf.mxu1  ;;  %v12663_v7 = vpop.f32.mrf.mxu0 }
 0x1e7   :  { %15881 = vst [vmem:[#allocation75_spill] sm:$0xff] %v12661_v40  ;;  %15882 = vst [vmem:[#allocation76_spill] sm:$0xff] %v12663_v7 }
 0x1e8   :  { %v801_v9 = vpop.f32.mrf.mxu1  ;;  %v1058_v57 = vpop.f32.mrf.mxu0  ;;  %10701 = vmatpush3.xpose.msra.mxu0 %v1041_v37 }
 0x1e9   :  { %v1059_v59 = vadd.f32 %v1058_v57, %v12504_v55  ;;  %v802_v46 = vadd.f32 %v801_v9, %v12518_v2 }
 0x1ea   :  { %v12668_v61 = vpop.f32.mrf.mxu1  ;;  %v12670_v50 = vpop.f32.mrf.mxu0 }
 0x1eb   :  { %15883 = vst [vmem:[#allocation77_spill] sm:$0xff] %v12668_v61  ;;  %15884 = vst [vmem:[#allocation78_spill] sm:$0xff] %v12670_v50  ;;  %10703 = vmatmul.mubr.f32.vlgmr.msra.gmra.mxu0 %v790_v43  ;;  %10705 = vmatprep.subr.mxu0 %v1059_v59 }
 0x1ec   :  { %v807_v3 = vpop.f32.mrf.mxu1  ;;  %v1064_v54 = vpop.f32.mrf.mxu0  ;;  %10706 = vmatpush3.xpose.msra.mxu0 %v1059_v59  ;;  %10709 = vmatprep.mubr.f32.mxu0 %v796_v33 }
 0x1ed   :  { %v808_v37 = vadd.f32 %v807_v3, %v12518_v2  ;;  %10707 = vmatprep.subr.mxu0 %v1053_v1  ;;  %v1065_v59 = vadd.f32 %v1064_v54, %v12504_v55 }
 0x1ee   :  { %v12674_v56 = vpop.f32.mrf.mxu1  ;;  %v12676_v57 = vpop.f32.mrf.mxu0 }
 0x1ef   :  { %15885 = vst [vmem:[#allocation79_spill] sm:$0xff] %v12674_v56  ;;  %15886 = vst [vmem:[#allocation80_spill] sm:$0xff] %v12676_v57  ;;  %10716 = vmatprep.mubr.f32.mxu1 %v808_v37 }
 0x1f0   :  { %v813_v14 = vpop.f32.mrf.mxu1  ;;  %v1070_v42 = vpop.f32.mrf.mxu0  ;;  %10708 = vmatpush3.xpose.msra.mxu0 %v1053_v1 }
 0x1f1   :  { %v1071_v48 = vadd.f32 %v1070_v42, %v12504_v55  ;;  %v814_v26 = vadd.f32 %v813_v14, %v12518_v2 }
 0x1f2   :  { %v12680_v43 = vpop.f32.mrf.mxu1  ;;  %v12682_v34 = vpop.f32.mrf.mxu0 }
 0x1f3   :  { %15887 = vst [vmem:[#allocation81_spill] sm:$0xff] %v12680_v43  ;;  %15888 = vst [vmem:[#allocation82_spill] sm:$0xff] %v12682_v34  ;;  %10710 = vmatmul.mubr.f32.vlgmr.msra.gmra.mxu0 %v802_v46  ;;  %10712 = vmatprep.subr.mxu1 %v1071_v48 }
 0x1f4   :  { %v819_v33 = vpop.f32.mrf.mxu1  ;;  %v1076_v3 = vpop.f32.mrf.mxu0  ;;  %10713 = vmatpush3.xpose.msra.mxu1 %v1071_v48 }
 0x1f5   :  { %v820_v37 = vadd.f32 %v819_v33, %v12518_v2  ;;  %10714 = vmatprep.subr.mxu1 %v1065_v59  ;;  %v1077_v48 = vadd.f32 %v1076_v3, %v12504_v55 }
 0x1f6   :  { %v12686_v38 = vpop.f32.mrf.mxu1  ;;  %v12688_v1 = vpop.f32.mrf.mxu0 }
 0x1f7   :  { %15889 = vst [vmem:[#allocation83_spill] sm:$0xff] %v12686_v38  ;;  %15890 = vst [vmem:[#allocation84_spill] sm:$0xff] %v12688_v1  ;;  %10723 = vmatprep.mubr.f32.mxu0 %v820_v37 }
 0x1f8   :  { %v825_v42 = vpop.f32.mrf.mxu1  ;;  %v1082_v9 = vpop.f32.mrf.mxu0  ;;  %10715 = vmatpush3.xpose.msra.mxu1 %v1065_v59 }
 0x1f9   :  { %v1083_v54 = vadd.f32 %v1082_v9, %v12504_v55 }
 0x1fa   :  { %v12692_v46 = vpop.f32.mrf.mxu1  ;;  %v12694_v30 = vpop.f32.mrf.mxu0 }
 0x1fb   :  { %15891 = vst [vmem:[#allocation85_spill] sm:$0xff] %v12692_v46  ;;  %15892 = vst [vmem:[#allocation86_spill] sm:$0xff] %v12694_v30  ;;  %10717 = vmatmul.mubr.f32.vlgmr.msra.gmra.mxu1 %v814_v26  ;;  %10719 = vmatprep.subr.mxu0 %v1083_v54  ;;  %v826_v46 = vadd.f32 %v825_v42, %v12518_v2 }
 0x1fc   :  { %v831_v33 = vpop.f32.mrf.mxu1  ;;  %v1088_v18 = vpop.f32.mrf.mxu0  ;;  %10720 = vmatpush3.xpose.msra.mxu0 %v1083_v54 }
 0x1fd   :  { %v832_v37 = vadd.f32 %v831_v33, %v12518_v2  ;;  %10721 = vmatprep.subr.mxu0 %v1077_v48  ;;  %v1089_v54 = vadd.f32 %v1088_v18, %v12504_v55 }
 0x1fe   :  { %v12698_v22 = vpop.f32.mrf.mxu1  ;;  %v12700_v59 = vpop.f32.mrf.mxu0 }
 0x1ff   :  { %15893 = vst [vmem:[#allocation87_spill] sm:$0xff] %v12698_v22  ;;  %15894 = vst [vmem:[#allocation88_spill] sm:$0xff] %v12700_v59  ;;  %10730 = vmatprep.mubr.f32.mxu1 %v832_v37 }
 0x200   :  { %v837_v14 = vpop.f32.mrf.mxu1  ;;  %v1094_v9 = vpop.f32.mrf.mxu0  ;;  %10722 = vmatpush3.xpose.msra.mxu0 %v1077_v48 }
 0x201   :  { %v1095_v3 = vadd.f32 %v1094_v9, %v12504_v55 }
 0x202   :  { %v12704_v26 = vpop.f32.mrf.mxu1  ;;  %v12706_v1 = vpop.f32.mrf.mxu0 }
 0x203   :  { %15895 = vst [vmem:[#allocation89_spill] sm:$0xff] %v12704_v26  ;;  %15896 = vst [vmem:[#allocation90_spill] sm:$0xff] %v12706_v1  ;;  %10724 = vmatmul.mubr.f32.vlgmr.msra.gmra.mxu0 %v826_v46  ;;  %10726 = vmatprep.subr.mxu1 %v1095_v3  ;;  %v838_v26 = vadd.f32 %v837_v14, %v12518_v2 }
 0x204   :  { %v843_v33 = vpop.f32.mrf.mxu1  ;;  %v1100_v22 = vpop.f32.mrf.mxu0  ;;  %10727 = vmatpush3.xpose.msra.mxu1 %v1095_v3 }
 0x205   :  { %v844_v37 = vadd.f32 %v843_v33, %v12518_v2  ;;  %10728 = vmatprep.subr.mxu1 %v1089_v54  ;;  %v1101_v3 = vadd.f32 %v1100_v22, %v12504_v55 }
 0x206   :  { %v12710_v59 = vpop.f32.mrf.mxu1  ;;  %v12712_v48 = vpop.f32.mrf.mxu0 }
 0x207   :  { %15897 = vst [vmem:[#allocation91_spill] sm:$0xff] %v12710_v59  ;;  %15898 = vst [vmem:[#allocation92_spill] sm:$0xff] %v12712_v48  ;;  %10737 = vmatprep.mubr.f32.mxu0 %v844_v37 }
 0x208   :  { %v849_v42 = vpop.f32.mrf.mxu1  ;;  %v1106_v9 = vpop.f32.mrf.mxu0  ;;  %10729 = vmatpush3.xpose.msra.mxu1 %v1089_v54 }
 0x209   :  { %v1107_v18 = vadd.f32 %v1106_v9, %v12504_v55 }
 0x20a   :  { %v12716_v46 = vpop.f32.mrf.mxu1  ;;  %v12718_v38 = vpop.f32.mrf.mxu0 }
 0x20b   :  { %15899 = vst [vmem:[#allocation93_spill] sm:$0xff] %v12716_v46  ;;  %15900 = vst [vmem:[#allocation94_spill] sm:$0xff] %v12718_v38  ;;  %10731 = vmatmul.mubr.f32.vlgmr.msra.gmra.mxu1 %v838_v26  ;;  %10733 = vmatprep.subr.mxu0 %v1107_v18  ;;  %v850_v46 = vadd.f32 %v849_v42, %v12518_v2 }
 0x20c   :  { %v855_v33 = vpop.f32.mrf.mxu1  ;;  %v1112_v59 = vpop.f32.mrf.mxu0  ;;  %10734 = vmatpush3.xpose.msra.mxu0 %v1107_v18 }
 0x20d   :  { %v856_v37 = vadd.f32 %v855_v33, %v12518_v2  ;;  %10735 = vmatprep.subr.mxu0 %v1101_v3  ;;  %v1113_v18 = vadd.f32 %v1112_v59, %v12504_v55 }
 0x20e   :  { %v12722_v48 = vpop.f32.mrf.mxu1  ;;  %v12724_v54 = vpop.f32.mrf.mxu0 }
 0x20f   :  { %15901 = vst [vmem:[#allocation95_spill] sm:$0xff] %v12722_v48  ;;  %15902 = vst [vmem:[#allocation96_spill] sm:$0xff] %v12724_v54  ;;  %10744 = vmatprep.mubr.f32.mxu1 %v856_v37 }
 0x210   :  { %v861_v14 = vpop.f32.mrf.mxu1  ;;  %v1118_v9 = vpop.f32.mrf.mxu0  ;;  %10736 = vmatpush3.xpose.msra.mxu0 %v1101_v3 }
 0x211   :  { %v1119_v22 = vadd.f32 %v1118_v9, %v12504_v55 }
 0x212   :  { %v12728_v26 = vpop.f32.mrf.mxu1  ;;  %v12730_v38 = vpop.f32.mrf.mxu0 }
 0x213   :  { %15903 = vst [vmem:[#allocation97_spill] sm:$0xff] %v12728_v26  ;;  %15904 = vst [vmem:[#allocation98_spill] sm:$0xff] %v12730_v38  ;;  %10738 = vmatmul.mubr.f32.vlgmr.msra.gmra.mxu0 %v850_v46  ;;  %10740 = vmatprep.subr.mxu1 %v1119_v22  ;;  %v862_v26 = vadd.f32 %v861_v14, %v12518_v2 }
 0x214   :  { %v867_v33 = vpop.f32.mrf.mxu1  ;;  %v1124_v48 = vpop.f32.mrf.mxu0  ;;  %10741 = vmatpush3.xpose.msra.mxu1 %v1119_v22  ;;  %v15794_v22 = vsub.s32 4, %v12478_v44 }
 0x215   :  { %v868_v37 = vadd.f32 %v867_v33, %v12518_v2  ;;  %10742 = vmatprep.subr.mxu1 %v1113_v18  ;;  %v1125_v38 = vadd.f32 %v1124_v48, %v12504_v55 }
 0x216   :  { %v12734_v54 = vpop.f32.mrf.mxu1  ;;  %v12736_v3 = vpop.f32.mrf.mxu0 }
 0x217   :  { %15905 = vst [vmem:[#allocation99_spill] sm:$0xff] %v12734_v54  ;;  %15906 = vst [vmem:[#allocation100_spill] sm:$0xff] %v12736_v3  ;;  %10751 = vmatprep.mubr.f32.mxu0 %v868_v37 }
 0x218   :  { %v873_v42 = vpop.f32.mrf.mxu1  ;;  %v1130_v9 = vpop.f32.mrf.mxu0  ;;  %10743 = vmatpush3.xpose.msra.mxu1 %v1113_v18  ;;  %v12749_v18 = vrot.slane %v12487_v47, %v15794_v22 }
 0x219   :  { %v1131_v59 = vadd.f32 %v1130_v9, %v12504_v55  ;;  %v874_v37 = vadd.f32 %v873_v42, %v12518_v2 }
 0x21a   :  { %v12740_v46 = vpop.f32.mrf.mxu1  ;;  %v12836_v40 = vpop.f32.mrf.mxu0 }
 0x21b   :  { %15907 = vst [vmem:[#allocation101_spill] sm:$0xff] %v12740_v46  ;;  %10745 = vmatmul.mubr.f32.vlgmr.msra.gmra.mxu1 %v862_v26  ;;  %10747 = vmatprep.subr.mxu0 %v1131_v59  ;;  %15930 = vst [vmem:[#allocation124_spill] sm:$0xff] %v12836_v40 }
 0x21c   :  { %v1201_v33 = vpop.f32.mrf.mxu1  ;;  %10748 = vmatpush3.xpose.msra.mxu0 %v1131_v59 }
 0x21d   :  { %10749 = vmatprep.subr.mxu0 %v1125_v38  ;;  %v1202_v26 = vadd.f32 %v1201_v33, %v12749_v18 }
 0x21e   :  { %v12744_v3 = vpop.f32.mrf.mxu1 }
 0x21f   :  { %15908 = vst [vmem:[#allocation102_spill] sm:$0xff] %v12744_v3 }
 0x220   :  { %v1207_v14 = vpop.f32.mrf.mxu1  ;;  %10750 = vmatpush3.xpose.msra.mxu0 %v1125_v38 }
 0x221   :  { %v1208_v55 = vadd.f32 %v1207_v14, %v12749_v18 }
 0x222   :  { %v12753_v48 = vpop.f32.mrf.mxu1 }
 0x223   :  { %15909 = vst [vmem:[#allocation103_spill] sm:$0xff] %v12753_v48  ;;  %10752 = vmatmul.mubr.f32.vlgmr.msra.gmra.mxu0 %v874_v37  ;;  %10754 = vmatprep.subr.mxu1 %v1208_v55 }
 0x224   :  { %v12756_v9 = vpop.f32.mrf.mxu1  ;;  %10755 = vmatpush3.msra.mxu1 %v1208_v55 }
 0x225   :  { %10756 = vmatprep.subr.mxu1 %v1202_v26 }
 0x226   :  { %v12758_v59 = vpop.f32.mrf.mxu1  ;;  %10757 = vmatpush3.msra.mxu1 %v1202_v26 }
 0x227   :  { %15910 = vst [vmem:[#allocation104_spill] sm:$0xff] %v12758_v59 }
 0x228   :  { %v1219_v47 = vpop.f32.mrf.mxu1 }
 0x229   :  { %v12761_v38 = vadd.f32 %v1219_v47, %v12749_v18 }
 0x22a   :  { %v12763_v2 = vpop.f32.mrf.mxu1 }
 0x22b   :  { %15911 = vst [vmem:[#allocation105_spill] sm:$0xff] %v12763_v2  ;;  %10761 = vmatprep.subr.mxu1 %v12761_v38 }
 0x22c   :  { %v1225_v42 = vpop.f32.mrf.mxu1 }
 0x22d   :  { %v1226_v55 = vadd.f32 %v1225_v42, %v12749_v18 }
 0x22e   :  { %v12766_v14 = vpop.f32.mrf.mxu1 }
 0x22f   :  { %15912 = vst [vmem:[#allocation106_spill] sm:$0xff] %v12766_v14 }
 0x230   :  { %v1231_v33 = vpop.f32.mrf.mxu1 }
 0x231   :  { %v1232_v37 = vadd.f32 %v1231_v33, %v12749_v18 }
 0x232   :  { %v12769_v22 = vpop.f32.mrf.mxu1 }
 0x233   :  { %15913 = vst [vmem:[#allocation107_spill] sm:$0xff] %v12769_v22  ;;  %10768 = vmatprep.subr.mxu0 %v1232_v37 }
 0x234   :  { %v12772_v26 = vpop.f32.mrf.mxu1  ;;  %10769 = vmatpush3.msra.mxu0 %v1232_v37 }
 0x235   :  { %10770 = vmatprep.subr.mxu0 %v1226_v55 }
 0x236   :  { %v12774_v47 = vpop.f32.mrf.mxu1  ;;  %10771 = vmatpush3.msra.mxu0 %v1226_v55 }
 0x237   :  { %15914 = vst [vmem:[#allocation108_spill] sm:$0xff] %v12774_v47 }
 0x238   :  { %v12776_v59 = vpop.f32.mrf.mxu1 }
 0x23a   :  { %v12778_v46 = vpop.f32.mrf.mxu1 }
 0x23b   :  { %15915 = vst [vmem:[#allocation109_spill] sm:$0xff] %v12778_v46 }
 0x23c   :  { %v12780_v14 = vpop.f32.mrf.mxu1 }
 0x23e   :  { %v12782_v2 = vpop.f32.mrf.mxu1 }
 0x23f   :  { %15916 = vst [vmem:[#allocation110_spill] sm:$0xff] %v12782_v2 }
 0x240   :  { %v1255_v33 = vpop.f32.mrf.mxu1 }
 0x241   :  { %v12785_v22 = vadd.f32 %v1255_v33, %v12749_v18 }
 0x242   :  { %v12787_v42 = vpop.f32.mrf.mxu1 }
 0x243   :  { %15917 = vst [vmem:[#allocation111_spill] sm:$0xff] %v12787_v42  ;;  %10782 = vmatprep.subr.mxu0 %v12785_v22 }
 0x244   :  { %v12790_v37 = vpop.f32.mrf.mxu1 }
 0x246   :  { %v12792_v47 = vpop.f32.mrf.mxu1 }
 0x247   :  { %15918 = vst [vmem:[#allocation112_spill] sm:$0xff] %v12792_v47 }
 0x248   :  { %v12794_v55 = vpop.f32.mrf.mxu1 }
 0x24a   :  { %v12796_v3 = vpop.f32.mrf.mxu1 }
 0x24b   :  { %15919 = vst [vmem:[#allocation113_spill] sm:$0xff] %v12796_v3 }
 0x24c   :  { %v12798_v46 = vpop.f32.mrf.mxu1 }
 0x24e   :  { %v12800_v54 = vpop.f32.mrf.mxu1 }
 0x24f   :  { %15920 = vst [vmem:[#allocation114_spill] sm:$0xff] %v12800_v54 }
 0x250   :  { %v12802_v2 = vpop.f32.mrf.mxu1 }
 0x252   :  { %v12804_v33 = vpop.f32.mrf.mxu1 }
 0x253   :  { %15921 = vst [vmem:[#allocation115_spill] sm:$0xff] %v12804_v33 }
 0x254   :  { %v12806_v48 = vpop.f32.mrf.mxu1 }
 0x256   :  { %v12808_v42 = vpop.f32.mrf.mxu1 }
 0x257   :  { %15922 = vst [vmem:[#allocation116_spill] sm:$0xff] %v12808_v42 }
 0x258   :  { %v12810_v43 = vpop.f32.mrf.mxu1 }
 0x25a   :  { %v12812_v61 = vpop.f32.mrf.mxu1 }
 0x25b   :  { %15923 = vst [vmem:[#allocation117_spill] sm:$0xff] %v12812_v61 }
 0x25c   :  { %v12814_v47 = vpop.f32.mrf.mxu1 }
 0x25e   :  { %v12816_v1 = vpop.f32.mrf.mxu1 }
 0x25f   :  { %15924 = vst [vmem:[#allocation118_spill] sm:$0xff] %v12816_v1 }
 0x260   :  { %v12818_v3 = vpop.f32.mrf.mxu1 }
 0x262   :  { %v12820_v30 = vpop.f32.mrf.mxu1 }
 0x263   :  { %15925 = vst [vmem:[#allocation119_spill] sm:$0xff] %v12820_v30 }
 0x264   :  { %v12822_v54 = vpop.f32.mrf.mxu1 }
 0x265   :  { %15926 = vst [vmem:[#allocation120_spill] sm:$0xff] %v12822_v54 }
 0x266   :  { %v12824_v57 = vpop.f32.mrf.mxu1 }
 0x267   :  { %15927 = vst [vmem:[#allocation121_spill] sm:$0xff] %v12824_v57 }
 0x268   :  { %v12826_v33 = vpop.f32.mrf.mxu1 }
 0x26a   :  { %v12828_v56 = vpop.f32.mrf.mxu1 }
 0x26b   :  { %15928 = vst [vmem:[#allocation122_spill] sm:$0xff] %v12828_v56 }
 0x26c   :  { %v12830_v42 = vpop.f32.mrf.mxu1 }
 0x26e   :  { %v12832_v7 = vpop.f32.mrf.mxu1 }
 0x26f   :  { %15929 = vst [vmem:[#allocation123_spill] sm:$0xff] %v12832_v7 }
 0x270   :  { %v12834_v61 = vpop.f32.mrf.mxu1 }
 0x272   :  { %v12838_v1 = vpop.f32.mrf.mxu1 }
 0x273   :  { %15931 = vst [vmem:[#allocation125_spill] sm:$0xff] %v12838_v1  ;;  %v12840_v30 = vpop.f32.mrf.mxu0 }
 0x274   :  { %v12842_v11 = vpop.f32.mrf.mxu1  ;;  %v2602_v57 = vsel %vm2592_vm2, %v12840_v30, -inf }
 0x275   :  { %15932 = vst [vmem:[#allocation126_spill] sm:$0xff] %v12842_v11  ;;  %2603 = vmax.xlane.f32.xlu0 %v2602_v57  ;;  %v12846_v56 = vpop.f32.mrf.mxu0 }
 0x276   :  { %v12848_v41 = vpop.f32.mrf.mxu1  ;;  %v2599_v40 = vsel %vm2592_vm2, %v12846_v56, -inf }
 0x277   :  { %15933 = vst [vmem:[#allocation127_spill] sm:$0xff] %v12848_v41 }
 0x278   :  { %v12850_v7 = vpop.f32.mrf.mxu1 }
 0x279   :  { %15934 = vst [vmem:[#allocation128_spill] sm:$0xff] %v12850_v7  ;;  %2600 = vmax.xlane.f32.xlu0 %v2599_v40 }
 0x27a   :  { %v12854_v34 = vpop.f32.mrf.mxu1 }
 0x27b   :  { %15935 = vst [vmem:[#allocation129_spill] sm:$0xff] %v12854_v34  ;;  %v12856_v1 = vpop.f32.mrf.mxu0 }
 0x27c   :  { %v12858_v50 = vpop.f32.mrf.mxu1  ;;  %v2608_v5 = vsel %vm2592_vm2, %v12856_v1, -inf }
 0x27d   :  { %15936 = vst [vmem:[#allocation130_spill] sm:$0xff] %v12858_v50  ;;  %2609 = vmax.xlane.f32.xlu1 %v2608_v5  ;;  %v12862_v57 = vpop.f32.mrf.mxu0 }
 0x27e   :  { %v12864_v17 = vpop.f32.mrf.mxu1  ;;  %v2605_v41 = vsel %vm2592_vm2, %v12862_v57, -inf }
 0x27f   :  { %15937 = vst [vmem:[#allocation131_spill] sm:$0xff] %v12864_v17  ;;  %2606 = vmax.xlane.f32.xlu0 %v2605_v41 }
 0x280   :  { %v12868_v24 = vpop.f32.mrf.mxu1 }
 0x282   :  { %v12870_v40 = vpop.f32.mrf.mxu1 }
 0x283   :  { %15938 = vst [vmem:[#allocation132_spill] sm:$0xff] %v12870_v40  ;;  %v12872_v34 = vpop.f32.mrf.mxu0 }
 0x284   :  { %v12874_v28 = vpop.f32.mrf.mxu1  ;;  %v2614_v31 = vsel %vm2592_vm2, %v12872_v34, -inf }
 0x285   :  { %15939 = vst [vmem:[#allocation133_spill] sm:$0xff] %v12874_v28  ;;  %2615 = vmax.xlane.f32.xlu0 %v2614_v31  ;;  %v12878_v5 = vpop.f32.mrf.mxu0 }
 0x286   :  { %v12880_v25 = vpop.f32.mrf.mxu1  ;;  %v2611_v41 = vsel %vm2592_vm2, %v12878_v5, -inf }
 0x287   :  { %15940 = vst [vmem:[#allocation134_spill] sm:$0xff] %v12880_v25 }
 0x288   :  { %v12882_v17 = vpop.f32.mrf.mxu1 }
 0x289   :  { %15941 = vst [vmem:[#allocation135_spill] sm:$0xff] %v12882_v17  ;;  %2612 = vmax.xlane.f32.xlu0 %v2611_v41 }
 0x28a   :  { %v12886_v63 = vpop.f32.mrf.mxu1 }
 0x28b   :  { %15942 = vst [vmem:[#allocation136_spill] sm:$0xff] %v12886_v63  ;;  %v12888_v40 = vpop.f32.mrf.mxu0 }
 0x28c   :  { %v12890_v13 = vpop.f32.mrf.mxu1  ;;  %v2620_v35 = vsel %vm2592_vm2, %v12888_v40, -inf }
 0x28d   :  { %15943 = vst [vmem:[#allocation137_spill] sm:$0xff] %v12890_v13  ;;  %2621 = vmax.xlane.f32.xlu1 %v2620_v35  ;;  %v12894_v31 = vpop.f32.mrf.mxu0 }
 0x28e   :  { %v12896_v23 = vpop.f32.mrf.mxu1  ;;  %v2617_v58 = vsel %vm2592_vm2, %v12894_v31, -inf }
 0x28f   :  { %15944 = vst [vmem:[#allocation138_spill] sm:$0xff] %v12896_v23 }
 0x290   :  { %v12898_v25 = vpop.f32.mrf.mxu1 }
 0x291   :  { %15945 = vst [vmem:[#allocation139_spill] sm:$0xff] %v12898_v25  ;;  %2618 = vmax.xlane.f32.xlu1 %v2617_v58 }
 0x292   :  { %v12902_v41 = vpop.f32.mrf.mxu1 }
 0x293   :  { %15946 = vst [vmem:[#allocation140_spill] sm:$0xff] %v12902_v41  ;;  %v12904_v63 = vpop.f32.mrf.mxu0 }
 0x294   :  { %v12906_v20 = vpop.f32.mrf.mxu1  ;;  %v2626_v53 = vsel %vm2592_vm2, %v12904_v63, -inf }
 0x295   :  { %15947 = vst [vmem:[#allocation141_spill] sm:$0xff] %v12906_v20  ;;  %2627 = vmax.xlane.f32.xlu0 %v2626_v53  ;;  %v12910_v35 = vpop.f32.mrf.mxu0 }
 0x296   :  { %v12912_v4 = vpop.f32.mrf.mxu1  ;;  %v2623_v45 = vsel %vm2592_vm2, %v12910_v35, -inf }
 0x297   :  { %15948 = vst [vmem:[#allocation142_spill] sm:$0xff] %v12912_v4 }
 0x298   :  { %v12914_v23 = vpop.f32.mrf.mxu1 }
 0x299   :  { %15949 = vst [vmem:[#allocation143_spill] sm:$0xff] %v12914_v23  ;;  %2624 = vmax.xlane.f32.xlu0 %v2623_v45 }
 0x29a   :  { %v12918_v58 = vpop.f32.mrf.mxu1 }
 0x29b   :  { %15950 = vst [vmem:[#allocation144_spill] sm:$0xff] %v12918_v58  ;;  %v12920_v41 = vpop.f32.mrf.mxu0 }
 0x29c   :  { %v12922_v36 = vpop.f32.mrf.mxu1  ;;  %v2632_v21 = vsel %vm2592_vm2, %v12920_v41, -inf }
 0x29d   :  { %2633 = vmax.xlane.f32.xlu1 %v2632_v21  ;;  %v2596_v32 = vsel %vm2592_vm2, %v12922_v36, -inf  ;;  %v12932_v45 = vpop.f32.mrf.mxu0 }
 0x29e   :  { %v12926_v53 = vpop.f32.mrf.mxu1  ;;  %v2629_v49 = vsel %vm2592_vm2, %v12932_v45, -inf }
 0x29f   :  { %v2593_v4 = vsel %vm2592_vm2, %v12926_v53, -inf }
 0x2a0   :  { %2594 = vmax.xlane.f32.xlu0 %v2593_v4 }
 0x2a1   :  { %2597 = vmax.xlane.f32.xlu1 %v2596_v32 }
 0x2a3   :  { %v12934_v58 = vpop.f32.mrf.mxu0 }
 0x2a4   :  { %v2638_v21 = vsel %vm2592_vm2, %v12934_v58, -inf }
 0x2a5   :  { %v12940_v19 = vpop.f32.mrf.mxu0  ;;  %2630 = vmax.xlane.f32.xlu1 %v2629_v49  ;;  %2639 = vmax.xlane.f32.xlu0 %v2638_v21 }
 0x2a6   :  { %v2635_v4 = vsel %vm2592_vm2, %v12940_v19, -inf }
 0x2a9   :  { %2636 = vmax.xlane.f32.xlu0 %v2635_v4 }
 0x2ab   :  { %v12944_v6 = vpop.f32.mrf.mxu0 }
 0x2ac   :  { %v2644_v32 = vsel %vm2592_vm2, %v12944_v6, -inf }
 0x2ad   :  { %v12948_v27 = vpop.f32.mrf.mxu0  ;;  %2645 = vmax.xlane.f32.xlu1 %v2644_v32 }
 0x2ae   :  { %v2641_v60 = vsel %vm2592_vm2, %v12948_v27, -inf }
 0x2b1   :  { %2642 = vmax.xlane.f32.xlu1 %v2641_v60 }
 0x2b3   :  { %v12952_v10 = vpop.f32.mrf.mxu0 }
 0x2b4   :  { %v2650_v49 = vsel %vm2592_vm2, %v12952_v10, -inf }
 0x2b5   :  { %v12956_v21 = vpop.f32.mrf.mxu0  ;;  %2651 = vmax.xlane.f32.xlu0 %v2650_v49 }
 0x2b6   :  { %v2647_v4 = vsel %vm2592_vm2, %v12956_v21, -inf }
 0x2b9   :  { %2648 = vmax.xlane.f32.xlu0 %v2647_v4 }
 0x2bb   :  { %v12960_v16 = vpop.f32.mrf.mxu1 }
 0x2bc   :  { %v2656_v32 = vsel %vm2592_vm2, %v12960_v16, -inf }
 0x2bd   :  { %2657 = vmax.xlane.f32.xlu1 %v2656_v32  ;;  %v12964_v12 = vpop.f32.mrf.mxu1 }
 0x2be   :  { %v2653_v60 = vsel %vm2592_vm2, %v12964_v12, -inf }
 0x2c1   :  { %2654 = vmax.xlane.f32.xlu1 %v2653_v60 }
 0x2c3   :  { %v12968_v39 = vpop.f32.mrf.mxu0 }
 0x2c4   :  { %v2662_v49 = vsel %vm2592_vm2, %v12968_v39, -inf }
 0x2c5   :  { %v12972_v15 = vpop.f32.mrf.mxu0  ;;  %2663 = vmax.xlane.f32.xlu0 %v2662_v49 }
 0x2c6   :  { %v2659_v4 = vsel %vm2592_vm2, %v12972_v15, -inf }
 0x2c9   :  { %2660 = vmax.xlane.f32.xlu0 %v2659_v4 }
 0x2cb   :  { %v12976_v29 = vpop.f32.mrf.mxu1 }
 0x2cc   :  { %v2668_v32 = vsel %vm2592_vm2, %v12976_v29, -inf }
 0x2cd   :  { %2669 = vmax.xlane.f32.xlu1 %v2668_v32  ;;  %v12980_v62 = vpop.f32.mrf.mxu1 }
 0x2ce   :  { %v2665_v60 = vsel %vm2592_vm2, %v12980_v62, -inf }
 0x2d1   :  { %2666 = vmax.xlane.f32.xlu1 %v2665_v60 }
 0x2d3   :  { %v12984_v20 = vpop.f32.mrf.mxu0 }
 0x2d5   :  { %v12986_v8 = vpop.f32.mrf.mxu0 }
 0x2d6   :  { %v2671_v49 = vsel %vm2592_vm2, %v12986_v8, -inf }
 0x2d7   :  { %2672 = vmax.xlane.f32.xlu0 %v2671_v49  ;;  %v2674_v49 = vsel %vm2592_vm2, %v12984_v20, -inf }
 0x2db   :  { %v12990_v4 = vpop.f32.mrf.mxu1 }
 0x2dc   :  { %v2680_v51 = vsel %vm2592_vm2, %v12990_v4, -inf }
 0x2dd   :  { %v12992_v52 = vpop.f32.mrf.mxu1 }
 0x2de   :  { %v2677_v32 = vsel %vm2592_vm2, %v12992_v52, -inf }
 0x2df   :  { %2678 = vmax.xlane.f32.xlu1 %v2677_v32 }
 0x2e3   :  { %v12998_v60 = vpop.f32.mrf.mxu0  ;;  %2681 = vmax.xlane.f32.xlu1 %v2680_v51 }
 0x2e4   :  { %v2686_v44 = vsel %vm2592_vm2, %v12998_v60, -inf }
 0x2e5   :  { %v13000_v0 = vpop.f32.mrf.mxu0 }
 0x2e6   :  { %v2683_v13 = vsel %vm2592_vm2, %v13000_v0, -inf }
 0x2e7   :  { %2684 = vmax.xlane.f32.xlu0 %v2683_v13  ;;  %2675 = vmax.xlane.f32.xlu1 %v2674_v49 }
 0x2eb   :  { %2687 = vmax.xlane.f32.xlu1 %v2686_v44 }
 0x2fe   :  { %v2604_v32 = vpop.xlane.xlu0 %2603 }
 0x2ff   :  { %v2692_v23 = vsub.f32 %v12840_v30, %v2604_v32 }
 0x301   :  { %v2727_v28 = vmul.f32 1.442695, %v2692_v23 }
 0x302   :  { %v2601_v25 = vpop.xlane.xlu0 %2600 }
 0x303   :  { %11300 = vpow2.f32 %v2727_v28  ;;  %v2691_v51 = vsub.f32 %v12846_v56, %v2601_v25 }
 0x305   :  { %v2725_v50 = vmul.f32 1.442695, %v2691_v51 }
 0x306   :  { %v2610_v17 = vpop.xlane.xlu1 %2609 }
 0x307   :  { %11302 = vpow2.f32 %v2725_v50  ;;  %v2694_v11 = vsub.f32 %v12856_v1, %v2610_v17 }
 0x308   :  { %v2607_v7 = vpop.xlane.xlu0 %2606 }
 0x309   :  { %v2731_v13 = vmul.f32 1.442695, %v2694_v11  ;;  %v2693_v49 = vsub.f32 %v12862_v57, %v2607_v7 }
 0x30b   :  { %11304 = vpow2.f32 %v2731_v13  ;;  %v2729_v54 = vmul.f32 1.442695, %v2693_v49 }
 0x30d   :  { %11306 = vpow2.f32 %v2729_v54 }
 0x30e   :  { %v2616_v44 = vpop.xlane.xlu0 %2615 }
 0x30f   :  { %v2696_v30 = vsub.f32 %v12872_v34, %v2616_v44 }
 0x310   :  { %v13013_v23 = vpop.eup %11300 }
 0x311   :  { %v2735_v28 = vmul.f32 1.442695, %v2696_v30  ;;  %v2794_v25 = vsel %vm2592_vm2, %v13013_v23, 0.0 }
 0x312   :  { %v2613_v56 = vpop.xlane.xlu0 %2612  ;;  %2795 = vadd.xlane.f32.xlu0 %v2794_v25 }
 0x313   :  { %11308 = vpow2.f32 %v2735_v28  ;;  %v2695_v50 = vsub.f32 %v12878_v5, %v2613_v56 }
 0x314   :  { %v13018_v17 = vpop.eup %11302 }
 0x315   :  { %v2733_v11 = vmul.f32 1.442695, %v2695_v50  ;;  %v2791_v7 = vsel %vm2592_vm2, %v13018_v17, 0.0 }
 0x316   :  { %v2622_v1 = vpop.xlane.xlu1 %2621  ;;  %2792 = vadd.xlane.f32.xlu0 %v2791_v7 }
 0x317   :  { %11310 = vpow2.f32 %v2733_v11  ;;  %v2698_v34 = vsub.f32 %v12888_v40, %v2622_v1 }
 0x318   :  { %v13023_v54 = vpop.eup %11304 }
 0x319   :  { %v2739_v57 = vmul.f32 1.442695, %v2698_v34  ;;  %v2800_v32 = vsel %vm2592_vm2, %v13023_v54, 0.0 }
 0x31a   :  { %v13027_v51 = vpop.eup %11306  ;;  %v2619_v5 = vpop.xlane.xlu1 %2618  ;;  %2801 = vadd.xlane.f32.xlu1 %v2800_v32 }
 0x31b   :  { %11312 = vpow2.f32 %v2739_v57  ;;  %v2697_v13 = vsub.f32 %v12894_v31, %v2619_v5  ;;  %v2797_v44 = vsel %vm2592_vm2, %v13027_v51, 0.0 }
 0x31d   :  { %v2737_v49 = vmul.f32 1.442695, %v2697_v13 }
 0x31e   :  { %v2628_v30 = vpop.xlane.xlu0 %2627  ;;  %2798 = vadd.xlane.f32.xlu1 %v2797_v44 }
 0x31f   :  { %11314 = vpow2.f32 %v2737_v49  ;;  %v2700_v40 = vsub.f32 %v12904_v63, %v2628_v30 }
 0x320   :  { %v13033_v28 = vpop.eup %11308 }
 0x321   :  { %v2743_v25 = vmul.f32 1.442695, %v2700_v40  ;;  %v2806_v56 = vsel %vm2592_vm2, %v13033_v28, 0.0 }
 0x322   :  { %v2625_v50 = vpop.xlane.xlu0 %2624  ;;  %2807 = vadd.xlane.f32.xlu0 %v2806_v56 }
 0x323   :  { %11316 = vpow2.f32 %v2743_v25  ;;  %v2699_v31 = vsub.f32 %v12910_v35, %v2625_v50 }
 0x324   :  { %v13038_v11 = vpop.eup %11310 }
 0x325   :  { %v2741_v7 = vmul.f32 1.442695, %v2699_v31  ;;  %v2803_v1 = vsel %vm2592_vm2, %v13038_v11, 0.0 }
 0x326   :  { %v2634_v34 = vpop.xlane.xlu1 %2633  ;;  %2804 = vadd.xlane.f32.xlu0 %v2803_v1 }
 0x327   :  { %11318 = vpow2.f32 %v2741_v7  ;;  %v2702_v63 = vsub.f32 %v12920_v41, %v2634_v34 }
 0x328   :  { %v13043_v57 = vpop.eup %11312 }
 0x329   :  { %v2747_v32 = vmul.f32 1.442695, %v2702_v63  ;;  %v2595_v5 = vpop.xlane.xlu0 %2594  ;;  %v2812_v13 = vsel %vm2592_vm2, %v13043_v57, 0.0 }
 0x32a   :  { %v2689_v35 = vsub.f32 %v12926_v53, %v2595_v5  ;;  %v2598_v49 = vpop.xlane.xlu1 %2597  ;;  %2813 = vadd.xlane.f32.xlu1 %v2812_v13 }
 0x32b   :  { %11320 = vpow2.f32 %v2747_v32  ;;  %v2690_v44 = vsub.f32 %v12922_v36, %v2598_v49 }
 0x32c   :  { %v13049_v30 = vpop.eup %11314  ;;  %v2721_v40 = vmul.f32 1.442695, %v2689_v35 }
 0x32d   :  { %v2723_v25 = vmul.f32 1.442695, %v2690_v44  ;;  %v2809_v41 = vsel %vm2592_vm2, %v13049_v30, 0.0 }
 0x32e   :  { %v2631_v56 = vpop.xlane.xlu1 %2630  ;;  %v2640_v50 = vpop.xlane.xlu0 %2639  ;;  %2810 = vadd.xlane.f32.xlu1 %v2809_v41 }
 0x32f   :  { %11322 = vpow2.f32 %v2723_v25  ;;  %v2701_v31 = vsub.f32 %v12932_v45, %v2631_v56  ;;  %v2704_v53 = vsub.f32 %v12934_v58, %v2640_v50 }
 0x330   :  { %v13055_v7 = vpop.eup %11316  ;;  %11324 = vpow2.f32 %v2721_v40 }
 0x331   :  { %v2745_v1 = vmul.f32 1.442695, %v2701_v31  ;;  %v2751_v36 = vmul.f32 1.442695, %v2704_v53  ;;  %v2818_v34 = vsel %vm2592_vm2, %v13055_v7, 0.0 }
 0x332   :  { %2819 = vadd.xlane.f32.xlu0 %v2818_v34  ;;  %v2637_v63 = vpop.xlane.xlu0 %2636 }
 0x333   :  { %11326 = vpow2.f32 %v2745_v1  ;;  %v2703_v32 = vsub.f32 %v12940_v19, %v2637_v63 }
 0x334   :  { %v13060_v5 = vpop.eup %11318  ;;  %11328 = vpow2.f32 %v2751_v36 }
 0x335   :  { %v2749_v13 = vmul.f32 1.442695, %v2703_v32  ;;  %v2815_v58 = vsel %vm2592_vm2, %v13060_v5, 0.0 }
 0x336   :  { %v2646_v45 = vpop.xlane.xlu1 %2645  ;;  %2816 = vadd.xlane.f32.xlu0 %v2815_v58 }
 0x337   :  { %v2706_v35 = vsub.f32 %v12944_v6, %v2646_v45  ;;  %11330 = vpow2.f32 %v2749_v13 }
 0x338   :  { %v13065_v49 = vpop.eup %11320 }
 0x339   :  { %v2755_v44 = vmul.f32 1.442695, %v2706_v35  ;;  %v2824_v40 = vsel %vm2592_vm2, %v13065_v49, 0.0 }
 0x33a   :  { %v2643_v25 = vpop.xlane.xlu1 %2642  ;;  %2825 = vadd.xlane.f32.xlu1 %v2824_v40 }
 0x33b   :  { %11332 = vpow2.f32 %v2755_v44  ;;  %v2705_v19 = vsub.f32 %v12948_v27, %v2643_v25 }
 0x33c   :  { %v13070_v41 = vpop.eup %11322 }
 0x33d   :  { %v2753_v56 = vmul.f32 1.442695, %v2705_v19  ;;  %v2788_v50 = vsel %vm2592_vm2, %v13070_v41, 0.0  ;;  %v13074_v31 = vpop.eup %11324 }
 0x33e   :  { %2789 = vadd.xlane.f32.xlu0 %v2788_v50  ;;  %v2652_v6 = vpop.xlane.xlu0 %2651  ;;  %v2785_v34 = vsel %vm2592_vm2, %v13074_v31, 0.0 }
 0x33f   :  { %11334 = vpow2.f32 %v2753_v56  ;;  %v2708_v53 = vsub.f32 %v12952_v10, %v2652_v6 }
 0x340   :  { %v13077_v1 = vpop.eup %11326 }
 0x341   :  { %v2759_v36 = vmul.f32 1.442695, %v2708_v53  ;;  %v2821_v27 = vsel %vm2592_vm2, %v13077_v1, 0.0  ;;  %v13083_v63 = vpop.eup %11328 }
 0x342   :  { %2786 = vadd.xlane.f32.xlu0 %v2785_v34  ;;  %v2649_v32 = vpop.xlane.xlu0 %2648  ;;  %2822 = vadd.xlane.f32.xlu1 %v2821_v27  ;;  %v2830_v10 = vsel %vm2592_vm2, %v13083_v63, 0.0 }
 0x343   :  { %11336 = vpow2.f32 %v2759_v36  ;;  %v2707_v13 = vsub.f32 %v12956_v21, %v2649_v32 }
 0x344   :  { %v13088_v45 = vpop.eup %11330 }
 0x345   :  { %v2757_v58 = vmul.f32 1.442695, %v2707_v13  ;;  %v2827_v19 = vsel %vm2592_vm2, %v13088_v45, 0.0 }
 0x346   :  { %2831 = vadd.xlane.f32.xlu0 %v2830_v10  ;;  %v2658_v35 = vpop.xlane.xlu1 %2657 }
 0x347   :  { %11338 = vpow2.f32 %v2757_v58  ;;  %v2710_v44 = vsub.f32 %v12960_v16, %v2658_v35 }
 0x348   :  { %v13091_v40 = vpop.eup %11332 }
 0x349   :  { %v2763_v25 = vmul.f32 1.442695, %v2710_v44  ;;  %v2836_v21 = vsel %vm2592_vm2, %v13091_v40, 0.0 }
 0x34a   :  { %2828 = vadd.xlane.f32.xlu0 %v2827_v19  ;;  %v2655_v56 = vpop.xlane.xlu1 %2654  ;;  %2837 = vadd.xlane.f32.xlu1 %v2836_v21 }
 0x34b   :  { %11340 = vpow2.f32 %v2763_v25  ;;  %v2709_v50 = vsub.f32 %v12964_v12, %v2655_v56 }
 0x34c   :  { %v13098_v6 = vpop.eup %11334 }
 0x34d   :  { %v2761_v53 = vmul.f32 1.442695, %v2709_v50  ;;  %v2833_v16 = vsel %vm2592_vm2, %v13098_v6, 0.0 }
 0x34e   :  { %v2664_v36 = vpop.xlane.xlu0 %2663  ;;  %2834 = vadd.xlane.f32.xlu1 %v2833_v16 }
 0x34f   :  { %11342 = vpow2.f32 %v2761_v53  ;;  %v2712_v34 = vsub.f32 %v12968_v39, %v2664_v36 }
 0x350   :  { %v13103_v27 = vpop.eup %11336 }
 0x351   :  { %v2767_v32 = vmul.f32 1.442695, %v2712_v34  ;;  %v2842_v13 = vsel %vm2592_vm2, %v13103_v27, 0.0 }
 0x352   :  { %2843 = vadd.xlane.f32.xlu0 %v2842_v13  ;;  %v2661_v58 = vpop.xlane.xlu0 %2660 }
 0x353   :  { %11344 = vpow2.f32 %v2767_v32  ;;  %v2711_v12 = vsub.f32 %v12972_v15, %v2661_v58 }
 0x354   :  { %v13108_v10 = vpop.eup %11338 }
 0x355   :  { %v2765_v35 = vmul.f32 1.442695, %v2711_v12  ;;  %v2839_v44 = vsel %vm2592_vm2, %v13108_v10, 0.0 }
 0x356   :  { %2840 = vadd.xlane.f32.xlu0 %v2839_v44  ;;  %v2670_v25 = vpop.xlane.xlu1 %2669 }
 0x357   :  { %11346 = vpow2.f32 %v2765_v35  ;;  %v2714_v39 = vsub.f32 %v12976_v29, %v2670_v25 }
 0x358   :  { %v13113_v19 = vpop.eup %11340 }
 0x359   :  { %v2771_v21 = vmul.f32 1.442695, %v2714_v39  ;;  %v2848_v56 = vsel %vm2592_vm2, %v13113_v19, 0.0 }
 0x35a   :  { %v2667_v50 = vpop.xlane.xlu1 %2666  ;;  %2849 = vadd.xlane.f32.xlu1 %v2848_v56 }
 0x35b   :  { %11348 = vpow2.f32 %v2771_v21  ;;  %v2713_v15 = vsub.f32 %v12980_v62, %v2667_v50 }
 0x35c   :  { %v13118_v53 = vpop.eup %11342 }
 0x35d   :  { %v2769_v16 = vmul.f32 1.442695, %v2713_v15  ;;  %v2845_v36 = vsel %vm2592_vm2, %v13118_v53, 0.0 }
 0x35e   :  { %2846 = vadd.xlane.f32.xlu1 %v2845_v36 }
 0x35f   :  { %11350 = vpow2.f32 %v2769_v16 }
 0x360   :  { %v13122_v29 = vpop.eup %11344  ;;  %v2673_v34 = vpop.xlane.xlu0 %2672 }
 0x361   :  { %v2715_v32 = vsub.f32 %v12986_v8, %v2673_v34  ;;  %v2854_v13 = vsel %vm2592_vm2, %v13122_v29, 0.0 }
 0x362   :  { %2855 = vadd.xlane.f32.xlu0 %v2854_v13 }
 0x363   :  { %v2773_v58 = vmul.f32 1.442695, %v2715_v32 }
 0x364   :  { %v13127_v12 = vpop.eup %11346 }
 0x365   :  { %11352 = vpow2.f32 %v2773_v58  ;;  %v2851_v62 = vsel %vm2592_vm2, %v13127_v12, 0.0 }
 0x366   :  { %2852 = vadd.xlane.f32.xlu0 %v2851_v62 }
 0x368   :  { %v13131_v35 = vpop.eup %11348  ;;  %v2679_v44 = vpop.xlane.xlu1 %2678 }
 0x369   :  { %v2717_v25 = vsub.f32 %v12992_v52, %v2679_v44  ;;  %v2860_v8 = vsel %vm2592_vm2, %v13131_v35, 0.0 }
 0x36a   :  { %2861 = vadd.xlane.f32.xlu1 %v2860_v8 }
 0x36b   :  { %v2777_v39 = vmul.f32 1.442695, %v2717_v25 }
 0x36c   :  { %v13136_v21 = vpop.eup %11350  ;;  %v2682_v56 = vpop.xlane.xlu1 %2681 }
 0x36d   :  { %11354 = vpow2.f32 %v2777_v39  ;;  %v2718_v50 = vsub.f32 %v12990_v4, %v2682_v56  ;;  %v2857_v15 = vsel %vm2592_vm2, %v13136_v21, 0.0 }
 0x36e   :  { %2858 = vadd.xlane.f32.xlu1 %v2857_v15 }
 0x36f   :  { %v2779_v16 = vmul.f32 1.442695, %v2718_v50 }
 0x370   :  { %v2685_v36 = vpop.xlane.xlu0 %2684  ;;  %v2676_v34 = vpop.xlane.xlu1 %2675 }
 0x371   :  { %11356 = vpow2.f32 %v2779_v16  ;;  %v2719_v52 = vsub.f32 %v13000_v0, %v2685_v36  ;;  %v2716_v32 = vsub.f32 %v12984_v20, %v2676_v34 }
 0x372   :  { %v13143_v13 = vpop.eup %11352 }
 0x373   :  { %v2781_v58 = vmul.f32 1.442695, %v2719_v52  ;;  %v2775_v62 = vmul.f32 1.442695, %v2716_v32  ;;  %v2863_v44 = vsel %vm2592_vm2, %v13143_v13, 0.0 }
 0x374   :  { %2864 = vadd.xlane.f32.xlu0 %v2863_v44  ;;  %v2688_v4 = vpop.xlane.xlu1 %2687 }
 0x375   :  { %11358 = vpow2.f32 %v2781_v58  ;;  %v2720_v25 = vsub.f32 %v12998_v60, %v2688_v4 }
 0x376   :  { %11360 = vpow2.f32 %v2775_v62 }
 0x377   :  { %v2783_v8 = vmul.f32 1.442695, %v2720_v25 }
 0x379   :  { %11362 = vpow2.f32 %v2783_v8 }
 0x37a   :  { %v13148_v39 = vpop.eup %11354 }
 0x37b   :  { %v2869_v0 = vsel %vm2592_vm2, %v13148_v39, 0.0 }
 0x37c   :  { %2870 = vadd.xlane.f32.xlu1 %v2869_v0 }
 0x37e   :  { %v13152_v20 = vpop.eup %11356 }
 0x37f   :  { %v2872_v56 = vsel %vm2592_vm2, %v13152_v20, 0.0 }
 0x380   :  { %2873 = vadd.xlane.f32.xlu1 %v2872_v56 }
 0x382   :  { %v13156_v50 = vpop.eup %11358 }
 0x383   :  { %v13158_v15 = vpop.eup %11360  ;;  %v2875_v60 = vsel %vm2592_vm2, %v13156_v50, 0.0 }
 0x384   :  { %2876 = vadd.xlane.f32.xlu0 %v2875_v60  ;;  %v2866_v16 = vsel %vm2592_vm2, %v13158_v15, 0.0 }
 0x385   :  { %2867 = vadd.xlane.f32.xlu1 %v2866_v16  ;;  %v1250_v16 = vadd.f32 %v12780_v14, %v12749_v18 }
 0x386   :  { %v13164_v36 = vpop.eup %11362 }
 0x387   :  { %v2878_v34 = vsel %vm2592_vm2, %v13164_v36, 0.0 }
 0x389   :  { %2879 = vadd.xlane.f32.xlu1 %v2878_v34 }
 0x39b   :  { %v2796_v58 = vpop.xlane.xlu0 %2795 }
 0x39f   :  { %v2793_v62 = vpop.xlane.xlu0 %2792 }
 0x3a3   :  { %v2802_v52 = vpop.xlane.xlu1 %2801 }
 0x3a4   :  { %11364 = vrcp.f32 %v2802_v52  ;;  %v1280_v52 = vadd.f32 %v12802_v2, %v12749_v18  ;;  %v1304_v2 = vadd.f32 %v12818_v3, %v12749_v18 }
 0x3a7   :  { %v2799_v32 = vpop.xlane.xlu1 %2798 }
 0x3a8   :  { %11366 = vrcp.f32 %v2799_v32 }
 0x3ab   :  { %v2808_v44 = vpop.xlane.xlu0 %2807 }
 0x3af   :  { %v2805_v34 = vpop.xlane.xlu0 %2804 }
 0x3b1   :  { %v11365_v25 = vpop.eup %11364 }
 0x3b2   :  { %v2918_v56 = vmul.f32 %v11365_v25, %v13023_v54 }
 0x3b3   :  { %v2814_v4 = vpop.xlane.xlu1 %2813 }
 0x3b4   :  { %11368 = vrcp.f32 %v2814_v4 }
 0x3b5   :  { %v11367_v8 = vpop.eup %11366 }
 0x3b6   :  { %v2917_v0 = vmul.f32 %v11367_v8, %v13027_v51 }
 0x3b7   :  { %v2811_v60 = vpop.xlane.xlu1 %2810 }
 0x3b8   :  { %11370 = vrcp.f32 %v2811_v60  ;;  %10772 = vmatprep.mubr.msk.f32.mxu0 %vm2592_vm2, %v2917_v0 }
 0x3b9   :  { %10773 = vmatmul.mubr.msk.f32.vlgmr.msra.gmra.mxu0 %vm2592_vm2, %v2918_v56 }
 0x3ba   :  { %10783 = vmatpush3.msra.mxu0 %v12785_v22  ;;  %v1274_v22 = vadd.f32 %v12798_v46, %v12749_v18 }
 0x3bb   :  { %10784 = vmatprep.subr.mxu0 %v1250_v16  ;;  %v2820_v51 = vpop.xlane.xlu0 %2819 }
 0x3bc   :  { %10785 = vmatpush3.msra.mxu0 %v1250_v16 }
 0x3bd   :  { %10796 = vmatprep.subr.mxu0 %v1280_v52 }
 0x3bf   :  { %v2817_v54 = vpop.xlane.xlu0 %2816 }
 0x3c1   :  { %v11369_v32 = vpop.eup %11368 }
 0x3c2   :  { %v2922_v8 = vmul.f32 %v11369_v32, %v13043_v57 }
 0x3c3   :  { %v2826_v14 = vpop.xlane.xlu1 %2825 }
 0x3c4   :  { %11372 = vrcp.f32 %v2826_v14  ;;  %v1328_v14 = vadd.f32 %v12834_v61, %v12749_v18 }
 0x3c5   :  { %v11371_v4 = vpop.eup %11370 }
 0x3c6   :  { %v2921_v25 = vmul.f32 %v11371_v4, %v13049_v30 }
 0x3c7   :  { %v2790_v0 = vpop.xlane.xlu0 %2789 }
 0x3c8   :  { %10786 = vmatprep.mubr.msk.f32.mxu0 %vm2592_vm2, %v2921_v25  ;;  %11374 = vrcp.f32 %v2790_v0 }
 0x3c9   :  { %10787 = vmatmul.mubr.msk.f32.vlgmr.msra.gmra.mxu0 %vm2592_vm2, %v2922_v8 }
 0x3ca   :  { %10797 = vmatpush3.msra.mxu0 %v1280_v52 }
 0x3cb   :  { %10798 = vmatprep.subr.mxu0 %v1274_v22  ;;  %v2787_v56 = vpop.xlane.xlu0 %2786  ;;  %v2823_v30 = vpop.xlane.xlu1 %2822 }
 0x3cc   :  { %11376 = vrcp.f32 %v2787_v56  ;;  %10799 = vmatpush3.msra.mxu0 %v1274_v22 }
 0x3cd   :  { %11378 = vrcp.f32 %v2823_v30  ;;  %10810 = vmatprep.subr.mxu0 %v1304_v2 }
 0x3ce   :  { %11380 = vrcp.f32 %v2793_v62 }
 0x3cf   :  { %11382 = vrcp.f32 %v2796_v58  ;;  %v2832_v57 = vpop.xlane.xlu0 %2831 }
 0x3d0   :  { %11384 = vrcp.f32 %v2805_v34 }
 0x3d1   :  { %11386 = vrcp.f32 %v2808_v44  ;;  %v11373_v60 = vpop.eup %11372 }
 0x3d2   :  { %11388 = vrcp.f32 %v2817_v54  ;;  %v2926_v44 = vmul.f32 %v11373_v60, %v13065_v49  ;;  %v1214_v54 = vadd.f32 %v12756_v9, %v12749_v18  ;;  %v1244_v9 = vadd.f32 %v12776_v59, %v12749_v18 }
 0x3d3   :  { %v2838_v46 = vpop.xlane.xlu1 %2837  ;;  %v2829_v16 = vpop.xlane.xlu0 %2828  ;;  %v1238_v59 = vadd.f32 %v12772_v26, %v12749_v18 }
 0x3d4   :  { %11390 = vrcp.f32 %v2838_v46 }
 0x3d5   :  { %v11375_v3 = vpop.eup %11374 }
 0x3d6   :  { %v2914_v62 = vmul.f32 %v11375_v3, %v13070_v41 }
 0x3d7   :  { %v2835_v52 = vpop.xlane.xlu1 %2834 }
 0x3d8   :  { %11392 = vrcp.f32 %v2835_v52  ;;  %v1316_v52 = vadd.f32 %v12826_v33, %v12749_v18 }
 0x3d9   :  { %v11377_v32 = vpop.eup %11376  ;;  %11394 = vrcp.f32 %v2820_v51 }
 0x3da   :  { %v11379_v4 = vpop.eup %11378  ;;  %v2913_v25 = vmul.f32 %v11377_v32, %v13074_v31  ;;  %11396 = vrcp.f32 %v2829_v16  ;;  %v1298_v31 = vadd.f32 %v12814_v47, %v12749_v18 }
 0x3db   :  { %v11381_v8 = vpop.eup %11380  ;;  %v2844_v58 = vpop.xlane.xlu0 %2843  ;;  %v2925_v34 = vmul.f32 %v11379_v4, %v13077_v1  ;;  %11398 = vrcp.f32 %v2832_v57  ;;  %v1262_v57 = vadd.f32 %v12790_v37, %v12749_v18  ;;  %v15951_v4 = vld [vmem:[#allocation120_spill] sm:$0xff] }
 0x3dc   :  { %10758 = vmatprep.mubr.msk.f32.mxu1 %vm2592_vm2, %v2913_v25  ;;  %v11383_v51 = vpop.eup %11382  ;;  %v2915_v49 = vmul.f32 %v11381_v8, %v13018_v17  ;;  %v1310_v33 = vadd.f32 %v15951_v4, %v12749_v18 }
 0x3dd   :  { %10800 = vmatprep.mubr.msk.f32.mxu0 %vm2592_vm2, %v2925_v34  ;;  %10759 = vmatmul.mubr.msk.f32.vlgmr.msra.gmra.mxu1 %vm2592_vm2, %v2914_v62  ;;  %v11385_v41 = vpop.eup %11384  ;;  %v15953_v62 = vld [vmem:[#allocation126_spill] sm:$0xff] }
 0x3de   :  { %10762 = vmatpush3.msra.mxu1 %v12761_v38  ;;  %10801 = vmatmul.mubr.msk.f32.vlgmr.msra.gmra.mxu0 %vm2592_vm2, %v2926_v44  ;;  %v2916_v38 = vmul.f32 %v11383_v51, %v13013_v23  ;;  %v11387_v47 = vpop.eup %11386  ;;  %v2919_v17 = vmul.f32 %v11385_v41, %v13038_v11  ;;  %v15954_v44 = vld [vmem:[#allocation135_spill] sm:$0xff] }
 0x3df   :  { %10811 = vmatpush3.msra.mxu0 %v1304_v2  ;;  %10763 = vmatprep.subr.mxu1 %v1214_v54  ;;  %v2841_v1 = vpop.xlane.xlu0 %2840  ;;  %v11389_v0 = vpop.eup %11388  ;;  %v1268_v2 = vadd.f32 %v12794_v55, %v12749_v18  ;;  %v2920_v56 = vmul.f32 %v11387_v47, %v13033_v28  ;;  %v1292_v28 = vadd.f32 %v12810_v43, %v12749_v18 }
 0x3e0   :  { %10765 = vmatprep.mubr.msk.f32.mxu1 %vm2592_vm2, %v2915_v49  ;;  %10812 = vmatprep.subr.mxu0 %v1298_v31  ;;  %11400 = vrcp.f32 %v2841_v1  ;;  %v2923_v11 = vmul.f32 %v11389_v0, %v13060_v5  ;;  %v1322_v43 = vadd.f32 %v12830_v42, %v12749_v18  ;;  %v15955_v49 = vld [vmem:[#allocation130_spill] sm:$0xff]  ;;  %v15956_v1 = vld [vmem:[#allocation139_spill] sm:$0xff] }
 0x3e1   :  { %10764 = vmatpush3.msra.mxu1 %v1214_v54  ;;  %10813 = vmatpush3.msra.mxu0 %v1298_v31  ;;  %11402 = vrcp.f32 %v2844_v58  ;;  %v11391_v22 = vpop.eup %11390  ;;  %v1334_v58 = vadd.f32 %v15953_v62, %v12749_v18  ;;  %v1364_v54 = vadd.f32 %v15954_v44, %v12749_v18  ;;  %v1346_v41 = vadd.f32 %v15955_v49, %v12749_v18  ;;  %v15970_v44 = vld [vmem:[#allocation47_spill] sm:$0xff] }
 0x3e2   :  { %10775 = vmatprep.subr.mxu1 %v1244_v9  ;;  %10824 = vmatprep.subr.mxu0 %v1328_v14  ;;  %v2930_v55 = vmul.f32 %v11391_v22, %v13091_v40 }
 0x3e3   :  { %10766 = vmatmul.mubr.msk.f32.vlgmr.msra.gmra.mxu1 %vm2592_vm2, %v2916_v38  ;;  %v2850_v61 = vpop.xlane.xlu1 %2849 }
 0x3e4   :  { %10776 = vmatpush3.msra.mxu1 %v1244_v9  ;;  %10779 = vmatprep.mubr.msk.f32.mxu1 %vm2592_vm2, %v2919_v17  ;;  %11404 = vrcp.f32 %v2850_v61  ;;  %v1376_v9 = vadd.f32 %v15956_v1, %v12749_v18  ;;  %v15957_v17 = vld [vmem:[#allocation133_spill] sm:$0xff]  ;;  %v15974_v1 = vld [vmem:[#allocation58_spill] sm:$0xff] }
 0x3e5   :  { %v11393_v23 = vpop.eup %11392  ;;  %10777 = vmatprep.subr.mxu1 %v1238_v59  ;;  %v1358_v0 = vadd.f32 %v15957_v17, %v12749_v18 }
 0x3e6   :  { %v11395_v30 = vpop.eup %11394  ;;  %10778 = vmatpush3.msra.mxu1 %v1238_v59  ;;  %v2929_v26 = vmul.f32 %v11393_v23, %v13098_v6  ;;  %v1286_v6 = vadd.f32 %v12806_v48, %v12749_v18  ;;  %v1352_v48 = vadd.f32 %v12868_v24, %v12749_v18  ;;  %v15952_v24 = vld [vmem:[#allocation128_spill] sm:$0xff]  ;;  %v15958_v59 = vld [vmem:[#allocation143_spill] sm:$0xff] }
 0x3e7   :  { %10789 = vmatprep.subr.mxu1 %v1268_v2  ;;  %10780 = vmatmul.mubr.msk.f32.vlgmr.msra.gmra.mxu1 %vm2592_vm2, %v2920_v56  ;;  %v2847_v46 = vpop.xlane.xlu1 %2846  ;;  %v11397_v60 = vpop.eup %11396  ;;  %v2924_v5 = vmul.f32 %v11395_v30, %v13055_v7  ;;  %v1388_v61 = vadd.f32 %v15958_v59, %v12749_v18 }
 0x3e8   :  { %10790 = vmatpush3.msra.mxu1 %v1268_v2  ;;  %10793 = vmatprep.mubr.msk.f32.mxu1 %vm2592_vm2, %v2923_v11  ;;  %11406 = vrcp.f32 %v2847_v46  ;;  %v11399_v37 = vpop.eup %11398  ;;  %v2927_v40 = vmul.f32 %v11397_v60, %v13088_v45  ;;  %v15959_v2 = vld [vmem:[#allocation37_spill] sm:$0xff]  ;;  %v13273_v11 = vld [vmem:[%s15737_s5] sm:$0x3f]  ;;  %v15961_v60 = vld [vmem:[#allocation42_spill] sm:$0xff] }
 0x3e9   :  { %10791 = vmatprep.subr.mxu1 %v1262_v57  ;;  %10814 = vmatprep.mubr.msk.f32.mxu0 %vm2592_vm2, %v2929_v26  ;;  %v2928_v3 = vmul.f32 %v11399_v37, %v13083_v63  ;;  %v1340_v63 = vadd.f32 %v15952_v24, %v12749_v18  ;;  %v15797_v56 = vsub.s32 3, %v15959_v2  ;;  %v15965_v24 = vld [vmem:[#allocation50_spill] sm:$0xff] }
 0x3ea   :  { %10792 = vmatpush3.msra.mxu1 %v1262_v57  ;;  %10815 = vmatmul.mubr.msk.f32.vlgmr.msra.gmra.mxu0 %vm2592_vm2, %v2930_v55  ;;  %v15960_v57 = vld [vmem:[#allocation137_spill] sm:$0xff] }
 0x3eb   :  { %10803 = vmatprep.subr.mxu1 %v1292_v28  ;;  %10794 = vmatmul.mubr.msk.f32.vlgmr.msra.gmra.mxu1 %vm2592_vm2, %v2924_v5  ;;  %v2856_v16 = vpop.xlane.xlu0 %2855  ;;  %v13278_v26 = vrot.slane %v13273_v11, %v15797_v56  ;;  %v1370_v46 = vadd.f32 %v15960_v57, %v12749_v18  ;;  %v15982_v57 = vld [vmem:[#allocation66_spill] sm:$0xff] }
 0x3ec   :  { %10804 = vmatpush3.msra.mxu1 %v1292_v28  ;;  %10825 = vmatpush3.msra.mxu0 %v1328_v14  ;;  %11408 = vrcp.f32 %v2856_v16 }
 0x3ed   :  { %v11401_v7 = vpop.eup %11400  ;;  %10805 = vmatprep.subr.mxu1 %v1286_v6  ;;  %10807 = vmatprep.mubr.msk.f32.mxu1 %vm2592_vm2, %v2927_v40  ;;  %v953_v55 = vadd.f32 %v15961_v60, %v13278_v26  ;;  %v15984_v60 = vld [vmem:[#allocation57_spill] sm:$0xff] }
 0x3ee   :  { %10826 = vmatprep.subr.mxu0 %v1322_v43  ;;  %10806 = vmatpush3.msra.mxu1 %v1286_v6  ;;  %v2931_v45 = vmul.f32 %v11401_v7, %v13108_v10  ;;  %v11403_v32 = vpop.eup %11402  ;;  %v13288_v6 = vsub.s32 1, %v15959_v2 }
 0x3ef   :  { %10827 = vmatpush3.msra.mxu0 %v1322_v43  ;;  %10817 = vmatprep.subr.mxu1 %v1316_v52  ;;  %v2853_v42 = vpop.xlane.xlu0 %2852  ;;  %v2932_v10 = vmul.f32 %v11403_v32, %v13103_v27 }
 0x3f0   :  { %10838 = vmatprep.subr.mxu0 %v1352_v48  ;;  %10808 = vmatmul.mubr.msk.f32.vlgmr.msra.gmra.mxu1 %vm2592_vm2, %v2928_v3  ;;  %11410 = vrcp.f32 %v2853_v42  ;;  %15962 = vst [vmem:[#allocation120_spill] sm:$0xff] %v13288_v6  ;;  %v13293_v7 = vrot.slane %v13273_v11, %v13288_v6 }
 0x3f1   :  { %10818 = vmatpush3.msra.mxu1 %v1316_v52  ;;  %10821 = vmatprep.mubr.msk.f32.mxu1 %vm2592_vm2, %v2931_v45  ;;  %v11405_v8 = vpop.eup %11404  ;;  %v15964_v45 = vld [vmem:[#allocation39_spill] sm:$0xff] }
 0x3f2   :  { %10819 = vmatprep.subr.mxu1 %v1310_v33  ;;  %v2934_v27 = vmul.f32 %v11405_v8, %v13113_v19  ;;  %v947_v32 = vadd.f32 %v15964_v45, %v13278_v26  ;;  %v15967_v8 = vld [vmem:[#allocation41_spill] sm:$0xff]  ;;  %v15990_v45 = vld [vmem:[#allocation74_spill] sm:$0xff] }
 0x3f3   :  { %10820 = vmatpush3.msra.mxu1 %v1310_v33  ;;  %v2862_v25 = vpop.xlane.xlu1 %2861  ;;  %v696_v62 = vadd.f32 %v15967_v8, %v13293_v7 }
 0x3f4   :  { %10831 = vmatprep.subr.mxu1 %v1340_v63  ;;  %10822 = vmatmul.mubr.msk.f32.vlgmr.msra.gmra.mxu1 %vm2592_vm2, %v2932_v10  ;;  %11412 = vrcp.f32 %v2862_v25 }
 0x3f5   :  { %v11407_v34 = vpop.eup %11406  ;;  %10832 = vmatpush3.msra.mxu1 %v1340_v63  ;;  %v15966_v63 = vld [vmem:[#allocation141_spill] sm:$0xff] }
 0x3f6   :  { %10833 = vmatprep.subr.mxu1 %v1334_v58  ;;  %v2933_v51 = vmul.f32 %v11407_v34, %v13118_v53  ;;  %v1382_v10 = vadd.f32 %v15966_v63, %v12749_v18  ;;  %v15969_v18 = vld [vmem:[#allocation44_spill] sm:$0xff] }
 0x3f7   :  { %10834 = vmatpush3.msra.mxu1 %v1334_v58  ;;  %v2859_v31 = vpop.xlane.xlu1 %2858  ;;  %v959_v34 = vadd.f32 %v15969_v18, %v13278_v26  ;;  %v15994_v63 = vld [vmem:[#allocation68_spill] sm:$0xff]  ;;  %v15998_v18 = vld [vmem:[#allocation82_spill] sm:$0xff] }
 0x3f8   :  { %10845 = vmatprep.subr.mxu1 %v1364_v54  ;;  %11414 = vrcp.f32 %v2859_v31  ;;  %10828 = vmatprep.mubr.msk.f32.mxu0 %vm2592_vm2, %v2933_v51  ;;  %v15971_v51 = vld [vmem:[#allocation43_spill] sm:$0xff]  ;;  %v15972_v31 = vld [vmem:[#allocation48_spill] sm:$0xff] }
 0x3f9   :  { %10829 = vmatmul.mubr.msk.f32.vlgmr.msra.gmra.mxu0 %vm2592_vm2, %v2934_v27  ;;  %v11409_v53 = vpop.eup %11408  ;;  %v702_v27 = vadd.f32 %v15971_v51, %v13293_v7  ;;  %v971_v49 = vadd.f32 %v15972_v31, %v13278_v26  ;;  %v16000_v51 = vld [vmem:[#allocation73_spill] sm:$0xff]  ;;  %v16001_v31 = vld [vmem:[#allocation75_spill] sm:$0xff] }
 0x3fa   :  { %10839 = vmatpush3.msra.mxu0 %v1352_v48  ;;  %v2936_v47 = vmul.f32 %v11409_v53, %v13122_v29  ;;  %v15963_v48 = vld [vmem:[#allocation38_spill] sm:$0xff]  ;;  %v15975_v53 = vld [vmem:[#allocation45_spill] sm:$0xff] }
 0x3fb   :  { %10840 = vmatprep.subr.mxu0 %v1346_v41  ;;  %v690_v3 = vadd.f32 %v15963_v48, %v13293_v7  ;;  %v15989_v48 = vld [vmem:[#allocation70_spill] sm:$0xff] }
 0x3fc   :  { %10841 = vmatpush3.msra.mxu0 %v1346_v41 }
 0x3fd   :  { %v11411_v19 = vpop.eup %11410  ;;  %10852 = vmatprep.subr.mxu0 %v1376_v9  ;;  %v2865_v14 = vpop.xlane.xlu0 %2864 }
 0x3fe   :  { %11416 = vrcp.f32 %v2865_v14  ;;  %v2935_v38 = vmul.f32 %v11411_v19, %v13127_v12  ;;  %v708_v19 = vadd.f32 %v15975_v53, %v13293_v7  ;;  %v15976_v14 = vld [vmem:[#allocation49_spill] sm:$0xff]  ;;  %v16004_v53 = vld [vmem:[#allocation80_spill] sm:$0xff] }
 0x400   :  { %10835 = vmatprep.mubr.msk.f32.mxu1 %vm2592_vm2, %v2935_v38  ;;  %v720_v38 = vadd.f32 %v15976_v14, %v13293_v7  ;;  %v16005_v14 = vld [vmem:[#allocation86_spill] sm:$0xff] }
 0x401   :  { %10836 = vmatmul.mubr.msk.f32.vlgmr.msra.gmra.mxu1 %vm2592_vm2, %v2936_v47  ;;  %v11413_v22 = vpop.eup %11412  ;;  %v15977_v47 = vld [vmem:[#allocation51_spill] sm:$0xff] }
 0x402   :  { %10846 = vmatpush3.msra.mxu1 %v1364_v54  ;;  %v2938_v30 = vmul.f32 %v11413_v22, %v13131_v35  ;;  %v714_v54 = vadd.f32 %v15970_v44, %v13293_v7  ;;  %v726_v17 = vadd.f32 %v15977_v47, %v13293_v7  ;;  %v15999_v44 = vld [vmem:[#allocation69_spill] sm:$0xff]  ;;  %v16006_v47 = vld [vmem:[#allocation90_spill] sm:$0xff] }
 0x403   :  { %10847 = vmatprep.subr.mxu1 %v1358_v0 }
 0x404   :  { %10848 = vmatpush3.msra.mxu1 %v1358_v0  ;;  %v15978_v0 = vld [vmem:[#allocation55_spill] sm:$0xff] }
 0x405   :  { %v11415_v23 = vpop.eup %11414  ;;  %10859 = vmatprep.subr.mxu1 %v1388_v61  ;;  %v2871_v12 = vpop.xlane.xlu1 %2870  ;;  %v738_v59 = vadd.f32 %v15978_v0, %v13293_v7  ;;  %v16007_v0 = vld [vmem:[#allocation77_spill] sm:$0xff] }
 0x406   :  { %11418 = vrcp.f32 %v2871_v12  ;;  %v2937_v29 = vmul.f32 %v11415_v23, %v13136_v21  ;;  %v15980_v23 = vld [vmem:[#allocation56_spill] sm:$0xff] }
 0x407   :  { %v995_v12 = vadd.f32 %v15980_v23, %v13278_v26  ;;  %v16009_v23 = vld [vmem:[#allocation83_spill] sm:$0xff] }
 0x408   :  { %10842 = vmatprep.mubr.msk.f32.mxu0 %vm2592_vm2, %v2937_v29  ;;  %v15981_v29 = vld [vmem:[#allocation62_spill] sm:$0xff] }
 0x409   :  { %10843 = vmatmul.mubr.msk.f32.vlgmr.msra.gmra.mxu0 %vm2592_vm2, %v2938_v30  ;;  %v2874_v21 = vpop.xlane.xlu1 %2873  ;;  %v1013_v30 = vadd.f32 %v15981_v29, %v13278_v26  ;;  %v16010_v29 = vld [vmem:[#allocation84_spill] sm:$0xff] }
 0x40a   :  { %10853 = vmatpush3.msra.mxu0 %v1376_v9  ;;  %11420 = vrcp.f32 %v2874_v21  ;;  %v1001_v9 = vadd.f32 %v15974_v1, %v13278_v26  ;;  %v15983_v21 = vld [vmem:[#allocation53_spill] sm:$0xff]  ;;  %v16003_v1 = vld [vmem:[#allocation79_spill] sm:$0xff] }
 0x40b   :  { %v11417_v35 = vpop.eup %11416  ;;  %10854 = vmatprep.subr.mxu0 %v1370_v46 }
 0x40c   :  { %10855 = vmatpush3.msra.mxu0 %v1370_v46  ;;  %v2939_v28 = vmul.f32 %v11417_v35, %v13143_v13  ;;  %v1025_v46 = vadd.f32 %v15982_v57, %v13278_v26  ;;  %v732_v35 = vadd.f32 %v15983_v21, %v13293_v7  ;;  %v16011_v57 = vld [vmem:[#allocation87_spill] sm:$0xff]  ;;  %v16012_v21 = vld [vmem:[#allocation88_spill] sm:$0xff] }
 0x40d   :  { %10866 = vmatprep.subr.mxu0 %v953_v55  ;;  %v2877_v5 = vpop.xlane.xlu0 %2876 }
 0x40e   :  { %11422 = vrcp.f32 %v2877_v5  ;;  %v2868_v37 = vpop.xlane.xlu1 %2867  ;;  %10849 = vmatprep.mubr.msk.f32.mxu1 %vm2592_vm2, %v2939_v28  ;;  %v15985_v28 = vld [vmem:[#allocation59_spill] sm:$0xff] }
 0x40f   :  { %11424 = vrcp.f32 %v2868_v37  ;;  %v750_v5 = vadd.f32 %v15985_v28, %v13293_v7  ;;  %v15986_v37 = vld [vmem:[#allocation60_spill] sm:$0xff]  ;;  %v16014_v28 = vld [vmem:[#allocation98_spill] sm:$0xff] }
 0x412   :  { %v2880_v40 = vpop.xlane.xlu1 %2879 }
 0x413   :  { %v11419_v16 = vpop.eup %11418  ;;  %11426 = vrcp.f32 %v2880_v40  ;;  %v1007_v40 = vadd.f32 %v15986_v37, %v13278_v26  ;;  %v16015_v37 = vld [vmem:[#allocation85_spill] sm:$0xff] }
 0x414   :  { %v2941_v43 = vmul.f32 %v11419_v16, %v13148_v39  ;;  %v15987_v16 = vld [vmem:[#allocation63_spill] sm:$0xff] }
 0x416   :  { %10856 = vmatprep.mubr.msk.f32.mxu0 %vm2592_vm2, %v2941_v43  ;;  %v762_v43 = vadd.f32 %v15987_v16, %v13293_v7  ;;  %v16016_v16 = vld [vmem:[#allocation89_spill] sm:$0xff] }
 0x417   :  { %v11421_v13 = vpop.eup %11420 }
 0x418   :  { %v2942_v52 = vmul.f32 %v11421_v13, %v13152_v20  ;;  %v977_v20 = vadd.f32 %v15965_v24, %v13278_v26  ;;  %v15988_v13 = vld [vmem:[#allocation64_spill] sm:$0xff]  ;;  %v15993_v24 = vld [vmem:[#allocation67_spill] sm:$0xff] }
 0x41a   :  { %10857 = vmatmul.mubr.msk.f32.vlgmr.msra.gmra.mxu0 %vm2592_vm2, %v2942_v52  ;;  %v1019_v52 = vadd.f32 %v15988_v13, %v13278_v26  ;;  %v516_v13 = vsub.s32 5, %v15959_v2 }
 0x41b   :  { %v11423_v42 = vpop.eup %11422  ;;  %10867 = vmatpush3.xpose.msra.mxu0 %v953_v55  ;;  %10870 = vmatprep.mubr.f32.mxu0 %v690_v3  ;;  %v744_v55 = vadd.f32 %v15984_v60, %v13293_v7  ;;  %v1037_v3 = vadd.f32 %v15989_v48, %v13278_v26  ;;  %v16013_v60 = vld [vmem:[#allocation94_spill] sm:$0xff] }
 0x41c   :  { %v11425_v39 = vpop.eup %11424  ;;  %10868 = vmatprep.subr.mxu0 %v947_v32  ;;  %v2943_v4 = vmul.f32 %v11423_v42, %v13156_v50  ;;  %v15968_v50 = vld [vmem:[#allocation46_spill] sm:$0xff]  ;;  %v15991_v42 = vld [vmem:[#allocation61_spill] sm:$0xff] }
 0x41d   :  { %v2940_v33 = vmul.f32 %v11425_v39, %v13158_v15  ;;  %v965_v58 = vadd.f32 %v15968_v50, %v13278_v26  ;;  %v756_v39 = vadd.f32 %v15991_v42, %v13293_v7 }
 0x41f   :  { %10850 = vmatmul.mubr.msk.f32.vlgmr.msra.gmra.mxu1 %vm2592_vm2, %v2940_v33  ;;  %10869 = vmatpush3.xpose.msra.mxu0 %v947_v32  ;;  %v1049_v32 = vadd.f32 %v15990_v45, %v13278_v26 }
 0x420   :  { %v11427_v25 = vpop.eup %11426  ;;  %10860 = vmatpush3.msra.mxu1 %v1388_v61  ;;  %10863 = vmatprep.mubr.msk.f32.mxu1 %vm2592_vm2, %v2943_v4  ;;  %v15979_v61 = vld [vmem:[#allocation52_spill] sm:$0xff]  ;;  %v15992_v4 = vld [vmem:[#allocation65_spill] sm:$0xff] }
 0x421   :  { %v2944_v15 = vmul.f32 %v11427_v25, %v13164_v36  ;;  %10861 = vmatprep.subr.mxu1 %v1382_v10  ;;  %10880 = vmatprep.subr.mxu0 %v977_v20  ;;  %v15973_v36 = vld [vmem:[#allocation54_spill] sm:$0xff]  ;;  %v983_v22 = vadd.f32 %v15979_v61, %v13278_v26  ;;  %v768_v33 = vadd.f32 %v15992_v4, %v13293_v7  ;;  %v15995_v25 = vld [vmem:[#allocation71_spill] sm:$0xff]  ;;  %v16008_v61 = vld [vmem:[#allocation81_spill] sm:$0xff] }
 0x422   :  { %10862 = vmatpush3.msra.mxu1 %v1382_v10  ;;  %10871 = vmatmul.mubr.f32.vlgmr.msra.gmra.mxu0 %v696_v62  ;;  %v989_v41 = vadd.f32 %v15973_v36, %v13278_v26  ;;  %v1031_v10 = vadd.f32 %v15994_v63, %v13278_v26  ;;  %v786_v8 = vadd.f32 %v15995_v25, %v13293_v7  ;;  %v15996_v62 = vld [vmem:[#allocation72_spill] sm:$0xff]  ;;  %v16022_v63 = vld [vmem:[#allocation103_spill] sm:$0xff]  ;;  %v16023_v25 = vld [vmem:[#allocation93_spill] sm:$0xff] }
 0x423   :  { %10873 = vmatprep.subr.mxu1 %v965_v58  ;;  %10864 = vmatmul.mubr.msk.f32.vlgmr.msra.gmra.mxu1 %vm2592_vm2, %v2944_v15  ;;  %v1043_v50 = vadd.f32 %v15996_v62, %v13278_v26  ;;  %v16002_v36 = vld [vmem:[#allocation76_spill] sm:$0xff]  ;;  %v16024_v62 = vld [vmem:[#allocation97_spill] sm:$0xff] }
 0x424   :  { %10874 = vmatpush3.xpose.msra.mxu1 %v965_v58  ;;  %10881 = vmatpush3.xpose.msra.mxu0 %v977_v20  ;;  %v774_v20 = vadd.f32 %v15993_v24, %v13293_v7  ;;  %v15997_v58 = vld [vmem:[#allocation78_spill] sm:$0xff]  ;;  %v16021_v24 = vld [vmem:[#allocation124_spill] sm:$0xff] }
 0x425   :  { %10884 = vmatprep.mubr.f32.mxu0 %v714_v54  ;;  %10875 = vmatprep.subr.mxu1 %v959_v34  ;;  %v1061_v15 = vadd.f32 %v15997_v58, %v13278_v26  ;;  %v780_v54 = vadd.f32 %v15999_v44, %v13293_v7 }
 0x426   :  { %10877 = vmatprep.mubr.f32.mxu1 %v702_v27  ;;  %10882 = vmatprep.subr.mxu0 %v971_v49  ;;  %v792_v27 = vadd.f32 %v16000_v51, %v13293_v7 }
 0x428   :  { %10876 = vmatpush3.xpose.msra.mxu1 %v959_v34  ;;  %10883 = vmatpush3.xpose.msra.mxu0 %v971_v49  ;;  %v1073_v34 = vadd.f32 %v15998_v18, %v13278_v26  ;;  %v798_v49 = vadd.f32 %v16001_v31, %v13293_v7 }
 0x429   :  { %10887 = vmatprep.subr.mxu1 %v989_v41  ;;  %10894 = vmatprep.subr.mxu0 %v1001_v9 }
 0x42b   :  { %10878 = vmatmul.mubr.f32.vlgmr.msra.gmra.mxu1 %v708_v19  ;;  %10885 = vmatmul.mubr.f32.vlgmr.msra.gmra.mxu0 %v720_v38  ;;  %v1067_v19 = vadd.f32 %v16004_v53, %v13278_v26  ;;  %v1085_v38 = vadd.f32 %v16005_v14, %v13278_v26 }
 0x42c   :  { %10888 = vmatpush3.xpose.msra.mxu1 %v989_v41  ;;  %10891 = vmatprep.mubr.f32.mxu1 %v726_v17  ;;  %v1055_v41 = vadd.f32 %v16002_v36, %v13278_v26  ;;  %v1097_v17 = vadd.f32 %v16006_v47, %v13278_v26  ;;  %v16031_v36 = vld [vmem:[#allocation104_spill] sm:$0xff] }
 0x42d   :  { %10895 = vmatpush3.xpose.msra.mxu0 %v1001_v9  ;;  %10898 = vmatprep.mubr.f32.mxu0 %v738_v59  ;;  %v810_v9 = vadd.f32 %v16003_v1, %v13293_v7  ;;  %v804_v59 = vadd.f32 %v16007_v0, %v13293_v7  ;;  %v16032_v1 = vld [vmem:[#allocation109_spill] sm:$0xff] }
 0x42e   :  { %10889 = vmatprep.subr.mxu1 %v983_v22  ;;  %10896 = vmatprep.subr.mxu0 %v995_v12 }
 0x430   :  { %10890 = vmatpush3.xpose.msra.mxu1 %v983_v22  ;;  %v816_v22 = vadd.f32 %v16008_v61, %v13293_v7 }
 0x431   :  { %10897 = vmatpush3.xpose.msra.mxu0 %v995_v12  ;;  %10901 = vmatprep.subr.mxu1 %v1013_v30  ;;  %v822_v12 = vadd.f32 %v16009_v23, %v13293_v7 }
 0x432   :  { %10908 = vmatprep.subr.mxu0 %v1025_v46 }
 0x433   :  { %10892 = vmatmul.mubr.f32.vlgmr.msra.gmra.mxu1 %v732_v35  ;;  %v1091_v35 = vadd.f32 %v16012_v21, %v13278_v26 }
 0x434   :  { %10899 = vmatmul.mubr.f32.vlgmr.msra.gmra.mxu0 %v744_v55  ;;  %10902 = vmatpush3.xpose.msra.mxu1 %v1013_v30  ;;  %v1079_v30 = vadd.f32 %v16010_v29, %v13278_v26  ;;  %v1109_v55 = vadd.f32 %v16013_v60, %v13278_v26 }
 0x435   :  { %10905 = vmatprep.mubr.f32.mxu1 %v750_v5  ;;  %10909 = vmatpush3.xpose.msra.mxu0 %v1025_v46  ;;  %v834_v46 = vadd.f32 %v16011_v57, %v13293_v7  ;;  %v1121_v5 = vadd.f32 %v16014_v28, %v13278_v26 }
 0x436   :  { %10912 = vmatprep.mubr.f32.mxu0 %v762_v43  ;;  %10903 = vmatprep.subr.mxu1 %v1007_v40  ;;  %v840_v43 = vadd.f32 %v16016_v16, %v13293_v7 }
 0x437   :  { %10910 = vmatprep.subr.mxu0 %v1019_v52 }
 0x438   :  { %10904 = vmatpush3.xpose.msra.mxu1 %v1007_v40  ;;  %v828_v40 = vadd.f32 %v16015_v37, %v13293_v7 }
 0x439   :  { %10911 = vmatpush3.xpose.msra.mxu0 %v1019_v52  ;;  %10915 = vmatprep.subr.mxu1 %v1037_v3  ;;  %v16017_v52 = vld [vmem:[#allocation91_spill] sm:$0xff] }
 0x43a   :  { %10922 = vmatprep.subr.mxu0 %v1049_v32  ;;  %v846_v48 = vadd.f32 %v16017_v52, %v13293_v7 }
 0x43b   :  { %10906 = vmatmul.mubr.f32.vlgmr.msra.gmra.mxu1 %v756_v39  ;;  %v16020_v39 = vld [vmem:[#allocation96_spill] sm:$0xff] }
 0x43c   :  { %10913 = vmatmul.mubr.f32.vlgmr.msra.gmra.mxu0 %v768_v33  ;;  %10916 = vmatpush3.xpose.msra.mxu1 %v1037_v3  ;;  %v16018_v3 = vld [vmem:[#allocation92_spill] sm:$0xff]  ;;  %v1115_v4 = vadd.f32 %v16020_v39, %v13278_v26  ;;  %v13422_v33 = vrot.slane %v13273_v11, %v516_v13  ;;  %v16025_v11 = vld [vmem:[#allocation99_spill] sm:$0xff] }
 0x43d   :  { %10919 = vmatprep.mubr.f32.mxu1 %v774_v20  ;;  %10923 = vmatpush3.xpose.msra.mxu0 %v1049_v32  ;;  %v1103_v45 = vadd.f32 %v16018_v3, %v13278_v26  ;;  %v16019_v32 = vld [vmem:[#allocation95_spill] sm:$0xff]  ;;  %v1133_v20 = vadd.f32 %v16021_v24, %v13278_v26  ;;  %v870_v58 = vadd.f32 %v16025_v11, %v13293_v7 }
 0x43e   :  { %10926 = vmatprep.mubr.f32.mxu0 %v786_v8  ;;  %10917 = vmatprep.subr.mxu1 %v1031_v10  ;;  %v858_v42 = vadd.f32 %v16019_v32, %v13293_v7  ;;  %v852_v8 = vadd.f32 %v16023_v25, %v13293_v7 }
 0x43f   :  { %10924 = vmatprep.subr.mxu0 %v1043_v50 }
 0x440   :  { %10918 = vmatpush3.xpose.msra.mxu1 %v1031_v10  ;;  %v1210_v10 = vadd.f32 %v16022_v63, %v13422_v33 }
 0x441   :  { %10925 = vmatpush3.xpose.msra.mxu0 %v1043_v50  ;;  %10929 = vmatprep.subr.mxu1 %v1061_v15  ;;  %v864_v50 = vadd.f32 %v16024_v62, %v13293_v7 }
 0x442   :  { %10936 = vmatprep.subr.mxu0 %v1073_v34 }
 0x443   :  { %10920 = vmatmul.mubr.f32.vlgmr.msra.gmra.mxu1 %v780_v54  ;;  %v16028_v54 = vld [vmem:[#allocation107_spill] sm:$0xff] }
 0x444   :  { %10927 = vmatmul.mubr.f32.vlgmr.msra.gmra.mxu0 %v792_v27  ;;  %10930 = vmatpush3.xpose.msra.mxu1 %v1061_v15  ;;  %v16026_v15 = vld [vmem:[#allocation100_spill] sm:$0xff]  ;;  %v13440_v51 = vadd.f32 %v16028_v54, %v13422_v33  ;;  %v16029_v27 = vld [vmem:[#allocation105_spill] sm:$0xff] }
 0x445   :  { %10933 = vmatprep.mubr.f32.mxu1 %v798_v49  ;;  %10937 = vmatpush3.xpose.msra.mxu0 %v1073_v34  ;;  %v1127_v18 = vadd.f32 %v16026_v15, %v13278_v26  ;;  %v16027_v34 = vld [vmem:[#allocation102_spill] sm:$0xff]  ;;  %v1222_v31 = vadd.f32 %v16029_v27, %v13422_v33  ;;  %v16030_v26 = vld [vmem:[#allocation101_spill] sm:$0xff] }
 0x446   :  { %10940 = vmatprep.mubr.f32.mxu0 %v810_v9  ;;  %10931 = vmatprep.subr.mxu1 %v1055_v41  ;;  %v1204_v44 = vadd.f32 %v16027_v34, %v13422_v33  ;;  %v876_v49 = vadd.f32 %v16030_v26, %v13293_v7  ;;  %v13451_v9 = vadd.f32 %v16032_v1, %v13422_v33 }
 0x447   :  { %10938 = vmatprep.subr.mxu0 %v1067_v19 }
 0x448   :  { %10932 = vmatpush3.xpose.msra.mxu1 %v1055_v41  ;;  %v1216_v41 = vadd.f32 %v16031_v36, %v13422_v33 }
 0x449   :  { %10939 = vmatpush3.xpose.msra.mxu0 %v1067_v19  ;;  %10943 = vmatprep.subr.mxu1 %v1085_v38 }
 0x44a   :  { %10950 = vmatprep.subr.mxu0 %v1097_v17 }
 0x44b   :  { %10934 = vmatmul.mubr.f32.vlgmr.msra.gmra.mxu1 %v804_v59 }
 0x44c   :  { %10941 = vmatmul.mubr.f32.vlgmr.msra.gmra.mxu0 %v816_v22  ;;  %10944 = vmatpush3.xpose.msra.mxu1 %v1085_v38 }
 0x44d   :  { %10947 = vmatprep.mubr.f32.mxu1 %v822_v12  ;;  %10951 = vmatpush3.xpose.msra.mxu0 %v1097_v17 }
 0x44e   :  { %10954 = vmatprep.mubr.f32.mxu0 %v834_v46  ;;  %10945 = vmatprep.subr.mxu1 %v1079_v30 }
 0x44f   :  { %10952 = vmatprep.subr.mxu0 %v1091_v35 }
 0x450   :  { %10946 = vmatpush3.xpose.msra.mxu1 %v1079_v30 }
 0x451   :  { %10953 = vmatpush3.xpose.msra.mxu0 %v1091_v35  ;;  %10957 = vmatprep.subr.mxu1 %v1109_v55 }
 0x452   :  { %10964 = vmatprep.subr.mxu0 %v1121_v5 }
 0x453   :  { %10948 = vmatmul.mubr.f32.vlgmr.msra.gmra.mxu1 %v828_v40 }
 0x454   :  { %10955 = vmatmul.mubr.f32.vlgmr.msra.gmra.mxu0 %v840_v43  ;;  %10958 = vmatpush3.xpose.msra.mxu1 %v1109_v55 }
 0x455   :  { %10961 = vmatprep.mubr.f32.mxu1 %v846_v48  ;;  %10965 = vmatpush3.xpose.msra.mxu0 %v1121_v5 }
 0x456   :  { %10968 = vmatprep.mubr.f32.mxu0 %v858_v42  ;;  %10959 = vmatprep.subr.mxu1 %v1103_v45 }
 0x457   :  { %10966 = vmatprep.subr.mxu0 %v1115_v4 }
 0x458   :  { %10960 = vmatpush3.xpose.msra.mxu1 %v1103_v45 }
 0x459   :  { %10967 = vmatpush3.xpose.msra.mxu0 %v1115_v4  ;;  %10971 = vmatprep.subr.mxu1 %v1133_v20 }
 0x45a   :  { %10978 = vmatprep.subr.mxu0 %v1210_v10 }
 0x45b   :  { %10962 = vmatmul.mubr.f32.vlgmr.msra.gmra.mxu1 %v852_v8 }
 0x45c   :  { %10969 = vmatmul.mubr.f32.vlgmr.msra.gmra.mxu0 %v864_v50  ;;  %10972 = vmatpush3.xpose.msra.mxu1 %v1133_v20 }
 0x45d   :  { %10975 = vmatprep.mubr.f32.mxu1 %v870_v58  ;;  %10979 = vmatpush3.msra.mxu0 %v1210_v10 }
 0x45e   :  { %10973 = vmatprep.subr.mxu1 %v1127_v18  ;;  %10980 = vmatprep.subr.mxu0 %v1204_v44 }
 0x45f   :  { %10981 = vmatpush3.msra.mxu0 %v1204_v44 }
 0x460   :  { %10992 = vmatprep.subr.mxu0 %v13440_v51  ;;  %10974 = vmatpush3.xpose.msra.mxu1 %v1127_v18 }
 0x461   :  { %10985 = vmatprep.subr.mxu1 %v1222_v31 }
 0x463   :  { %10976 = vmatmul.mubr.f32.vlgmr.msra.gmra.mxu1 %v876_v49 }
 0x464   :  { %10986 = vmatpush3.msra.mxu1 %v1222_v31 }
 0x465   :  { %10987 = vmatprep.subr.mxu1 %v1216_v41 }
 0x466   :  { %10988 = vmatpush3.msra.mxu1 %v1216_v41 }
 0x467   :  { %10999 = vmatprep.subr.mxu1 %v13451_v9 }
 0x479   :  { %v13462_v38 = vpop.f32.mrf.mxu0 }
 0x47b   :  { %v13466_v17 = vpop.f32.mrf.mxu0 }
 0x489   :  { %v13468_v0 = vpop.f32.mrf.mxu0 }
 0x48b   :  { %v13472_v61 = vpop.f32.mrf.mxu0 }
 0x49d   :  { %v13454_v53 = vpop.f32.mrf.mxu1 }
 0x49e   :  { %v13476_v23 = vpop.f32.mrf.mxu0 }
 0x49f   :  { %v13456_v19 = vpop.f32.mrf.mxu1 }
 0x4a0   :  { %v13480_v29 = vpop.f32.mrf.mxu0 }
 0x4a3   :  { %v13458_v14 = vpop.f32.mrf.mxu1 }
 0x4a5   :  { %v13460_v7 = vpop.f32.mrf.mxu1 }
 0x4a7   :  { %v13464_v47 = vpop.f32.mrf.mxu1 }
 0x4a9   :  { %v13470_v59 = vpop.f32.mrf.mxu1 }
 0x4aa   :  { %v13482_v30 = vpop.f32.mrf.mxu0 }
 0x4ab   :  { %v13474_v22 = vpop.f32.mrf.mxu1  ;;  %16033 = vst [vmem:[#allocation128_spill] sm:$0xff] %v13482_v30 }
 0x4ac   :  { %v13486_v46 = vpop.f32.mrf.mxu0 }
 0x4ad   :  { %v13478_v12 = vpop.f32.mrf.mxu1  ;;  %16035 = vst [vmem:[#allocation135_spill] sm:$0xff] %v13486_v46 }
 0x4b0   :  { %v13484_v57 = vpop.f32.mrf.mxu1 }
 0x4b1   :  { %16034 = vst [vmem:[#allocation126_spill] sm:$0xff] %v13484_v57 }
 0x4b2   :  { %v13488_v21 = vpop.f32.mrf.mxu1 }
 0x4b4   :  { %v13492_v60 = vpop.f32.mrf.mxu1 }
 0x4b5   :  { %16037 = vst [vmem:[#allocation139_spill] sm:$0xff] %v13492_v60 }
 0x4b6   :  { %v13498_v5 = vpop.f32.mrf.mxu1 }
 0x4b7   :  { %16040 = vst [vmem:[#allocation137_spill] sm:$0xff] %v13498_v5 }
 0x4b9   :  { %v13490_v35 = vpop.f32.mrf.mxu0 }
 0x4ba   :  { %16036 = vst [vmem:[#allocation130_spill] sm:$0xff] %v13490_v35 }
 0x4bb   :  { %v13494_v55 = vpop.f32.mrf.mxu0 }
 0x4bc   :  { %16038 = vst [vmem:[#allocation133_spill] sm:$0xff] %v13494_v55 }
 0x4c1   :  { %v13500_v37 = vpop.f32.mrf.mxu1 }
 0x4c2   :  { %16041 = vst [vmem:[#allocation42_spill] sm:$0xff] %v13500_v37 }
 0x4c3   :  { %v13506_v43 = vpop.f32.mrf.mxu1 }
 0x4c4   :  { %16044 = vst [vmem:[#allocation50_spill] sm:$0xff] %v13506_v43 }
 0x4c9   :  { %v13496_v28 = vpop.f32.mrf.mxu0 }
 0x4ca   :  { %16039 = vst [vmem:[#allocation143_spill] sm:$0xff] %v13496_v28 }
 0x4cb   :  { %v13502_v40 = vpop.f32.mrf.mxu0 }
 0x4cc   :  { %16042 = vst [vmem:[#allocation38_spill] sm:$0xff] %v13502_v40 }
 0x4da   :  { %v13504_v16 = vpop.f32.mrf.mxu0 }
 0x4db   :  { %16043 = vst [vmem:[#allocation39_spill] sm:$0xff] %v13504_v16 }
 0x4dc   :  { %v13510_v52 = vpop.f32.mrf.mxu0 }
 0x4dd   :  { %16046 = vst [vmem:[#allocation41_spill] sm:$0xff] %v13510_v52 }
 0x4df   :  { %v13508_v13 = vpop.f32.mrf.mxu1 }
 0x4e0   :  { %16045 = vst [vmem:[#allocation141_spill] sm:$0xff] %v13508_v13 }
 0x4e1   :  { %v13512_v48 = vpop.f32.mrf.mxu1 }
 0x4e2   :  { %16047 = vst [vmem:[#allocation46_spill] sm:$0xff] %v13512_v48  ;;  %v13514_v3 = vpop.f32.mrf.mxu0 }
 0x4e3   :  { %v5460_v45 = vsel %vm2592_vm2, %v13514_v3, -inf  ;;  %v13520_v42 = vpop.f32.mrf.mxu1 }
 0x4e4   :  { %5461 = vmax.xlane.f32.xlu1 %v5460_v45  ;;  %v13518_v32 = vpop.f32.mrf.mxu0  ;;  %16048 = vst [vmem:[#allocation44_spill] sm:$0xff] %v13520_v42 }
 0x4e5   :  { %v5457_v39 = vsel %vm2592_vm2, %v13518_v32, -inf  ;;  %v13524_v4 = vpop.f32.mrf.mxu1 }
 0x4e6   :  { %5458 = vmax.xlane.f32.xlu0 %v5457_v39  ;;  %16049 = vst [vmem:[#allocation47_spill] sm:$0xff] %v13524_v4 }
 0x4eb   :  { %v13526_v24 = vpop.f32.mrf.mxu1  ;;  %v13528_v20 = vpop.f32.mrf.mxu0 }
 0x4ec   :  { %v5466_v63 = vsel %vm2592_vm2, %v13526_v24, -inf  ;;  %v5472_v62 = vsel %vm2592_vm2, %v13528_v20, -inf }
 0x4ed   :  { %5467 = vmax.xlane.f32.xlu1 %v5466_v63  ;;  %v13532_v10 = vpop.f32.mrf.mxu1  ;;  %v13536_v8 = vpop.f32.mrf.mxu0 }
 0x4ee   :  { %v5463_v25 = vsel %vm2592_vm2, %v13532_v10, -inf  ;;  %v5469_v50 = vsel %vm2592_vm2, %v13536_v8, -inf }
 0x4ef   :  { %5464 = vmax.xlane.f32.xlu0 %v5463_v25 }
 0x4f1   :  { %5473 = vmax.xlane.f32.xlu1 %v5472_v62 }
 0x4f3   :  { %5470 = vmax.xlane.f32.xlu0 %v5469_v50  ;;  %v13542_v11 = vpop.f32.mrf.mxu1 }
 0x4f4   :  { %v13544_v58 = vpop.f32.mrf.mxu0  ;;  %v5478_v15 = vsel %vm2592_vm2, %v13542_v11, -inf }
 0x4f5   :  { %5479 = vmax.xlane.f32.xlu1 %v5478_v15  ;;  %v13548_v18 = vpop.f32.mrf.mxu1  ;;  %v5484_v54 = vsel %vm2592_vm2, %v13544_v58, -inf }
 0x4f6   :  { %v5475_v34 = vsel %vm2592_vm2, %v13548_v18, -inf  ;;  %v13552_v44 = vpop.f32.mrf.mxu0 }
 0x4f7   :  { %5476 = vmax.xlane.f32.xlu0 %v5475_v34  ;;  %v5481_v27 = vsel %vm2592_vm2, %v13552_v44, -inf }
 0x4f9   :  { %5485 = vmax.xlane.f32.xlu1 %v5484_v54 }
 0x4fb   :  { %5482 = vmax.xlane.f32.xlu0 %v5481_v27  ;;  %v13558_v31 = vpop.f32.mrf.mxu1 }
 0x4fc   :  { %v13560_v26 = vpop.f32.mrf.mxu0  ;;  %v5490_v49 = vsel %vm2592_vm2, %v13558_v31, -inf }
 0x4fd   :  { %5491 = vmax.xlane.f32.xlu1 %v5490_v49  ;;  %v13564_v36 = vpop.f32.mrf.mxu1  ;;  %v5496_v45 = vsel %vm2592_vm2, %v13560_v26, -inf }
 0x4fe   :  { %v5487_v41 = vsel %vm2592_vm2, %v13564_v36, -inf  ;;  %v13568_v1 = vpop.f32.mrf.mxu0 }
 0x4ff   :  { %5488 = vmax.xlane.f32.xlu0 %v5487_v41  ;;  %v5493_v39 = vsel %vm2592_vm2, %v13568_v1, -inf }
 0x501   :  { %5497 = vmax.xlane.f32.xlu1 %v5496_v45 }
 0x503   :  { %5494 = vmax.xlane.f32.xlu0 %v5493_v39  ;;  %v13574_v63 = vpop.f32.mrf.mxu1 }
 0x504   :  { %v13576_v25 = vpop.f32.mrf.mxu0  ;;  %v5502_v62 = vsel %vm2592_vm2, %v13574_v63, -inf }
 0x505   :  { %5503 = vmax.xlane.f32.xlu1 %v5502_v62  ;;  %v13580_v50 = vpop.f32.mrf.mxu1  ;;  %v5508_v54 = vsel %vm2592_vm2, %v13576_v25, -inf }
 0x506   :  { %v5499_v15 = vsel %vm2592_vm2, %v13580_v50, -inf  ;;  %v13584_v34 = vpop.f32.mrf.mxu0 }
 0x507   :  { %5500 = vmax.xlane.f32.xlu0 %v5499_v15  ;;  %v5505_v27 = vsel %vm2592_vm2, %v13584_v34, -inf }
 0x509   :  { %5509 = vmax.xlane.f32.xlu1 %v5508_v54 }
 0x50b   :  { %5506 = vmax.xlane.f32.xlu0 %v5505_v27  ;;  %v13590_v49 = vpop.f32.mrf.mxu1 }
 0x50c   :  { %v13592_v41 = vpop.f32.mrf.mxu0  ;;  %v5514_v45 = vsel %vm2592_vm2, %v13590_v49, -inf }
 0x50d   :  { %5515 = vmax.xlane.f32.xlu1 %v5514_v45  ;;  %v13596_v39 = vpop.f32.mrf.mxu1  ;;  %v5520_v54 = vsel %vm2592_vm2, %v13592_v41, -inf }
 0x50e   :  { %v5511_v62 = vsel %vm2592_vm2, %v13596_v39, -inf  ;;  %v13600_v15 = vpop.f32.mrf.mxu0 }
 0x50f   :  { %5512 = vmax.xlane.f32.xlu0 %v5511_v62  ;;  %v5517_v27 = vsel %vm2592_vm2, %v13600_v15, -inf }
 0x511   :  { %5521 = vmax.xlane.f32.xlu1 %v5520_v54 }
 0x513   :  { %5518 = vmax.xlane.f32.xlu0 %v5517_v27  ;;  %v13606_v56 = vpop.f32.mrf.mxu1 }
 0x514   :  { %v5526_v45 = vsel %vm2592_vm2, %v13606_v56, -inf }
 0x515   :  { %5527 = vmax.xlane.f32.xlu1 %v5526_v45  ;;  %v13610_v2 = vpop.f32.mrf.mxu1 }
 0x516   :  { %v5523_v6 = vsel %vm2592_vm2, %v13610_v2, -inf }
 0x517   :  { %5524 = vmax.xlane.f32.xlu0 %v5523_v6 }
 0x56d   :  { %v5462_v62 = vpop.xlane.xlu1 %5461 }
 0x56e   :  { %v5554_v42 = vsub.f32 %v13514_v3, %v5462_v62  ;;  %v13622_v62 = vpop.f32.mrf.mxu0 }
 0x56f   :  { %v5459_v54 = vpop.xlane.xlu0 %5458 }
 0x570   :  { %v5587_v4 = vmul.f32 1.442695, %v5554_v42  ;;  %v5553_v16 = vsub.f32 %v13518_v32, %v5459_v54  ;;  %v5532_v54 = vsel %vm2592_vm2, %v13622_v62, -inf }
 0x572   :  { %11428 = vpow2.f32 %v5587_v4  ;;  %v5585_v27 = vmul.f32 1.442695, %v5553_v16 }
 0x574   :  { %11430 = vpow2.f32 %v5585_v27 }
 0x576   :  { %v5468_v52 = vpop.xlane.xlu1 %5467 }
 0x577   :  { %v5556_v13 = vsub.f32 %v13526_v24, %v5468_v52 }
 0x578   :  { %v5465_v45 = vpop.xlane.xlu0 %5464 }
 0x579   :  { %v5591_v48 = vmul.f32 1.442695, %v5556_v13  ;;  %v5555_v28 = vsub.f32 %v13532_v10, %v5465_v45 }
 0x57a   :  { %v5474_v40 = vpop.xlane.xlu1 %5473 }
 0x57b   :  { %11432 = vpow2.f32 %v5591_v48  ;;  %v5589_v6 = vmul.f32 1.442695, %v5555_v28  ;;  %v5558_v37 = vsub.f32 %v13528_v20, %v5474_v40  ;;  %v13631_v48 = vpop.f32.mrf.mxu0 }
 0x57c   :  { %v5471_v3 = vpop.xlane.xlu0 %5470 }
 0x57d   :  { %11434 = vpow2.f32 %v5589_v6  ;;  %v5595_v42 = vmul.f32 1.442695, %v5558_v37  ;;  %v5557_v32 = vsub.f32 %v13536_v8, %v5471_v3  ;;  %v13662_v43 = vpop.f32.mrf.mxu0 }
 0x57e   :  { %v5480_v4 = vpop.xlane.xlu1 %5479 }
 0x57f   :  { %v13620_v16 = vpop.eup %11428  ;;  %v5593_v52 = vmul.f32 1.442695, %v5557_v32  ;;  %11436 = vpow2.f32 %v5595_v42  ;;  %v5560_v28 = vsub.f32 %v13542_v11, %v5480_v4  ;;  %v5529_v11 = vsel %vm2592_vm2, %v13631_v48, -inf  ;;  %v13640_v42 = vpop.f32.mrf.mxu1 }
 0x580   :  { %v5477_v24 = vpop.xlane.xlu0 %5476  ;;  %v5652_v13 = vsel %vm2592_vm2, %v13620_v16, 0.0  ;;  %v13670_v35 = vpop.f32.mrf.mxu0 }
 0x581   :  { %v13626_v10 = vpop.eup %11430  ;;  %5653 = vadd.xlane.f32.xlu1 %v5652_v13  ;;  %11438 = vpow2.f32 %v5593_v52  ;;  %v5559_v20 = vsub.f32 %v13548_v18, %v5477_v24  ;;  %v5599_v27 = vmul.f32 1.442695, %v5560_v28 }
 0x582   :  { %v5486_v40 = vpop.xlane.xlu1 %5485  ;;  %v5649_v37 = vsel %vm2592_vm2, %v13626_v10, 0.0 }
 0x583   :  { %5650 = vadd.xlane.f32.xlu0 %v5649_v37  ;;  %v5597_v6 = vmul.f32 1.442695, %v5559_v20  ;;  %11440 = vpow2.f32 %v5599_v27  ;;  %v5562_v18 = vsub.f32 %v13544_v58, %v5486_v40  ;;  %v13650_v37 = vpop.f32.mrf.mxu1  ;;  %v5538_v40 = vsel %vm2592_vm2, %v13640_v42, -inf }
 0x584   :  { %v5483_v8 = vpop.xlane.xlu0 %5482 }
 0x585   :  { %5533 = vmax.xlane.f32.xlu1 %v5532_v54  ;;  %11442 = vpow2.f32 %v5597_v6  ;;  %v5561_v13 = vsub.f32 %v13552_v44, %v5483_v8  ;;  %v5603_v54 = vmul.f32 1.442695, %v5562_v18  ;;  %v5535_v8 = vsel %vm2592_vm2, %v13650_v37, -inf }
 0x586   :  { %v5492_v45 = vpop.xlane.xlu1 %5491 }
 0x587   :  { %5530 = vmax.xlane.f32.xlu0 %v5529_v11  ;;  %v5564_v58 = vsub.f32 %v13558_v31, %v5492_v45  ;;  %v5601_v6 = vmul.f32 1.442695, %v5561_v13  ;;  %11444 = vpow2.f32 %v5603_v54 }
 0x588   :  { %v13638_v3 = vpop.eup %11432  ;;  %v5489_v32 = vpop.xlane.xlu0 %5488 }
 0x589   :  { %v5658_v4 = vsel %vm2592_vm2, %v13638_v3, 0.0  ;;  %v5563_v44 = vsub.f32 %v13564_v36, %v5489_v32  ;;  %v5607_v31 = vmul.f32 1.442695, %v5564_v58  ;;  %11446 = vpow2.f32 %v5601_v6 }
 0x58a   :  { %v13645_v52 = vpop.eup %11434  ;;  %5659 = vadd.xlane.f32.xlu1 %v5658_v4  ;;  %v5498_v24 = vpop.xlane.xlu1 %5497 }
 0x58b   :  { %v5655_v28 = vsel %vm2592_vm2, %v13645_v52, 0.0  ;;  %v5566_v45 = vsub.f32 %v13560_v26, %v5498_v24  ;;  %v5605_v36 = vmul.f32 1.442695, %v5563_v44  ;;  %11448 = vpow2.f32 %v5607_v31  ;;  %v13682_v31 = vpop.f32.mrf.mxu1 }
 0x58c   :  { %v5495_v20 = vpop.xlane.xlu0 %5494  ;;  %5656 = vadd.xlane.f32.xlu0 %v5655_v28  ;;  %v13655_v27 = vpop.eup %11436  ;;  %v5544_v24 = vsel %vm2592_vm2, %v13662_v43, -inf  ;;  %v5541_v44 = vsel %vm2592_vm2, %v13670_v35, -inf }
 0x58d   :  { %v5664_v28 = vsel %vm2592_vm2, %v13655_v27, 0.0  ;;  %v5565_v32 = vsub.f32 %v13568_v1, %v5495_v20  ;;  %v5611_v54 = vmul.f32 1.442695, %v5566_v45  ;;  %11450 = vpow2.f32 %v5605_v36 }
 0x58e   :  { %5539 = vmax.xlane.f32.xlu1 %v5538_v40  ;;  %v5504_v11 = vpop.xlane.xlu1 %5503  ;;  %v13660_v4 = vpop.eup %11438 }
 0x58f   :  { %v5661_v40 = vsel %vm2592_vm2, %v13660_v4, 0.0  ;;  %v5568_v26 = vsub.f32 %v13574_v63, %v5504_v11  ;;  %v5609_v1 = vmul.f32 1.442695, %v5565_v32  ;;  %11452 = vpow2.f32 %v5611_v54  ;;  %v13690_v32 = vpop.f32.mrf.mxu1 }
 0x590   :  { %v5501_v18 = vpop.xlane.xlu0 %5500  ;;  %5536 = vmax.xlane.f32.xlu0 %v5535_v8  ;;  %v13675_v58 = vpop.eup %11440 }
 0x591   :  { %v5567_v20 = vsub.f32 %v13580_v50, %v5501_v18  ;;  %v5615_v63 = vmul.f32 1.442695, %v5568_v26  ;;  %11454 = vpow2.f32 %v5609_v1  ;;  %v5547_v1 = vsel %vm2592_vm2, %v13690_v32, -inf }
 0x592   :  { %5665 = vadd.xlane.f32.xlu1 %v5664_v28  ;;  %v5510_v13 = vpop.xlane.xlu1 %5509  ;;  %v13680_v8 = vpop.eup %11442  ;;  %v5670_v28 = vsel %vm2592_vm2, %v13675_v58, 0.0 }
 0x593   :  { %v5570_v11 = vsub.f32 %v13576_v25, %v5510_v13  ;;  %v5613_v36 = vmul.f32 1.442695, %v5567_v20  ;;  %v5667_v18 = vsel %vm2592_vm2, %v13680_v8, 0.0  ;;  %11456 = vpow2.f32 %v5615_v63 }
 0x594   :  { %v5507_v55 = vpop.xlane.xlu0 %5506  ;;  %5662 = vadd.xlane.f32.xlu0 %v5661_v40  ;;  %v5550_v25 = vsel %vm2592_vm2, %v13682_v31, -inf  ;;  %v13695_v13 = vpop.eup %11444 }
 0x595   :  { %v5569_v50 = vsub.f32 %v13584_v34, %v5507_v55  ;;  %v5619_v54 = vmul.f32 1.442695, %v5570_v11  ;;  %11458 = vpow2.f32 %v5613_v36 }
 0x596   :  { %5545 = vmax.xlane.f32.xlu1 %v5544_v24  ;;  %v5516_v6 = vpop.xlane.xlu1 %5515  ;;  %v13700_v20 = vpop.eup %11446 }
 0x597   :  { %v5572_v26 = vsub.f32 %v13590_v49, %v5516_v6  ;;  %v5617_v55 = vmul.f32 1.442695, %v5569_v50  ;;  %11460 = vpow2.f32 %v5619_v54  ;;  %v5676_v6 = vsel %vm2592_vm2, %v13695_v13, 0.0 }
 0x598   :  { %v5513_v45 = vpop.xlane.xlu0 %5512  ;;  %5542 = vmax.xlane.f32.xlu0 %v5541_v44  ;;  %v13705_v63 = vpop.eup %11448 }
 0x599   :  { %v5571_v34 = vsub.f32 %v13596_v39, %v5513_v45  ;;  %v5623_v44 = vmul.f32 1.442695, %v5572_v26  ;;  %11462 = vpow2.f32 %v5617_v55  ;;  %v5673_v45 = vsel %vm2592_vm2, %v13700_v20, 0.0 }
 0x59a   :  { %5671 = vadd.xlane.f32.xlu1 %v5670_v28  ;;  %v5522_v40 = vpop.xlane.xlu1 %5521  ;;  %v13710_v36 = vpop.eup %11450 }
 0x59b   :  { %v5574_v49 = vsub.f32 %v13592_v41, %v5522_v40  ;;  %v5621_v28 = vmul.f32 1.442695, %v5571_v34  ;;  %11464 = vpow2.f32 %v5623_v44  ;;  %v5682_v40 = vsel %vm2592_vm2, %v13705_v63, 0.0 }
 0x59c   :  { %5668 = vadd.xlane.f32.xlu0 %v5667_v18  ;;  %v5519_v24 = vpop.xlane.xlu0 %5518  ;;  %v13715_v54 = vpop.eup %11452 }
 0x59d   :  { %v5573_v39 = vsub.f32 %v13600_v15, %v5519_v24  ;;  %v5627_v41 = vmul.f32 1.442695, %v5574_v49  ;;  %11466 = vpow2.f32 %v5621_v28 }
 0x59e   :  { %5551 = vmax.xlane.f32.xlu1 %v5550_v25  ;;  %v5528_v11 = vpop.xlane.xlu1 %5527  ;;  %v5679_v25 = vsel %vm2592_vm2, %v13710_v36, 0.0  ;;  %v13720_v24 = vpop.eup %11454 }
 0x59f   :  { %v5576_v18 = vsub.f32 %v13606_v56, %v5528_v11  ;;  %v5625_v26 = vmul.f32 1.442695, %v5573_v39  ;;  %11468 = vpow2.f32 %v5627_v41  ;;  %v5688_v56 = vsel %vm2592_vm2, %v13715_v54, 0.0 }
 0x5a0   :  { %5548 = vmax.xlane.f32.xlu0 %v5547_v1  ;;  %v5525_v50 = vpop.xlane.xlu0 %5524  ;;  %v13724_v34 = vpop.eup %11456  ;;  %v5685_v44 = vsel %vm2592_vm2, %v13720_v24, 0.0 }
 0x5a1   :  { %v5575_v15 = vsub.f32 %v13610_v2, %v5525_v50  ;;  %v5631_v55 = vmul.f32 1.442695, %v5576_v18  ;;  %11470 = vpow2.f32 %v5625_v26  ;;  %v5694_v49 = vsel %vm2592_vm2, %v13724_v34, 0.0 }
 0x5a2   :  { %5677 = vadd.xlane.f32.xlu1 %v5676_v6  ;;  %v13728_v2 = vpop.eup %11458 }
 0x5a3   :  { %v5629_v1 = vmul.f32 1.442695, %v5575_v15  ;;  %11472 = vpow2.f32 %v5631_v55  ;;  %v5691_v11 = vsel %vm2592_vm2, %v13728_v2, 0.0 }
 0x5a4   :  { %5674 = vadd.xlane.f32.xlu0 %v5673_v45  ;;  %v13732_v6 = vpop.eup %11460 }
 0x5a5   :  { %11474 = vpow2.f32 %v5629_v1  ;;  %v5700_v39 = vsel %vm2592_vm2, %v13732_v6, 0.0 }
 0x5a6   :  { %5683 = vadd.xlane.f32.xlu1 %v5682_v40  ;;  %v13736_v28 = vpop.eup %11462 }
 0x5a7   :  { %v5697_v50 = vsel %vm2592_vm2, %v13736_v28, 0.0 }
 0x5a8   :  { %5680 = vadd.xlane.f32.xlu0 %v5679_v25  ;;  %v13740_v45 = vpop.eup %11464 }
 0x5a9   :  { %v5706_v18 = vsel %vm2592_vm2, %v13740_v45, 0.0 }
 0x5aa   :  { %5689 = vadd.xlane.f32.xlu1 %v5688_v56  ;;  %v13744_v41 = vpop.eup %11466 }
 0x5ab   :  { %v5703_v26 = vsel %vm2592_vm2, %v13744_v41, 0.0 }
 0x5ac   :  { %5686 = vadd.xlane.f32.xlu0 %v5685_v44  ;;  %v13748_v40 = vpop.eup %11468 }
 0x5ad   :  { %v5712_v25 = vsel %vm2592_vm2, %v13748_v40, 0.0 }
 0x5ae   :  { %5695 = vadd.xlane.f32.xlu1 %v5694_v49  ;;  %v13752_v15 = vpop.eup %11470 }
 0x5af   :  { %v5709_v56 = vsel %vm2592_vm2, %v13752_v15, 0.0 }
 0x5b0   :  { %5692 = vadd.xlane.f32.xlu0 %v5691_v11  ;;  %v13756_v55 = vpop.eup %11472 }
 0x5b1   :  { %v5718_v44 = vsel %vm2592_vm2, %v13756_v55, 0.0 }
 0x5b2   :  { %5701 = vadd.xlane.f32.xlu1 %v5700_v39  ;;  %v13760_v1 = vpop.eup %11474 }
 0x5b3   :  { %v5715_v49 = vsel %vm2592_vm2, %v13760_v1, 0.0 }
 0x5b4   :  { %5698 = vadd.xlane.f32.xlu0 %v5697_v50 }
 0x5b6   :  { %5707 = vadd.xlane.f32.xlu1 %v5706_v18 }
 0x5b8   :  { %5704 = vadd.xlane.f32.xlu0 %v5703_v26 }
 0x5ba   :  { %5713 = vadd.xlane.f32.xlu1 %v5712_v25 }
 0x5bc   :  { %5710 = vadd.xlane.f32.xlu0 %v5709_v56 }
 0x5be   :  { %5719 = vadd.xlane.f32.xlu1 %v5718_v44 }
 0x5c0   :  { %5716 = vadd.xlane.f32.xlu0 %v5715_v49 }
 0x60a   :  { %v5654_v11 = vpop.xlane.xlu1 %5653 }
 0x60b   :  { %11476 = vrcp.f32 %v5654_v11 }
 0x60c   :  { %v5651_v39 = vpop.xlane.xlu0 %5650 }
 0x60d   :  { %11478 = vrcp.f32 %v5651_v39 }
 0x60e   :  { %v5534_v50 = vpop.xlane.xlu1 %5533 }
 0x60f   :  { %v5578_v18 = vsub.f32 %v13622_v62, %v5534_v50 }
 0x610   :  { %v5531_v26 = vpop.xlane.xlu0 %5530 }
 0x611   :  { %v5635_v25 = vmul.f32 1.442695, %v5578_v18  ;;  %v5577_v60 = vsub.f32 %v13631_v48, %v5531_v26  ;;  %v16050_v26 = vld [vmem:[#allocation106_spill] sm:$0xff] }
 0x613   :  { %11480 = vpow2.f32 %v5635_v25  ;;  %v5633_v56 = vmul.f32 1.442695, %v5577_v60  ;;  %v5660_v5 = vpop.xlane.xlu1 %5659 }
 0x614   :  { %11482 = vrcp.f32 %v5660_v5 }
 0x615   :  { %11484 = vpow2.f32 %v5633_v56  ;;  %v5657_v44 = vpop.xlane.xlu0 %5656 }
 0x616   :  { %11486 = vrcp.f32 %v5657_v44 }
 0x617   :  { %v5540_v30 = vpop.xlane.xlu1 %5539 }
 0x618   :  { %v5580_v49 = vsub.f32 %v13640_v42, %v5540_v30  ;;  %v11477_v11 = vpop.eup %11476  ;;  %v1228_v30 = vadd.f32 %v16050_v26, %v13422_v33 }
 0x619   :  { %v5537_v46 = vpop.xlane.xlu0 %5536  ;;  %v5778_v48 = vmul.f32 %v11477_v11, %v13620_v16  ;;  %v16051_v16 = vld [vmem:[#allocation111_spill] sm:$0xff] }
 0x61a   :  { %v11479_v39 = vpop.eup %11478  ;;  %v5639_v57 = vmul.f32 1.442695, %v5580_v49  ;;  %v5579_v62 = vsub.f32 %v13650_v37, %v5537_v46 }
 0x61b   :  { %v5666_v50 = vpop.xlane.xlu1 %5665  ;;  %v5777_v18 = vmul.f32 %v11479_v39, %v13626_v10 }
 0x61c   :  { %11488 = vpow2.f32 %v5639_v57  ;;  %v5637_v60 = vmul.f32 1.442695, %v5579_v62  ;;  %v1258_v57 = vadd.f32 %v16051_v16, %v13422_v33 }
 0x61d   :  { %11490 = vrcp.f32 %v5666_v50  ;;  %v5663_v5 = vpop.xlane.xlu0 %5662  ;;  %10982 = vmatprep.mubr.msk.f32.mxu0 %vm2592_vm2, %v5777_v18 }
 0x61e   :  { %11492 = vpow2.f32 %v5637_v60  ;;  %10983 = vmatmul.mubr.msk.f32.vlgmr.msra.gmra.mxu0 %vm2592_vm2, %v5778_v48 }
 0x61f   :  { %11494 = vrcp.f32 %v5663_v5  ;;  %10993 = vmatpush3.msra.mxu0 %v13440_v51  ;;  %v5546_v46 = vpop.xlane.xlu1 %5545 }
 0x620   :  { %v13777_v42 = vpop.eup %11480  ;;  %v5582_v10 = vsub.f32 %v13662_v43, %v5546_v46  ;;  %10994 = vmatprep.subr.mxu0 %v1228_v30 }
 0x621   :  { %v11483_v37 = vpop.eup %11482  ;;  %v5543_v25 = vpop.xlane.xlu0 %5542  ;;  %10995 = vmatpush3.msra.mxu0 %v1228_v30  ;;  %v5724_v56 = vsel %vm2592_vm2, %v13777_v42, 0.0 }
 0x622   :  { %v13784_v44 = vpop.eup %11484  ;;  %v5643_v49 = vmul.f32 1.442695, %v5582_v10  ;;  %v5581_v51 = vsub.f32 %v13670_v35, %v5543_v25  ;;  %11006 = vmatprep.subr.mxu0 %v1258_v57  ;;  %5725 = vadd.xlane.f32.xlu1 %v5724_v56  ;;  %v5780_v18 = vmul.f32 %v11483_v37, %v13638_v3  ;;  %v16052_v35 = vld [vmem:[#allocation108_spill] sm:$0xff]  ;;  %v16053_v3 = vld [vmem:[#allocation113_spill] sm:$0xff] }
 0x623   :  { %v11487_v11 = vpop.eup %11486  ;;  %v5672_v39 = vpop.xlane.xlu1 %5671  ;;  %v5721_v62 = vsel %vm2592_vm2, %v13784_v44, 0.0  ;;  %v1240_v60 = vadd.f32 %v16052_v35, %v13422_v33 }
 0x624   :  { %11496 = vpow2.f32 %v5643_v49  ;;  %v5641_v43 = vmul.f32 1.442695, %v5581_v51  ;;  %5722 = vadd.xlane.f32.xlu0 %v5721_v62  ;;  %v5779_v50 = vmul.f32 %v11487_v11, %v13645_v52  ;;  %v1270_v52 = vadd.f32 %v16053_v3, %v13422_v33 }
 0x625   :  { %11498 = vrcp.f32 %v5672_v39  ;;  %v5669_v48 = vpop.xlane.xlu0 %5668 }
 0x626   :  { %11500 = vpow2.f32 %v5641_v43  ;;  %10989 = vmatprep.mubr.msk.f32.mxu1 %vm2592_vm2, %v5779_v50  ;;  %v16054_v43 = vld [vmem:[#allocation110_spill] sm:$0xff] }
 0x627   :  { %11502 = vrcp.f32 %v5669_v48  ;;  %10990 = vmatmul.mubr.msk.f32.vlgmr.msra.gmra.mxu1 %vm2592_vm2, %v5780_v18  ;;  %v5552_v5 = vpop.xlane.xlu1 %5551  ;;  %v1252_v50 = vadd.f32 %v16054_v43, %v13422_v33 }
 0x628   :  { %11000 = vmatpush3.msra.mxu1 %v13451_v9  ;;  %v5584_v26 = vsub.f32 %v13682_v31, %v5552_v5 }
 0x629   :  { %v13797_v30 = vpop.eup %11488  ;;  %11001 = vmatprep.subr.mxu1 %v1240_v60  ;;  %v5549_v46 = vpop.xlane.xlu0 %5548 }
 0x62a   :  { %v11491_v16 = vpop.eup %11490  ;;  %v5647_v10 = vmul.f32 1.442695, %v5584_v26  ;;  %v5583_v37 = vsub.f32 %v13690_v32, %v5549_v46  ;;  %11002 = vmatpush3.msra.mxu1 %v1240_v60  ;;  %v5730_v25 = vsel %vm2592_vm2, %v13797_v30, 0.0 }
 0x62b   :  { %v13804_v56 = vpop.eup %11492  ;;  %11013 = vmatprep.subr.mxu1 %v1270_v52  ;;  %5731 = vadd.xlane.f32.xlu1 %v5730_v25  ;;  %v5678_v9 = vpop.xlane.xlu1 %5677  ;;  %v5782_v39 = vmul.f32 %v11491_v16, %v13655_v27  ;;  %v16056_v25 = vld [vmem:[#allocation112_spill] sm:$0xff] }
 0x62c   :  { %v11495_v31 = vpop.eup %11494  ;;  %11504 = vpow2.f32 %v5647_v10  ;;  %v5645_v49 = vmul.f32 1.442695, %v5583_v37  ;;  %v5727_v51 = vsel %vm2592_vm2, %v13804_v56, 0.0 }
 0x62d   :  { %11506 = vrcp.f32 %v5678_v9  ;;  %5728 = vadd.xlane.f32.xlu0 %v5727_v51  ;;  %v5675_v11 = vpop.xlane.xlu0 %5674  ;;  %v5781_v32 = vmul.f32 %v11495_v31, %v13660_v4  ;;  %v16055_v4 = vld [vmem:[#allocation115_spill] sm:$0xff]  ;;  %v1264_v9 = vadd.f32 %v16056_v25, %v13422_v33  ;;  %v16060_v25 = vld [vmem:[#allocation116_spill] sm:$0xff] }
 0x62e   :  { %11508 = vpow2.f32 %v5645_v49  ;;  %v1282_v60 = vadd.f32 %v16055_v4, %v13422_v33 }
 0x62f   :  { %11510 = vrcp.f32 %v5675_v11  ;;  %10996 = vmatprep.mubr.msk.f32.mxu0 %vm2592_vm2, %v5781_v32  ;;  %v5684_v62 = vpop.xlane.xlu1 %5683  ;;  %v16057_v11 = vld [vmem:[#allocation117_spill] sm:$0xff] }
 0x630   :  { %10997 = vmatmul.mubr.msk.f32.vlgmr.msra.gmra.mxu0 %vm2592_vm2, %v5782_v39  ;;  %11512 = vrcp.f32 %v5684_v62 }
 0x631   :  { %v13814_v18 = vpop.eup %11496  ;;  %11007 = vmatpush3.msra.mxu0 %v1258_v57  ;;  %v5681_v48 = vpop.xlane.xlu0 %5680 }
 0x632   :  { %v11499_v35 = vpop.eup %11498  ;;  %11008 = vmatprep.subr.mxu0 %v1252_v50  ;;  %11514 = vrcp.f32 %v5681_v48  ;;  %v5736_v27 = vsel %vm2592_vm2, %v13814_v18, 0.0 }
 0x633   :  { %v13820_v5 = vpop.eup %11500  ;;  %11009 = vmatpush3.msra.mxu0 %v1252_v50  ;;  %5737 = vadd.xlane.f32.xlu1 %v5736_v27  ;;  %v5690_v26 = vpop.xlane.xlu1 %5689  ;;  %v5784_v10 = vmul.f32 %v11499_v35, %v13675_v58 }
 0x634   :  { %v11503_v3 = vpop.eup %11502  ;;  %11020 = vmatprep.subr.mxu0 %v1282_v60  ;;  %v5733_v57 = vsel %vm2592_vm2, %v13820_v5, 0.0  ;;  %11516 = vrcp.f32 %v5690_v26  ;;  %v16058_v26 = vld [vmem:[#allocation114_spill] sm:$0xff] }
 0x635   :  { %5734 = vadd.xlane.f32.xlu0 %v5733_v57  ;;  %v5687_v46 = vpop.xlane.xlu0 %5686  ;;  %v5783_v16 = vmul.f32 %v11503_v3, %v13680_v8  ;;  %v1294_v8 = vadd.f32 %v16057_v11, %v13422_v33  ;;  %v1276_v3 = vadd.f32 %v16058_v26, %v13422_v33 }
 0x636   :  { %11518 = vrcp.f32 %v5687_v46 }
 0x637   :  { %11003 = vmatprep.mubr.msk.f32.mxu1 %vm2592_vm2, %v5783_v16  ;;  %v5696_v37 = vpop.xlane.xlu1 %5695 }
 0x638   :  { %11004 = vmatmul.mubr.msk.f32.vlgmr.msra.gmra.mxu1 %vm2592_vm2, %v5784_v10  ;;  %11520 = vrcp.f32 %v5696_v37 }
 0x639   :  { %v13830_v31 = vpop.eup %11504  ;;  %11014 = vmatpush3.msra.mxu1 %v1270_v52  ;;  %v5693_v49 = vpop.xlane.xlu0 %5692 }
 0x63a   :  { %v11507_v51 = vpop.eup %11506  ;;  %11015 = vmatprep.subr.mxu1 %v1264_v9  ;;  %11522 = vrcp.f32 %v5693_v49  ;;  %v5742_v58 = vsel %vm2592_vm2, %v13830_v31, 0.0 }
 0x63b   :  { %v13836_v32 = vpop.eup %11508  ;;  %11016 = vmatpush3.msra.mxu1 %v1264_v9  ;;  %5743 = vadd.xlane.f32.xlu1 %v5742_v58  ;;  %v5702_v39 = vpop.xlane.xlu1 %5701  ;;  %v5786_v35 = vmul.f32 %v11507_v51, %v13695_v13  ;;  %v16059_v13 = vld [vmem:[#allocation119_spill] sm:$0xff]  ;;  %v1288_v9 = vadd.f32 %v16060_v25, %v13422_v33 }
 0x63c   :  { %v11511_v62 = vpop.eup %11510  ;;  %11027 = vmatprep.subr.mxu1 %v1294_v8  ;;  %v5739_v52 = vsel %vm2592_vm2, %v13836_v32, 0.0  ;;  %11524 = vrcp.f32 %v5702_v39  ;;  %v1306_v10 = vadd.f32 %v16059_v13, %v13422_v33 }
 0x63d   :  { %5740 = vadd.xlane.f32.xlu0 %v5739_v52  ;;  %v5699_v43 = vpop.xlane.xlu0 %5698  ;;  %v5785_v50 = vmul.f32 %v11511_v62, %v13700_v20  ;;  %v11513_v48 = vpop.eup %11512  ;;  %v16062_v62 = vld [vmem:[#allocation118_spill] sm:$0xff] }
 0x63e   :  { %11526 = vrcp.f32 %v5699_v43  ;;  %v5788_v46 = vmul.f32 %v11513_v48, %v13705_v63  ;;  %v1300_v52 = vadd.f32 %v16062_v62, %v13422_v33  ;;  %v16071_v62 = vld [vmem:[#allocation140_spill] sm:$0xff] }
 0x63f   :  { %v11515_v4 = vpop.eup %11514  ;;  %11010 = vmatprep.mubr.msk.f32.mxu0 %vm2592_vm2, %v5785_v50  ;;  %v5708_v27 = vpop.xlane.xlu1 %5707 }
 0x640   :  { %11011 = vmatmul.mubr.msk.f32.vlgmr.msra.gmra.mxu0 %vm2592_vm2, %v5786_v35  ;;  %v5787_v57 = vmul.f32 %v11515_v4, %v13710_v36  ;;  %11528 = vrcp.f32 %v5708_v27  ;;  %v16064_v27 = vld [vmem:[#allocation121_spill] sm:$0xff] }
 0x641   :  { %11021 = vmatpush3.msra.mxu0 %v1282_v60  ;;  %v5705_v20 = vpop.xlane.xlu0 %5704  ;;  %v11517_v16 = vpop.eup %11516  ;;  %v16061_v60 = vld [vmem:[#allocation122_spill] sm:$0xff]  ;;  %v1312_v26 = vadd.f32 %v16064_v27, %v13422_v33 }
 0x642   :  { %11022 = vmatprep.subr.mxu0 %v1276_v3  ;;  %11530 = vrcp.f32 %v5705_v20  ;;  %11017 = vmatprep.mubr.msk.f32.mxu1 %vm2592_vm2, %v5787_v57  ;;  %v1318_v49 = vadd.f32 %v16061_v60, %v13422_v33  ;;  %v5790_v51 = vmul.f32 %v11517_v16, %v13715_v54  ;;  %v16063_v54 = vld [vmem:[#allocation125_spill] sm:$0xff]  ;;  %v16066_v16 = vld [vmem:[#allocation123_spill] sm:$0xff]  ;;  %v16069_v60 = vld [vmem:[#allocation136_spill] sm:$0xff] }
 0x643   :  { %v11519_v37 = vpop.eup %11518  ;;  %11023 = vmatpush3.msra.mxu0 %v1276_v3  ;;  %11018 = vmatmul.mubr.msk.f32.vlgmr.msra.gmra.mxu1 %vm2592_vm2, %v5788_v46  ;;  %v5714_v36 = vpop.xlane.xlu1 %5713  ;;  %v1330_v43 = vadd.f32 %v16063_v54, %v13422_v33  ;;  %v1324_v13 = vadd.f32 %v16066_v16, %v13422_v33  ;;  %v16073_v54 = vld [vmem:[#allocation144_spill] sm:$0xff] }
 0x644   :  { %11034 = vmatprep.subr.mxu0 %v1306_v10  ;;  %11028 = vmatpush3.msra.mxu1 %v1294_v8  ;;  %v5789_v63 = vmul.f32 %v11519_v37, %v13720_v24  ;;  %11532 = vrcp.f32 %v5714_v36  ;;  %v16068_v36 = vld [vmem:[#allocation127_spill] sm:$0xff] }
 0x645   :  { %11029 = vmatprep.subr.mxu1 %v1288_v9  ;;  %v5711_v11 = vpop.xlane.xlu0 %5710  ;;  %v11521_v58 = vpop.eup %11520 }
 0x646   :  { %11534 = vrcp.f32 %v5711_v11  ;;  %11030 = vmatpush3.msra.mxu1 %v1288_v9  ;;  %11024 = vmatprep.mubr.msk.f32.mxu0 %vm2592_vm2, %v5789_v63  ;;  %v5792_v50 = vmul.f32 %v11521_v58, %v13724_v34  ;;  %v16065_v34 = vld [vmem:[#allocation129_spill] sm:$0xff]  ;;  %v1336_v63 = vadd.f32 %v16068_v36, %v13422_v33  ;;  %v16070_v58 = vld [vmem:[#allocation131_spill] sm:$0xff]  ;;  %v7118_v36 = vld [vmem:[%s15738_s6 + $0xe8] sm:$0xff] }
 0x647   :  { %v11523_v39 = vpop.eup %11522  ;;  %11041 = vmatprep.subr.mxu1 %v1318_v49  ;;  %11025 = vmatmul.mubr.msk.f32.vlgmr.msra.gmra.mxu0 %vm2592_vm2, %v5790_v51  ;;  %v5720_v24 = vpop.xlane.xlu1 %5719  ;;  %v1342_v3 = vadd.f32 %v16065_v34, %v13422_v33 }
 0x648   :  { %11035 = vmatpush3.msra.mxu0 %v1306_v10  ;;  %v5791_v8 = vmul.f32 %v11523_v39, %v13728_v2  ;;  %11536 = vrcp.f32 %v5720_v24  ;;  %v16067_v10 = vld [vmem:[#allocation132_spill] sm:$0xff]  ;;  %v1348_v39 = vadd.f32 %v16070_v58, %v13422_v33  ;;  %v16072_v24 = vld [vmem:[#allocation134_spill] sm:$0xff]  ;;  %v4253_v58 = vld [vmem:[%s15738_s6 + $0x60] sm:$0xff] }
 0x649   :  { %11036 = vmatprep.subr.mxu0 %v1300_v52  ;;  %v5717_v48 = vpop.xlane.xlu0 %5716  ;;  %v11525_v35 = vpop.eup %11524  ;;  %v1354_v37 = vadd.f32 %v16067_v10, %v13422_v33  ;;  %v16075_v10 = vld [vmem:[#allocation142_spill] sm:$0xff] }
 0x64a   :  { %11538 = vrcp.f32 %v5717_v48  ;;  %11037 = vmatpush3.msra.mxu0 %v1300_v52  ;;  %11031 = vmatprep.mubr.msk.f32.mxu1 %vm2592_vm2, %v5791_v8  ;;  %v5794_v57 = vmul.f32 %v11525_v35, %v13732_v6  ;;  %v1378_v52 = vadd.f32 %v16071_v62, %v13422_v33  ;;  %v1360_v8 = vadd.f32 %v16072_v24, %v13422_v33  ;;  %v7111_v62 = vld [vmem:[%s15738_s6 + $0xb0] sm:$0xff]  ;;  %v7110_v24 = vld [vmem:[%s15738_s6 + $0xa8] sm:$0xff] }
 0x64b   :  { %v11527_v4 = vpop.eup %11526  ;;  %11048 = vmatprep.subr.mxu0 %v1330_v43  ;;  %11032 = vmatmul.mubr.msk.f32.vlgmr.msra.gmra.mxu1 %vm2592_vm2, %v5792_v50 }
 0x64c   :  { %11042 = vmatpush3.msra.mxu1 %v1318_v49  ;;  %v5793_v2 = vmul.f32 %v11527_v4, %v13736_v28  ;;  %v1366_v49 = vadd.f32 %v16069_v60, %v13422_v33  ;;  %v7116_v60 = vld [vmem:[%s15738_s6 + $0xd8] sm:$0xff] }
 0x64d   :  { %11043 = vmatprep.subr.mxu1 %v1312_v26  ;;  %v11529_v46 = vpop.eup %11528 }
 0x64e   :  { %11044 = vmatpush3.msra.mxu1 %v1312_v26  ;;  %11038 = vmatprep.mubr.msk.f32.mxu0 %vm2592_vm2, %v5793_v2  ;;  %v5796_v6 = vmul.f32 %v11529_v46, %v13740_v45  ;;  %v7120_v46 = vld [vmem:[%s15738_s6 + $0xf8] sm:$0xff] }
 0x64f   :  { %v11531_v20 = vpop.eup %11530  ;;  %11055 = vmatprep.subr.mxu1 %v1342_v3  ;;  %11039 = vmatmul.mubr.msk.f32.vlgmr.msra.gmra.mxu0 %vm2592_vm2, %v5794_v57 }
 0x650   :  { %11049 = vmatpush3.msra.mxu0 %v1330_v43  ;;  %v5795_v28 = vmul.f32 %v11531_v20, %v13744_v41  ;;  %v1390_v43 = vadd.f32 %v16073_v54, %v13422_v33  ;;  %v7109_v54 = vld [vmem:[%s15738_s6 + $0xa0] sm:$0xff] }
 0x651   :  { %11050 = vmatprep.subr.mxu0 %v1324_v13  ;;  %v11533_v25 = vpop.eup %11532 }
 0x652   :  { %11051 = vmatpush3.msra.mxu0 %v1324_v13  ;;  %11045 = vmatprep.mubr.msk.f32.mxu1 %vm2592_vm2, %v5795_v28  ;;  %v5798_v45 = vmul.f32 %v11533_v25, %v13748_v40 }
 0x653   :  { %v11535_v9 = vpop.eup %11534  ;;  %11062 = vmatprep.subr.mxu0 %v1354_v37  ;;  %11046 = vmatmul.mubr.msk.f32.vlgmr.msra.gmra.mxu1 %vm2592_vm2, %v5796_v6  ;;  %v4256_v6 = vld [vmem:[%s15738_s6 + $0x78] sm:$0xff] }
 0x654   :  { %11056 = vmatpush3.msra.mxu1 %v1342_v3  ;;  %v5797_v41 = vmul.f32 %v11535_v9, %v13752_v15  ;;  %v16074_v3 = vld [vmem:[#allocation138_spill] sm:$0xff] }
 0x655   :  { %11057 = vmatprep.subr.mxu1 %v1336_v63  ;;  %v11537_v51 = vpop.eup %11536  ;;  %v1372_v57 = vadd.f32 %v16074_v3, %v13422_v33  ;;  %v4243_v3 = vld [vmem:[%s15738_s6 + $0x10] sm:$0xff] }
 0x656   :  { %11058 = vmatpush3.msra.mxu1 %v1336_v63  ;;  %11052 = vmatprep.mubr.msk.f32.mxu0 %vm2592_vm2, %v5797_v41  ;;  %v5800_v40 = vmul.f32 %v11537_v51, %v13756_v55  ;;  %v4255_v51 = vld [vmem:[%s15738_s6 + $0x70] sm:$0xff] }
 0x657   :  { %v11539_v11 = vpop.eup %11538  ;;  %11069 = vmatprep.subr.mxu1 %v1366_v49  ;;  %11053 = vmatmul.mubr.msk.f32.vlgmr.msra.gmra.mxu0 %vm2592_vm2, %v5798_v45  ;;  %v7115_v45 = vld [vmem:[%s15738_s6 + $0xd0] sm:$0xff] }
 0x658   :  { %11063 = vmatpush3.msra.mxu0 %v1354_v37  ;;  %v5799_v15 = vmul.f32 %v11539_v11, %v13760_v1  ;;  %v1384_v37 = vadd.f32 %v16075_v10, %v13422_v33  ;;  %v7119_v33 = vld [vmem:[%s15738_s6 + $0xf0] sm:$0xff]  ;;  %v7113_v11 = vld [vmem:[%s15738_s6 + $0xc0] sm:$0xff] }
 0x659   :  { %11064 = vmatprep.subr.mxu0 %v1348_v39 }
 0x65a   :  { %11065 = vmatpush3.msra.mxu0 %v1348_v39  ;;  %11059 = vmatprep.mubr.msk.f32.mxu1 %vm2592_vm2, %v5799_v15  ;;  %v7112_v39 = vld [vmem:[%s15738_s6 + $0xb8] sm:$0xff] }
 0x65b   :  { %11076 = vmatprep.subr.mxu0 %v1378_v52  ;;  %11060 = vmatmul.mubr.msk.f32.vlgmr.msra.gmra.mxu1 %vm2592_vm2, %v5800_v40  ;;  %v4252_v15 = vld [vmem:[%s15738_s6 + $0x58] sm:$0xff] }
 0x65c   :  { %11070 = vmatpush3.msra.mxu1 %v1366_v49 }
 0x65d   :  { %11071 = vmatprep.subr.mxu1 %v1360_v8 }
 0x65e   :  { %11072 = vmatpush3.msra.mxu1 %v1360_v8  ;;  %v4250_v8 = vld [vmem:[%s15738_s6 + $0x48] sm:$0xff] }
 0x65f   :  { %11083 = vmatprep.subr.mxu1 %v1390_v43 }
 0x6ab   :  { %v5726_v1 = vpop.xlane.xlu1 %5725 }
 0x6ac   :  { %11540 = vrcp.f32 %v5726_v1  ;;  %v7108_v1 = vld [vmem:[%s15738_s6 + $0x98] sm:$0xff] }
 0x6ad   :  { %v5723_v55 = vpop.xlane.xlu0 %5722 }
 0x6ae   :  { %11542 = vrcp.f32 %v5723_v55  ;;  %v4248_v55 = vld [vmem:[%s15738_s6 + $0x38] sm:$0xff] }
 0x6b4   :  { %v5732_v50 = vpop.xlane.xlu1 %5731 }
 0x6b5   :  { %11544 = vrcp.f32 %v5732_v50  ;;  %v7107_v50 = vld [vmem:[%s15738_s6 + $0x90] sm:$0xff] }
 0x6b6   :  { %v5729_v48 = vpop.xlane.xlu0 %5728 }
 0x6b7   :  { %11546 = vrcp.f32 %v5729_v48  ;;  %v4247_v48 = vld [vmem:[%s15738_s6 + $0x30] sm:$0xff] }
 0x6b9   :  { %v11541_v35 = vpop.eup %11540 }
 0x6ba   :  { %v5802_v2 = vmul.f32 %v11541_v35, %v13777_v42  ;;  %v7106_v35 = vld [vmem:[%s15738_s6 + $0x88] sm:$0xff] }
 0x6bb   :  { %v11543_v4 = vpop.eup %11542 }
 0x6bc   :  { %v5738_v27 = vpop.xlane.xlu1 %5737  ;;  %v5801_v26 = vmul.f32 %v11543_v4, %v13784_v44  ;;  %v4246_v4 = vld [vmem:[%s15738_s6 + $0x28] sm:$0xff] }
 0x6bd   :  { %11548 = vrcp.f32 %v5738_v27  ;;  %v7105_v27 = vld [vmem:[%s15738_s6 + $0x80] sm:$0xff] }
 0x6be   :  { %v5735_v34 = vpop.xlane.xlu0 %5734  ;;  %11066 = vmatprep.mubr.msk.f32.mxu0 %vm2592_vm2, %v5801_v26  ;;  %v4245_v26 = vld [vmem:[%s15738_s6 + $0x20] sm:$0xff] }
 0x6bf   :  { %11550 = vrcp.f32 %v5735_v34  ;;  %11067 = vmatmul.mubr.msk.f32.vlgmr.msra.gmra.mxu0 %vm2592_vm2, %v5802_v2  ;;  %v4244_v34 = vld [vmem:[%s15738_s6 + $0x18] sm:$0xff] }
 0x6c0   :  { %11077 = vmatpush3.msra.mxu0 %v1378_v52  ;;  %v4251_v52 = vld [vmem:[%s15738_s6 + $0x50] sm:$0xff] }
 0x6c1   :  { %11078 = vmatprep.subr.mxu0 %v1372_v57 }
 0x6c2   :  { %11079 = vmatpush3.msra.mxu0 %v1372_v57  ;;  %v11545_v44 = vpop.eup %11544 }
 0x6c3   :  { %11090 = vmatprep.subr.mxu0 %v7120_v46  ;;  %v5804_v13 = vmul.f32 %v11545_v44, %v13797_v30  ;;  %v4242_v44 = vld [vmem:[%s15738_s6 + $0x8] sm:$0xff] }
 0x6c4   :  { %v11547_v42 = vpop.eup %11546  ;;  %v5744_v20 = vpop.xlane.xlu1 %5743 }
 0x6c5   :  { %v5803_v16 = vmul.f32 %v11547_v42, %v13804_v56  ;;  %11552 = vrcp.f32 %v5744_v20  ;;  %v4241_v42 = vld [vmem:[%s15738_s6] sm:$0xff] }
 0x6c6   :  { %v5741_v28 = vpop.xlane.xlu0 %5740 }
 0x6c7   :  { %11554 = vrcp.f32 %v5741_v28  ;;  %11073 = vmatprep.mubr.msk.f32.mxu1 %vm2592_vm2, %v5803_v16  ;;  %v16076_v28 = vmov 0.0  }
 0x6c8   :  { %11074 = vmatmul.mubr.msk.f32.vlgmr.msra.gmra.mxu1 %vm2592_vm2, %v5804_v13 }
 0x6c9   :  { %11084 = vmatpush3.msra.mxu1 %v1390_v43  ;;  %v4249_v43 = vld [vmem:[%s15738_s6 + $0x40] sm:$0xff] }
 0x6ca   :  { %11085 = vmatprep.subr.mxu1 %v1384_v37  ;;  %v11549_v25 = vpop.eup %11548 }
 0x6cb   :  { %11086 = vmatpush3.msra.mxu1 %v1384_v37  ;;  %v5806_v9 = vmul.f32 %v11549_v25, %v13814_v18  ;;  %v7117_v18 = vld [vmem:[%s15738_s6 + $0xe0] sm:$0xff] }
 0x6cc   :  { %v11551_v56 = vpop.eup %11550  ;;  %11170 = vmatprep.subr.mxu1 %v4256_v6  ;;  %v16078_v25 = vld [vmem:[#allocation135_spill] sm:$0xff] }
 0x6cd   :  { %v5805_v30 = vmul.f32 %v11551_v56, %v13820_v5 }
 0x6cf   :  { %11080 = vmatprep.mubr.msk.f32.mxu0 %vm2592_vm2, %v5805_v30  ;;  %v16080_v30 = vld [vmem:[#allocation137_spill] sm:$0xff] }
 0x6d0   :  { %11081 = vmatmul.mubr.msk.f32.vlgmr.msra.gmra.mxu0 %vm2592_vm2, %v5806_v9 }
 0x6d1   :  { %11091 = vmatpush3.msra.mxu0 %v7120_v46 }
 0x6d2   :  { %11092 = vmatprep.subr.mxu0 %v7119_v33  ;;  %v11553_v63 = vpop.eup %11552 }
 0x6d3   :  { %11093 = vmatpush3.msra.mxu0 %v7119_v33  ;;  %v5808_v49 = vmul.f32 %v11553_v63, %v13830_v31  ;;  %v7114_v31 = vld [vmem:[%s15738_s6 + $0xc8] sm:$0xff]  ;;  %v16082_v33 = vld [vmem:[#allocation133_spill] sm:$0xff]  ;;  %v16084_v63 = vld [vmem:[#allocation50_spill] sm:$0xff] }
 0x6d4   :  { %v11555_v5 = vpop.eup %11554  ;;  %11094 = vmatprep.subr.mxu0 %v7118_v36 }
 0x6d5   :  { %11095 = vmatpush3.msra.mxu0 %v7118_v36  ;;  %v5807_v41 = vmul.f32 %v11555_v5, %v13836_v32  ;;  %v4254_v32 = vld [vmem:[%s15738_s6 + $0x68] sm:$0xff]  ;;  %v16083_v36 = vld [vmem:[#allocation130_spill] sm:$0xff] }
 0x6d6   :  { %11096 = vmatprep.subr.mxu0 %v7117_v18  ;;  %v16086_v5 = vld [vmem:[#allocation38_spill] sm:$0xff] }
 0x6d7   :  { %11097 = vmatpush3.msra.mxu0 %v7117_v18  ;;  %11087 = vmatprep.mubr.msk.f32.mxu1 %vm2592_vm2, %v5807_v41  ;;  %v16085_v18 = vld [vmem:[#allocation42_spill] sm:$0xff]  ;;  %v16087_v41 = vld [vmem:[#allocation143_spill] sm:$0xff] }
 0x6d8   :  { %11098 = vmatprep.subr.mxu0 %v7116_v60  ;;  %11088 = vmatmul.mubr.msk.f32.vlgmr.msra.gmra.mxu1 %vm2592_vm2, %v5808_v49  ;;  %v16089_v49 = vld [vmem:[#allocation141_spill] sm:$0xff] }
 0x6d9   :  { %11099 = vmatpush3.msra.mxu0 %v7116_v60  ;;  %11171 = vmatpush3.msra.mxu1 %v4256_v6  ;;  %v16088_v60 = vld [vmem:[#allocation46_spill] sm:$0xff] }
 0x6da   :  { %11100 = vmatprep.subr.mxu0 %v7115_v45  ;;  %11172 = vmatprep.subr.mxu1 %v4255_v51 }
 0x6db   :  { %11202 = vmatprep.mubr.f32.mxu1 %v13456_v19  ;;  %11101 = vmatpush3.msra.mxu0 %v7115_v45  ;;  %v16090_v45 = vld [vmem:[#allocation41_spill] sm:$0xff] }
 0x6dc   :  { %11173 = vmatpush3.msra.mxu1 %v4255_v51  ;;  %11102 = vmatprep.subr.mxu0 %v7114_v31  ;;  %v16091_v51 = vld [vmem:[#allocation39_spill] sm:$0xff] }
 0x6dd   :  { %11174 = vmatprep.subr.mxu1 %v4254_v32  ;;  %11103 = vmatpush3.msra.mxu0 %v7114_v31  ;;  %v16092_v31 = vld [vmem:[#allocation47_spill] sm:$0xff] }
 0x6de   :  { %11175 = vmatpush3.msra.mxu1 %v4254_v32  ;;  %11104 = vmatprep.subr.mxu0 %v7113_v11  ;;  %v10984_v19 = vpop.f32.mrf.mxu0  ;;  %v16093_v32 = vld [vmem:[#allocation44_spill] sm:$0xff] }
 0x6df   :  { %11176 = vmatprep.subr.mxu1 %v4253_v58  ;;  %11105 = vmatpush3.msra.mxu0 %v7113_v11 }
 0x6e0   :  { %11177 = vmatpush3.msra.mxu1 %v4253_v58  ;;  %11106 = vmatprep.subr.mxu0 %v7112_v39  ;;  %v5881_v40 = vpop.f32.mrf.mxu0 }
 0x6e1   :  { %11178 = vmatprep.subr.mxu1 %v4252_v15  ;;  %11107 = vmatpush3.msra.mxu0 %v7112_v39 }
 0x6e2   :  { %11179 = vmatpush3.msra.mxu1 %v4252_v15  ;;  %11108 = vmatprep.subr.mxu0 %v7111_v62 }
 0x6e3   :  { %11180 = vmatprep.subr.mxu1 %v4251_v52  ;;  %11109 = vmatpush3.msra.mxu0 %v7111_v62 }
 0x6e4   :  { %11122 = vmatprep.mubr.f32.mxu0 %v5881_v40  ;;  %11181 = vmatpush3.msra.mxu1 %v4251_v52 }
 0x6e5   :  { %11110 = vmatprep.subr.mxu0 %v7110_v24  ;;  %11182 = vmatprep.subr.mxu1 %v4250_v8 }
 0x6e6   :  { %11111 = vmatpush3.msra.mxu0 %v7110_v24  ;;  %11183 = vmatpush3.msra.mxu1 %v4250_v8 }
 0x6e7   :  { %11112 = vmatprep.subr.mxu0 %v7109_v54  ;;  %11184 = vmatprep.subr.mxu1 %v4249_v43  ;;  %v10991_v2 = vpop.f32.mrf.mxu1 }
 0x6e8   :  { %11113 = vmatpush3.msra.mxu0 %v7109_v54  ;;  %11185 = vmatpush3.msra.mxu1 %v4249_v43 }
 0x6e9   :  { %11114 = vmatprep.subr.mxu0 %v7108_v1  ;;  %11186 = vmatprep.subr.mxu1 %v4248_v55  ;;  %v5962_v57 = vpop.f32.mrf.mxu1 }
 0x6ea   :  { %11115 = vmatpush3.msra.mxu0 %v7108_v1  ;;  %11187 = vmatpush3.msra.mxu1 %v4248_v55 }
 0x6eb   :  { %11116 = vmatprep.subr.mxu0 %v7107_v50  ;;  %11188 = vmatprep.subr.mxu1 %v4247_v48 }
 0x6ec   :  { %11117 = vmatpush3.msra.mxu0 %v7107_v50  ;;  %11189 = vmatpush3.msra.mxu1 %v4247_v48  ;;  %v14057_v50 = vld [vmem:[%s15739_s7] ss:$0 sm:$0xff] }
 0x6ed   :  { %11118 = vmatprep.subr.mxu0 %v7106_v35  ;;  %11190 = vmatprep.subr.mxu1 %v4246_v4 }
 0x6ee   :  { %11119 = vmatpush3.msra.mxu0 %v7106_v35  ;;  %11191 = vmatpush3.msra.mxu1 %v4246_v4 }
 0x6ef   :  { %11120 = vmatprep.subr.mxu0 %v7105_v27  ;;  %11192 = vmatprep.subr.mxu1 %v4245_v26 }
 0x6f0   :  { %11121 = vmatpush3.msra.mxu0 %v7105_v27  ;;  %11193 = vmatpush3.msra.mxu1 %v4245_v26  ;;  %v10998_v46 = vpop.f32.mrf.mxu0 }
 0x6f1   :  { %11123 = vmatmul.mubr.f32.vlgmr.msra.gmra.mxu0 %v10984_v19  ;;  %11194 = vmatprep.subr.mxu1 %v4244_v34 }
 0x6f2   :  { %11125 = vmatprep.mubr.f32.mxu0 %v5962_v57  ;;  %11195 = vmatpush3.msra.mxu1 %v4244_v34  ;;  %v6043_v20 = vpop.f32.mrf.mxu0 }
 0x6f3   :  { %11196 = vmatprep.subr.mxu1 %v4243_v3 }
 0x6f4   :  { %11197 = vmatpush3.msra.mxu1 %v4243_v3 }
 0x6f5   :  { %11126 = vmatmul.mubr.f32.gmra.mxu0 %v10991_v2  ;;  %11198 = vmatprep.subr.mxu1 %v4242_v44 }
 0x6f6   :  { %11128 = vmatprep.mubr.f32.mxu0 %v6043_v20  ;;  %11199 = vmatpush3.msra.mxu1 %v4242_v44 }
 0x6f7   :  { %11200 = vmatprep.subr.mxu1 %v4241_v42 }
 0x6f8   :  { %11201 = vmatpush3.msra.mxu1 %v4241_v42  ;;  %v11005_v16 = vpop.f32.mrf.mxu1 }
 0x6f9   :  { %11129 = vmatmul.mubr.f32.gmra.mxu0 %v10998_v46  ;;  %11203 = vmatmul.mubr.f32.vlgmr.msra.gmra.mxu1 %v13454_v53  ;;  %v16094_v46 = vld [vmem:[#allocation6_spill] sm:$0xff] }
 0x6fa   :  { %11205 = vmatprep.mubr.f32.mxu1 %v13460_v7  ;;  %v6124_v13 = vpop.f32.mrf.mxu1  ;;  %8625 = vmatprep.subr.mxu1 %v16076_v28 }
 0x6fb   :  { %11131 = vmatprep.mubr.f32.mxu0 %v6124_v13 }
 0x6fd   :  { %11132 = vmatmul.mubr.f32.gmra.mxu0 %v11005_v16  ;;  %11206 = vmatmul.mubr.f32.gmra.mxu1 %v13458_v14 }
 0x6fe   :  { %11208 = vmatprep.mubr.f32.mxu1 %v13466_v17 }
 0x700   :  { %v11012_v10 = vpop.f32.mrf.mxu0 }
 0x701   :  { %11209 = vmatmul.mubr.f32.gmra.mxu1 %v13462_v38 }
 0x702   :  { %11211 = vmatprep.mubr.f32.mxu1 %v13470_v59  ;;  %v6205_v37 = vpop.f32.mrf.mxu0 }
 0x703   :  { %11134 = vmatprep.mubr.f32.mxu0 %v6205_v37  ;;  %v11019_v6 = vpop.f32.mrf.mxu1 }
 0x704   :  { %11135 = vmatmul.mubr.f32.gmra.mxu0 %v11012_v10  ;;  %v16095_v10 = vld [vmem:[#allocation5_spill] sm:$0xff] }
 0x705   :  { %11212 = vmatmul.mubr.f32.gmra.mxu1 %v13464_v47  ;;  %v6286_v53 = vpop.f32.mrf.mxu1 }
 0x706   :  { %11214 = vmatprep.mubr.f32.mxu1 %v13472_v61  ;;  %11137 = vmatprep.mubr.f32.mxu0 %v6286_v53  ;;  %v16077_v61 = vld [vmem:[#allocation126_spill] sm:$0xff] }
 0x707   :  { %v11026_v7 = vpop.f32.mrf.mxu0 }
 0x708   :  { %11138 = vmatmul.mubr.f32.gmra.mxu0 %v11019_v6 }
 0x709   :  { %11215 = vmatmul.mubr.f32.gmra.mxu1 %v13468_v0  ;;  %v6367_v14 = vpop.f32.mrf.mxu0 }
 0x70a   :  { %11217 = vmatprep.mubr.f32.mxu1 %v13478_v12  ;;  %11140 = vmatprep.mubr.f32.mxu0 %v6367_v14 }
 0x70b   :  { %v11033_v38 = vpop.f32.mrf.mxu1 }
 0x70c   :  { %11141 = vmatmul.mubr.f32.gmra.mxu0 %v11026_v7 }
 0x70d   :  { %11218 = vmatmul.mubr.f32.gmra.mxu1 %v13474_v22  ;;  %v6448_v17 = vpop.f32.mrf.mxu1 }
 0x70e   :  { %11220 = vmatprep.mubr.f32.mxu1 %v13480_v29  ;;  %11143 = vmatprep.mubr.f32.mxu0 %v6448_v17  ;;  %v16079_v29 = vld [vmem:[#allocation128_spill] sm:$0xff] }
 0x70f   :  { %v11040_v47 = vpop.f32.mrf.mxu0  ;;  %v16096_v17 = vld [vmem:[#allocation8_spill] sm:$0xff] }
 0x710   :  { %11144 = vmatmul.mubr.f32.gmra.mxu0 %v11033_v38 }
 0x711   :  { %11221 = vmatmul.mubr.f32.gmra.mxu1 %v13476_v23  ;;  %v6529_v59 = vpop.f32.mrf.mxu0 }
 0x712   :  { %11223 = vmatprep.mubr.f32.mxu1 %v13488_v21  ;;  %11146 = vmatprep.mubr.f32.mxu0 %v6529_v59  ;;  %v16081_v21 = vld [vmem:[#allocation139_spill] sm:$0xff] }
 0x713   :  { %v11047_v0 = vpop.f32.mrf.mxu1 }
 0x714   :  { %11147 = vmatmul.mubr.f32.gmra.mxu0 %v11040_v47 }
 0x715   :  { %11224 = vmatmul.mubr.f32.gmra.mxu1 %v16077_v61  ;;  %v6610_v12 = vpop.f32.mrf.mxu1 }
 0x716   :  { %11226 = vmatprep.mubr.f32.mxu1 %v16078_v25  ;;  %11149 = vmatprep.mubr.f32.mxu0 %v6610_v12 }
 0x717   :  { %v11054_v22 = vpop.f32.mrf.mxu0 }
 0x718   :  { %11150 = vmatmul.mubr.f32.gmra.mxu0 %v11047_v0 }
 0x719   :  { %11227 = vmatmul.mubr.f32.gmra.mxu1 %v16079_v29  ;;  %v6691_v56 = vpop.f32.mrf.mxu0 }
 0x71a   :  { %11229 = vmatprep.mubr.f32.mxu1 %v16080_v30  ;;  %11152 = vmatprep.mubr.f32.mxu0 %v6691_v56 }
 0x71b   :  { %v11061_v23 = vpop.f32.mrf.mxu1 }
 0x71c   :  { %11153 = vmatmul.mubr.f32.gmra.mxu0 %v11054_v22  ;;  %v16097_v22 = vld [vmem:[#allocation7_spill] sm:$0xff] }
 0x71d   :  { %11230 = vmatmul.mubr.f32.gmra.mxu1 %v16081_v21  ;;  %v6772_v9 = vpop.f32.mrf.mxu1 }
 0x71e   :  { %11232 = vmatprep.mubr.f32.mxu1 %v16082_v33  ;;  %11155 = vmatprep.mubr.f32.mxu0 %v6772_v9  ;;  %v16098_v33 = vld [vmem:[#allocation10_spill] sm:$0xff] }
 0x720   :  { %11156 = vmatmul.mubr.f32.gmra.mxu0 %v11061_v23 }
 0x721   :  { %11233 = vmatmul.mubr.f32.gmra.mxu1 %v16083_v36 }
 0x722   :  { %11235 = vmatprep.mubr.f32.mxu1 %v16084_v63 }
 0x725   :  { %11236 = vmatmul.mubr.f32.gmra.mxu1 %v16085_v18 }
 0x726   :  { %11238 = vmatprep.mubr.f32.mxu1 %v16086_v5 }
 0x729   :  { %11239 = vmatmul.mubr.f32.gmra.mxu1 %v16087_v41 }
 0x72a   :  { %11241 = vmatprep.mubr.f32.mxu1 %v16088_v60 }
 0x72d   :  { %11242 = vmatmul.mubr.f32.gmra.mxu1 %v16089_v49  ;;  %v16099_v49 = vld [vmem:[#allocation9_spill] sm:$0xff] }
 0x72e   :  { %11244 = vmatprep.mubr.f32.mxu1 %v16090_v45 }
 0x731   :  { %11245 = vmatmul.mubr.f32.gmra.mxu1 %v16091_v51 }
 0x732   :  { %11247 = vmatprep.mubr.f32.mxu1 %v16092_v31 }
 0x735   :  { %11248 = vmatmul.mubr.f32.gmra.mxu1 %v16093_v32 }
 0x77f   :  { %v11068_v11 = vpop.f32.mrf.mxu0 }
 0x781   :  { %v6853_v58 = vpop.f32.mrf.mxu0 }
 0x782   :  { %11158 = vmatprep.mubr.f32.mxu0 %v6853_v58 }
 0x783   :  { %11159 = vmatmul.mubr.f32.gmra.mxu0 %v11068_v11 }
 0x788   :  { %v11075_v39 = vpop.f32.mrf.mxu1 }
 0x78a   :  { %v6934_v19 = vpop.f32.mrf.mxu1 }
 0x78b   :  { %11161 = vmatprep.mubr.f32.mxu0 %v6934_v19 }
 0x78c   :  { %11162 = vmatmul.mubr.f32.gmra.mxu0 %v11075_v39  ;;  %v16100_v39 = vld [vmem:[#allocation12_spill] sm:$0xff] }
 0x790   :  { %v11082_v15 = vpop.f32.mrf.mxu0 }
 0x792   :  { %v7015_v62 = vpop.f32.mrf.mxu0 }
 0x793   :  { %11164 = vmatprep.mubr.f32.mxu0 %v7015_v62 }
 0x794   :  { %11165 = vmatmul.mubr.f32.gmra.mxu0 %v11082_v15 }
 0x798   :  { %v11089_v52 = vpop.f32.mrf.mxu1 }
 0x79a   :  { %v7096_v40 = vpop.f32.mrf.mxu1 }
 0x79b   :  { %11167 = vmatprep.mubr.f32.mxu0 %v7096_v40 }
 0x79c   :  { %11168 = vmatmul.mubr.f32.gmra.mxu0 %v11089_v52 }
 0x79d   :  { %8329 = vmatprep.mubr.f32.mxu0 %v16076_v28 }
 0x7b1   :  { %v11124_v24 = vpop.f32.mrf.mxu0 }
 0x7b3   :  { %v7187_v8 = vpop.f32.mrf.mxu0 }
 0x7b5   :  { %v11127_v54 = vpop.f32.mrf.mxu0 }
 0x7b7   :  { %v7197_v43 = vpop.f32.mrf.mxu0 }
 0x7b9   :  { %v11130_v1 = vpop.f32.mrf.mxu0  ;;  %v11204_v55 = vpop.f32.mrf.mxu1 }
 0x7ba   :  { %v7418_v48 = vadd.f32 %v11204_v55, %v11124_v24 }
 0x7bb   :  { %v7207_v35 = vpop.f32.mrf.mxu0  ;;  %v7412_v4 = vpop.f32.mrf.mxu1 }
 0x7bc   :  { %v7579_v27 = vadd.f32 %v14057_v50, %v7418_v48  ;;  %v7413_v26 = vadd.f32 %v7412_v4, %v7187_v8  ;;  %v16101_v8 = vld [vmem:[#allocation11_spill] sm:$0xff]  ;;  %v16102_v4 = vld [vmem:[#allocation14_spill] sm:$0xff] }
 0x7bd   :  { %v11207_v2 = vpop.f32.mrf.mxu1  ;;  %v11133_v3 = vpop.f32.mrf.mxu0 }
 0x7be   :  { %v7578_v34 = vadd.f32 %v14057_v50, %v7413_v26  ;;  %v7428_v57 = vadd.f32 %v11207_v2, %v11127_v54  ;;  %v14062_v44 = vadd.f32 %v7579_v27, %v16094_v46  ;;  %v16103_v46 = vld [vmem:[#allocation13_spill] sm:$0xff] }
 0x7bf   :  { %v7422_v42 = vpop.f32.mrf.mxu1  ;;  %v7217_v53 = vpop.f32.mrf.mxu0 }
 0x7c0   :  { %v7581_v20 = vadd.f32 %v14057_v50, %v7428_v57  ;;  %v7423_v16 = vadd.f32 %v7422_v42, %v7197_v43  ;;  %v7647_v13 = vsel %vm524_vm1, %v14062_v44, 0.0  ;;  %v14068_v37 = vadd.f32 %v7578_v34, %v16095_v10 }
 0x7c1   :  { %7648 = vadd.xlane.f32.xlu1 %v7647_v13  ;;  %v11210_v6 = vpop.f32.mrf.mxu1 }
 0x7c2   :  { %v7580_v7 = vadd.f32 %v14057_v50, %v7423_v16  ;;  %v7438_v14 = vadd.f32 %v11210_v6, %v11130_v1  ;;  %v7644_v38 = vsel %vm524_vm1, %v14068_v37, 0.0  ;;  %v14074_v47 = vadd.f32 %v7581_v20, %v16096_v17 }
 0x7c3   :  { %v7432_v59 = vpop.f32.mrf.mxu1  ;;  %7645 = vadd.xlane.f32.xlu0 %v7644_v38 }
 0x7c4   :  { %v7583_v0 = vadd.f32 %v14057_v50, %v7438_v14  ;;  %v7433_v61 = vadd.f32 %v7432_v59, %v7207_v35  ;;  %v11136_v12 = vpop.f32.mrf.mxu0  ;;  %v7653_v25 = vsel %vm524_vm1, %v14074_v47, 0.0  ;;  %v14080_v29 = vadd.f32 %v7580_v7, %v16097_v22 }
 0x7c5   :  { %7654 = vadd.xlane.f32.xlu1 %v7653_v25  ;;  %v11213_v56 = vpop.f32.mrf.mxu1 }
 0x7c6   :  { %v7582_v30 = vadd.f32 %v14057_v50, %v7433_v61  ;;  %v7448_v23 = vadd.f32 %v11213_v56, %v11133_v3  ;;  %v7227_v21 = vpop.f32.mrf.mxu0  ;;  %v7650_v9 = vsel %vm524_vm1, %v14080_v29, 0.0  ;;  %v14086_v36 = vadd.f32 %v7583_v0, %v16098_v33  ;;  %v16105_v61 = vld [vmem:[#allocation15_spill] sm:$0xff] }
 0x7c7   :  { %v7442_v63 = vpop.f32.mrf.mxu1  ;;  %7651 = vadd.xlane.f32.xlu0 %v7650_v9 }
 0x7c8   :  { %v7585_v18 = vadd.f32 %v14057_v50, %v7448_v23  ;;  %v7443_v5 = vadd.f32 %v7442_v63, %v7217_v53  ;;  %v11139_v41 = vpop.f32.mrf.mxu0  ;;  %v7659_v60 = vsel %vm524_vm1, %v14086_v36, 0.0  ;;  %v14092_v45 = vadd.f32 %v7582_v30, %v16099_v49  ;;  %v16104_v53 = vld [vmem:[#allocation16_spill] sm:$0xff] }
 0x7c9   :  { %7660 = vadd.xlane.f32.xlu1 %v7659_v60  ;;  %v11216_v51 = vpop.f32.mrf.mxu1  ;;  %v16107_v60 = vld [vmem:[#allocation17_spill] sm:$0xff] }
 0x7ca   :  { %v7584_v31 = vadd.f32 %v14057_v50, %v7443_v5  ;;  %v7458_v32 = vadd.f32 %v11216_v51, %v11136_v12  ;;  %v7237_v11 = vpop.f32.mrf.mxu0  ;;  %v7656_v58 = vsel %vm524_vm1, %v14092_v45, 0.0  ;;  %v14098_v19 = vadd.f32 %v7585_v18, %v16100_v39  ;;  %v16108_v39 = vld [vmem:[#allocation20_spill] sm:$0xff] }
 0x7cb   :  { %v7452_v15 = vpop.f32.mrf.mxu1  ;;  %7657 = vadd.xlane.f32.xlu0 %v7656_v58 }
 0x7cc   :  { %v7587_v62 = vadd.f32 %v14057_v50, %v7458_v32  ;;  %v7453_v52 = vadd.f32 %v7452_v15, %v7227_v21  ;;  %v11142_v40 = vpop.f32.mrf.mxu0  ;;  %v7665_v24 = vsel %vm524_vm1, %v14098_v19, 0.0  ;;  %v14104_v54 = vadd.f32 %v7584_v31, %v16101_v8  ;;  %v16106_v21 = vld [vmem:[#allocation18_spill] sm:$0xff] }
 0x7cd   :  { %7666 = vadd.xlane.f32.xlu1 %v7665_v24  ;;  %v11219_v43 = vpop.f32.mrf.mxu1 }
 0x7ce   :  { %v7586_v1 = vadd.f32 %v14057_v50, %v7453_v52  ;;  %v7468_v55 = vadd.f32 %v11219_v43, %v11139_v41  ;;  %v7247_v48 = vpop.f32.mrf.mxu0  ;;  %v7662_v35 = vsel %vm524_vm1, %v14104_v54, 0.0  ;;  %v14110_v27 = vadd.f32 %v7587_v62, %v16102_v4  ;;  %v16109_v43 = vld [vmem:[#allocation19_spill] sm:$0xff] }
 0x7cf   :  { %v7462_v26 = vpop.f32.mrf.mxu1  ;;  %7663 = vadd.xlane.f32.xlu0 %v7662_v35 }
 0x7d0   :  { %v7589_v2 = vadd.f32 %v14057_v50, %v7468_v55  ;;  %v7463_v34 = vadd.f32 %v7462_v26, %v7237_v11  ;;  %v11145_v3 = vpop.f32.mrf.mxu0  ;;  %v7671_v57 = vsel %vm524_vm1, %v14110_v27, 0.0  ;;  %v14116_v42 = vadd.f32 %v7586_v1, %v16103_v46  ;;  %v16110_v26 = vld [vmem:[#allocation22_spill] sm:$0xff] }
 0x7d1   :  { %7672 = vadd.xlane.f32.xlu1 %v7671_v57  ;;  %v11222_v20 = vpop.f32.mrf.mxu1 }
 0x7d2   :  { %v7588_v16 = vadd.f32 %v14057_v50, %v7463_v34  ;;  %v7478_v13 = vadd.f32 %v11222_v20, %v11142_v40  ;;  %v7257_v10 = vpop.f32.mrf.mxu0  ;;  %v7668_v6 = vsel %vm524_vm1, %v14116_v42, 0.0  ;;  %v14122_v7 = vadd.f32 %v7589_v2, %v16104_v53 }
 0x7d3   :  { %v7472_v14 = vpop.f32.mrf.mxu1  ;;  %7669 = vadd.xlane.f32.xlu0 %v7668_v6 }
 0x7d4   :  { %v7591_v38 = vadd.f32 %v14057_v50, %v7478_v13  ;;  %v7473_v17 = vadd.f32 %v7472_v14, %v7247_v48  ;;  %v11148_v59 = vpop.f32.mrf.mxu0  ;;  %v7677_v0 = vsel %vm524_vm1, %v14122_v7, 0.0  ;;  %v14128_v12 = vadd.f32 %v7588_v16, %v16105_v61  ;;  %v16111_v16 = vld [vmem:[#allocation21_spill] sm:$0xff] }
 0x7d5   :  { %7678 = vadd.xlane.f32.xlu1 %v7677_v0  ;;  %v11225_v25 = vpop.f32.mrf.mxu1 }
 0x7d6   :  { %v7590_v22 = vadd.f32 %v14057_v50, %v7473_v17  ;;  %v7488_v56 = vadd.f32 %v11225_v25, %v11145_v3  ;;  %v7267_v30 = vpop.f32.mrf.mxu0  ;;  %v7674_v23 = vsel %vm524_vm1, %v14128_v12, 0.0  ;;  %v14134_v9 = vadd.f32 %v7591_v38, %v16106_v21  ;;  %v16112_v38 = vld [vmem:[#allocation24_spill] sm:$0xff] }
 0x7d7   :  { %v7482_v33 = vpop.f32.mrf.mxu1  ;;  %7675 = vadd.xlane.f32.xlu0 %v7674_v23 }
 0x7d8   :  { %v7593_v63 = vadd.f32 %v14057_v50, %v7488_v56  ;;  %v7483_v18 = vadd.f32 %v7482_v33, %v7257_v10  ;;  %v11151_v5 = vpop.f32.mrf.mxu0  ;;  %v7683_v41 = vsel %vm524_vm1, %v14134_v9, 0.0  ;;  %v14140_v49 = vadd.f32 %v7590_v22, %v16107_v60  ;;  %v16113_v22 = vld [vmem:[#allocation23_spill] sm:$0xff] }
 0x7d9   :  { %7684 = vadd.xlane.f32.xlu1 %v7683_v41  ;;  %v11228_v51 = vpop.f32.mrf.mxu1  ;;  %v16114_v41 = vld [vmem:[#allocation25_spill] sm:$0xff] }
 0x7da   :  { %v7592_v31 = vadd.f32 %v14057_v50, %v7483_v18  ;;  %v7498_v32 = vadd.f32 %v11228_v51, %v11148_v59  ;;  %v7277_v11 = vpop.f32.mrf.mxu0  ;;  %v7680_v58 = vsel %vm524_vm1, %v14140_v49, 0.0  ;;  %v14146_v15 = vadd.f32 %v7593_v63, %v16108_v39 }
 0x7db   :  { %v7492_v62 = vpop.f32.mrf.mxu1  ;;  %7681 = vadd.xlane.f32.xlu0 %v7680_v58 }
 0x7dc   :  { %v7595_v52 = vadd.f32 %v14057_v50, %v7498_v32  ;;  %v7493_v40 = vadd.f32 %v7492_v62, %v7267_v30  ;;  %v11154_v24 = vpop.f32.mrf.mxu0  ;;  %v7689_v8 = vsel %vm524_vm1, %v14146_v15, 0.0  ;;  %v14152_v1 = vadd.f32 %v7592_v31, %v16109_v43 }
 0x7dd   :  { %7690 = vadd.xlane.f32.xlu1 %v7689_v8  ;;  %v11231_v55 = vpop.f32.mrf.mxu1  ;;  %v16117_v8 = vld [vmem:[#allocation28_spill] sm:$0xff] }
 0x7de   :  { %v7594_v48 = vadd.f32 %v14057_v50, %v7493_v40  ;;  %v7508_v35 = vadd.f32 %v11231_v55, %v11151_v5  ;;  %v7686_v4 = vsel %vm524_vm1, %v14152_v1, 0.0  ;;  %v14158_v2 = vadd.f32 %v7595_v52, %v16110_v26  ;;  %v7287_v34 = vpop.f32.mrf.mxu0  ;;  %v16116_v52 = vld [vmem:[#allocation27_spill] sm:$0xff] }
 0x7df   :  { %v7502_v3 = vpop.f32.mrf.mxu1  ;;  %7687 = vadd.xlane.f32.xlu0 %v7686_v4 }
 0x7e0   :  { %v7597_v57 = vadd.f32 %v14057_v50, %v7508_v35  ;;  %v7503_v46 = vadd.f32 %v7502_v3, %v7277_v11  ;;  %v7695_v20 = vsel %vm524_vm1, %v14158_v2, 0.0  ;;  %v14164_v13 = vadd.f32 %v7594_v48, %v16111_v16  ;;  %v11157_v59 = vpop.f32.mrf.mxu0  ;;  %v16115_v11 = vld [vmem:[#allocation26_spill] sm:$0xff] }
 0x7e1   :  { %7696 = vadd.xlane.f32.xlu1 %v7695_v20  ;;  %v11234_v10 = vpop.f32.mrf.mxu1 }
 0x7e2   :  { %v7596_v6 = vadd.f32 %v14057_v50, %v7503_v46  ;;  %v7518_v53 = vadd.f32 %v11234_v10, %v11154_v24  ;;  %v7692_v14 = vsel %vm524_vm1, %v14164_v13, 0.0  ;;  %v14170_v17 = vadd.f32 %v7597_v57, %v16112_v38  ;;  %v7297_v63 = vpop.f32.mrf.mxu0  ;;  %v16118_v10 = vld [vmem:[#allocation29_spill] sm:$0xff] }
 0x7e3   :  { %v7512_v0 = vpop.f32.mrf.mxu1  ;;  %7693 = vadd.xlane.f32.xlu0 %v7692_v14 }
 0x7e4   :  { %v7513_v61 = vadd.f32 %v7512_v0, %v7287_v34  ;;  %v7701_v25 = vsel %vm524_vm1, %v14170_v17, 0.0  ;;  %v14175_v56 = vadd.f32 %v7596_v6, %v16113_v22  ;;  %v7599_v23 = vadd.f32 %v14057_v50, %v7518_v53  ;;  %v16119_v0 = vld [vmem:[#allocation30_spill] sm:$0xff] }
 0x7e5   :  { %7702 = vadd.xlane.f32.xlu1 %v7701_v25  ;;  %v11237_v30 = vpop.f32.mrf.mxu1 }
 0x7e6   :  { %v7598_v21 = vadd.f32 %v14057_v50, %v7513_v61  ;;  %v7698_v33 = vsel %vm524_vm1, %v14175_v56, 0.0  ;;  %v7528_v51 = vadd.f32 %v11237_v30, %v11157_v59  ;;  %v14188_v58 = vadd.f32 %v7599_v23, %v16115_v11 }
 0x7e7   :  { %v7522_v18 = vpop.f32.mrf.mxu1  ;;  %7699 = vadd.xlane.f32.xlu0 %v7698_v33 }
 0x7e8   :  { %v7523_v5 = vadd.f32 %v7522_v18, %v7297_v63  ;;  %v14182_v60 = vadd.f32 %v7598_v21, %v16114_v41  ;;  %v7601_v39 = vadd.f32 %v14057_v50, %v7528_v51  ;;  %v7707_v62 = vsel %vm524_vm1, %v14188_v58, 0.0 }
 0x7e9   :  { %v11240_v48 = vpop.f32.mrf.mxu1 }
 0x7ea   :  { %v7600_v31 = vadd.f32 %v14057_v50, %v7523_v5  ;;  %v7704_v32 = vsel %vm524_vm1, %v14182_v60, 0.0  ;;  %v14199_v43 = vadd.f32 %v7601_v39, %v16117_v8 }
 0x7eb   :  { %7705 = vadd.xlane.f32.xlu1 %v7704_v32  ;;  %v7532_v26 = vpop.f32.mrf.mxu1 }
 0x7ec   :  { %v14194_v40 = vadd.f32 %v7600_v31, %v16116_v52  ;;  %v7713_v55 = vsel %vm524_vm1, %v14199_v43, 0.0 }
 0x7ed   :  { %v11243_v20 = vpop.f32.mrf.mxu1 }
 0x7ee   :  { %v7710_v24 = vsel %vm524_vm1, %v14194_v40, 0.0 }
 0x7ef   :  { %7708 = vadd.xlane.f32.xlu1 %v7707_v62  ;;  %v7542_v25 = vpop.f32.mrf.mxu1 }
 0x7f1   :  { %v11246_v51 = vpop.f32.mrf.mxu1 }
 0x7f3   :  { %7711 = vadd.xlane.f32.xlu1 %v7710_v24  ;;  %v16120_v24 = vld [vmem:[#allocation31_spill] sm:$0xff] }
 0x7f7   :  { %7714 = vadd.xlane.f32.xlu1 %v7713_v55 }
 0x843   :  { %v11160_v35 = vpop.f32.mrf.mxu0 }
 0x844   :  { %v7538_v4 = vadd.f32 %v11240_v48, %v11160_v35 }
 0x845   :  { %v7307_v34 = vpop.f32.mrf.mxu0 }
 0x846   :  { %v7533_v3 = vadd.f32 %v7532_v26, %v7307_v34  ;;  %v7603_v57 = vadd.f32 %v14057_v50, %v7538_v4  ;;  %v7552_v4 = vpop.f32.mrf.mxu1 }
 0x848   :  { %v7602_v46 = vadd.f32 %v14057_v50, %v7533_v3  ;;  %v14211_v61 = vadd.f32 %v7603_v57, %v16119_v0  ;;  %v16121_v3 = vld [vmem:[#allocation32_spill] sm:$0xff] }
 0x84a   :  { %v7649_v16 = vpop.xlane.xlu1 %7648  ;;  %v14206_v6 = vadd.f32 %v7602_v46, %v16118_v10  ;;  %v7719_v41 = vsel %vm524_vm1, %v14211_v61, 0.0 }
 0x84b   :  { %v7742_v53 = vmul.f32 0.0125, %v7649_v16 }
 0x84c   :  { %v7646_v14 = vpop.xlane.xlu0 %7645  ;;  %v11163_v38 = vpop.f32.mrf.mxu0  ;;  %v7716_v59 = vsel %vm524_vm1, %v14206_v6, 0.0 }
 0x84d   :  { %v7741_v22 = vmul.f32 0.0125, %v7646_v14  ;;  %v7548_v30 = vadd.f32 %v11243_v20, %v11163_v38  ;;  %7717 = vadd.xlane.f32.xlu1 %v7716_v59  ;;  %v14214_v33 = vsub.f32 %v14062_v44, %v7742_v53  ;;  %v11249_v38 = vpop.f32.mrf.mxu1 }
 0x84e   :  { %v7655_v23 = vpop.xlane.xlu1 %7654  ;;  %v7317_v21 = vpop.f32.mrf.mxu0 }
 0x84f   :  { %v14217_v63 = vsub.f32 %v14068_v37, %v7741_v22  ;;  %v7543_v18 = vadd.f32 %v7542_v25, %v7317_v21  ;;  %v7605_v31 = vadd.f32 %v14057_v50, %v7548_v30  ;;  %v7744_v44 = vmul.f32 0.0125, %v7655_v23  ;;  %v16122_v21 = vld [vmem:[#allocation33_spill] sm:$0xff] }
 0x850   :  { %v7652_v5 = vpop.xlane.xlu0 %7651  ;;  %v7806_v55 = vmul.f32 %v14214_v33, %v14214_v33 }
 0x851   :  { %v7604_v32 = vadd.f32 %v14057_v50, %v7543_v18  ;;  %v7743_v11 = vmul.f32 0.0125, %v7652_v5  ;;  %7720 = vadd.xlane.f32.xlu1 %v7719_v41  ;;  %v7805_v39 = vmul.f32 %v14217_v63, %v14217_v63  ;;  %v14237_v57 = vadd.f32 %v7605_v31, %v16121_v3  ;;  %v7562_v31 = vpop.f32.mrf.mxu1 }
 0x852   :  { %v7661_v62 = vpop.xlane.xlu1 %7660  ;;  %v7840_v53 = vsel %vm524_vm1, %v7806_v55, 0.0 }
 0x853   :  { %v14226_v37 = vsub.f32 %v14080_v29, %v7743_v11  ;;  %v7837_v52 = vsel %vm524_vm1, %v7805_v39, 0.0  ;;  %v14230_v8 = vadd.f32 %v7604_v32, %v16120_v24  ;;  %v14240_v29 = vsub.f32 %v14074_v47, %v7744_v44  ;;  %v16123_v39 = vld [vmem:[#allocation34_spill] sm:$0xff] }
 0x854   :  { %7838 = vadd.xlane.f32.xlu0 %v7837_v52  ;;  %v7658_v48 = vpop.xlane.xlu0 %7657  ;;  %v11166_v35 = vpop.f32.mrf.mxu0  ;;  %v7725_v47 = vsel %vm524_vm1, %v14237_v57, 0.0  ;;  %v7746_v25 = vmul.f32 0.0125, %v7661_v62 }
 0x855   :  { %v7558_v26 = vadd.f32 %v11246_v51, %v11166_v35  ;;  %v7722_v34 = vsel %vm524_vm1, %v14230_v8, 0.0  ;;  %v7745_v16 = vmul.f32 0.0125, %v7658_v48  ;;  %v7807_v14 = vmul.f32 %v14226_v37, %v14226_v37 }
 0x856   :  { %v7667_v46 = vpop.xlane.xlu1 %7666  ;;  %v7327_v20 = vpop.f32.mrf.mxu0  ;;  %7723 = vadd.xlane.f32.xlu1 %v7722_v34  ;;  %v7808_v5 = vmul.f32 %v14240_v29, %v14240_v29 }
 0x857   :  { %v7553_v10 = vadd.f32 %v7552_v4, %v7327_v20  ;;  %v7607_v59 = vadd.f32 %v14057_v50, %v7558_v26  ;;  %v14252_v30 = vsub.f32 %v14092_v45, %v7745_v16  ;;  %v7843_v23 = vsel %vm524_vm1, %v7807_v14, 0.0 }
 0x858   :  { %7841 = vadd.xlane.f32.xlu0 %v7840_v53  ;;  %v7664_v41 = vpop.xlane.xlu0 %7663  ;;  %v14266_v45 = vsub.f32 %v14086_v36, %v7746_v25  ;;  %v7846_v55 = vsel %vm524_vm1, %v7808_v5, 0.0  ;;  %v7748_v34 = vmul.f32 0.0125, %v7667_v46  ;;  %v8155_v46 = vld [vmem:[%s15742_s10 + $0x90] sm:$0xff]  ;;  %v16125_v25 = vld [vmem:[#allocation36_spill] sm:$0xff] }
 0x859   :  { %v7606_v0 = vadd.f32 %v14057_v50, %v7553_v10  ;;  %v14263_v44 = vadd.f32 %v7607_v59, %v16123_v39  ;;  %v7747_v24 = vmul.f32 0.0125, %v7664_v41  ;;  %v7809_v35 = vmul.f32 %v14252_v30, %v14252_v30  ;;  %v8156_v10 = vld [vmem:[%s15742_s10 + $0x98] sm:$0xff] }
 0x85a   :  { %v14249_v22 = vpop.xlane.xlu1 %7672  ;;  %7726 = vadd.xlane.f32.xlu1 %v7725_v47  ;;  %v7810_v16 = vmul.f32 %v14266_v45, %v14266_v45  ;;  %8277 = vmatprep.subr.mxu0 %v8156_v10  ;;  %v14307_v5 = vsub.f32 %v14098_v19, %v7748_v34  ;;  %v8151_v19 = vld [vmem:[%s15742_s10 + $0x70] sm:$0xff] }
 0x85b   :  { %v14256_v18 = vadd.f32 %v7606_v0, %v16122_v21  ;;  %v7731_v36 = vsel %vm524_vm1, %v14263_v44, 0.0  ;;  %v14283_v53 = vsub.f32 %v14104_v54, %v7747_v24  ;;  %8278 = vmatpush1.msra.mxu0 %v8155_v46  ;;  %v8154_v0 = vld [vmem:[%s15742_s10 + $0x88] sm:$0xff]  ;;  %v8153_v21 = vld [vmem:[%s15742_s10 + $0x80] sm:$0xff] }
 0x85c   :  { %7844 = vadd.xlane.f32.xlu0 %v7843_v23  ;;  %v11169_v51 = vpop.f32.mrf.mxu0  ;;  %v7670_v3 = vpop.xlane.xlu0 %7669  ;;  %8279 = vmatprep.subr.mxu0 %v8154_v0 }
 0x85d   :  { %v7568_v32 = vadd.f32 %v11249_v38, %v11169_v51  ;;  %v7728_v11 = vsel %vm524_vm1, %v14256_v18, 0.0  ;;  %v16124_v38 = vld [vmem:[#allocation35_spill] sm:$0xff]  ;;  %8280 = vmatpush1.msra.mxu0 %v8153_v21  ;;  %v7749_v51 = vmul.f32 0.0125, %v7670_v3 }
 0x85e   :  { %v14268_v62 = vpop.xlane.xlu1 %7678  ;;  %7729 = vadd.xlane.f32.xlu1 %v7728_v11  ;;  %v7337_v52 = vpop.f32.mrf.mxu0  ;;  %v7811_v11 = vmul.f32 %v14283_v53, %v14283_v53 }
 0x85f   :  { %v7563_v48 = vadd.f32 %v7562_v31, %v7337_v52  ;;  %v7609_v4 = vadd.f32 %v14057_v50, %v7568_v32  ;;  %v7852_v32 = vsel %vm524_vm1, %v7810_v16, 0.0  ;;  %v8150_v52 = vld [vmem:[%s15742_s10 + $0x68] sm:$0xff] }
 0x860   :  { %7847 = vadd.xlane.f32.xlu0 %v7846_v55  ;;  %v7676_v39 = vpop.xlane.xlu0 %7675  ;;  %v7855_v3 = vsel %vm524_vm1, %v7811_v11, 0.0  ;;  %v8146_v16 = vld [vmem:[%s15742_s10 + $0x48] sm:$0xff]  ;;  %v8141_v11 = vld [vmem:[%s15742_s10 + $0x20] sm:$0xff] }
 0x861   :  { %v7608_v26 = vadd.f32 %v14057_v50, %v7563_v48  ;;  %v7849_v50 = vsel %vm524_vm1, %v7809_v35, 0.0  ;;  %v14301_v23 = vadd.f32 %v7609_v4, %v16125_v25  ;;  %v8149_v35 = vld [vmem:[%s15742_s10 + $0x60] sm:$0xff]  ;;  %v7750_v4 = vmul.f32 0.0125, %v14249_v22  ;;  %v8147_v22 = vld [vmem:[%s15742_s10 + $0x50] sm:$0xff] }
 0x862   :  { %v7685_v20 = vpop.xlane.xlu1 %7684  ;;  %7732 = vadd.xlane.f32.xlu1 %v7731_v36  ;;  %v14336_v36 = vsub.f32 %v14116_v42, %v7749_v51 }
 0x863   :  { %v7754_v14 = vmul.f32 0.0125, %v7685_v20  ;;  %v14287_v59 = vadd.f32 %v7608_v26, %v16124_v38  ;;  %v7737_v55 = vsel %vm524_vm1, %v14301_v23, 0.0  ;;  %v7812_v20 = vmul.f32 %v14307_v5, %v14307_v5 }
 0x864   :  { %7850 = vadd.xlane.f32.xlu0 %v7849_v50  ;;  %v8145_v50 = vld [vmem:[%s15742_s10 + $0x40] sm:$0xff]  ;;  %v14357_v38 = vsub.f32 %v14110_v27, %v7750_v4  ;;  %v7682_v46 = vpop.xlane.xlu0 %7681  ;;  %v8143_v27 = vld [vmem:[%s15742_s10 + $0x30] sm:$0xff] }
 0x865   :  { %v14296_v54 = vsub.f32 %v14134_v9, %v7754_v14  ;;  %v7734_v47 = vsel %vm524_vm1, %v14287_v59, 0.0  ;;  %v8152_v9 = vld [vmem:[%s15742_s10 + $0x78] sm:$0xff]  ;;  %v7858_v21 = vsel %vm524_vm1, %v7812_v20, 0.0 }
 0x866   :  { %v7691_v41 = vpop.xlane.xlu1 %7690  ;;  %7735 = vadd.xlane.f32.xlu1 %v7734_v47  ;;  %8281 = vmatprep.subr.mxu0 %v8152_v9  ;;  %v7751_v47 = vmul.f32 0.0125, %v7676_v39  ;;  %v8142_v9 = vld [vmem:[%s15742_s10 + $0x28] sm:$0xff]  ;;  %v7752_v39 = vmul.f32 0.0125, %v14268_v62 }
 0x867   :  { %v7756_v31 = vmul.f32 0.0125, %v7691_v41  ;;  %8282 = vmatpush1.msra.mxu0 %v8151_v19  ;;  %v7818_v48 = vmul.f32 %v14296_v54, %v14296_v54  ;;  %v7813_v41 = vmul.f32 %v14336_v36, %v14336_v36  ;;  %v8140_v19 = vld [vmem:[%s15742_s10 + $0x18] sm:$0xff]  ;;  %v8138_v62 = vld [vmem:[%s15742_s10 + $0x8] sm:$0xff] }
 0x868   :  { %7853 = vadd.xlane.f32.xlu0 %v7852_v32  ;;  %8283 = vmatprep.subr.mxu0 %v8150_v52 }
 0x869   :  { %v14322_v24 = vsub.f32 %v14146_v15, %v7756_v31  ;;  %8284 = vmatpush1.msra.mxu0 %v8149_v35  ;;  %v8148_v15 = vld [vmem:[%s15742_s10 + $0x58] sm:$0xff]  ;;  %v7876_v10 = vsel %vm524_vm1, %v7818_v48, 0.0  ;;  %v7861_v52 = vsel %vm524_vm1, %v7813_v41, 0.0  ;;  %v8139_v48 = vld [vmem:[%s15742_s10 + $0x10] sm:$0xff]  ;;  %v7688_v35 = vpop.xlane.xlu0 %7687 }
 0x86a   :  { %v7697_v26 = vpop.xlane.xlu1 %7696  ;;  %7738 = vadd.xlane.f32.xlu1 %v7737_v55  ;;  %8285 = vmatprep.subr.mxu0 %v8148_v15  ;;  %v7814_v55 = vmul.f32 %v14357_v38, %v14357_v38  ;;  %v8137_v15 = vld [vmem:[%s15742_s10] sm:$0xff] }
 0x86b   :  { %v7758_v34 = vmul.f32 0.0125, %v7697_v26  ;;  %8286 = vmatpush1.msra.mxu0 %v8147_v22  ;;  %v7820_v14 = vmul.f32 %v14322_v24, %v14322_v24 }
 0x86c   :  { %7856 = vadd.xlane.f32.xlu0 %v7855_v3  ;;  %8287 = vmatprep.subr.mxu0 %v8146_v16  ;;  %v7753_v3 = vmul.f32 0.0125, %v7682_v46  ;;  %v7864_v20 = vsel %vm524_vm1, %v7814_v55, 0.0 }
 0x86d   :  { %v14348_v42 = vsub.f32 %v14158_v2, %v7758_v34  ;;  %8288 = vmatpush1.msra.mxu0 %v8145_v50  ;;  %v8144_v2 = vld [vmem:[%s15742_s10 + $0x38] sm:$0xff]  ;;  %v7882_v31 = vsel %vm524_vm1, %v7820_v14, 0.0  ;;  %v14403_v34 = vsub.f32 %v14122_v7, %v7752_v39  ;;  %v7755_v50 = vmul.f32 0.0125, %v7688_v35 }
 0x86e   :  { %v7703_v0 = vpop.xlane.xlu1 %7702  ;;  %7877 = vadd.xlane.f32.xlu1 %v7876_v10  ;;  %8289 = vmatprep.subr.mxu0 %v8144_v2  ;;  %v14410_v2 = vsub.f32 %v14140_v49, %v7753_v3 }
 0x86f   :  { %v7760_v25 = vmul.f32 0.0125, %v7703_v0  ;;  %8290 = vmatpush1.msra.mxu0 %v8143_v27  ;;  %v7822_v32 = vmul.f32 %v14348_v42, %v14348_v42  ;;  %v7694_v0 = vpop.xlane.xlu0 %7693  ;;  %v14421_v41 = vsub.f32 %v14152_v1, %v7755_v50 }
 0x870   :  { %7859 = vadd.xlane.f32.xlu0 %v7858_v21  ;;  %8291 = vmatprep.subr.mxu0 %v8142_v9  ;;  %v7757_v27 = vmul.f32 0.0125, %v7694_v0 }
 0x871   :  { %v14372_v51 = vsub.f32 %v14170_v17, %v7760_v25  ;;  %8292 = vmatpush1.msra.mxu0 %v8141_v11  ;;  %v14385_v17 = vsub.f32 %v14128_v12, %v7751_v47  ;;  %v7888_v12 = vsel %vm524_vm1, %v7822_v32, 0.0  ;;  %v7816_v47 = vmul.f32 %v14403_v34, %v14403_v34 }
 0x872   :  { %7883 = vadd.xlane.f32.xlu1 %v7882_v31  ;;  %8293 = vmatprep.subr.mxu0 %v8140_v19  ;;  %v7819_v19 = vmul.f32 %v14421_v41, %v14421_v41  ;;  %v14430_v39 = vsub.f32 %v14164_v13, %v7757_v27 }
 0x873   :  { %8294 = vmatpush1.msra.mxu0 %v8139_v48  ;;  %v7824_v26 = vmul.f32 %v14372_v51, %v14372_v51  ;;  %v7815_v22 = vmul.f32 %v14385_v17, %v14385_v17  ;;  %v7870_v49 = vsel %vm524_vm1, %v7816_v47, 0.0  ;;  %v7700_v31 = vpop.xlane.xlu0 %7699 }
 0x874   :  { %v7706_v4 = vpop.xlane.xlu1 %7705  ;;  %7862 = vadd.xlane.f32.xlu0 %v7861_v52  ;;  %8295 = vmatprep.subr.mxu0 %v8138_v62  ;;  %v7759_v1 = vmul.f32 0.0125, %v7700_v31  ;;  %v7879_v35 = vsel %vm524_vm1, %v7819_v19, 0.0  ;;  %v7821_v13 = vmul.f32 %v14430_v39, %v14430_v39 }
 0x875   :  { %8296 = vmatpush1.msra.mxu0 %v8137_v15  ;;  %v7894_v14 = vsel %vm524_vm1, %v7824_v26, 0.0  ;;  %v7867_v46 = vsel %vm524_vm1, %v7815_v22, 0.0 }
 0x876   :  { %7889 = vadd.xlane.f32.xlu1 %v7888_v12  ;;  %v14440_v62 = vsub.f32 %v14175_v56, %v7759_v1  ;;  %v7761_v12 = vmul.f32 0.0125, %v7706_v4  ;;  %v7885_v3 = vsel %vm524_vm1, %v7821_v13, 0.0 }
 0x878   :  { %v7709_v16 = vpop.xlane.xlu1 %7708  ;;  %7865 = vadd.xlane.f32.xlu0 %v7864_v20  ;;  %v7823_v20 = vmul.f32 %v14440_v62, %v14440_v62 }
 0x879   :  { %v7762_v10 = vmul.f32 0.0125, %v7709_v16 }
 0x87a   :  { %7895 = vadd.xlane.f32.xlu1 %v7894_v14  ;;  %v7891_v4 = vsel %vm524_vm1, %v7823_v20, 0.0 }
 0x87b   :  { %v14413_v7 = vsub.f32 %v14188_v58, %v7762_v10  ;;  %v7817_v58 = vmul.f32 %v14410_v2, %v14410_v2 }
 0x87c   :  { %v7712_v25 = vpop.xlane.xlu1 %7711  ;;  %7868 = vadd.xlane.f32.xlu0 %v7867_v46 }
 0x87d   :  { %v7826_v21 = vmul.f32 %v14413_v7, %v14413_v7  ;;  %v7873_v55 = vsel %vm524_vm1, %v7817_v58, 0.0  ;;  %v7763_v15 = vmul.f32 0.0125, %v7712_v25 }
 0x87f   :  { %v7900_v9 = vsel %vm524_vm1, %v7826_v21, 0.0  ;;  %v14452_v56 = vsub.f32 %v14194_v40, %v7763_v15 }
 0x880   :  { %v7715_v32 = vpop.xlane.xlu1 %7714  ;;  %7871 = vadd.xlane.f32.xlu0 %v7870_v49  ;;  %7901 = vadd.xlane.f32.xlu1 %v7900_v9 }
 0x881   :  { %v7764_v11 = vmul.f32 0.0125, %v7715_v32 }
 0x883   :  { %v14433_v52 = vsub.f32 %v14199_v43, %v7764_v11  ;;  %v14446_v43 = vsub.f32 %v14182_v60, %v7761_v12  ;;  %v7827_v60 = vmul.f32 %v14452_v56, %v14452_v56 }
 0x884   :  { %7874 = vadd.xlane.f32.xlu0 %v7873_v55 }
 0x885   :  { %v7828_v48 = vmul.f32 %v14433_v52, %v14433_v52  ;;  %v7825_v22 = vmul.f32 %v14446_v43, %v14446_v43  ;;  %v7903_v10 = vsel %vm524_vm1, %v7827_v60, 0.0 }
 0x887   :  { %v7906_v26 = vsel %vm524_vm1, %v7828_v48, 0.0  ;;  %v7897_v16 = vsel %vm524_vm1, %v7825_v22, 0.0 }
 0x888   :  { %7880 = vadd.xlane.f32.xlu0 %v7879_v35  ;;  %7907 = vadd.xlane.f32.xlu1 %v7906_v26 }
 0x88c   :  { %7886 = vadd.xlane.f32.xlu0 %v7885_v3 }
 0x890   :  { %7892 = vadd.xlane.f32.xlu0 %v7891_v4 }
 0x894   :  { %7898 = vadd.xlane.f32.xlu0 %v7897_v16 }
 0x898   :  { %7904 = vadd.xlane.f32.xlu0 %v7903_v10 }
 0x8d6   :  { %v7718_v14 = vpop.xlane.xlu1 %7717 }
 0x8d7   :  { %v7765_v50 = vmul.f32 0.0125, %v7718_v14 }
 0x8d9   :  { %v14462_v40 = vsub.f32 %v14206_v6, %v7765_v50 }
 0x8da   :  { %v7721_v0 = vpop.xlane.xlu1 %7720 }
 0x8db   :  { %v7766_v46 = vmul.f32 0.0125, %v7721_v0  ;;  %v7829_v47 = vmul.f32 %v14462_v40, %v14462_v40 }
 0x8dd   :  { %v14467_v25 = vsub.f32 %v14211_v61, %v7766_v46  ;;  %v7839_v21 = vpop.xlane.xlu0 %7838  ;;  %v7909_v27 = vsel %vm524_vm1, %v7829_v47, 0.0 }
 0x8de   :  { %v7933_v49 = vmul.f32 0.0125, %v7839_v21  ;;  %7910 = vadd.xlane.f32.xlu0 %v7909_v27 }
 0x8df   :  { %v7724_v9 = vpop.xlane.xlu1 %7723  ;;  %v7830_v58 = vmul.f32 %v14467_v25, %v14467_v25 }
 0x8e0   :  { %v7965_v31 = vadd.f32 1e-05, %v7933_v49  ;;  %v7767_v6 = vmul.f32 0.0125, %v7724_v9  ;;  %v14497_v49 = vld [vmem:[%s15740_s8] ss:$0 sm:$0xff] }
 0x8e1   :  { %v7842_v32 = vpop.xlane.xlu0 %7841  ;;  %v7912_v11 = vsel %vm524_vm1, %v7830_v58, 0.0 }
 0x8e2   :  { %11556 = vrsqrt.f32 %v7965_v31  ;;  %v14474_v19 = vsub.f32 %v14230_v8, %v7767_v6  ;;  %v7934_v61 = vmul.f32 0.0125, %v7842_v32  ;;  %7913 = vadd.xlane.f32.xlu1 %v7912_v11 }
 0x8e3   :  { %v7727_v1 = vpop.xlane.xlu1 %7726 }
 0x8e4   :  { %v7966_v55 = vadd.f32 1e-05, %v7934_v61  ;;  %v7768_v48 = vmul.f32 0.0125, %v7727_v1  ;;  %v7831_v35 = vmul.f32 %v14474_v19, %v14474_v19 }
 0x8e5   :  { %v7845_v12 = vpop.xlane.xlu0 %7844 }
 0x8e6   :  { %11558 = vrsqrt.f32 %v7966_v55  ;;  %v14479_v26 = vsub.f32 %v14237_v57, %v7768_v48  ;;  %v7935_v13 = vmul.f32 0.0125, %v7845_v12  ;;  %v7915_v15 = vsel %vm524_vm1, %v7831_v35, 0.0 }
 0x8e7   :  { %v7730_v3 = vpop.xlane.xlu1 %7729  ;;  %7916 = vadd.xlane.f32.xlu0 %v7915_v15 }
 0x8e8   :  { %v7967_v8 = vadd.f32 1e-05, %v7935_v13  ;;  %v7769_v20 = vmul.f32 0.0125, %v7730_v3  ;;  %v7832_v4 = vmul.f32 %v14479_v26, %v14479_v26 }
 0x8e9   :  { %v7848_v22 = vpop.xlane.xlu0 %7847 }
 0x8ea   :  { %11560 = vrsqrt.f32 %v7967_v8  ;;  %v14485_v16 = vsub.f32 %v14256_v18, %v7769_v20  ;;  %v7936_v60 = vmul.f32 0.0125, %v7848_v22  ;;  %v7918_v10 = vsel %vm524_vm1, %v7832_v4, 0.0 }
 0x8eb   :  { %v7733_v57 = vpop.xlane.xlu1 %7732  ;;  %7919 = vadd.xlane.f32.xlu1 %v7918_v10 }
 0x8ec   :  { %v7968_v14 = vadd.f32 1e-05, %v7936_v60  ;;  %v7770_v50 = vmul.f32 0.0125, %v7733_v57  ;;  %v7833_v0 = vmul.f32 %v14485_v16, %v14485_v16 }
 0x8ed   :  { %v7851_v46 = vpop.xlane.xlu0 %7850 }
 0x8ee   :  { %11562 = vrsqrt.f32 %v7968_v14  ;;  %v14491_v47 = vsub.f32 %v14263_v44, %v7770_v50  ;;  %v7937_v21 = vmul.f32 0.0125, %v7851_v46  ;;  %v7921_v27 = vsel %vm524_vm1, %v7833_v0, 0.0  ;;  %v14505_v44 = vld [vmem:[%s15741_s9] ss:$0 sm:$0xff] }
 0x8ef   :  { %v11557_v18 = vpop.eup %11556  ;;  %7922 = vadd.xlane.f32.xlu0 %v7921_v27  ;;  %v7736_v9 = vpop.xlane.xlu1 %7735 }
 0x8f0   :  { %v8029_v58 = vmul.f32 %v11557_v18, %v14217_v63  ;;  %v7969_v31 = vadd.f32 1e-05, %v7937_v21  ;;  %v7771_v6 = vmul.f32 0.0125, %v7736_v9  ;;  %v7834_v32 = vmul.f32 %v14491_v47, %v14491_v47 }
 0x8f1   :  { %v7854_v11 = vpop.xlane.xlu0 %7853 }
 0x8f2   :  { %v8067_v61 = vmul.f32 %v14497_v49, %v8029_v58  ;;  %11564 = vrsqrt.f32 %v7969_v31  ;;  %v7938_v1 = vmul.f32 0.0125, %v7854_v11  ;;  %v14509_v55 = vsub.f32 %v14287_v59, %v7771_v6  ;;  %v8601_v11 = vld [vmem:[%s15744_s12 + $0x78] sm:$0xff] }
 0x8f3   :  { %v11559_v48 = vpop.eup %11558  ;;  %v7924_v63 = vsel %vm524_vm1, %v7834_v32, 0.0  ;;  %v7739_v35 = vpop.xlane.xlu1 %7738  ;;  %8626 = vmatpush1.msra.mxu1 %v8601_v11 }
 0x8f4   :  { %v14513_v12 = vadd.f32 %v14505_v44, %v8067_v61  ;;  %v7970_v13 = vadd.f32 1e-05, %v7938_v1  ;;  %7925 = vadd.xlane.f32.xlu1 %v7924_v63  ;;  %v7772_v15 = vmul.f32 0.0125, %v7739_v35  ;;  %v7835_v3 = vmul.f32 %v14509_v55, %v14509_v55  ;;  %8627 = vmatprep.subr.mxu1 %v16076_v28  ;;  %v8600_v63 = vld [vmem:[%s15744_s12 + $0x70] sm:$0xff] }
 0x8f5   :  { %v7857_v8 = vpop.xlane.xlu0 %7856  ;;  %v8030_v20 = vmul.f32 %v11559_v48, %v14214_v33  ;;  %8628 = vmatpush1.msra.mxu1 %v8600_v63 }
 0x8f6   :  { %11566 = vrsqrt.f32 %v7970_v13  ;;  %v7939_v4 = vmul.f32 0.0125, %v7857_v8  ;;  %v14519_v59 = vsub.f32 %v14301_v23, %v7772_v15  ;;  %10089 = vmatmul.mubr.msk.f32.vlgmr.msra.gmra.mxu0 %vm524_vm1, %v14513_v12  ;;  %v7927_v22 = vsel %vm524_vm1, %v7835_v3, 0.0  ;;  %8629 = vmatprep.subr.mxu1 %v16076_v28 }
 0x8f7   :  { %v11561_v60 = vpop.eup %11560  ;;  %8335 = vmatprep.mubr.f32.mxu0 %v16076_v28  ;;  %7928 = vadd.xlane.f32.xlu0 %v7927_v22  ;;  %v8068_v10 = vmul.f32 %v14497_v49, %v8030_v20  ;;  %v8598_v22 = vld [vmem:[%s15744_s12 + $0x60] sm:$0xff] }
 0x8f8   :  { %v7971_v57 = vadd.f32 1e-05, %v7939_v4  ;;  %v7836_v33 = vmul.f32 %v14519_v59, %v14519_v59  ;;  %v8031_v14 = vmul.f32 %v11561_v60, %v14226_v37  ;;  %v7878_v60 = vpop.xlane.xlu1 %7877 }
 0x8f9   :  { %v7860_v50 = vpop.xlane.xlu0 %7859  ;;  %v14530_v23 = vadd.f32 %v14505_v44, %v8068_v10 }
 0x8fa   :  { %11568 = vrsqrt.f32 %v7971_v57  ;;  %v7940_v0 = vmul.f32 0.0125, %v7860_v50  ;;  %v7930_v46 = vsel %vm524_vm1, %v7836_v33, 0.0  ;;  %v8069_v27 = vmul.f32 %v14497_v49, %v8031_v14  ;;  %v8597_v33 = vld [vmem:[%s15744_s12 + $0x58] sm:$0xff] }
 0x8fb   :  { %v11563_v21 = vpop.eup %11562  ;;  %10090 = vmatmul.mubr.msk.f32.gmra.mxu0 %vm524_vm1, %v14530_v23  ;;  %7931 = vadd.xlane.f32.xlu1 %v7930_v46  ;;  %v7946_v46 = vmul.f32 0.0125, %v7878_v60 }
 0x8fc   :  { %v7972_v18 = vadd.f32 1e-05, %v7940_v0  ;;  %8341 = vmatprep.mubr.f32.mxu0 %v16076_v28  ;;  %v8032_v37 = vmul.f32 %v11563_v21, %v14240_v29  ;;  %v14539_v58 = vadd.f32 %v14505_v44, %v8069_v27  ;;  %v8596_v27 = vld [vmem:[%s15744_s12 + $0x50] sm:$0xff]  ;;  %v7884_v11 = vpop.xlane.xlu1 %7883 }
 0x8fd   :  { %v7863_v9 = vpop.xlane.xlu0 %7862 }
 0x8fe   :  { %11570 = vrsqrt.f32 %v7972_v18  ;;  %v7941_v31 = vmul.f32 0.0125, %v7863_v9  ;;  %v8070_v6 = vmul.f32 %v14497_v49, %v8032_v37  ;;  %v8595_v9 = vld [vmem:[%s15744_s12 + $0x48] sm:$0xff] }
 0x8ff   :  { %v11565_v32 = vpop.eup %11564  ;;  %10091 = vmatmul.mubr.msk.f32.gmra.mxu0 %vm524_vm1, %v14539_v58 }
 0x900   :  { %v7973_v61 = vadd.f32 1e-05, %v7941_v31  ;;  %8347 = vmatprep.mubr.f32.mxu0 %v16076_v28  ;;  %v14549_v29 = vadd.f32 %v14505_v44, %v8070_v6  ;;  %v8033_v48 = vmul.f32 %v11565_v32, %v14252_v30  ;;  %v8599_v30 = vld [vmem:[%s15744_s12 + $0x68] sm:$0xff]  ;;  %v7978_v32 = vadd.f32 1e-05, %v7946_v46 }
 0x901   :  { %v7866_v1 = vpop.xlane.xlu0 %7865  ;;  %8630 = vmatpush1.msra.mxu1 %v8599_v30  ;;  %v7948_v30 = vmul.f32 0.0125, %v7884_v11 }
 0x902   :  { %11572 = vrsqrt.f32 %v7973_v61  ;;  %v7942_v35 = vmul.f32 0.0125, %v7866_v1  ;;  %v8071_v15 = vmul.f32 %v14497_v49, %v8033_v48  ;;  %8631 = vmatprep.subr.mxu1 %v16076_v28  ;;  %v8594_v48 = vld [vmem:[%s15744_s12 + $0x40] sm:$0xff] }
 0x903   :  { %v11567_v13 = vpop.eup %11566  ;;  %10092 = vmatmul.mubr.msk.f32.gmra.mxu0 %vm524_vm1, %v14549_v29  ;;  %8632 = vmatpush1.msra.mxu1 %v8598_v22  ;;  %v8592_v22 = vld [vmem:[%s15744_s12 + $0x30] sm:$0xff] }
 0x904   :  { %v8034_v3 = vmul.f32 %v11567_v13, %v14266_v45  ;;  %v7974_v8 = vadd.f32 1e-05, %v7942_v35  ;;  %8353 = vmatprep.mubr.f32.mxu0 %v16076_v28  ;;  %v14566_v4 = vadd.f32 %v14505_v44, %v8071_v15  ;;  %8633 = vmatprep.subr.mxu1 %v16076_v28  ;;  %v8593_v13 = vld [vmem:[%s15744_s12 + $0x38] sm:$0xff] }
 0x905   :  { %v7869_v20 = vpop.xlane.xlu0 %7868  ;;  %8634 = vmatpush1.msra.mxu1 %v8597_v33 }
 0x906   :  { %11574 = vrsqrt.f32 %v7974_v8  ;;  %v7943_v10 = vmul.f32 0.0125, %v7869_v20  ;;  %v8072_v57 = vmul.f32 %v14497_v49, %v8034_v3  ;;  %8635 = vmatprep.subr.mxu1 %v16076_v28 }
 0x907   :  { %v11569_v45 = vpop.eup %11568  ;;  %10093 = vmatmul.mubr.msk.f32.gmra.mxu0 %vm524_vm1, %v14566_v4  ;;  %8636 = vmatpush1.msra.mxu1 %v8596_v27  ;;  %v7890_v27 = vpop.xlane.xlu1 %7889 }
 0x908   :  { %v8035_v14 = vmul.f32 %v11569_v45, %v14283_v53  ;;  %v7975_v50 = vadd.f32 1e-05, %v7943_v10  ;;  %8359 = vmatprep.mubr.f32.mxu0 %v16076_v28  ;;  %v14582_v0 = vadd.f32 %v14505_v44, %v8072_v57  ;;  %8637 = vmatprep.subr.mxu1 %v16076_v28  ;;  %v8591_v57 = vld [vmem:[%s15744_s12 + $0x28] sm:$0xff]  ;;  %v7980_v45 = vadd.f32 1e-05, %v7948_v30 }
 0x909   :  { %v7872_v21 = vpop.xlane.xlu0 %7871  ;;  %8638 = vmatpush1.msra.mxu1 %v8595_v9  ;;  %v8588_v9 = vld [vmem:[%s15744_s12 + $0x10] sm:$0xff] }
 0x90a   :  { %11576 = vrsqrt.f32 %v7975_v50  ;;  %v7944_v18 = vmul.f32 0.0125, %v7872_v21  ;;  %v8073_v53 = vmul.f32 %v14497_v49, %v8035_v14  ;;  %8639 = vmatprep.subr.mxu1 %v16076_v28  ;;  %v8590_v21 = vld [vmem:[%s15744_s12 + $0x20] sm:$0xff] }
 0x90b   :  { %v11571_v37 = vpop.eup %11570  ;;  %10094 = vmatmul.mubr.msk.f32.gmra.mxu0 %vm524_vm1, %v14582_v0  ;;  %8640 = vmatpush1.msra.mxu1 %v8594_v48  ;;  %v7896_v30 = vpop.xlane.xlu1 %7895 }
 0x90c   :  { %v8036_v31 = vmul.f32 %v11571_v37, %v14307_v5  ;;  %v7976_v6 = vadd.f32 1e-05, %v7944_v18  ;;  %8365 = vmatprep.mubr.f32.mxu0 %v16076_v28  ;;  %v14598_v1 = vadd.f32 %v14505_v44, %v8073_v53  ;;  %8641 = vmatprep.subr.mxu1 %v16076_v28  ;;  %v8589_v53 = vld [vmem:[%s15744_s12 + $0x18] sm:$0xff] }
 0x90d   :  { %v7875_v61 = vpop.xlane.xlu0 %7874  ;;  %8642 = vmatpush1.msra.mxu1 %v8593_v13 }
 0x90e   :  { %11578 = vrsqrt.f32 %v7976_v6  ;;  %v7945_v63 = vmul.f32 0.0125, %v7875_v61  ;;  %v8074_v5 = vmul.f32 %v14497_v49, %v8036_v31  ;;  %8643 = vmatprep.subr.mxu1 %v16076_v28 }
 0x90f   :  { %v11573_v35 = vpop.eup %11572  ;;  %10095 = vmatmul.mubr.msk.f32.gmra.mxu0 %vm524_vm1, %v14598_v1  ;;  %11580 = vrsqrt.f32 %v7978_v32  ;;  %8644 = vmatpush1.msra.mxu1 %v8592_v22  ;;  %v7950_v32 = vmul.f32 0.0125, %v7890_v27 }
 0x910   :  { %v8037_v15 = vmul.f32 %v11573_v35, %v14336_v36  ;;  %v7977_v3 = vadd.f32 1e-05, %v7945_v63  ;;  %8371 = vmatprep.mubr.f32.mxu0 %v16076_v28  ;;  %v14614_v8 = vadd.f32 %v14505_v44, %v8074_v5  ;;  %8645 = vmatprep.subr.mxu1 %v16076_v28  ;;  %v8587_v63 = vld [vmem:[%s15744_s12 + $0x8] sm:$0xff] }
 0x911   :  { %v7881_v20 = vpop.xlane.xlu0 %7880  ;;  %8646 = vmatpush1.msra.mxu1 %v8591_v57 }
 0x912   :  { %11582 = vrsqrt.f32 %v7977_v3  ;;  %v7947_v60 = vmul.f32 0.0125, %v7881_v20  ;;  %v8075_v10 = vmul.f32 %v14497_v49, %v8037_v15  ;;  %8647 = vmatprep.subr.mxu1 %v16076_v28  ;;  %v7982_v15 = vadd.f32 1e-05, %v7950_v32 }
 0x913   :  { %v11575_v36 = vpop.eup %11574  ;;  %10096 = vmatmul.mubr.msk.f32.gmra.mxu0 %vm524_vm1, %v14614_v8  ;;  %8648 = vmatpush1.msra.mxu1 %v8590_v21 }
 0x914   :  { %v8038_v33 = vmul.f32 %v11575_v36, %v14357_v38  ;;  %v7979_v14 = vadd.f32 1e-05, %v7947_v60  ;;  %8377 = vmatprep.mubr.f32.mxu0 %v16076_v28  ;;  %v14630_v46 = vadd.f32 %v14505_v44, %v8075_v10  ;;  %8649 = vmatprep.subr.mxu1 %v16076_v28  ;;  %v8616_v36 = vld [vmem:[%s15744_s12 + $0xf0] sm:$0xff]  ;;  %v7952_v10 = vmul.f32 0.0125, %v7896_v30 }
 0x915   :  { %v7887_v50 = vpop.xlane.xlu0 %7886  ;;  %8650 = vmatpush1.msra.mxu1 %v8589_v53  ;;  %v7902_v53 = vpop.xlane.xlu1 %7901 }
 0x916   :  { %11584 = vrsqrt.f32 %v7979_v14  ;;  %v7949_v18 = vmul.f32 0.0125, %v7887_v50  ;;  %v8076_v37 = vmul.f32 %v14497_v49, %v8038_v33  ;;  %8651 = vmatprep.subr.mxu1 %v16076_v28  ;;  %v8615_v50 = vld [vmem:[%s15744_s12 + $0xe8] sm:$0xff] }
 0x917   :  { %v11577_v38 = vpop.eup %11576  ;;  %10097 = vmatmul.mubr.msk.f32.gmra.mxu0 %vm524_vm1, %v14630_v46  ;;  %11586 = vrsqrt.f32 %v7980_v45  ;;  %8652 = vmatpush1.msra.mxu1 %v8588_v9 }
 0x918   :  { %v8039_v31 = vmul.f32 %v11577_v38, %v14385_v17  ;;  %8383 = vmatprep.mubr.f32.mxu0 %v16076_v28  ;;  %v14649_v6 = vadd.f32 %v14505_v44, %v8076_v37  ;;  %v7981_v11 = vadd.f32 1e-05, %v7949_v18  ;;  %8653 = vmatprep.subr.mxu1 %v16076_v28  ;;  %v8586_v17 = vld [vmem:[%s15744_s12] sm:$0xff]  ;;  %v7984_v18 = vadd.f32 1e-05, %v7952_v10  ;;  %v8609_v10 = vld [vmem:[%s15744_s12 + $0xb8] sm:$0xff] }
 0x919   :  { %v7893_v61 = vpop.xlane.xlu0 %7892  ;;  %8654 = vmatpush1.msra.mxu1 %v8587_v63 }
 0x91a   :  { %v8077_v48 = vmul.f32 %v14497_v49, %v8039_v31  ;;  %11588 = vrsqrt.f32 %v7981_v11  ;;  %v7951_v3 = vmul.f32 0.0125, %v7893_v61  ;;  %8655 = vmatprep.subr.mxu1 %v16076_v28  ;;  %v8613_v11 = vld [vmem:[%s15744_s12 + $0xd8] sm:$0xff] }
 0x91b   :  { %v11579_v5 = vpop.eup %11578  ;;  %10098 = vmatmul.mubr.msk.f32.gmra.mxu0 %vm524_vm1, %v14649_v6  ;;  %8656 = vmatpush1.msra.mxu1 %v8586_v17  ;;  %11590 = vrsqrt.f32 %v7982_v15 }
 0x91c   :  { %v8040_v35 = vmul.f32 %v11579_v5, %v14403_v34  ;;  %8389 = vmatprep.mubr.f32.mxu0 %v16076_v28  ;;  %v14665_v13 = vadd.f32 %v14505_v44, %v8077_v48  ;;  %v11581_v20 = vpop.eup %11580  ;;  %v8617_v34 = vld [vmem:[%s15744_s12 + $0xf8] sm:$0xff]  ;;  %8657 = vmatprep.subr.mxu1 %v16076_v28  ;;  %v7983_v14 = vadd.f32 1e-05, %v7951_v3  ;;  %v7954_v48 = vmul.f32 0.0125, %v7902_v53 }
 0x91d   :  { %8658 = vmatpush2.msra.mxu1 %v8617_v34  ;;  %v8042_v33 = vmul.f32 %v11581_v20, %v14296_v54  ;;  %v7899_v21 = vpop.xlane.xlu0 %7898  ;;  %v8614_v54 = vld [vmem:[%s15744_s12 + $0xe0] sm:$0xff] }
 0x91e   :  { %v8078_v22 = vmul.f32 %v14497_v49, %v8040_v35  ;;  %8659 = vmatprep.subr.mxu1 %v16076_v28  ;;  %11592 = vrsqrt.f32 %v7983_v14  ;;  %v7953_v31 = vmul.f32 0.0125, %v7899_v21  ;;  %v8611_v35 = vld [vmem:[%s15744_s12 + $0xc8] sm:$0xff]  ;;  %v7986_v3 = vadd.f32 1e-05, %v7954_v48 }
 0x91f   :  { %v11583_v60 = vpop.eup %11582  ;;  %10099 = vmatmul.mubr.msk.f32.gmra.mxu0 %vm524_vm1, %v14665_v13  ;;  %8660 = vmatpush2.msra.mxu1 %v8616_v36  ;;  %v8080_v32 = vmul.f32 %v14497_v49, %v8042_v33  ;;  %11594 = vrsqrt.f32 %v7984_v18 }
 0x920   :  { %v8041_v57 = vmul.f32 %v11583_v60, %v14410_v2  ;;  %8395 = vmatprep.mubr.f32.mxu0 %v16076_v28  ;;  %v14681_v45 = vadd.f32 %v14505_v44, %v8078_v22  ;;  %8661 = vmatprep.subr.mxu1 %v16076_v28  ;;  %v7985_v63 = vadd.f32 1e-05, %v7953_v31  ;;  %v7908_v22 = vpop.xlane.xlu1 %7907 }
 0x921   :  { %8662 = vmatpush2.msra.mxu1 %v8615_v50  ;;  %v14714_v5 = vadd.f32 %v14505_v44, %v8080_v32  ;;  %v7905_v30 = vpop.xlane.xlu0 %7904  ;;  %v7956_v33 = vmul.f32 0.0125, %v7908_v22  ;;  %v8605_v32 = vld [vmem:[%s15744_s12 + $0x98] sm:$0xff] }
 0x922   :  { %v8079_v27 = vmul.f32 %v14497_v49, %v8041_v57  ;;  %8663 = vmatprep.subr.mxu1 %v16076_v28  ;;  %11596 = vrsqrt.f32 %v7985_v63  ;;  %v7955_v60 = vmul.f32 0.0125, %v7905_v30  ;;  %v8602_v30 = vld [vmem:[%s15744_s12 + $0x80] sm:$0xff] }
 0x923   :  { %v11585_v2 = vpop.eup %11584  ;;  %10100 = vmatmul.mubr.msk.f32.gmra.mxu0 %vm524_vm1, %v14681_v45  ;;  %8664 = vmatpush2.msra.mxu1 %v8614_v54  ;;  %11598 = vrsqrt.f32 %v7986_v3  ;;  %v7988_v18 = vadd.f32 1e-05, %v7956_v33 }
 0x924   :  { %8401 = vmatprep.mubr.f32.mxu0 %v16076_v28  ;;  %v14697_v37 = vadd.f32 %v14505_v44, %v8079_v27  ;;  %v11587_v38 = vpop.eup %11586  ;;  %v8043_v9 = vmul.f32 %v11585_v2, %v14421_v41  ;;  %8665 = vmatprep.subr.mxu1 %v16076_v28  ;;  %v8612_v41 = vld [vmem:[%s15744_s12 + $0xd0] sm:$0xff]  ;;  %v7987_v50 = vadd.f32 1e-05, %v7955_v60  ;;  %v8607_v2 = vld [vmem:[%s15744_s12 + $0xa8] sm:$0xff] }
 0x925   :  { %v8044_v61 = vmul.f32 %v11587_v38, %v14322_v24  ;;  %8666 = vmatpush2.msra.mxu1 %v8613_v11  ;;  %v8610_v24 = vld [vmem:[%s15744_s12 + $0xc0] sm:$0xff] }
 0x926   :  { %v8081_v17 = vmul.f32 %v14497_v49, %v8043_v9  ;;  %8667 = vmatprep.subr.mxu1 %v16076_v28  ;;  %11600 = vrsqrt.f32 %v7987_v50 }
 0x927   :  { %10101 = vmatmul.mubr.msk.f32.gmra.mxu0 %vm524_vm1, %v14697_v37  ;;  %v11589_v15 = vpop.eup %11588  ;;  %8668 = vmatpush2.msra.mxu1 %v8612_v41  ;;  %v8082_v20 = vmul.f32 %v14497_v49, %v8044_v61  ;;  %11602 = vrsqrt.f32 %v7988_v18  ;;  %v8604_v61 = vld [vmem:[%s15744_s12 + $0x90] sm:$0xff] }
 0x928   :  { %8407 = vmatprep.mubr.f32.mxu0 %v16076_v28  ;;  %8669 = vmatprep.subr.mxu1 %v16076_v28  ;;  %v8045_v34 = vmul.f32 %v11589_v15, %v14430_v39  ;;  %v14731_v36 = vadd.f32 %v14505_v44, %v8081_v17  ;;  %v11591_v57 = vpop.eup %11590  ;;  %v8608_v39 = vld [vmem:[%s15744_s12 + $0xb0] sm:$0xff] }
 0x929   :  { %8670 = vmatpush2.msra.mxu1 %v8611_v35  ;;  %v8046_v14 = vmul.f32 %v11591_v57, %v14348_v42  ;;  %v14746_v21 = vadd.f32 %v14505_v44, %v8082_v20  ;;  %v8606_v42 = vld [vmem:[%s15744_s12 + $0xa0] sm:$0xff] }
 0x92a   :  { %8671 = vmatprep.subr.mxu1 %v16076_v28  ;;  %v8083_v27 = vmul.f32 %v14497_v49, %v8045_v34 }
 0x92b   :  { %10102 = vmatmul.mubr.msk.f32.gmra.mxu0 %vm524_vm1, %v14714_v5  ;;  %8672 = vmatpush2.msra.mxu1 %v8610_v24  ;;  %v11593_v54 = vpop.eup %11592  ;;  %v8084_v9 = vmul.f32 %v14497_v49, %v8046_v14 }
 0x92c   :  { %8413 = vmatprep.mubr.f32.mxu0 %v16076_v28  ;;  %8673 = vmatprep.subr.mxu1 %v16076_v28  ;;  %v8047_v38 = vmul.f32 %v11593_v54, %v14440_v62  ;;  %v14762_v53 = vadd.f32 %v14505_v44, %v8083_v27  ;;  %v11595_v31 = vpop.eup %11594 }
 0x92d   :  { %8674 = vmatpush2.msra.mxu1 %v8609_v10  ;;  %v8048_v62 = vmul.f32 %v11595_v31, %v14372_v51  ;;  %v14775_v11 = vadd.f32 %v14505_v44, %v8084_v9  ;;  %v8603_v51 = vld [vmem:[%s15744_s12 + $0x88] sm:$0xff] }
 0x92e   :  { %8675 = vmatprep.subr.mxu1 %v16076_v28  ;;  %v8085_v41 = vmul.f32 %v14497_v49, %v8047_v38 }
 0x92f   :  { %10103 = vmatmul.mubr.msk.f32.gmra.mxu0 %vm524_vm1, %v14731_v36  ;;  %8676 = vmatpush2.msra.mxu1 %v8608_v39  ;;  %v11597_v48 = vpop.eup %11596  ;;  %v8086_v15 = vmul.f32 %v14497_v49, %v8048_v62 }
 0x930   :  { %8419 = vmatprep.mubr.f32.mxu0 %v16076_v28  ;;  %8677 = vmatprep.subr.mxu1 %v16076_v28  ;;  %v11599_v63 = vpop.eup %11598  ;;  %v8049_v17 = vmul.f32 %v11597_v48, %v14446_v43  ;;  %v14791_v35 = vadd.f32 %v14505_v44, %v8085_v41 }
 0x931   :  { %8678 = vmatpush2.msra.mxu1 %v8607_v2  ;;  %v8050_v24 = vmul.f32 %v11599_v63, %v14413_v7  ;;  %v14803_v43 = vadd.f32 %v14505_v44, %v8086_v15 }
 0x932   :  { %8679 = vmatprep.subr.mxu1 %v16076_v28  ;;  %v8087_v3 = vmul.f32 %v14497_v49, %v8049_v17 }
 0x933   :  { %10104 = vmatmul.mubr.msk.f32.gmra.mxu0 %vm524_vm1, %v14746_v21  ;;  %8680 = vmatpush2.msra.mxu1 %v8606_v42  ;;  %v11601_v20 = vpop.eup %11600  ;;  %v8088_v60 = vmul.f32 %v14497_v49, %v8050_v24 }
 0x934   :  { %8425 = vmatprep.mubr.f32.mxu0 %v16076_v28  ;;  %8681 = vmatprep.subr.mxu1 %v16076_v28  ;;  %v8051_v22 = vmul.f32 %v11601_v20, %v14452_v56  ;;  %v14811_v34 = vadd.f32 %v14505_v44, %v8087_v3  ;;  %v11603_v10 = vpop.eup %11602 }
 0x935   :  { %8682 = vmatpush2.msra.mxu1 %v8605_v32  ;;  %v8052_v7 = vmul.f32 %v11603_v10, %v14433_v52  ;;  %v14819_v57 = vadd.f32 %v14505_v44, %v8088_v60 }
 0x936   :  { %8683 = vmatprep.subr.mxu1 %v16076_v28  ;;  %v8089_v39 = vmul.f32 %v14497_v49, %v8051_v22 }
 0x937   :  { %10105 = vmatmul.mubr.msk.f32.gmra.mxu0 %vm524_vm1, %v14762_v53  ;;  %8684 = vmatpush2.msra.mxu1 %v8604_v61  ;;  %v8090_v33 = vmul.f32 %v14497_v49, %v8052_v7 }
 0x938   :  { %8431 = vmatprep.mubr.f32.mxu0 %v16076_v28  ;;  %8685 = vmatprep.subr.mxu1 %v16076_v28  ;;  %v14826_v56 = vadd.f32 %v14505_v44, %v8089_v39 }
 0x939   :  { %8686 = vmatpush2.msra.mxu1 %v8603_v51  ;;  %v14833_v52 = vadd.f32 %v14505_v44, %v8090_v33 }
 0x93a   :  { %8687 = vmatprep.subr.mxu1 %v16076_v28 }
 0x93b   :  { %10106 = vmatmul.mubr.msk.f32.gmra.mxu0 %vm524_vm1, %v14775_v11  ;;  %8688 = vmatpush2.msra.mxu1 %v8602_v30 }
 0x93c   :  { %8437 = vmatprep.mubr.f32.mxu0 %v16076_v28 }
 0x93f   :  { %10107 = vmatmul.mubr.msk.f32.gmra.mxu0 %vm524_vm1, %v14791_v35 }
 0x940   :  { %8443 = vmatprep.mubr.f32.mxu0 %v16076_v28 }
 0x943   :  { %10108 = vmatmul.mubr.msk.f32.gmra.mxu0 %vm524_vm1, %v14803_v43 }
 0x944   :  { %8449 = vmatprep.mubr.f32.mxu0 %v16076_v28 }
 0x947   :  { %10109 = vmatmul.mubr.msk.f32.gmra.mxu0 %vm524_vm1, %v14811_v34 }
 0x948   :  { %8455 = vmatprep.mubr.f32.mxu0 %v16076_v28 }
 0x94b   :  { %10110 = vmatmul.mubr.msk.f32.gmra.mxu0 %vm524_vm1, %v14819_v57 }
 0x94c   :  { %8461 = vmatprep.mubr.f32.mxu0 %v16076_v28 }
 0x94f   :  { %10111 = vmatmul.mubr.msk.f32.gmra.mxu0 %vm524_vm1, %v14826_v56 }
 0x950   :  { %8467 = vmatprep.mubr.f32.mxu0 %v16076_v28 }
 0x953   :  { %10112 = vmatmul.mubr.msk.f32.gmra.mxu0 %vm524_vm1, %v14833_v52 }
 0x954   :  { %8473 = vmatprep.mubr.f32.mxu0 %v16076_v28 }
 0x967   :  { %v7911_v14 = vpop.xlane.xlu0 %7910 }
 0x968   :  { %v7957_v50 = vmul.f32 0.0125, %v7911_v14 }
 0x96a   :  { %v7989_v27 = vadd.f32 1e-05, %v7957_v50 }
 0x96b   :  { %v7914_v2 = vpop.xlane.xlu1 %7913 }
 0x96c   :  { %11604 = vrsqrt.f32 %v7989_v27  ;;  %v7958_v54 = vmul.f32 0.0125, %v7914_v2 }
 0x96e   :  { %v7990_v42 = vadd.f32 1e-05, %v7958_v54 }
 0x970   :  { %11606 = vrsqrt.f32 %v7990_v42  ;;  %v7917_v18 = vpop.xlane.xlu0 %7916 }
 0x971   :  { %v7959_v38 = vmul.f32 0.0125, %v7917_v18 }
 0x973   :  { %v7991_v9 = vadd.f32 1e-05, %v7959_v38 }
 0x974   :  { %v7920_v31 = vpop.xlane.xlu1 %7919 }
 0x975   :  { %11608 = vrsqrt.f32 %v7991_v9  ;;  %v7960_v32 = vmul.f32 0.0125, %v7920_v31 }
 0x977   :  { %v7992_v62 = vadd.f32 1e-05, %v7960_v32 }
 0x978   :  { %v7923_v41 = vpop.xlane.xlu0 %7922 }
 0x979   :  { %v11605_v61 = vpop.eup %11604  ;;  %11610 = vrsqrt.f32 %v7992_v62  ;;  %v7961_v48 = vmul.f32 0.0125, %v7923_v41 }
 0x97a   :  { %v8053_v51 = vmul.f32 %v11605_v61, %v14462_v40 }
 0x97b   :  { %v7993_v63 = vadd.f32 1e-05, %v7961_v48 }
 0x97c   :  { %v8091_v17 = vmul.f32 %v14497_v49, %v8053_v51 }
 0x97d   :  { %v11607_v15 = vpop.eup %11606  ;;  %11612 = vrsqrt.f32 %v7993_v63  ;;  %v7926_v30 = vpop.xlane.xlu1 %7925 }
 0x97e   :  { %v8054_v24 = vmul.f32 %v11607_v15, %v14467_v25  ;;  %v7962_v3 = vmul.f32 0.0125, %v7926_v30  ;;  %v14842_v20 = vadd.f32 %v14505_v44, %v8091_v17 }
 0x980   :  { %v7994_v22 = vadd.f32 1e-05, %v7962_v3  ;;  %v7929_v60 = vpop.xlane.xlu0 %7928  ;;  %10113 = vmatmul.mubr.msk.f32.gmra.mxu0 %vm524_vm1, %v14842_v20  ;;  %v8092_v10 = vmul.f32 %v14497_v49, %v8054_v24  ;;  %v16126_v24 = vld [vmem:[#allocation40_spill] sm:$0xff] }
 0x981   :  { %v7963_v40 = vmul.f32 0.0125, %v7929_v60  ;;  %8479 = vmatprep.mubr.f32.mxu0 %v16076_v28 }
 0x982   :  { %v11609_v7 = vpop.eup %11608  ;;  %11614 = vrsqrt.f32 %v7994_v22  ;;  %v14849_v39 = vadd.f32 %v14505_v44, %v8092_v10  ;;  %v16127_v22 = vld [vmem:[#allocation120_spill] sm:$0xff] }
 0x983   :  { %v8055_v25 = vmul.f32 %v11609_v7, %v14474_v19  ;;  %v7995_v33 = vadd.f32 1e-05, %v7963_v40 }
 0x984   :  { %v7932_v14 = vpop.xlane.xlu1 %7931  ;;  %10114 = vmatmul.mubr.msk.f32.gmra.mxu0 %vm524_vm1, %v14849_v39 }
 0x985   :  { %11616 = vrsqrt.f32 %v7995_v33  ;;  %v7964_v50 = vmul.f32 0.0125, %v7932_v14  ;;  %8485 = vmatprep.mubr.f32.mxu0 %v16076_v28  ;;  %v8093_v27 = vmul.f32 %v14497_v49, %v8055_v25 }
 0x986   :  { %v11611_v2 = vpop.eup %11610 }
 0x987   :  { %v8056_v54 = vmul.f32 %v11611_v2, %v14479_v26  ;;  %v7996_v42 = vadd.f32 1e-05, %v7964_v50  ;;  %v14858_v18 = vadd.f32 %v14505_v44, %v8093_v27 }
 0x989   :  { %11618 = vrsqrt.f32 %v7996_v42  ;;  %10115 = vmatmul.mubr.msk.f32.gmra.mxu0 %vm524_vm1, %v14858_v18  ;;  %v8094_v19 = vmul.f32 %v14497_v49, %v8056_v54 }
 0x98a   :  { %v11613_v38 = vpop.eup %11612  ;;  %8491 = vmatprep.mubr.f32.mxu0 %v16076_v28 }
 0x98b   :  { %v8057_v9 = vmul.f32 %v11613_v38, %v14485_v16  ;;  %v14866_v31 = vadd.f32 %v14505_v44, %v8094_v19 }
 0x98d   :  { %10116 = vmatmul.mubr.msk.f32.gmra.mxu0 %vm524_vm1, %v14866_v31  ;;  %v8095_v26 = vmul.f32 %v14497_v49, %v8057_v9 }
 0x98e   :  { %8497 = vmatprep.mubr.f32.mxu0 %v16076_v28 }
 0x98f   :  { %v11615_v32 = vpop.eup %11614  ;;  %v14873_v62 = vadd.f32 %v14505_v44, %v8095_v26 }
 0x990   :  { %v8058_v41 = vmul.f32 %v11615_v32, %v14491_v47 }
 0x991   :  { %10117 = vmatmul.mubr.msk.f32.gmra.mxu0 %vm524_vm1, %v14873_v62 }
 0x992   :  { %v11617_v16 = vpop.eup %11616  ;;  %8503 = vmatprep.mubr.f32.mxu0 %v16076_v28  ;;  %v8096_v61 = vmul.f32 %v14497_v49, %v8058_v41 }
 0x993   :  { %v8059_v48 = vmul.f32 %v11617_v16, %v14509_v55 }
 0x994   :  { %v14882_v51 = vadd.f32 %v14505_v44, %v8096_v61 }
 0x995   :  { %v8097_v63 = vmul.f32 %v14497_v49, %v8059_v48 }
 0x996   :  { %v11619_v17 = vpop.eup %11618  ;;  %10118 = vmatmul.mubr.msk.f32.gmra.mxu0 %vm524_vm1, %v14882_v51 }
 0x997   :  { %v8060_v47 = vmul.f32 %v11619_v17, %v14519_v59  ;;  %8509 = vmatprep.mubr.f32.mxu0 %v16076_v28  ;;  %v14890_v15 = vadd.f32 %v14505_v44, %v8097_v63  ;;  %v8157_v59 = vld [vmem:[%s15743_s11] sm:$0x3] }
 0x998   :  { %v14905_v3 = vrot.slane %v8157_v59, %v16126_v24 }
 0x999   :  { %v8098_v30 = vmul.f32 %v14497_v49, %v8060_v47  ;;  %v14908_v49 = vrot.slane %v8157_v59, %v16127_v22 }
 0x99a   :  { %10119 = vmatmul.mubr.msk.f32.gmra.mxu0 %vm524_vm1, %v14890_v15 }
 0x99b   :  { %8515 = vmatprep.mubr.f32.mxu0 %v16076_v28  ;;  %v14897_v55 = vadd.f32 %v14505_v44, %v8098_v30 }
 0x99e   :  { %10120 = vmatmul.mubr.msk.f32.gmra.mxu0 %vm524_vm1, %v14897_v55 }
 0x9b6   :  { %v8331_v60 = vpop.f32.mrf.mxu0 }
 0x9b7   :  { %v8332_v10 = vadd.f32 %v8331_v60, %v14905_v3 }
 0x9b8   :  { %v8333_v40 = vpop.f32.mrf.mxu0 }
 0x9b9   :  { %v8334_v44 = vadd.f32 %v8333_v40, %v14908_v49  ;;  %v8522_v33 = vmax.f32 %v8332_v10, 0.0 }
 0x9bb   :  { %v8523_v7 = vmax.f32 %v8334_v44, 0.0  ;;  %v8337_v25 = vpop.f32.mrf.mxu0 }
 0x9bc   :  { %v8338_v14 = vadd.f32 %v8337_v25, %v14905_v3 }
 0x9bd   :  { %v8339_v50 = vpop.f32.mrf.mxu0  ;;  %8689 = vmatprep.mubr.f32.mxu1 %v8523_v7 }
 0x9be   :  { %v8340_v27 = vadd.f32 %v8339_v50, %v14908_v49  ;;  %8690 = vmatmul.mubr.f32.vlgmr.msra.gmra.mxu1 %v8522_v33  ;;  %v8524_v42 = vmax.f32 %v8338_v14, 0.0 }
 0x9bf   :  { %v8343_v2 = vpop.f32.mrf.mxu0 }
 0x9c0   :  { %v8525_v54 = vmax.f32 %v8340_v27, 0.0  ;;  %v8344_v19 = vadd.f32 %v8343_v2, %v14905_v3 }
 0x9c1   :  { %v8345_v38 = vpop.f32.mrf.mxu0 }
 0x9c2   :  { %v8346_v9 = vadd.f32 %v8345_v38, %v14908_v49  ;;  %8694 = vmatprep.mubr.f32.mxu1 %v8525_v54  ;;  %v8526_v41 = vmax.f32 %v8344_v19, 0.0 }
 0x9c3   :  { %v8349_v26 = vpop.f32.mrf.mxu0  ;;  %8695 = vmatmul.mubr.f32.gmra.mxu1 %v8524_v42 }
 0x9c4   :  { %v8527_v32 = vmax.f32 %v8346_v9, 0.0  ;;  %v8350_v16 = vadd.f32 %v8349_v26, %v14905_v3 }
 0x9c5   :  { %v8351_v61 = vpop.f32.mrf.mxu0 }
 0x9c6   :  { %v8352_v48 = vadd.f32 %v8351_v61, %v14908_v49  ;;  %8699 = vmatprep.mubr.f32.mxu1 %v8527_v32  ;;  %v8528_v47 = vmax.f32 %v8350_v16, 0.0 }
 0x9c7   :  { %v8355_v63 = vpop.f32.mrf.mxu0  ;;  %8700 = vmatmul.mubr.f32.gmra.mxu1 %v8526_v41 }
 0x9c8   :  { %v8529_v17 = vmax.f32 %v8352_v48, 0.0  ;;  %v8356_v30 = vadd.f32 %v8355_v63, %v14905_v3 }
 0x9c9   :  { %v8357_v59 = vpop.f32.mrf.mxu0 }
 0x9ca   :  { %v8358_v60 = vadd.f32 %v8357_v59, %v14908_v49  ;;  %8704 = vmatprep.mubr.f32.mxu1 %v8529_v17  ;;  %v8530_v44 = vmax.f32 %v8356_v30, 0.0 }
 0x9cb   :  { %v8361_v10 = vpop.f32.mrf.mxu0  ;;  %8705 = vmatmul.mubr.f32.gmra.mxu1 %v8528_v47 }
 0x9cc   :  { %v8531_v40 = vmax.f32 %v8358_v60, 0.0  ;;  %v8362_v7 = vadd.f32 %v8361_v10, %v14905_v3 }
 0x9cd   :  { %v8363_v25 = vpop.f32.mrf.mxu0 }
 0x9ce   :  { %v8364_v33 = vadd.f32 %v8363_v25, %v14908_v49  ;;  %8709 = vmatprep.mubr.f32.mxu1 %v8531_v40  ;;  %v8532_v27 = vmax.f32 %v8362_v7, 0.0 }
 0x9cf   :  { %v8367_v14 = vpop.f32.mrf.mxu0  ;;  %8710 = vmatmul.mubr.f32.gmra.mxu1 %v8530_v44 }
 0x9d0   :  { %v8533_v50 = vmax.f32 %v8364_v33, 0.0  ;;  %v8368_v2 = vadd.f32 %v8367_v14, %v14905_v3 }
 0x9d1   :  { %v8369_v54 = vpop.f32.mrf.mxu0 }
 0x9d2   :  { %v8370_v42 = vadd.f32 %v8369_v54, %v14908_v49  ;;  %8714 = vmatprep.mubr.f32.mxu1 %v8533_v50  ;;  %v8534_v9 = vmax.f32 %v8368_v2, 0.0 }
 0x9d3   :  { %v8373_v19 = vpop.f32.mrf.mxu0  ;;  %8715 = vmatmul.mubr.f32.gmra.mxu1 %v8532_v27 }
 0x9d4   :  { %v8535_v38 = vmax.f32 %v8370_v42, 0.0  ;;  %v8374_v26 = vadd.f32 %v8373_v19, %v14905_v3 }
 0x9d5   :  { %v8375_v32 = vpop.f32.mrf.mxu0 }
 0x9d6   :  { %v8376_v41 = vadd.f32 %v8375_v32, %v14908_v49  ;;  %8719 = vmatprep.mubr.f32.mxu1 %v8535_v38  ;;  %v8536_v48 = vmax.f32 %v8374_v26, 0.0 }
 0x9d7   :  { %v8379_v16 = vpop.f32.mrf.mxu0  ;;  %8720 = vmatmul.mubr.f32.gmra.mxu1 %v8534_v9 }
 0x9d8   :  { %v8537_v61 = vmax.f32 %v8376_v41, 0.0  ;;  %v8380_v63 = vadd.f32 %v8379_v16, %v14905_v3 }
 0x9d9   :  { %v8381_v17 = vpop.f32.mrf.mxu0 }
 0x9da   :  { %v8382_v47 = vadd.f32 %v8381_v17, %v14908_v49  ;;  %8724 = vmatprep.mubr.f32.mxu1 %v8537_v61  ;;  %v8538_v60 = vmax.f32 %v8380_v63, 0.0 }
 0x9db   :  { %v8385_v30 = vpop.f32.mrf.mxu0  ;;  %8725 = vmatmul.mubr.f32.gmra.mxu1 %v8536_v48 }
 0x9dc   :  { %v8539_v59 = vmax.f32 %v8382_v47, 0.0  ;;  %v8386_v10 = vadd.f32 %v8385_v30, %v14905_v3 }
 0x9dd   :  { %v8387_v40 = vpop.f32.mrf.mxu0 }
 0x9de   :  { %v8388_v44 = vadd.f32 %v8387_v40, %v14908_v49  ;;  %8729 = vmatprep.mubr.f32.mxu1 %v8539_v59  ;;  %v8540_v33 = vmax.f32 %v8386_v10, 0.0 }
 0x9df   :  { %v8391_v7 = vpop.f32.mrf.mxu0  ;;  %8730 = vmatmul.mubr.f32.gmra.mxu1 %v8538_v60 }
 0x9e0   :  { %v8541_v25 = vmax.f32 %v8388_v44, 0.0  ;;  %v8392_v14 = vadd.f32 %v8391_v7, %v14905_v3 }
 0x9e1   :  { %v8393_v50 = vpop.f32.mrf.mxu0 }
 0x9e2   :  { %v8394_v27 = vadd.f32 %v8393_v50, %v14908_v49  ;;  %8734 = vmatprep.mubr.f32.mxu1 %v8541_v25  ;;  %v8542_v42 = vmax.f32 %v8392_v14, 0.0 }
 0x9e3   :  { %v8397_v2 = vpop.f32.mrf.mxu0  ;;  %8735 = vmatmul.mubr.f32.gmra.mxu1 %v8540_v33 }
 0x9e4   :  { %v8543_v54 = vmax.f32 %v8394_v27, 0.0  ;;  %v8398_v19 = vadd.f32 %v8397_v2, %v14905_v3 }
 0x9e5   :  { %v8399_v38 = vpop.f32.mrf.mxu0 }
 0x9e6   :  { %v8400_v9 = vadd.f32 %v8399_v38, %v14908_v49  ;;  %8739 = vmatprep.mubr.f32.mxu1 %v8543_v54  ;;  %v8544_v41 = vmax.f32 %v8398_v19, 0.0 }
 0x9e7   :  { %v8403_v26 = vpop.f32.mrf.mxu0  ;;  %8740 = vmatmul.mubr.f32.gmra.mxu1 %v8542_v42 }
 0x9e8   :  { %v8545_v32 = vmax.f32 %v8400_v9, 0.0  ;;  %v8404_v16 = vadd.f32 %v8403_v26, %v14905_v3 }
 0x9e9   :  { %v8405_v61 = vpop.f32.mrf.mxu0 }
 0x9ea   :  { %v8406_v48 = vadd.f32 %v8405_v61, %v14908_v49  ;;  %8744 = vmatprep.mubr.f32.mxu1 %v8545_v32  ;;  %v8546_v47 = vmax.f32 %v8404_v16, 0.0 }
 0x9eb   :  { %v8409_v63 = vpop.f32.mrf.mxu0  ;;  %8745 = vmatmul.mubr.f32.gmra.mxu1 %v8544_v41 }
 0x9ec   :  { %v8547_v17 = vmax.f32 %v8406_v48, 0.0  ;;  %v8410_v30 = vadd.f32 %v8409_v63, %v14905_v3 }
 0x9ed   :  { %v8411_v59 = vpop.f32.mrf.mxu0 }
 0x9ee   :  { %v8412_v60 = vadd.f32 %v8411_v59, %v14908_v49  ;;  %8749 = vmatprep.mubr.f32.mxu1 %v8547_v17  ;;  %v8548_v44 = vmax.f32 %v8410_v30, 0.0 }
 0x9ef   :  { %v8415_v10 = vpop.f32.mrf.mxu0  ;;  %8750 = vmatmul.mubr.f32.gmra.mxu1 %v8546_v47 }
 0x9f0   :  { %v8549_v40 = vmax.f32 %v8412_v60, 0.0  ;;  %v8416_v7 = vadd.f32 %v8415_v10, %v14905_v3 }
 0x9f1   :  { %v8417_v25 = vpop.f32.mrf.mxu0 }
 0x9f2   :  { %v8418_v33 = vadd.f32 %v8417_v25, %v14908_v49  ;;  %8754 = vmatprep.mubr.f32.mxu1 %v8549_v40  ;;  %v8550_v27 = vmax.f32 %v8416_v7, 0.0 }
 0x9f3   :  { %v8421_v14 = vpop.f32.mrf.mxu0  ;;  %8755 = vmatmul.mubr.f32.gmra.mxu1 %v8548_v44 }
 0x9f4   :  { %v8551_v50 = vmax.f32 %v8418_v33, 0.0  ;;  %v8422_v2 = vadd.f32 %v8421_v14, %v14905_v3 }
 0x9f5   :  { %v8423_v54 = vpop.f32.mrf.mxu0 }
 0x9f6   :  { %v8424_v42 = vadd.f32 %v8423_v54, %v14908_v49  ;;  %8759 = vmatprep.mubr.f32.mxu1 %v8551_v50  ;;  %v8552_v9 = vmax.f32 %v8422_v2, 0.0 }
 0x9f7   :  { %v8427_v19 = vpop.f32.mrf.mxu0  ;;  %8760 = vmatmul.mubr.f32.gmra.mxu1 %v8550_v27 }
 0x9f8   :  { %v8553_v38 = vmax.f32 %v8424_v42, 0.0  ;;  %v8428_v26 = vadd.f32 %v8427_v19, %v14905_v3 }
 0x9f9   :  { %v8429_v32 = vpop.f32.mrf.mxu0 }
 0x9fa   :  { %v8430_v41 = vadd.f32 %v8429_v32, %v14908_v49  ;;  %8764 = vmatprep.mubr.f32.mxu1 %v8553_v38  ;;  %v8554_v48 = vmax.f32 %v8428_v26, 0.0 }
 0x9fb   :  { %v8433_v16 = vpop.f32.mrf.mxu0  ;;  %8765 = vmatmul.mubr.f32.gmra.mxu1 %v8552_v9 }
 0x9fc   :  { %v8555_v61 = vmax.f32 %v8430_v41, 0.0  ;;  %v8434_v63 = vadd.f32 %v8433_v16, %v14905_v3 }
 0x9fd   :  { %v8435_v17 = vpop.f32.mrf.mxu0 }
 0x9fe   :  { %v8436_v47 = vadd.f32 %v8435_v17, %v14908_v49  ;;  %8769 = vmatprep.mubr.f32.mxu1 %v8555_v61  ;;  %v8556_v60 = vmax.f32 %v8434_v63, 0.0 }
 0x9ff   :  { %v8439_v30 = vpop.f32.mrf.mxu0  ;;  %8770 = vmatmul.mubr.f32.gmra.mxu1 %v8554_v48 }
 0xa00   :  { %v8557_v59 = vmax.f32 %v8436_v47, 0.0  ;;  %v8440_v10 = vadd.f32 %v8439_v30, %v14905_v3 }
 0xa01   :  { %v8441_v40 = vpop.f32.mrf.mxu0 }
 0xa02   :  { %v8442_v44 = vadd.f32 %v8441_v40, %v14908_v49  ;;  %8774 = vmatprep.mubr.f32.mxu1 %v8557_v59  ;;  %v8558_v33 = vmax.f32 %v8440_v10, 0.0 }
 0xa03   :  { %v8445_v7 = vpop.f32.mrf.mxu0  ;;  %8775 = vmatmul.mubr.f32.gmra.mxu1 %v8556_v60 }
 0xa04   :  { %v8559_v25 = vmax.f32 %v8442_v44, 0.0  ;;  %v8446_v14 = vadd.f32 %v8445_v7, %v14905_v3 }
 0xa05   :  { %v8447_v50 = vpop.f32.mrf.mxu0 }
 0xa06   :  { %v8448_v27 = vadd.f32 %v8447_v50, %v14908_v49  ;;  %8779 = vmatprep.mubr.f32.mxu1 %v8559_v25  ;;  %v8560_v42 = vmax.f32 %v8446_v14, 0.0 }
 0xa07   :  { %v8451_v2 = vpop.f32.mrf.mxu0  ;;  %8780 = vmatmul.mubr.f32.gmra.mxu1 %v8558_v33 }
 0xa08   :  { %v8561_v54 = vmax.f32 %v8448_v27, 0.0  ;;  %v8452_v19 = vadd.f32 %v8451_v2, %v14905_v3 }
 0xa09   :  { %v8453_v38 = vpop.f32.mrf.mxu0 }
 0xa0a   :  { %v8454_v9 = vadd.f32 %v8453_v38, %v14908_v49  ;;  %8784 = vmatprep.mubr.f32.mxu1 %v8561_v54  ;;  %v8562_v41 = vmax.f32 %v8452_v19, 0.0 }
 0xa0b   :  { %v8457_v26 = vpop.f32.mrf.mxu0  ;;  %8785 = vmatmul.mubr.f32.gmra.mxu1 %v8560_v42 }
 0xa0c   :  { %v8563_v32 = vmax.f32 %v8454_v9, 0.0  ;;  %v8458_v16 = vadd.f32 %v8457_v26, %v14905_v3 }
 0xa0d   :  { %v8459_v61 = vpop.f32.mrf.mxu0 }
 0xa0e   :  { %v8460_v48 = vadd.f32 %v8459_v61, %v14908_v49  ;;  %8789 = vmatprep.mubr.f32.mxu1 %v8563_v32  ;;  %v8564_v47 = vmax.f32 %v8458_v16, 0.0 }
 0xa0f   :  { %v8463_v63 = vpop.f32.mrf.mxu0  ;;  %8790 = vmatmul.mubr.f32.gmra.mxu1 %v8562_v41 }
 0xa10   :  { %v8565_v17 = vmax.f32 %v8460_v48, 0.0  ;;  %v8464_v30 = vadd.f32 %v8463_v63, %v14905_v3 }
 0xa11   :  { %v8465_v59 = vpop.f32.mrf.mxu0 }
 0xa12   :  { %v8466_v60 = vadd.f32 %v8465_v59, %v14908_v49  ;;  %8794 = vmatprep.mubr.f32.mxu1 %v8565_v17  ;;  %v8566_v44 = vmax.f32 %v8464_v30, 0.0 }
 0xa13   :  { %v8469_v10 = vpop.f32.mrf.mxu0  ;;  %8795 = vmatmul.mubr.f32.gmra.mxu1 %v8564_v47 }
 0xa14   :  { %v8567_v40 = vmax.f32 %v8466_v60, 0.0  ;;  %v8470_v7 = vadd.f32 %v8469_v10, %v14905_v3 }
 0xa15   :  { %v8471_v25 = vpop.f32.mrf.mxu0 }
 0xa16   :  { %v8472_v33 = vadd.f32 %v8471_v25, %v14908_v49  ;;  %8799 = vmatprep.mubr.f32.mxu1 %v8567_v40  ;;  %v8568_v50 = vmax.f32 %v8470_v7, 0.0 }
 0xa17   :  { %8800 = vmatmul.mubr.f32.gmra.mxu1 %v8566_v44 }
 0xa18   :  { %v8569_v14 = vmax.f32 %v8472_v33, 0.0 }
 0xa1a   :  { %8804 = vmatprep.mubr.f32.mxu1 %v8569_v14 }
 0xa1b   :  { %8805 = vmatmul.mubr.f32.gmra.mxu1 %v8568_v50 }
 0xa40   :  { %v8475_v27 = vpop.f32.mrf.mxu0 }
 0xa41   :  { %v8476_v2 = vadd.f32 %v8475_v27, %v14905_v3 }
 0xa42   :  { %v8477_v54 = vpop.f32.mrf.mxu0 }
 0xa43   :  { %v8478_v42 = vadd.f32 %v8477_v54, %v14908_v49  ;;  %v8570_v9 = vmax.f32 %v8476_v2, 0.0 }
 0xa44   :  { %v8481_v19 = vpop.f32.mrf.mxu0 }
 0xa45   :  { %v8571_v38 = vmax.f32 %v8478_v42, 0.0  ;;  %v8482_v26 = vadd.f32 %v8481_v19, %v14905_v3 }
 0xa46   :  { %v8483_v32 = vpop.f32.mrf.mxu0 }
 0xa47   :  { %v8484_v41 = vadd.f32 %v8483_v32, %v14908_v49  ;;  %8809 = vmatprep.mubr.f32.mxu1 %v8571_v38  ;;  %v8572_v48 = vmax.f32 %v8482_v26, 0.0 }
 0xa48   :  { %8810 = vmatmul.mubr.f32.gmra.mxu1 %v8570_v9 }
 0xa49   :  { %v8573_v16 = vmax.f32 %v8484_v41, 0.0  ;;  %v8487_v61 = vpop.f32.mrf.mxu0 }
 0xa4a   :  { %v8488_v63 = vadd.f32 %v8487_v61, %v14905_v3 }
 0xa4b   :  { %v8489_v17 = vpop.f32.mrf.mxu0  ;;  %8814 = vmatprep.mubr.f32.mxu1 %v8573_v16 }
 0xa4c   :  { %v8490_v47 = vadd.f32 %v8489_v17, %v14908_v49  ;;  %8815 = vmatmul.mubr.f32.gmra.mxu1 %v8572_v48  ;;  %v8574_v60 = vmax.f32 %v8488_v63, 0.0 }
 0xa4d   :  { %v8493_v30 = vpop.f32.mrf.mxu0 }
 0xa4e   :  { %v8575_v59 = vmax.f32 %v8490_v47, 0.0  ;;  %v8494_v10 = vadd.f32 %v8493_v30, %v14905_v3 }
 0xa4f   :  { %v8495_v40 = vpop.f32.mrf.mxu0 }
 0xa50   :  { %v8496_v44 = vadd.f32 %v8495_v40, %v14908_v49  ;;  %8819 = vmatprep.mubr.f32.mxu1 %v8575_v59  ;;  %v8576_v33 = vmax.f32 %v8494_v10, 0.0 }
 0xa51   :  { %v8499_v7 = vpop.f32.mrf.mxu0  ;;  %8820 = vmatmul.mubr.f32.gmra.mxu1 %v8574_v60 }
 0xa52   :  { %v8577_v25 = vmax.f32 %v8496_v44, 0.0  ;;  %v8500_v14 = vadd.f32 %v8499_v7, %v14905_v3 }
 0xa53   :  { %v8501_v50 = vpop.f32.mrf.mxu0 }
 0xa54   :  { %v8502_v27 = vadd.f32 %v8501_v50, %v14908_v49  ;;  %8824 = vmatprep.mubr.f32.mxu1 %v8577_v25  ;;  %v8578_v42 = vmax.f32 %v8500_v14, 0.0 }
 0xa55   :  { %8825 = vmatmul.mubr.f32.gmra.mxu1 %v8576_v33 }
 0xa56   :  { %v8579_v2 = vmax.f32 %v8502_v27, 0.0  ;;  %v8505_v54 = vpop.f32.mrf.mxu0 }
 0xa57   :  { %v8506_v19 = vadd.f32 %v8505_v54, %v14905_v3 }
 0xa58   :  { %v8507_v38 = vpop.f32.mrf.mxu0  ;;  %8829 = vmatprep.mubr.f32.mxu1 %v8579_v2 }
 0xa59   :  { %v8508_v9 = vadd.f32 %v8507_v38, %v14908_v49  ;;  %8830 = vmatmul.mubr.f32.gmra.mxu1 %v8578_v42  ;;  %v8580_v41 = vmax.f32 %v8506_v19, 0.0 }
 0xa5a   :  { %v8511_v26 = vpop.f32.mrf.mxu0 }
 0xa5b   :  { %v8581_v32 = vmax.f32 %v8508_v9, 0.0  ;;  %v8512_v16 = vadd.f32 %v8511_v26, %v14905_v3 }
 0xa5c   :  { %v8513_v61 = vpop.f32.mrf.mxu0 }
 0xa5d   :  { %v8514_v48 = vadd.f32 %v8513_v61, %v14908_v49  ;;  %8834 = vmatprep.mubr.f32.mxu1 %v8581_v32  ;;  %v8582_v47 = vmax.f32 %v8512_v16, 0.0  ;;  %v14987_v32 = vld [vmem:[%s15745_s13] ss:$0 sm:$0xff] }
 0xa5e   :  { %v8517_v63 = vpop.f32.mrf.mxu0  ;;  %8835 = vmatmul.mubr.f32.gmra.mxu1 %v8580_v41 }
 0xa5f   :  { %v8583_v17 = vmax.f32 %v8514_v48, 0.0  ;;  %v8518_v30 = vadd.f32 %v8517_v63, %v14905_v3 }
 0xa60   :  { %v8519_v59 = vpop.f32.mrf.mxu0 }
 0xa61   :  { %v8520_v60 = vadd.f32 %v8519_v59, %v14908_v49  ;;  %8839 = vmatprep.mubr.f32.mxu1 %v8583_v17  ;;  %v8584_v40 = vmax.f32 %v8518_v30, 0.0 }
 0xa62   :  { %8840 = vmatmul.mubr.f32.gmra.mxu1 %v8582_v47 }
 0xa63   :  { %v8585_v10 = vmax.f32 %v8520_v60, 0.0 }
 0xa65   :  { %8844 = vmatprep.mubr.f32.mxu1 %v8585_v10 }
 0xa66   :  { %8845 = vmatmul.mubr.f32.gmra.mxu1 %v8584_v40 }
 0xa7e   :  { %v14974_v44 = vpop.f32.mrf.mxu1 }
 0xa80   :  { %v8693_v7 = vpop.f32.mrf.mxu1 }
 0xa83   :  { %v14976_v25 = vpop.f32.mrf.mxu1 }
 0xa85   :  { %v8698_v33 = vpop.f32.mrf.mxu1 }
 0xa87   :  { %v14978_v14 = vpop.f32.mrf.mxu1 }
 0xa89   :  { %v8703_v50 = vpop.f32.mrf.mxu1 }
 0xa8b   :  { %v14980_v27 = vpop.f32.mrf.mxu1 }
 0xa8d   :  { %v8708_v3 = vpop.f32.mrf.mxu1 }
 0xa8f   :  { %v14982_v2 = vpop.f32.mrf.mxu1 }
 0xa91   :  { %v8713_v49 = vpop.f32.mrf.mxu1 }
 0xa93   :  { %v8716_v54 = vpop.f32.mrf.mxu1 }
 0xa95   :  { %v8718_v42 = vpop.f32.mrf.mxu1 }
 0xa97   :  { %v8721_v19 = vpop.f32.mrf.mxu1 }
 0xa99   :  { %v8723_v38 = vpop.f32.mrf.mxu1 }
 0xa9b   :  { %v8726_v9 = vpop.f32.mrf.mxu1 }
 0xa9d   :  { %v8728_v26 = vpop.f32.mrf.mxu1 }
 0xa9f   :  { %v8731_v41 = vpop.f32.mrf.mxu1 }
 0xaa0   :  { %v8732_v16 = vadd.f32 %v14987_v32, %v8731_v41 }
 0xaa1   :  { %v8733_v61 = vpop.f32.mrf.mxu1 }
 0xaa2   :  { %v14991_v48 = vadd.f32 %v8732_v16, %v14630_v46 }
 0xaa3   :  { %v8736_v63 = vpop.f32.mrf.mxu1 }
 0xaa4   :  { %v8737_v17 = vadd.f32 %v14987_v32, %v8736_v63  ;;  %v8908_v47 = vsel %vm524_vm1, %v14991_v48, 0.0 }
 0xaa5   :  { %v8738_v30 = vpop.f32.mrf.mxu1  ;;  %8909 = vadd.xlane.f32.xlu1 %v8908_v47 }
 0xaa6   :  { %v14997_v59 = vadd.f32 %v8737_v17, %v14649_v6 }
 0xaa7   :  { %v8741_v60 = vpop.f32.mrf.mxu1 }
 0xaa8   :  { %v8742_v10 = vadd.f32 %v14987_v32, %v8741_v60  ;;  %v8911_v40 = vsel %vm524_vm1, %v14997_v59, 0.0 }
 0xaa9   :  { %v8743_v7 = vpop.f32.mrf.mxu1  ;;  %8912 = vadd.xlane.f32.xlu1 %v8911_v40 }
 0xaaa   :  { %v15003_v46 = vadd.f32 %v8742_v10, %v14665_v13  ;;  %v8727_v7 = vadd.f32 %v14987_v32, %v8726_v9 }
 0xaab   :  { %v8746_v33 = vpop.f32.mrf.mxu1 }
 0xaac   :  { %v8747_v50 = vadd.f32 %v14987_v32, %v8746_v33  ;;  %v8914_v3 = vsel %vm524_vm1, %v15003_v46, 0.0 }
 0xaad   :  { %v8748_v49 = vpop.f32.mrf.mxu1  ;;  %8915 = vadd.xlane.f32.xlu1 %v8914_v3 }
 0xaae   :  { %v15009_v6 = vadd.f32 %v8747_v50, %v14681_v45 }
 0xaaf   :  { %v8751_v42 = vpop.f32.mrf.mxu1 }
 0xab0   :  { %v8752_v38 = vadd.f32 %v14987_v32, %v8751_v42  ;;  %v8917_v26 = vsel %vm524_vm1, %v15009_v6, 0.0  ;;  %v8722_v42 = vadd.f32 %v14987_v32, %v8721_v19 }
 0xab1   :  { %v8753_v41 = vpop.f32.mrf.mxu1  ;;  %8918 = vadd.xlane.f32.xlu1 %v8917_v26 }
 0xab2   :  { %v15015_v13 = vadd.f32 %v8752_v38, %v14697_v37  ;;  %v8717_v41 = vadd.f32 %v14987_v32, %v8716_v54 }
 0xab3   :  { %v8756_v16 = vpop.f32.mrf.mxu1 }
 0xab4   :  { %v8757_v61 = vadd.f32 %v14987_v32, %v8756_v16  ;;  %v8920_v63 = vsel %vm524_vm1, %v15015_v13, 0.0  ;;  %v15048_v16 = vadd.f32 %v8722_v42, %v14598_v1  ;;  %v8692_v42 = vadd.f32 %v14987_v32, %v14974_v44 }
 0xab5   :  { %8921 = vadd.xlane.f32.xlu1 %v8920_v63  ;;  %v8758_v45 = vpop.f32.mrf.mxu1  ;;  %v15057_v63 = vadd.f32 %v8717_v41, %v14582_v0 }
 0xab6   :  { %v15021_v17 = vadd.f32 %v8757_v61, %v14714_v5  ;;  %v8902_v45 = vsel %vm524_vm1, %v15048_v16, 0.0 }
 0xab7   :  { %v8761_v47 = vpop.f32.mrf.mxu1 }
 0xab8   :  { %v8762_v30 = vadd.f32 %v14987_v32, %v8761_v47  ;;  %v8923_v60 = vsel %vm524_vm1, %v15021_v17, 0.0  ;;  %v8707_v47 = vadd.f32 %v14987_v32, %v14980_v27 }
 0xab9   :  { %v8763_v10 = vpop.f32.mrf.mxu1  ;;  %8924 = vadd.xlane.f32.xlu1 %v8923_v60  ;;  %v8899_v60 = vsel %vm524_vm1, %v15057_v63, 0.0 }
 0xaba   :  { %v15027_v37 = vadd.f32 %v8762_v30, %v14731_v36  ;;  %v15040_v36 = vadd.f32 %v8727_v7, %v14614_v8  ;;  %v8712_v8 = vadd.f32 %v14987_v32, %v14982_v2  ;;  %v8702_v10 = vadd.f32 %v14987_v32, %v14978_v14 }
 0xabb   :  { %v8766_v40 = vpop.f32.mrf.mxu1 }
 0xabc   :  { %v8767_v33 = vadd.f32 %v14987_v32, %v8766_v40  ;;  %v8926_v5 = vsel %vm524_vm1, %v15027_v37, 0.0  ;;  %v15066_v30 = vadd.f32 %v8712_v8, %v14566_v4  ;;  %v15075_v40 = vadd.f32 %v8707_v47, %v14549_v29 }
 0xabd   :  { %8927 = vadd.xlane.f32.xlu1 %v8926_v5  ;;  %v8768_v50 = vpop.f32.mrf.mxu1  ;;  %v15084_v5 = vadd.f32 %v8702_v10, %v14539_v58  ;;  %v15096_v58 = vadd.f32 %v8692_v42, %v14513_v12 }
 0xabe   :  { %v15034_v3 = vadd.f32 %v8767_v33, %v14746_v21  ;;  %v8905_v21 = vsel %vm524_vm1, %v15040_v36, 0.0  ;;  %v8896_v7 = vsel %vm524_vm1, %v15066_v30, 0.0  ;;  %v8697_v33 = vadd.f32 %v14987_v32, %v14976_v25 }
 0xabf   :  { %v15036_v49 = vpop.f32.mrf.mxu1  ;;  %v8893_v50 = vsel %vm524_vm1, %v15075_v40, 0.0  ;;  %v8884_v44 = vsel %vm524_vm1, %v15096_v58, 0.0 }
 0xac0   :  { %v8929_v9 = vsel %vm524_vm1, %v15034_v3, 0.0 }
 0xac1   :  { %v8773_v38 = vpop.f32.mrf.mxu1  ;;  %8930 = vadd.xlane.f32.xlu1 %v8929_v9  ;;  %v15091_v9 = vadd.f32 %v8697_v33, %v14530_v23 }
 0xac2   :  { %v8890_v38 = vsel %vm524_vm1, %v15084_v5, 0.0 }
 0xac3   :  { %v15044_v26 = vpop.f32.mrf.mxu1 }
 0xac5   :  { %8906 = vadd.xlane.f32.xlu1 %v8905_v21  ;;  %v8778_v19 = vpop.f32.mrf.mxu1  ;;  %v8887_v21 = vsel %vm524_vm1, %v15091_v9, 0.0 }
 0xac7   :  { %v15052_v61 = vpop.f32.mrf.mxu1 }
 0xac9   :  { %8903 = vadd.xlane.f32.xlu1 %v8902_v45  ;;  %v8783_v54 = vpop.f32.mrf.mxu1 }
 0xacb   :  { %v15061_v1 = vpop.f32.mrf.mxu1 }
 0xacd   :  { %8900 = vadd.xlane.f32.xlu1 %v8899_v60  ;;  %v8788_v2 = vpop.f32.mrf.mxu1 }
 0xacf   :  { %v15070_v0 = vpop.f32.mrf.mxu1 }
 0xad1   :  { %8897 = vadd.xlane.f32.xlu1 %v8896_v7  ;;  %v8793_v27 = vpop.f32.mrf.mxu1 }
 0xad3   :  { %v15079_v4 = vpop.f32.mrf.mxu1 }
 0xad5   :  { %8894 = vadd.xlane.f32.xlu1 %v8893_v50  ;;  %v8798_v14 = vpop.f32.mrf.mxu1 }
 0xad7   :  { %v8801_v29 = vpop.f32.mrf.mxu1 }
 0xad9   :  { %8891 = vadd.xlane.f32.xlu1 %v8890_v38  ;;  %v8803_v25 = vpop.f32.mrf.mxu1 }
 0xadb   :  { %v8806_v41 = vpop.f32.mrf.mxu1 }
 0xadd   :  { %8888 = vadd.xlane.f32.xlu1 %v8887_v21  ;;  %v8808_v19 = vpop.f32.mrf.mxu1 }
 0xae1   :  { %8885 = vadd.xlane.f32.xlu1 %v8884_v44 }
 0xb08   :  { %v8811_v23 = vpop.f32.mrf.mxu1 }
 0xb09   :  { %v8812_v8 = vadd.f32 %v14987_v32, %v8811_v23 }
 0xb0a   :  { %v8813_v45 = vpop.f32.mrf.mxu1 }
 0xb0b   :  { %v15104_v54 = vadd.f32 %v8812_v8, %v14842_v20 }
 0xb0c   :  { %v8816_v47 = vpop.f32.mrf.mxu1 }
 0xb0d   :  { %v8817_v12 = vadd.f32 %v14987_v32, %v8816_v47  ;;  %v8956_v60 = vsel %vm524_vm1, %v15104_v54, 0.0 }
 0xb0e   :  { %8957 = vadd.xlane.f32.xlu0 %v8956_v60  ;;  %v8818_v2 = vpop.f32.mrf.mxu1 }
 0xb0f   :  { %v15110_v10 = vadd.f32 %v8817_v12, %v14849_v39 }
 0xb11   :  { %v8821_v7 = vpop.f32.mrf.mxu1  ;;  %v8959_v27 = vsel %vm524_vm1, %v15110_v10, 0.0 }
 0xb12   :  { %v8822_v33 = vadd.f32 %v14987_v32, %v8821_v7  ;;  %8960 = vadd.xlane.f32.xlu0 %v8959_v27 }
 0xb13   :  { %v8823_v20 = vpop.f32.mrf.mxu1 }
 0xb14   :  { %v15116_v50 = vadd.f32 %v8822_v33, %v14858_v18  ;;  %v8807_v20 = vadd.f32 %v14987_v32, %v8806_v41 }
 0xb15   :  { %v8826_v14 = vpop.f32.mrf.mxu1 }
 0xb16   :  { %v8827_v42 = vadd.f32 %v14987_v32, %v8826_v14  ;;  %v8962_v38 = vsel %vm524_vm1, %v15116_v50, 0.0 }
 0xb17   :  { %8963 = vadd.xlane.f32.xlu0 %v8962_v38  ;;  %v8828_v39 = vpop.f32.mrf.mxu1 }
 0xb18   :  { %v15122_v25 = vadd.f32 %v8827_v42, %v14866_v31  ;;  %v8802_v39 = vadd.f32 %v14987_v32, %v8801_v29 }
 0xb19   :  { %v8831_v21 = vpop.f32.mrf.mxu1 }
 0xb1a   :  { %v8832_v19 = vadd.f32 %v14987_v32, %v8831_v21  ;;  %v8965_v44 = vsel %vm524_vm1, %v15122_v25, 0.0  ;;  %v15151_v21 = vadd.f32 %v8807_v20, %v14833_v52  ;;  %v8792_v52 = vadd.f32 %v14987_v32, %v15070_v0 }
 0xb1b   :  { %v8833_v23 = vpop.f32.mrf.mxu1  ;;  %8966 = vadd.xlane.f32.xlu0 %v8965_v44  ;;  %v15158_v44 = vadd.f32 %v8802_v39, %v14826_v56  ;;  %v8787_v0 = vadd.f32 %v14987_v32, %v15061_v1  ;;  %v8782_v1 = vadd.f32 %v14987_v32, %v15052_v61  ;;  %v8777_v61 = vadd.f32 %v14987_v32, %v15044_v26 }
 0xb1c   :  { %v15128_v18 = vadd.f32 %v8832_v19, %v14873_v62  ;;  %v8797_v19 = vadd.f32 %v14987_v32, %v15079_v4  ;;  %v8772_v26 = vadd.f32 %v14987_v32, %v15036_v49 }
 0xb1d   :  { %v8950_v56 = vsel %vm524_vm1, %v15158_v44, 0.0 }
 0xb1e   :  { %v8836_v8 = vpop.f32.mrf.mxu1  ;;  %v8968_v45 = vsel %vm524_vm1, %v15128_v18, 0.0  ;;  %v15231_v49 = vadd.f32 %v8772_v26, %v14762_v53 }
 0xb1f   :  { %v8837_v47 = vadd.f32 %v14987_v32, %v8836_v8  ;;  %8969 = vadd.xlane.f32.xlu0 %v8968_v45  ;;  %v15168_v45 = vadd.f32 %v8797_v19, %v14819_v57  ;;  %v15181_v57 = vadd.f32 %v8792_v52, %v14811_v34  ;;  %v15194_v34 = vadd.f32 %v8787_v0, %v14803_v43 }
 0xb20   :  { %v8838_v31 = vpop.f32.mrf.mxu1  ;;  %v15207_v43 = vadd.f32 %v8782_v1, %v14791_v35  ;;  %v15220_v35 = vadd.f32 %v8777_v61, %v14775_v11  ;;  %v8932_v53 = vsel %vm524_vm1, %v15231_v49, 0.0 }
 0xb21   :  { %v15134_v12 = vadd.f32 %v8837_v47, %v14882_v51  ;;  %v8941_v19 = vsel %vm524_vm1, %v15194_v34, 0.0 }
 0xb22   :  { %v8841_v60 = vpop.f32.mrf.mxu1 }
 0xb23   :  { %v8842_v2 = vadd.f32 %v14987_v32, %v8841_v60  ;;  %v8971_v7 = vsel %vm524_vm1, %v15134_v12, 0.0 }
 0xb24   :  { %v8843_v27 = vpop.f32.mrf.mxu1  ;;  %8972 = vadd.xlane.f32.xlu0 %v8971_v7  ;;  %v8947_v7 = vsel %vm524_vm1, %v15168_v45, 0.0 }
 0xb25   :  { %v15140_v62 = vadd.f32 %v8842_v2, %v14890_v15 }
 0xb26   :  { %v8846_v33 = vpop.f32.mrf.mxu1 }
 0xb27   :  { %v8847_v14 = vadd.f32 %v14987_v32, %v8846_v33  ;;  %v8974_v51 = vsel %vm524_vm1, %v15140_v62, 0.0 }
 0xb28   :  { %8975 = vadd.xlane.f32.xlu0 %v8974_v51  ;;  %v8848_v42 = vpop.f32.mrf.mxu1  ;;  %v8944_v51 = vsel %vm524_vm1, %v15181_v57, 0.0 }
 0xb29   :  { %v15147_v38 = vadd.f32 %v8847_v14, %v14897_v55  ;;  %v8953_v55 = vsel %vm524_vm1, %v15151_v21, 0.0 }
 0xb2b   :  { %v8977_v15 = vsel %vm524_vm1, %v15147_v38, 0.0 }
 0xb2c   :  { %8978 = vadd.xlane.f32.xlu0 %v8977_v15 }
 0xb2e   :  { %v8910_v41 = vpop.xlane.xlu1 %8909 }
 0xb2f   :  { %v8988_v23 = vmul.f32 0.0125, %v8910_v41 }
 0xb30   :  { %8954 = vadd.xlane.f32.xlu0 %v8953_v55 }
 0xb31   :  { %v15163_v29 = vsub.f32 %v14991_v48, %v8988_v23 }
 0xb32   :  { %v8913_v8 = vpop.xlane.xlu1 %8912 }
 0xb33   :  { %v8989_v47 = vmul.f32 0.0125, %v8913_v8  ;;  %v9052_v4 = vmul.f32 %v15163_v29, %v15163_v29 }
 0xb34   :  { %8951 = vadd.xlane.f32.xlu0 %v8950_v56 }
 0xb35   :  { %v15175_v31 = vsub.f32 %v14997_v59, %v8989_v47  ;;  %v9100_v48 = vsel %vm524_vm1, %v9052_v4, 0.0  ;;  %v8938_v47 = vsel %vm524_vm1, %v15207_v43, 0.0 }
 0xb36   :  { %9101 = vadd.xlane.f32.xlu1 %v9100_v48  ;;  %v8916_v60 = vpop.xlane.xlu1 %8915  ;;  %v8935_v48 = vsel %vm524_vm1, %v15220_v35, 0.0 }
 0xb37   :  { %v8990_v2 = vmul.f32 0.0125, %v8916_v60  ;;  %v9053_v27 = vmul.f32 %v15175_v31, %v15175_v31 }
 0xb38   :  { %8948 = vadd.xlane.f32.xlu0 %v8947_v7 }
 0xb39   :  { %v15188_v59 = vsub.f32 %v15003_v46, %v8990_v2  ;;  %v9103_v33 = vsel %vm524_vm1, %v9053_v27, 0.0 }
 0xb3a   :  { %9104 = vadd.xlane.f32.xlu1 %v9103_v33  ;;  %v8919_v20 = vpop.xlane.xlu1 %8918 }
 0xb3b   :  { %v8991_v14 = vmul.f32 0.0125, %v8919_v20  ;;  %v9054_v42 = vmul.f32 %v15188_v59, %v15188_v59 }
 0xb3c   :  { %8945 = vadd.xlane.f32.xlu0 %v8944_v51 }
 0xb3d   :  { %v15201_v46 = vsub.f32 %v15009_v6, %v8991_v14  ;;  %v9106_v39 = vsel %vm524_vm1, %v9054_v42, 0.0 }
 0xb3e   :  { %9107 = vadd.xlane.f32.xlu1 %v9106_v39  ;;  %v8922_v15 = vpop.xlane.xlu1 %8921 }
 0xb3f   :  { %v8992_v41 = vmul.f32 0.0125, %v8922_v15  ;;  %v9055_v23 = vmul.f32 %v15201_v46, %v15201_v46 }
 0xb40   :  { %8942 = vadd.xlane.f32.xlu0 %v8941_v19 }
 0xb41   :  { %v15214_v6 = vsub.f32 %v15015_v13, %v8992_v41  ;;  %v9109_v55 = vsel %vm524_vm1, %v9055_v23, 0.0 }
 0xb42   :  { %9110 = vadd.xlane.f32.xlu1 %v9109_v55  ;;  %v8925_v52 = vpop.xlane.xlu1 %8924 }
 0xb43   :  { %v8993_v8 = vmul.f32 0.0125, %v8925_v52  ;;  %v9056_v56 = vmul.f32 %v15214_v6, %v15214_v6 }
 0xb44   :  { %8939 = vadd.xlane.f32.xlu0 %v8938_v47 }
 0xb45   :  { %v15227_v13 = vsub.f32 %v15021_v17, %v8993_v8  ;;  %v9112_v4 = vsel %vm524_vm1, %v9056_v56, 0.0 }
 0xb46   :  { %9113 = vadd.xlane.f32.xlu1 %v9112_v4  ;;  %v8928_v32 = vpop.xlane.xlu1 %8927 }
 0xb47   :  { %v8994_v11 = vmul.f32 0.0125, %v8928_v32  ;;  %v9057_v0 = vmul.f32 %v15227_v13, %v15227_v13 }
 0xb48   :  { %8936 = vadd.xlane.f32.xlu0 %v8935_v48 }
 0xb49   :  { %v15238_v60 = vsub.f32 %v15027_v37, %v8994_v11  ;;  %v9115_v17 = vsel %vm524_vm1, %v9057_v0, 0.0 }
 0xb4a   :  { %9116 = vadd.xlane.f32.xlu1 %v9115_v17  ;;  %v8931_v2 = vpop.xlane.xlu1 %8930 }
 0xb4b   :  { %v8995_v7 = vmul.f32 0.0125, %v8931_v2  ;;  %v9058_v27 = vmul.f32 %v15238_v60, %v15238_v60 }
 0xb4c   :  { %8933 = vadd.xlane.f32.xlu0 %v8932_v53 }
 0xb4d   :  { %v15246_v33 = vsub.f32 %v15034_v3, %v8995_v7  ;;  %v9118_v1 = vsel %vm524_vm1, %v9058_v27, 0.0 }
 0xb4e   :  { %9119 = vadd.xlane.f32.xlu1 %v9118_v1  ;;  %v8907_v37 = vpop.xlane.xlu1 %8906 }
 0xb4f   :  { %v8987_v20 = vmul.f32 0.0125, %v8907_v37  ;;  %v9059_v14 = vmul.f32 %v15246_v33, %v15246_v33 }
 0xb51   :  { %v15252_v51 = vsub.f32 %v15040_v36, %v8987_v20  ;;  %v9121_v42 = vsel %vm524_vm1, %v9059_v14, 0.0 }
 0xb52   :  { %9122 = vadd.xlane.f32.xlu1 %v9121_v42  ;;  %v8904_v39 = vpop.xlane.xlu1 %8903 }
 0xb53   :  { %v8986_v61 = vmul.f32 0.0125, %v8904_v39  ;;  %v9051_v3 = vmul.f32 %v15252_v51, %v15252_v51 }
 0xb55   :  { %v15258_v15 = vsub.f32 %v15048_v16, %v8986_v61  ;;  %v9097_v41 = vsel %vm524_vm1, %v9051_v3, 0.0 }
 0xb56   :  { %9098 = vadd.xlane.f32.xlu1 %v9097_v41  ;;  %v8901_v19 = vpop.xlane.xlu1 %8900 }
 0xb57   :  { %v8985_v23 = vmul.f32 0.0125, %v8901_v19  ;;  %v9050_v36 = vmul.f32 %v15258_v15, %v15258_v15 }
 0xb59   :  { %v15264_v55 = vsub.f32 %v15057_v63, %v8985_v23  ;;  %v9094_v26 = vsel %vm524_vm1, %v9050_v36, 0.0 }
 0xb5a   :  { %9095 = vadd.xlane.f32.xlu1 %v9094_v26  ;;  %v8898_v52 = vpop.xlane.xlu1 %8897 }
 0xb5b   :  { %v8984_v8 = vmul.f32 0.0125, %v8898_v52  ;;  %v9049_v16 = vmul.f32 %v15264_v55, %v15264_v55 }
 0xb5d   :  { %v15270_v47 = vsub.f32 %v15066_v30, %v8984_v8  ;;  %v9091_v56 = vsel %vm524_vm1, %v9049_v16, 0.0 }
 0xb5e   :  { %9092 = vadd.xlane.f32.xlu1 %v9091_v56  ;;  %v8895_v4 = vpop.xlane.xlu1 %8894 }
 0xb5f   :  { %v8983_v32 = vmul.f32 0.0125, %v8895_v4  ;;  %v9048_v63 = vmul.f32 %v15270_v47, %v15270_v47 }
 0xb61   :  { %v15276_v11 = vsub.f32 %v15075_v40, %v8983_v32  ;;  %v9088_v48 = vsel %vm524_vm1, %v9048_v63, 0.0 }
 0xb62   :  { %9089 = vadd.xlane.f32.xlu1 %v9088_v48  ;;  %v8892_v0 = vpop.xlane.xlu1 %8891 }
 0xb63   :  { %v8982_v17 = vmul.f32 0.0125, %v8892_v0  ;;  %v9047_v30 = vmul.f32 %v15276_v11, %v15276_v11 }
 0xb65   :  { %v15282_v2 = vsub.f32 %v15084_v5, %v8982_v17  ;;  %v9085_v7 = vsel %vm524_vm1, %v9047_v30, 0.0 }
 0xb66   :  { %9086 = vadd.xlane.f32.xlu1 %v9085_v7  ;;  %v8889_v53 = vpop.xlane.xlu1 %8888 }
 0xb67   :  { %v8981_v27 = vmul.f32 0.0125, %v8889_v53  ;;  %v9046_v40 = vmul.f32 %v15282_v2, %v15282_v2 }
 0xb69   :  { %v15288_v1 = vsub.f32 %v15091_v9, %v8981_v27  ;;  %v9082_v37 = vsel %vm524_vm1, %v9046_v40, 0.0 }
 0xb6a   :  { %9083 = vadd.xlane.f32.xlu1 %v9082_v37  ;;  %v8886_v20 = vpop.xlane.xlu1 %8885 }
 0xb6b   :  { %v8980_v14 = vmul.f32 0.0125, %v8886_v20  ;;  %v9045_v5 = vmul.f32 %v15288_v1, %v15288_v1 }
 0xb6d   :  { %v15294_v42 = vsub.f32 %v15096_v58, %v8980_v14  ;;  %v9079_v39 = vsel %vm524_vm1, %v9045_v5, 0.0 }
 0xb6e   :  { %9080 = vadd.xlane.f32.xlu1 %v9079_v39 }
 0xb6f   :  { %v9044_v61 = vmul.f32 %v15294_v42, %v15294_v42 }
 0xb71   :  { %v9076_v9 = vsel %vm524_vm1, %v9044_v61, 0.0 }
 0xb72   :  { %9077 = vadd.xlane.f32.xlu1 %v9076_v9 }
 0xb97   :  { %v8958_v3 = vpop.xlane.xlu0 %8957 }
 0xb98   :  { %v9004_v41 = vmul.f32 0.0125, %v8958_v3 }
 0xb9a   :  { %v15301_v19 = vsub.f32 %v15104_v54, %v9004_v41 }
 0xb9b   :  { %v8961_v23 = vpop.xlane.xlu0 %8960 }
 0xb9c   :  { %v9005_v36 = vmul.f32 0.0125, %v8961_v23  ;;  %v9068_v58 = vmul.f32 %v15301_v19, %v15301_v19 }
 0xb9e   :  { %v15306_v26 = vsub.f32 %v15110_v10, %v9005_v36  ;;  %v9148_v52 = vsel %vm524_vm1, %v9068_v58, 0.0 }
 0xb9f   :  { %9149 = vadd.xlane.f32.xlu0 %v9148_v52 }
 0xba0   :  { %v8964_v8 = vpop.xlane.xlu0 %8963  ;;  %v9069_v16 = vmul.f32 %v15306_v26, %v15306_v26 }
 0xba1   :  { %v9006_v56 = vmul.f32 0.0125, %v8964_v8 }
 0xba2   :  { %v9151_v4 = vsel %vm524_vm1, %v9069_v16, 0.0 }
 0xba3   :  { %v15313_v54 = vsub.f32 %v15116_v50, %v9006_v56  ;;  %9152 = vadd.xlane.f32.xlu0 %v9151_v4 }
 0xba4   :  { %v8967_v32 = vpop.xlane.xlu0 %8966 }
 0xba5   :  { %v9007_v63 = vmul.f32 0.0125, %v8967_v32  ;;  %v9070_v10 = vmul.f32 %v15313_v54, %v15313_v54 }
 0xba7   :  { %v15318_v48 = vsub.f32 %v15122_v25, %v9007_v63  ;;  %v9154_v0 = vsel %vm524_vm1, %v9070_v10, 0.0 }
 0xba8   :  { %v8970_v17 = vpop.xlane.xlu0 %8969  ;;  %9155 = vadd.xlane.f32.xlu0 %v9154_v0 }
 0xba9   :  { %v9008_v30 = vmul.f32 0.0125, %v8970_v17  ;;  %v9071_v7 = vmul.f32 %v15318_v48, %v15318_v48 }
 0xbab   :  { %v15324_v50 = vsub.f32 %v15128_v18, %v9008_v30  ;;  %v9157_v53 = vsel %vm524_vm1, %v9071_v7, 0.0 }
 0xbac   :  { %9158 = vadd.xlane.f32.xlu0 %v9157_v53 }
 0xbad   :  { %v8973_v27 = vpop.xlane.xlu0 %8972  ;;  %v9072_v40 = vmul.f32 %v15324_v50, %v15324_v50 }
 0xbae   :  { %v9009_v25 = vmul.f32 0.0125, %v8973_v27 }
 0xbaf   :  { %v9160_v37 = vsel %vm524_vm1, %v9072_v40, 0.0 }
 0xbb0   :  { %v15331_v20 = vsub.f32 %v15134_v12, %v9009_v25  ;;  %9161 = vadd.xlane.f32.xlu0 %v9160_v37 }
 0xbb1   :  { %v8976_v14 = vpop.xlane.xlu0 %8975 }
 0xbb2   :  { %v9010_v5 = vmul.f32 0.0125, %v8976_v14  ;;  %v9073_v18 = vmul.f32 %v15331_v20, %v15331_v20 }
 0xbb4   :  { %v15336_v39 = vsub.f32 %v15140_v62, %v9010_v5  ;;  %v9163_v61 = vsel %vm524_vm1, %v9073_v18, 0.0 }
 0xbb5   :  { %9164 = vadd.xlane.f32.xlu0 %v9163_v61  ;;  %v8979_v9 = vpop.xlane.xlu0 %8978 }
 0xbb6   :  { %v9011_v3 = vmul.f32 0.0125, %v8979_v9  ;;  %v9074_v41 = vmul.f32 %v15336_v39, %v15336_v39 }
 0xbb8   :  { %v15342_v12 = vsub.f32 %v15147_v38, %v9011_v3  ;;  %v9166_v23 = vsel %vm524_vm1, %v9074_v41, 0.0 }
 0xbb9   :  { %9167 = vadd.xlane.f32.xlu0 %v9166_v23  ;;  %v8955_v36 = vpop.xlane.xlu0 %8954 }
 0xbba   :  { %v9003_v58 = vmul.f32 0.0125, %v8955_v36  ;;  %v9075_v62 = vmul.f32 %v15342_v12, %v15342_v12 }
 0xbbc   :  { %v15348_v52 = vsub.f32 %v15151_v21, %v9003_v58  ;;  %v9169_v8 = vsel %vm524_vm1, %v9075_v62, 0.0 }
 0xbbd   :  { %9170 = vadd.xlane.f32.xlu0 %v9169_v8  ;;  %v8952_v16 = vpop.xlane.xlu0 %8951 }
 0xbbe   :  { %v9002_v56 = vmul.f32 0.0125, %v8952_v16  ;;  %v9067_v38 = vmul.f32 %v15348_v52, %v15348_v52 }
 0xbc0   :  { %v15354_v4 = vsub.f32 %v15158_v44, %v9002_v56  ;;  %v9145_v32 = vsel %vm524_vm1, %v9067_v38, 0.0  ;;  %v9377_v38 = vld [vmem:[%s16128_s28 + $0x8] sm:$0xff] }
 0xbc1   :  { %9146 = vadd.xlane.f32.xlu0 %v9145_v32  ;;  %v8949_v63 = vpop.xlane.xlu0 %8948  ;;  %v15399_v32 = vpop.xlane.xlu1 %9101  ;;  %9444 = vmatprep.mubr.f32.mxu0 %v9377_v38 }
 0xbc2   :  { %v9001_v10 = vmul.f32 0.0125, %v8949_v63  ;;  %v9066_v21 = vmul.f32 %v15354_v4, %v15354_v4  ;;  %v9463_v63 = vld [vmem:[%s15748_s16 + $0x40] sm:$0xff] }
 0xbc4   :  { %v15360_v0 = vsub.f32 %v15168_v45, %v9001_v10  ;;  %v9142_v17 = vsel %vm524_vm1, %v9066_v21, 0.0  ;;  %v9462_v21 = vld [vmem:[%s15748_s16 + $0x38] sm:$0xff] }
 0xbc5   :  { %9143 = vadd.xlane.f32.xlu0 %v9142_v17  ;;  %v8946_v30 = vpop.xlane.xlu0 %8945  ;;  %v9105_v10 = vpop.xlane.xlu1 %9104  ;;  %v9461_v17 = vld [vmem:[%s15748_s16 + $0x30] sm:$0xff] }
 0xbc6   :  { %v9000_v7 = vmul.f32 0.0125, %v8946_v30  ;;  %v9065_v44 = vmul.f32 %v15360_v0, %v15360_v0  ;;  %v9460_v30 = vld [vmem:[%s15748_s16 + $0x28] sm:$0xff] }
 0xbc8   :  { %v15366_v53 = vsub.f32 %v15181_v57, %v9000_v7  ;;  %v9139_v27 = vsel %vm524_vm1, %v9065_v44, 0.0  ;;  %v9459_v44 = vld [vmem:[%s15748_s16 + $0x20] sm:$0xff] }
 0xbc9   :  { %9140 = vadd.xlane.f32.xlu0 %v9139_v27  ;;  %v8943_v40 = vpop.xlane.xlu0 %8942  ;;  %v9108_v7 = vpop.xlane.xlu1 %9107  ;;  %v9458_v27 = vld [vmem:[%s15748_s16 + $0x18] sm:$0xff] }
 0xbca   :  { %v8999_v25 = vmul.f32 0.0125, %v8943_v40  ;;  %v9064_v45 = vmul.f32 %v15366_v53, %v15366_v53  ;;  %v9457_v40 = vld [vmem:[%s15748_s16 + $0x10] sm:$0xff] }
 0xbcc   :  { %v15372_v37 = vsub.f32 %v15194_v34, %v8999_v25  ;;  %v9136_v14 = vsel %vm524_vm1, %v9064_v45, 0.0 }
 0xbcd   :  { %9137 = vadd.xlane.f32.xlu0 %v9136_v14  ;;  %v8940_v5 = vpop.xlane.xlu0 %8939  ;;  %v9111_v25 = vpop.xlane.xlu1 %9110 }
 0xbce   :  { %v8998_v18 = vmul.f32 0.0125, %v8940_v5  ;;  %v9063_v57 = vmul.f32 %v15372_v37, %v15372_v37  ;;  %v9183_v38 = vmul.f32 0.0125, %v9111_v25 }
 0xbd0   :  { %v15378_v61 = vsub.f32 %v15207_v43, %v8998_v18  ;;  %v9133_v9 = vsel %vm524_vm1, %v9063_v57, 0.0 }
 0xbd1   :  { %9134 = vadd.xlane.f32.xlu0 %v9133_v9  ;;  %v8937_v3 = vpop.xlane.xlu0 %8936  ;;  %v9114_v45 = vpop.xlane.xlu1 %9113 }
 0xbd2   :  { %v8997_v41 = vmul.f32 0.0125, %v8937_v3  ;;  %v9062_v34 = vmul.f32 %v15378_v61, %v15378_v61 }
 0xbd4   :  { %v15384_v23 = vsub.f32 %v15220_v35, %v8997_v41  ;;  %v9130_v36 = vsel %vm524_vm1, %v9062_v34, 0.0 }
 0xbd5   :  { %9131 = vadd.xlane.f32.xlu0 %v9130_v36  ;;  %v8934_v58 = vpop.xlane.xlu0 %8933  ;;  %v9117_v14 = vpop.xlane.xlu1 %9116 }
 0xbd6   :  { %v8996_v62 = vmul.f32 0.0125, %v8934_v58  ;;  %v9061_v43 = vmul.f32 %v15384_v23, %v15384_v23  ;;  %v9181_v58 = vmul.f32 0.0125, %v9105_v10 }
 0xbd8   :  { %v15390_v8 = vsub.f32 %v15231_v49, %v8996_v62  ;;  %v9127_v16 = vsel %vm524_vm1, %v9061_v43, 0.0  ;;  %v9464_v49 = vld [vmem:[%s15748_s16 + $0x48] sm:$0xff]  ;;  %v9182_v43 = vmul.f32 0.0125, %v9108_v7 }
 0xbd9   :  { %9128 = vadd.xlane.f32.xlu0 %v9127_v16  ;;  %11250 = vmatprep.subr.mxu1 %v9464_v49  ;;  %v9120_v5 = vpop.xlane.xlu1 %9119  ;;  %v9185_v16 = vmul.f32 0.0125, %v9117_v14 }
 0xbda   :  { %v9060_v56 = vmul.f32 %v15390_v8, %v15390_v8  ;;  %11251 = vmatpush3.msra.mxu1 %v9464_v49 }
 0xbdb   :  { %11252 = vmatprep.subr.mxu1 %v9463_v63 }
 0xbdc   :  { %v9124_v35 = vsel %vm524_vm1, %v9060_v56, 0.0  ;;  %11253 = vmatpush3.msra.mxu1 %v9463_v63  ;;  %v9214_v63 = vadd.f32 1e-05, %v9182_v43 }
 0xbdd   :  { %9125 = vadd.xlane.f32.xlu0 %v9124_v35  ;;  %11254 = vmatprep.subr.mxu1 %v9462_v21  ;;  %v9123_v57 = vpop.xlane.xlu1 %9122  ;;  %v9213_v35 = vadd.f32 1e-05, %v9181_v58 }
 0xbde   :  { %11255 = vmatpush3.msra.mxu1 %v9462_v21  ;;  %v9187_v56 = vmul.f32 0.0125, %v9123_v57  ;;  %v9184_v21 = vmul.f32 0.0125, %v9114_v45 }
 0xbdf   :  { %11256 = vmatprep.subr.mxu1 %v9461_v17  ;;  %11620 = vrsqrt.f32 %v9213_v35 }
 0xbe0   :  { %11257 = vmatpush3.msra.mxu1 %v9461_v17  ;;  %11622 = vrsqrt.f32 %v9214_v63  ;;  %v9216_v24 = vadd.f32 1e-05, %v9184_v21 }
 0xbe1   :  { %11258 = vmatprep.subr.mxu1 %v9460_v30  ;;  %v9099_v3 = vpop.xlane.xlu1 %9098 }
 0xbe2   :  { %11259 = vmatpush3.msra.mxu1 %v9460_v30  ;;  %v9217_v30 = vadd.f32 1e-05, %v9185_v16 }
 0xbe3   :  { %11260 = vmatprep.subr.mxu1 %v9459_v44 }
 0xbe4   :  { %11261 = vmatpush3.msra.mxu1 %v9459_v44  ;;  %v9186_v44 = vmul.f32 0.0125, %v9120_v5  ;;  %11624 = vrsqrt.f32 %v9217_v30 }
 0xbe5   :  { %11262 = vmatprep.subr.mxu1 %v9458_v27  ;;  %v9096_v36 = vpop.xlane.xlu1 %9095 }
 0xbe6   :  { %11263 = vmatpush3.msra.mxu1 %v9458_v27  ;;  %v9219_v27 = vadd.f32 1e-05, %v9187_v56  ;;  %v9218_v57 = vadd.f32 1e-05, %v9186_v44  ;;  %v9178_v44 = vmul.f32 0.0125, %v9096_v36 }
 0xbe7   :  { %11264 = vmatprep.subr.mxu1 %v9457_v40 }
 0xbe8   :  { %11265 = vmatpush3.msra.mxu1 %v9457_v40  ;;  %v9215_v40 = vadd.f32 1e-05, %v9183_v38  ;;  %11626 = vrsqrt.f32 %v9219_v27 }
 0xbe9   :  { %v9093_v49 = vpop.xlane.xlu1 %9092 }
 0xbea   :  { %11628 = vrsqrt.f32 %v9215_v40 }
 0xbeb   :  { %11630 = vrsqrt.f32 %v9216_v24 }
 0xbed   :  { %v9090_v7 = vpop.xlane.xlu1 %9089 }
 0xbf1   :  { %v9087_v35 = vpop.xlane.xlu1 %9086 }
 0xc28   :  { %v9150_v18 = vpop.xlane.xlu0 %9149 }
 0xc29   :  { %v9196_v21 = vmul.f32 0.0125, %v9150_v18 }
 0xc2b   :  { %v9228_v27 = vadd.f32 1e-05, %v9196_v21 }
 0xc2c   :  { %v9153_v9 = vpop.xlane.xlu0 %9152 }
 0xc2d   :  { %v9197_v38 = vmul.f32 0.0125, %v9153_v9 }
 0xc2f   :  { %v9229_v24 = vadd.f32 1e-05, %v9197_v38 }
 0xc31   :  { %v9156_v41 = vpop.xlane.xlu0 %9155 }
 0xc32   :  { %v9198_v43 = vmul.f32 0.0125, %v9156_v41  ;;  %v11621_v41 = vpop.eup %11620 }
 0xc33   :  { %v11623_v9 = vpop.eup %11622 }
 0xc34   :  { %v11625_v18 = vpop.eup %11624 }
 0xc35   :  { %v9159_v34 = vpop.xlane.xlu0 %9158  ;;  %v9281_v38 = vmul.f32 %v11625_v18, %v15227_v13 }
 0xc36   :  { %v9199_v25 = vmul.f32 0.0125, %v9159_v34  ;;  %v9180_v34 = vmul.f32 0.0125, %v15399_v32 }
 0xc39   :  { %v9162_v62 = vpop.xlane.xlu0 %9161 }
 0xc3a   :  { %v9200_v28 = vmul.f32 0.0125, %v9162_v62  ;;  %v9231_v62 = vadd.f32 1e-05, %v9199_v25 }
 0xc3c   :  { %v9232_v5 = vadd.f32 1e-05, %v9200_v28 }
 0xc3e   :  { %v9165_v17 = vpop.xlane.xlu0 %9164 }
 0xc3f   :  { %v9201_v22 = vmul.f32 0.0125, %v9165_v17  ;;  %v9230_v17 = vadd.f32 1e-05, %v9198_v43  ;;  %v9210_v43 = vadd.f32 1e-05, %v9178_v44 }
 0xc40   :  { %v9175_v44 = vmul.f32 0.0125, %v9087_v35 }
 0xc41   :  { %v9233_v58 = vadd.f32 1e-05, %v9201_v22  ;;  %v9179_v22 = vmul.f32 0.0125, %v9099_v3  ;;  %v9177_v3 = vmul.f32 0.0125, %v9093_v49 }
 0xc42   :  { %v9168_v10 = vpop.xlane.xlu0 %9167 }
 0xc43   :  { %v9202_v14 = vmul.f32 0.0125, %v9168_v10  ;;  %v9212_v10 = vadd.f32 1e-05, %v9180_v34  ;;  %v9211_v25 = vadd.f32 1e-05, %v9179_v22 }
 0xc44   :  { %v9209_v13 = vadd.f32 1e-05, %v9177_v3 }
 0xc45   :  { %v9234_v45 = vadd.f32 1e-05, %v9202_v14  ;;  %v9084_v14 = vpop.xlane.xlu1 %9083 }
 0xc46   :  { %v9171_v16 = vpop.xlane.xlu0 %9170 }
 0xc47   :  { %11632 = vrsqrt.f32 %v9234_v45  ;;  %v9203_v56 = vmul.f32 0.0125, %v9171_v16 }
 0xc48   :  { %11634 = vrsqrt.f32 %v9218_v57 }
 0xc49   :  { %11636 = vrsqrt.f32 %v9233_v58  ;;  %v9235_v63 = vadd.f32 1e-05, %v9203_v56  ;;  %v11627_v58 = vpop.eup %11626  ;;  %v9081_v34 = vpop.xlane.xlu1 %9080 }
 0xc4a   :  { %11638 = vrsqrt.f32 %v9232_v5  ;;  %v9147_v30 = vpop.xlane.xlu0 %9146  ;;  %v11629_v32 = vpop.eup %11628  ;;  %v9283_v21 = vmul.f32 %v11627_v58, %v15246_v33  ;;  %v15438_v33 = vld [vmem:[%s15746_s14] ss:$0 sm:$0xff] }
 0xc4b   :  { %11640 = vrsqrt.f32 %v9235_v63  ;;  %v9195_v28 = vmul.f32 0.0125, %v9147_v30  ;;  %v11631_v16 = vpop.eup %11630  ;;  %v9176_v63 = vmul.f32 0.0125, %v9090_v7  ;;  %v9279_v22 = vmul.f32 %v11629_v32, %v15201_v46 }
 0xc4c   :  { %11642 = vrsqrt.f32 %v9231_v62  ;;  %v9321_v35 = vmul.f32 %v15438_v33, %v9283_v21  ;;  %v9173_v32 = vmul.f32 0.0125, %v9081_v34 }
 0xc4d   :  { %11644 = vrsqrt.f32 %v9230_v17  ;;  %v9227_v45 = vadd.f32 1e-05, %v9195_v28  ;;  %v15429_v17 = vmul.f32 %v11621_v41, %v15175_v31  ;;  %v9280_v31 = vmul.f32 %v11631_v16, %v15214_v6 }
 0xc4e   :  { %v9144_v40 = vpop.xlane.xlu0 %9143  ;;  %11646 = vrsqrt.f32 %v9229_v24  ;;  %v15433_v24 = vmul.f32 %v11623_v9, %v15188_v59  ;;  %v9319_v59 = vmul.f32 %v15438_v33, %v9281_v38  ;;  %v9208_v9 = vadd.f32 1e-05, %v9176_v63 }
 0xc4f   :  { %v9194_v57 = vmul.f32 0.0125, %v9144_v40  ;;  %11648 = vrsqrt.f32 %v9228_v27 }
 0xc50   :  { %11650 = vrsqrt.f32 %v9212_v10  ;;  %v9174_v10 = vmul.f32 0.0125, %v9084_v14 }
 0xc51   :  { %v9226_v36 = vadd.f32 1e-05, %v9194_v57  ;;  %11652 = vrsqrt.f32 %v9211_v25 }
 0xc52   :  { %v9141_v5 = vpop.xlane.xlu0 %9140  ;;  %11654 = vrsqrt.f32 %v9227_v45  ;;  %v9207_v45 = vadd.f32 1e-05, %v9175_v44  ;;  %v9206_v16 = vadd.f32 1e-05, %v9174_v10 }
 0xc53   :  { %v9193_v56 = vmul.f32 0.0125, %v9141_v5  ;;  %11656 = vrsqrt.f32 %v9210_v43  ;;  %v9078_v5 = vpop.xlane.xlu1 %9077 }
 0xc54   :  { %v11633_v62 = vpop.eup %11632  ;;  %11658 = vrsqrt.f32 %v9226_v36  ;;  %v9172_v34 = vmul.f32 0.0125, %v9078_v5 }
 0xc55   :  { %v11635_v30 = vpop.eup %11634  ;;  %v9225_v49 = vadd.f32 1e-05, %v9193_v56  ;;  %v9298_v46 = vmul.f32 %v11633_v62, %v15336_v39 }
 0xc56   :  { %v11637_v28 = vpop.eup %11636  ;;  %v9138_v27 = vpop.xlane.xlu0 %9137  ;;  %v9282_v57 = vmul.f32 %v11635_v30, %v15238_v60  ;;  %v15451_v60 = vld [vmem:[%s15747_s15] ss:$0 sm:$0xff]  ;;  %v9205_v30 = vadd.f32 1e-05, %v9173_v32 }
 0xc57   :  { %v11639_v7 = vpop.eup %11638  ;;  %v9192_v41 = vmul.f32 0.0125, %v9138_v27  ;;  %11660 = vrsqrt.f32 %v9225_v49  ;;  %v9297_v6 = vmul.f32 %v11637_v28, %v15331_v20  ;;  %v9336_v20 = vmul.f32 %v15438_v33, %v9298_v46 }
 0xc58   :  { %v11641_v40 = vpop.eup %11640  ;;  %11662 = vrsqrt.f32 %v9209_v13  ;;  %v9296_v43 = vmul.f32 %v11639_v7, %v15324_v50  ;;  %v9359_v36 = vadd.f32 %v15451_v60, %v9321_v35  ;;  %v9320_v56 = vmul.f32 %v15438_v33, %v9282_v57 }
 0xc59   :  { %v9224_v18 = vadd.f32 1e-05, %v9192_v41  ;;  %v9299_v25 = vmul.f32 %v11641_v40, %v15342_v12  ;;  %v11643_v58 = vpop.eup %11642  ;;  %v9335_v62 = vmul.f32 %v15438_v33, %v9297_v6  ;;  %v9374_v27 = vadd.f32 %v15451_v60, %v9336_v20 }
 0xc5a   :  { %v9135_v39 = vpop.xlane.xlu0 %9134  ;;  %v11645_v3 = vpop.eup %11644  ;;  %v9295_v63 = vmul.f32 %v11643_v58, %v15318_v48  ;;  %v9334_v7 = vmul.f32 %v15438_v33, %v9296_v43  ;;  %v9358_v48 = vadd.f32 %v15451_v60, %v9320_v56  ;;  %v9318_v46 = vmul.f32 %v15438_v33, %v9280_v31 }
 0xc5b   :  { %11664 = vrsqrt.f32 %v9224_v18  ;;  %v9191_v14 = vmul.f32 0.0125, %v9135_v39  ;;  %v9337_v12 = vmul.f32 %v15438_v33, %v9299_v25  ;;  %v11647_v21 = vpop.eup %11646  ;;  %v9294_v28 = vmul.f32 %v11645_v3, %v15313_v54 }
 0xc5c   :  { %11666 = vrsqrt.f32 %v9208_v9  ;;  %v11649_v13 = vpop.eup %11648  ;;  %v9317_v40 = vmul.f32 %v15438_v33, %v9279_v22  ;;  %v9373_v54 = vadd.f32 %v15451_v60, %v9335_v62  ;;  %v9333_v35 = vmul.f32 %v15438_v33, %v9295_v63 }
 0xc5d   :  { %v9223_v50 = vadd.f32 1e-05, %v9191_v14  ;;  %v9375_v38 = vadd.f32 %v15451_v60, %v9337_v12  ;;  %11668 = vrsqrt.f32 %v9207_v45  ;;  %v11651_v41 = vpop.eup %11650  ;;  %v9293_v57 = vmul.f32 %v11647_v21, %v15306_v26 }
 0xc5e   :  { %v9132_v49 = vpop.xlane.xlu0 %9131  ;;  %v11653_v9 = vpop.eup %11652  ;;  %v9204_v25 = vadd.f32 1e-05, %v9172_v34  ;;  %v9357_v58 = vadd.f32 %v15451_v60, %v9319_v59  ;;  %v9292_v31 = vmul.f32 %v11649_v13, %v15301_v19  ;;  %v9372_v32 = vadd.f32 %v15451_v60, %v9334_v7 }
 0xc5f   :  { %11670 = vrsqrt.f32 %v9223_v50  ;;  %v9190_v44 = vmul.f32 0.0125, %v9132_v49  ;;  %10522 = vmatprep.subr.mxu0 %v9375_v38  ;;  %v11655_v18 = vpop.eup %11654  ;;  %v9332_v39 = vmul.f32 %v15438_v33, %v9294_v28  ;;  %v9356_v26 = vadd.f32 %v15451_v60, %v9318_v46 }
 0xc60   :  { %11672 = vrsqrt.f32 %v9206_v16  ;;  %10523 = vmatpush3.msra.mxu0 %v9359_v36  ;;  %v11657_v45 = vpop.eup %11656  ;;  %v9316_v3 = vmul.f32 %v15438_v33, %v15433_v24  ;;  %v9315_v59 = vmul.f32 %v15438_v33, %v15429_v17  ;;  %v9276_v19 = vmul.f32 %v11651_v41, %v15163_v29 }
 0xc61   :  { %v9222_v10 = vadd.f32 1e-05, %v9190_v44  ;;  %10524 = vmatprep.subr.mxu0 %v9374_v27  ;;  %11674 = vrsqrt.f32 %v9205_v30  ;;  %v11659_v43 = vpop.eup %11658  ;;  %v9371_v14 = vadd.f32 %v15451_v60, %v9333_v35  ;;  %v9331_v12 = vmul.f32 %v15438_v33, %v9293_v57 }
 0xc62   :  { %v9129_v6 = vpop.xlane.xlu0 %9128  ;;  %10525 = vmatpush3.msra.mxu0 %v9358_v48  ;;  %v9291_v20 = vmul.f32 %v11655_v18, %v15348_v52  ;;  %v9355_v56 = vadd.f32 %v15451_v60, %v9317_v40  ;;  %v9330_v24 = vmul.f32 %v15438_v33, %v9292_v31  ;;  %v9275_v17 = vmul.f32 %v11653_v9, %v15252_v51 }
 0xc63   :  { %11676 = vrsqrt.f32 %v9222_v10  ;;  %v9189_v22 = vmul.f32 0.0125, %v9129_v6  ;;  %10526 = vmatprep.subr.mxu0 %v9373_v54  ;;  %v9370_v38 = vadd.f32 %v15451_v60, %v9332_v39  ;;  %v9290_v62 = vmul.f32 %v11659_v43, %v15354_v4 }
 0xc64   :  { %10527 = vmatpush3.msra.mxu0 %v9357_v58  ;;  %v11661_v16 = vpop.eup %11660  ;;  %11678 = vrsqrt.f32 %v9204_v25  ;;  %v9354_v52 = vadd.f32 %v15451_v60, %v9316_v3  ;;  %v9314_v21 = vmul.f32 %v15438_v33, %v9276_v19  ;;  %v9274_v30 = vmul.f32 %v11657_v45, %v15258_v15 }
 0xc65   :  { %v9221_v5 = vadd.f32 1e-05, %v9189_v22  ;;  %10528 = vmatprep.subr.mxu0 %v9372_v32  ;;  %v11663_v50 = vpop.eup %11662  ;;  %v9369_v51 = vadd.f32 %v15451_v60, %v9331_v12  ;;  %v9329_v28 = vmul.f32 %v15438_v33, %v9291_v20  ;;  %v9289_v13 = vmul.f32 %v11661_v16, %v15360_v0 }
 0xc66   :  { %v9126_v36 = vpop.xlane.xlu0 %9125  ;;  %10529 = vmatpush3.msra.mxu0 %v9356_v26  ;;  %v9353_v4 = vadd.f32 %v15451_v60, %v9315_v59  ;;  %v9313_v44 = vmul.f32 %v15438_v33, %v9275_v17  ;;  %v9273_v27 = vmul.f32 %v11663_v50, %v15264_v55  ;;  %v9368_v15 = vadd.f32 %v15451_v60, %v9330_v24 }
 0xc67   :  { %11680 = vrsqrt.f32 %v9221_v5  ;;  %v9188_v29 = vmul.f32 0.0125, %v9126_v36  ;;  %10530 = vmatprep.subr.mxu0 %v9371_v14  ;;  %v9328_v41 = vmul.f32 %v15438_v33, %v9290_v62  ;;  %v9352_v0 = vadd.f32 %v15451_v60, %v9314_v21 }
 0xc68   :  { %v11665_v63 = vpop.eup %11664  ;;  %10531 = vmatpush3.msra.mxu0 %v9355_v56  ;;  %v9312_v40 = vmul.f32 %v15438_v33, %v9274_v30  ;;  %v9367_v55 = vadd.f32 %v15451_v60, %v9329_v28  ;;  %v9327_v54 = vmul.f32 %v15438_v33, %v9289_v13  ;;  %v9351_v57 = vadd.f32 %v15451_v60, %v9313_v44  ;;  %v9455_v30 = vld [vmem:[%s15748_s16] sm:$0xff]  ;;  %v9586_v44 = vld [vmem:[%s15750_s18 + $0xf8] sm:$0xff] }
 0xc69   :  { %v11667_v34 = vpop.eup %11666  ;;  %v9220_v49 = vadd.f32 1e-05, %v9188_v29  ;;  %10532 = vmatprep.subr.mxu0 %v9370_v38  ;;  %v9288_v48 = vmul.f32 %v11665_v63, %v15366_v53  ;;  %v9311_v53 = vmul.f32 %v15438_v33, %v9273_v27  ;;  %v9366_v6 = vadd.f32 %v15451_v60, %v9328_v41  ;;  %v9595_v28 = vld [vmem:[%s15750_s18 + $0x140] sm:$0xff]  ;;  %v9585_v27 = vld [vmem:[%s15750_s18 + $0xf0] sm:$0xff]  ;;  %v9576_v41 = vld [vmem:[%s15750_s18 + $0xa8] sm:$0xff] }
 0xc6a   :  { %10533 = vmatpush3.msra.mxu0 %v9354_v52  ;;  %v11669_v7 = vpop.eup %11668  ;;  %v9272_v9 = vmul.f32 %v11667_v34, %v15270_v47  ;;  %v9350_v31 = vadd.f32 %v15451_v60, %v9312_v40  ;;  %v9365_v22 = vadd.f32 %v15451_v60, %v9327_v54  ;;  %v9376_v52 = vld [vmem:[%s16128_s28] sm:$0xff]  ;;  %v16129_v21 = vmov 0.0   ;;  %v9601_v34 = vld [vmem:[%s15750_s18 + $0x170] sm:$0xff] }
 0xc6b   :  { %11682 = vrsqrt.f32 %v9220_v49  ;;  %10534 = vmatprep.subr.mxu0 %v9369_v51  ;;  %v9271_v18 = vmul.f32 %v11669_v7, %v15276_v11  ;;  %v9326_v47 = vmul.f32 %v15438_v33, %v9288_v48  ;;  %v9349_v39 = vadd.f32 %v15451_v60, %v9311_v53  ;;  %v9600_v49 = vld [vmem:[%s15750_s18 + $0x168] sm:$0xff]  ;;  %v9591_v13 = vld [vmem:[%s15750_s18 + $0x120] sm:$0xff]  ;;  %v9581_v7 = vld [vmem:[%s15750_s18 + $0xd0] sm:$0xff] }
 0xc6c   :  { %v11671_v46 = vpop.eup %11670  ;;  %10535 = vmatpush3.msra.mxu0 %v9353_v4  ;;  %v9310_v45 = vmul.f32 %v15438_v33, %v9272_v9  ;;  %v9596_v51 = vld [vmem:[%s15750_s18 + $0x148] sm:$0xff]  ;;  %v9590_v4 = vld [vmem:[%s15750_s18 + $0x118] sm:$0xff]  ;;  %v9575_v48 = vld [vmem:[%s15750_s18 + $0xa0] sm:$0xff] }
 0xc6d   :  { %v11673_v10 = vpop.eup %11672  ;;  %10536 = vmatprep.subr.mxu0 %v9368_v15  ;;  %v9287_v35 = vmul.f32 %v11671_v46, %v15372_v37  ;;  %v9309_v43 = vmul.f32 %v15438_v33, %v9271_v18  ;;  %v9364_v59 = vadd.f32 %v15451_v60, %v9326_v47  ;;  %v9580_v15 = vld [vmem:[%s15750_s18 + $0xc8] sm:$0xff]  ;;  %v9571_v46 = vld [vmem:[%s15750_s18 + $0x80] sm:$0xff]  ;;  %v9602_v53 = vld [vmem:[%s15750_s18 + $0x178] sm:$0xff] }
 0xc6e   :  { %10537 = vmatpush3.msra.mxu0 %v9352_v0  ;;  %v11675_v25 = vpop.eup %11674  ;;  %v9270_v37 = vmul.f32 %v11673_v10, %v15282_v2  ;;  %v9348_v5 = vadd.f32 %v15451_v60, %v9310_v45  ;;  %v9570_v0 = vld [vmem:[%s15750_s18 + $0x78] sm:$0xff]  ;;  %v9592_v47 = vld [vmem:[%s15750_s18 + $0x128] sm:$0xff]  ;;  %v9583_v45 = vld [vmem:[%s15750_s18 + $0xe0] sm:$0xff] }
 0xc6f   :  { %10538 = vmatprep.subr.mxu0 %v9367_v55  ;;  %v9325_v32 = vmul.f32 %v15438_v33, %v9287_v35  ;;  %v9269_v26 = vmul.f32 %v11675_v25, %v15288_v1  ;;  %v9347_v1 = vadd.f32 %v15451_v60, %v9309_v43  ;;  %v9598_v18 = vld [vmem:[%s15750_s18 + $0x158] sm:$0xff]  ;;  %v9597_v25 = vld [vmem:[%s15750_s18 + $0x150] sm:$0xff]  ;;  %v9572_v43 = vld [vmem:[%s15750_s18 + $0x88] sm:$0xff] }
 0xc70   :  { %v11677_v58 = vpop.eup %11676  ;;  %10539 = vmatpush3.msra.mxu0 %v9351_v57  ;;  %v9308_v14 = vmul.f32 %v15438_v33, %v9270_v37  ;;  %v9603_v57 = vld [vmem:[%s15750_s18 + $0x180] sm:$0xff]  ;;  %v9582_v37 = vld [vmem:[%s15750_s18 + $0xd8] sm:$0xff] }
 0xc71   :  { %10540 = vmatprep.subr.mxu0 %v9366_v6  ;;  %v9286_v11 = vmul.f32 %v11677_v58, %v15378_v61  ;;  %v11679_v3 = vpop.eup %11678  ;;  %v9363_v61 = vadd.f32 %v15451_v60, %v9325_v32  ;;  %v9307_v20 = vmul.f32 %v15438_v33, %v9269_v26  ;;  %v9593_v6 = vld [vmem:[%s15750_s18 + $0x130] sm:$0xff]  ;;  %v9588_v58 = vld [vmem:[%s15750_s18 + $0x108] sm:$0xff] }
 0xc72   :  { %10541 = vmatpush3.msra.mxu0 %v9350_v31  ;;  %v9268_v16 = vmul.f32 %v11679_v3, %v15294_v42  ;;  %v9346_v17 = vadd.f32 %v15451_v60, %v9308_v14  ;;  %v9587_v31 = vld [vmem:[%s15750_s18 + $0x100] sm:$0xff]  ;;  %v9577_v32 = vld [vmem:[%s15750_s18 + $0xb0] sm:$0xff]  ;;  %v9568_v3 = vld [vmem:[%s15750_s18 + $0x68] sm:$0xff] }
 0xc73   :  { %10542 = vmatprep.subr.mxu0 %v9365_v22  ;;  %v9324_v2 = vmul.f32 %v15438_v33, %v9286_v11  ;;  %v9345_v29 = vadd.f32 %v15451_v60, %v9307_v20  ;;  %v9578_v22 = vld [vmem:[%s15750_s18 + $0xb8] sm:$0xff]  ;;  %v9573_v11 = vld [vmem:[%s15750_s18 + $0x90] sm:$0xff]  ;;  %v9555_v14 = vld [vmem:[%s15750_s18] sm:$0xff] }
 0xc74   :  { %v11681_v19 = vpop.eup %11680  ;;  %10543 = vmatpush3.msra.mxu0 %v9349_v39  ;;  %v9306_v38 = vmul.f32 %v15438_v33, %v9268_v16  ;;  %v9566_v39 = vld [vmem:[%s15750_s18 + $0x58] sm:$0xff]  ;;  %v9565_v26 = vld [vmem:[%s15750_s18 + $0x50] sm:$0xff] }
 0xc75   :  { %10544 = vmatprep.subr.mxu0 %v9364_v59  ;;  %v9285_v12 = vmul.f32 %v11681_v19, %v15384_v23  ;;  %v9362_v36 = vadd.f32 %v15451_v60, %v9324_v2  ;;  %v9561_v59 = vld [vmem:[%s15750_s18 + $0x30] sm:$0xff]  ;;  %v9567_v2 = vld [vmem:[%s15750_s18 + $0x60] sm:$0xff]  ;;  %v9560_v19 = vld [vmem:[%s15750_s18 + $0x28] sm:$0xff] }
 0xc76   :  { %10545 = vmatpush3.msra.mxu0 %v9348_v5  ;;  %v9344_v63 = vadd.f32 %v15451_v60, %v9306_v38  ;;  %v9556_v5 = vld [vmem:[%s15750_s18 + $0x8] sm:$0xff]  ;;  %v9558_v20 = vld [vmem:[%s15750_s18 + $0x18] sm:$0xff]  ;;  %v9557_v16 = vld [vmem:[%s15750_s18 + $0x10] sm:$0xff] }
 0xc77   :  { %10546 = vmatprep.subr.mxu0 %v9363_v61  ;;  %v9323_v56 = vmul.f32 %v15438_v33, %v9285_v12  ;;  %v9604_v61 = vld [vmem:[%s15750_s18 + $0x188] sm:$0xff]  ;;  %v9563_v12 = vld [vmem:[%s15750_s18 + $0x40] sm:$0xff]  ;;  %v9594_v38 = vld [vmem:[%s15750_s18 + $0x138] sm:$0xff] }
 0xc78   :  { %v11683_v24 = vpop.eup %11682  ;;  %10547 = vmatpush3.msra.mxu0 %v9347_v1  ;;  %v9562_v1 = vld [vmem:[%s15750_s18 + $0x38] sm:$0xff] }
 0xc79   :  { %10548 = vmatprep.subr.mxu0 %v9362_v36  ;;  %v9361_v50 = vadd.f32 %v15451_v60, %v9323_v56  ;;  %v9284_v23 = vmul.f32 %v11683_v24, %v15390_v8  ;;  %v9379_v8 = vld [vmem:[%s16128_s28 + $0x18] sm:$0xff]  ;;  %v10124_v56 = vld [vmem:[%s15749_s17] ss:$0 sm:$0xff] }
 0xc7a   :  { %10549 = vmatpush3.msra.mxu0 %v9346_v17 }
 0xc7b   :  { %10550 = vmatprep.subr.mxu0 %v9361_v50  ;;  %v9322_v42 = vmul.f32 %v15438_v33, %v9284_v23  ;;  %v9378_v33 = vld [vmem:[%s16128_s28 + $0x10] sm:$0xff] }
 0xc7c   :  { %10551 = vmatpush3.msra.mxu0 %v9345_v29  ;;  %v9599_v29 = vld [vmem:[%s15750_s18 + $0x160] sm:$0xff] }
 0xc7d   :  { %v9360_v62 = vadd.f32 %v15451_v60, %v9322_v42  ;;  %v9456_v60 = vld [vmem:[%s15748_s16 + $0x8] sm:$0xff] }
 0xc7e   :  { %11266 = vmatprep.subr.mxu1 %v9456_v60 }
 0xc7f   :  { %10552 = vmatprep.subr.mxu0 %v9360_v62  ;;  %11267 = vmatpush3.msra.mxu1 %v9456_v60  ;;  %v9589_v62 = vld [vmem:[%s15750_s18 + $0x110] sm:$0xff]  ;;  %v9559_v60 = vld [vmem:[%s15750_s18 + $0x20] sm:$0xff] }
 0xc80   :  { %10553 = vmatpush3.msra.mxu0 %v9344_v63  ;;  %11268 = vmatprep.subr.mxu1 %v9455_v30  ;;  %v9584_v63 = vld [vmem:[%s15750_s18 + $0xe8] sm:$0xff] }
 0xc81   :  { %9445 = vmatmul.mubr.f32.vlgmr.msra.gmra.mxu0 %v9376_v52  ;;  %11269 = vmatpush3.msra.mxu1 %v9455_v30  ;;  %v9579_v52 = vld [vmem:[%s15750_s18 + $0xc0] sm:$0xff] }
 0xc82   :  { %9449 = vmatprep.mubr.f32.mxu0 %v9379_v8  ;;  %9650 = vmatprep.subr.mxu0 %v9601_v34  ;;  %v9574_v8 = vld [vmem:[%s15750_s18 + $0x98] sm:$0xff]  ;;  %v9605_v30 = vld [vmem:[%s15751_s19] sm:$0x1f]  ;;  %v16130_v34 = vld [vmem:[#allocation40_spill] sm:$0xff] }
 0xc83   :  { %9651 = vmatpush1.msra.mxu0 %v9600_v49  ;;  %9727 = vmatprep.subr.mxu1 %v9603_v57  ;;  %v9610_v49 = vrot.slane %v9605_v30, %v16130_v34 }
 0xc84   :  { %9652 = vmatprep.subr.mxu0 %v9596_v51  ;;  %v16131_v51 = vld [vmem:[#allocation37_spill] sm:$0xff] }
 0xc85   :  { %9450 = vmatmul.mubr.f32.gmra.mxu0 %v9378_v33  ;;  %v9569_v33 = vld [vmem:[%s15750_s18 + $0x70] sm:$0xff] }
 0xc86   :  { %9702 = vmatprep.mubr.f32.mxu0 %v16129_v21  ;;  %9653 = vmatpush1.msra.mxu0 %v9595_v28  ;;  %v16132_v28 = vsub.s32 2, %v16131_v51 }
 0xc87   :  { %9654 = vmatprep.subr.mxu0 %v9591_v13 }
 0xc88   :  { %9655 = vmatpush1.msra.mxu0 %v9590_v4  ;;  %v9618_v13 = vrot.slane %v9605_v30, %v16132_v28  ;;  %v16133_v4 = vld [vmem:[#allocation120_spill] sm:$0xff] }
 0xc89   :  { %9656 = vmatprep.subr.mxu0 %v9586_v44  ;;  %v9614_v44 = vrot.slane %v9605_v30, %v16133_v4 }
 0xc8a   :  { %9657 = vmatpush1.msra.mxu0 %v9585_v27  ;;  %v16134_v27 = vsub.s32 3, %v16131_v51 }
 0xc8b   :  { %9658 = vmatprep.subr.mxu0 %v9581_v7 }
 0xc8c   :  { %9659 = vmatpush1.msra.mxu0 %v9580_v15  ;;  %v9622_v7 = vrot.slane %v9605_v30, %v16134_v27 }
 0xc8d   :  { %9660 = vmatprep.subr.mxu0 %v9576_v41 }
 0xc8e   :  { %9661 = vmatpush1.msra.mxu0 %v9575_v48 }
 0xc8f   :  { %9662 = vmatprep.subr.mxu0 %v9571_v46 }
 0xc90   :  { %9663 = vmatpush1.msra.mxu0 %v9570_v0 }
 0xc91   :  { %9664 = vmatprep.subr.mxu0 %v9566_v39 }
 0xc92   :  { %9665 = vmatpush1.msra.mxu0 %v9565_v26 }
 0xc93   :  { %9666 = vmatprep.subr.mxu0 %v9561_v59 }
 0xc94   :  { %9667 = vmatpush1.msra.mxu0 %v9560_v19 }
 0xc95   :  { %9668 = vmatprep.subr.mxu0 %v9556_v5 }
 0xc96   :  { %9669 = vmatpush1.msra.mxu0 %v9555_v14 }
 0xc97   :  { %11273 = vmatprep.subr.mxu0 %v9604_v61 }
 0xd41   :  { %v10554_v40 = vpop.f32.mrf.mxu0 }
 0xd43   :  { %v10555_v9 = vpop.f32.mrf.mxu0 }
 0xd44   :  { %v10556_v10 = vadd.f32 %v10555_v9, %v10554_v40 }
 0xd45   :  { %v10557_v55 = vpop.f32.mrf.mxu0 }
 0xd46   :  { %11270 = vmatprep.mubr.msk.f32.mxu1 %vm524_vm1, %v10556_v10 }
 0xd47   :  { %v10558_v54 = vpop.f32.mrf.mxu0 }
 0xd48   :  { %v10559_v35 = vadd.f32 %v10558_v54, %v10557_v55 }
 0xd4a   :  { %11271 = vmatmul.mubr.msk.f32.vlgmr.msra.gmra.mxu1 %vm524_vm1, %v10559_v35 }
 0xd4b   :  { %9779 = vmatprep.mubr.f32.mxu1 %v16129_v21  ;;  %9728 = vmatpush1.msra.mxu1 %v9602_v53 }
 0xd4c   :  { %9729 = vmatprep.subr.mxu1 %v9598_v18 }
 0xd4d   :  { %9730 = vmatpush1.msra.mxu1 %v9597_v25 }
 0xd4e   :  { %9731 = vmatprep.subr.mxu1 %v9593_v6 }
 0xd4f   :  { %9732 = vmatpush1.msra.mxu1 %v9592_v47  ;;  %v16135_v47 = vsub.s32 4, %v16131_v51 }
 0xd50   :  { %9733 = vmatprep.subr.mxu1 %v9588_v58 }
 0xd51   :  { %9734 = vmatpush1.msra.mxu1 %v9587_v31  ;;  %v9626_v58 = vrot.slane %v9605_v30, %v16135_v47 }
 0xd52   :  { %9735 = vmatprep.subr.mxu1 %v9583_v45 }
 0xd53   :  { %9736 = vmatpush1.msra.mxu1 %v9582_v37 }
 0xd54   :  { %9737 = vmatprep.subr.mxu1 %v9578_v22 }
 0xd55   :  { %9738 = vmatpush1.msra.mxu1 %v9577_v32 }
 0xd56   :  { %9739 = vmatprep.subr.mxu1 %v9573_v11 }
 0xd57   :  { %9740 = vmatpush1.msra.mxu1 %v9572_v43 }
 0xd58   :  { %9741 = vmatprep.subr.mxu1 %v9568_v3 }
 0xd59   :  { %9742 = vmatpush1.msra.mxu1 %v9567_v2 }
 0xd5a   :  { %9743 = vmatprep.subr.mxu1 %v9563_v12 }
 0xd5b   :  { %9744 = vmatpush1.msra.mxu1 %v9562_v1 }
 0xd5c   :  { %9745 = vmatprep.subr.mxu1 %v9558_v20 }
 0xd5d   :  { %9746 = vmatpush1.msra.mxu1 %v9557_v16 }
 0xe0a   :  { %v11272_v36 = vpop.f32.mrf.mxu1 }
 0xe0b   :  { %v9550_v50 = vadd.f32 %v11272_v36, %v10124_v56 }
 0xe0c   :  { %v9544_v24 = vpop.f32.mrf.mxu1 }
 0xe0d   :  { %v9545_v17 = vadd.f32 %v10124_v56, %v9544_v24  ;;  %v9554_v42 = vmax.f32 %v9550_v50, 0.0 }
 0xe0f   :  { %v9553_v23 = vmax.f32 %v9545_v17, 0.0 }
 0xe11   :  { %10127 = vmatmul.mubr.msk.f32.vlgmr.msra.gmra.mxu0 %vm524_vm1, %v9553_v23  ;;  %10129 = vmatmul.mubr.msk.f32.vlgmr.msra.gmra.mxu1 %vm524_vm1, %v9553_v23 }
 0xe12   :  { %11274 = vmatpush3.msra.mxu0 %v9604_v61  ;;  %9708 = vmatprep.mubr.f32.mxu0 %v16129_v21 }
 0xe13   :  { %11275 = vmatprep.subr.mxu0 %v9599_v29  ;;  %9785 = vmatprep.mubr.f32.mxu1 %v16129_v21  ;;  %v9564_v21 = vld [vmem:[%s15750_s18 + $0x48] sm:$0xff]  ;;  %s11708_s18 = smov [#allocation2]  }
 0xe14   :  { %11276 = vmatpush3.msra.mxu0 %v9599_v29  ;;  %s9882_s19 = sshll.u32 %s11708_s18, 4  ;;  %s9883_s19 = int_to_ptr.vmem [resolvable:$true] %s9882_s19 }
 0xe15   :  { %11277 = vmatprep.subr.mxu0 %v9594_v38  ;;  %10128 = vmatmul.mubr.msk.f32.gmra.mxu0 %vm524_vm1, %v9554_v42  ;;  %s11685_s29 = scalar_lea.vmem %s9883_s19, 1280  ;;  %p11690_p1 = scmp.lt.s32.totalorder %s9883_s19, %s9883_s19 }
 0xe16   :  { %11278 = vmatpush3.msra.mxu0 %v9594_v38  ;;  %11293 = vmatprep.mubr.msk.f32.mxu0 %vm524_vm1, %v9553_v23  ;;  %p11686_p0 = scmp.ne.s32.totalorder %s9883_s19, %s11685_s29  ;;  %p11691_p2 = scmp.lt.s32.totalorder %s11685_s29, %s11685_s29 }
 0xe17   :  { %11279 = vmatprep.subr.mxu0 %v9589_v62  ;;  %10130 = vmatmul.mubr.msk.f32.gmra.mxu1 %vm524_vm1, %v9554_v42 }
 0xe18   :  { %11280 = vmatpush3.msra.mxu0 %v9589_v62  ;;  %p11692_p3 = por %p11691_p2, %p11690_p1 }
 0xe19   :  { %11281 = vmatprep.subr.mxu0 %v9584_v63 }
 0xe1a   :  { %11282 = vmatpush3.msra.mxu0 %v9584_v63  ;;  %p11693_p4 = pnand %p11692_p3, %p11686_p0 }
 0xe1b   :  { %11283 = vmatprep.subr.mxu0 %v9579_v52 }
 0xe1c   :  { %11284 = vmatpush3.msra.mxu0 %v9579_v52 }
 0xe1d   :  { %11285 = vmatprep.subr.mxu0 %v9574_v8 }
 0xe1e   :  { %11286 = vmatpush3.msra.mxu0 %v9574_v8 }
 0xe1f   :  { %11287 = vmatprep.subr.mxu0 %v9569_v33 }
 0xe20   :  { %11288 = vmatpush3.msra.mxu0 %v9569_v33 }
 0xe21   :  { %11289 = vmatprep.subr.mxu0 %v9564_v21 }
 0xe22   :  { %11290 = vmatpush3.msra.mxu0 %v9564_v21 }
 0xe23   :  { %11291 = vmatprep.subr.mxu0 %v9559_v60 }
 0xe24   :  { %11292 = vmatpush3.msra.mxu0 %v9559_v60 }
 0xe25   :  { %11294 = vmatmul.mubr.msk.f32.vlgmr.msra.gmra.mxu0 %vm524_vm1, %v9554_v42 }
 0xed1   :  { %v9704_v15 = vpop.f32.mrf.mxu0  ;;  %v9781_v41 = vpop.f32.mrf.mxu1 }
 0xed2   :  { %v9705_v48 = vadd.f32 %v9704_v15, %v9610_v49  ;;  %v9782_v46 = vadd.f32 %v9781_v41, %v9618_v13 }
 0xed3   :  { %v9706_v0 = vpop.f32.mrf.mxu0  ;;  %v9783_v40 = vpop.f32.mrf.mxu1 }
 0xed4   :  { %9867 = vst [vmem:[#allocation2] sm:$0xff] %v9705_v48  ;;  %v9707_v9 = vadd.f32 %v9706_v0, %v9614_v44  ;;  %9869 = vst [vmem:[#allocation2 + $0x10] sm:$0xff] %v9782_v46  ;;  %v9784_v10 = vadd.f32 %v9783_v40, %v9622_v7 }
 0xed5   :  { %v9710_v55 = vpop.f32.mrf.mxu0 }
 0xed6   :  { %9868 = vst [vmem:[#allocation2 + $0x8] sm:$0xff] %v9707_v9  ;;  %v9711_v54 = vadd.f32 %v9710_v55, %v9610_v49  ;;  %9870 = vst [vmem:[#allocation2 + $0x18] sm:$0xff] %v9784_v10 }
 0xed7   :  { %v9712_v35 = vpop.f32.mrf.mxu0  ;;  %v9787_v57 = vpop.f32.mrf.mxu1 }
 0xed8   :  { %9872 = vst [vmem:[#allocation2 + $0x28] sm:$0xff] %v9711_v54  ;;  %v9713_v53 = vadd.f32 %v9712_v35, %v9614_v44  ;;  %v9788_v18 = vadd.f32 %v9787_v57, %v9618_v13 }
 0xed9   :  { %v9789_v25 = vpop.f32.mrf.mxu1 }
 0xeda   :  { %9873 = vst [vmem:[#allocation2 + $0x30] sm:$0xff] %v9713_v53  ;;  %9874 = vst [vmem:[#allocation2 + $0x38] sm:$0xff] %v9788_v18  ;;  %v9790_v6 = vadd.f32 %v9789_v25, %v9622_v7 }
 0xedc   :  { %9875 = vst [vmem:[#allocation2 + $0x40] sm:$0xff] %v9790_v6 }
 0xee5   :  { %v11295_v31 = vpop.f32.mrf.mxu0 }
 0xee6   :  { %v9864_v45 = vadd.f32 %v11295_v31, %v9626_v58 }
 0xee7   :  { %v9858_v37 = vpop.f32.mrf.mxu0 }
 0xee8   :  { %9876 = vst [vmem:[#allocation2 + $0x48] sm:$0xff] %v9864_v45  ;;  %v9859_v22 = vadd.f32 %v9858_v37, %v9626_v58 }
 0xeea   :  { %9871 = vst [vmem:[#allocation2 + $0x20] sm:$0xff] %v9859_v22 }
 0xeeb   :  { %11696 = shalt.err (!%p11693_p4)
}
 0xeec   :  { %s11709_s30 = smov 640   ;;  %s11710_s4 = smov 40  }
 0xeed   :  { %9888 = dma.vmem_to_hbm [thread:$0]  %s9883_s19, 1280, %s15752_s20, [#allocation3], %s11709_s30, %s11709_s30, %s11710_s4  }
 0xeee   :  { %11705 = dma.done.wait [#allocation3], 1280  }
 0xeef   :  { %11706 = vsyncadd [#allocation3], 4294966016 }
 0xef0   :  { %9892 = vsyncpa [#allocation3], 1 }

</bundles_post_ra>
